<compile_context>
chip_gen: v5e
topology: v5e:2x2
jax: 0.10.0
libtpu: 0.0.40
codegen_flags: <defaults>
</compile_context>

<pallas_src>
import functools

import jax
import jax.numpy as jnp
from jax.experimental import pallas as pl
from jax.experimental.pallas import tpu as pltpu

EPS = 1e-5  # BatchNorm2d default eps


# ----------------------- fused (im2col-free) convolution ----------------------

def _conv_row_kernel(x_ref, w_ref, b_ref, o_ref, stats_ref, acc_ref, *, kw, cin, wo, act):
    n = pl.program_id(0)
    h = pl.program_id(1)
    ky = pl.program_id(2)

    @pl.when(jnp.logical_and(jnp.logical_and(n == 0, h == 0), ky == 0))
    def _init_stats():
        stats_ref[...] = jnp.zeros_like(stats_ref)

    @pl.when(ky == 0)
    def _init_acc():
        acc_ref[...] = jnp.zeros_like(acc_ref)

    row = x_ref[...]          # (w_in, cin)      bf16
    w_k = w_ref[...]          # (kw*cin, cout)   bf16
    acc = acc_ref[...]
    for kx in range(kw):      # unrolled; contiguous in-VMEM tap slices
        a = row[kx:kx + wo, :]                   # (wo, cin)
        b = w_k[kx * cin:(kx + 1) * cin, :]      # (cin, cout)
        acc = acc + jnp.dot(a, b, preferred_element_type=jnp.float32)
    acc_ref[...] = acc

    @pl.when(ky == pl.num_programs(2) - 1)
    def _finalize():
        y = acc_ref[...] + b_ref[...]
        if act == "tanh":
            y = jnp.tanh(y)
        o_ref[...] = y.astype(o_ref.dtype)
        # per-channel sum / sum-sq for training-mode BatchNorm (accumulated over whole grid)
        stats_ref[0:1, :] = stats_ref[0:1, :] + jnp.sum(y, axis=0, keepdims=True)
        stats_ref[1:2, :] = stats_ref[1:2, :] + jnp.sum(y * y, axis=0, keepdims=True)


def conv2d_fused(xpad, w4, bias, *, stride=1, act="none", out_dtype=jnp.bfloat16):
    """xpad: (N, Hp, Wp, Cin) already padded. w4: (kh, kw, Cin, Cout) bf16.
    bias: (1, Cout) f32.  Returns (out (N,Ho,Wo,Cout), stats (2,Cout) = [sum, sumsq])."""
    N, Hp, Wp, Cin = xpad.shape
    kh, kw, cin, cout = w4.shape
    assert cin == Cin
    ho = (Hp - kh) // stride + 1
    wo = (Wp - kw) // stride + 1

    if stride == 1:
        x_in = xpad
        kw_i, cin_i, w_in = kw, cin, Wp
    else:
        # Pre-gather the kw taps along W with XLA strided slices so the kernel
        # only needs contiguous reads (and the MXU never sees strided/dilated data).
        taps = [xpad[:, :, kx:kx + stride * (wo - 1) + 1:stride, :] for kx in range(kw)]
        x_in = jnp.concatenate(taps, axis=-1)          # (N, Hp, wo, kw*cin)
        kw_i, cin_i, w_in = 1, kw * cin, wo

    w_mat = w4.reshape(kh, kw * cin, cout)

    out, stats = pl.pallas_call(
        functools.partial(_conv_row_kernel, kw=kw_i, cin=cin_i, wo=wo, act=act),
        grid=(N, ho, kh),
        in_specs=[
            # channel dim of the block == channel dim of x_in (cin for stride=1,
            # kw*cin for the pre-gathered stride>1 path)
            pl.BlockSpec((None, None, w_in, cin_i),
                         lambda n, h, ky: (n, h * stride + ky, 0, 0)),
            pl.BlockSpec((None, kw * cin, cout), lambda n, h, ky: (ky, 0, 0)),
            pl.BlockSpec((1, cout), lambda n, h, ky: (0, 0)),
        ],
        out_specs=(
            pl.BlockSpec((None, None, wo, cout), lambda n, h, ky: (n, h, 0, 0)),
            pl.BlockSpec((2, cout), lambda n, h, ky: (0, 0)),
        ),
        out_shape=(
            jax.ShapeDtypeStruct((N, ho, wo, cout), out_dtype),
            jax.ShapeDtypeStruct((2, cout), jnp.float32),
        ),
        scratch_shapes=[pltpu.VMEM((wo, cout), jnp.float32)],
        compiler_params=pltpu.CompilerParams(
            dimension_semantics=("arbitrary", "arbitrary", "arbitrary"),
            vmem_limit_bytes=32 * 1024 * 1024),
    )(x_in.astype(jnp.bfloat16), w_mat, bias)
    return out, stats


# ------------------- tiled BatchNorm apply (+ReLU / +residual) -----------------

def _bn_apply_kernel(x_ref, stats_ref, g_ref, b_ref, o_ref, *, count, relu):
    inv = 1.0 / count
    mean = stats_ref[0:1, :] * inv
    var = jnp.maximum(stats_ref[1:2, :] * inv - mean * mean, 0.0)  # biased (training-mode)
    scale = g_ref[...] * jax.lax.rsqrt(var + EPS)
    shift = b_ref[...] - mean * scale
    y = x_ref[...].astype(jnp.float32) * scale + shift
    if relu:
        y = jnp.maximum(y, 0.0)
    o_ref[...] = y.astype(o_ref.dtype)


def _bn_apply_add_kernel(x_ref, stats_ref, g_ref, b_ref, r_ref, o_ref, *, count):
    inv = 1.0 / count
    mean = stats_ref[0:1, :] * inv
    var = jnp.maximum(stats_ref[1:2, :] * inv - mean * mean, 0.0)
    scale = g_ref[...] * jax.lax.rsqrt(var + EPS)
    shift = b_ref[...] - mean * scale
    y = x_ref[...].astype(jnp.float32) * scale + shift
    o_ref[...] = (y + r_ref[...].astype(jnp.float32)).astype(o_ref.dtype)


def batchnorm_apply(x, stats, gamma, beta, *, relu=False, residual=None, tr=512):
    """Training-mode BatchNorm2d from precomputed [sum, sumsq]; fused ReLU or residual add."""
    N, H, W, C = x.shape
    M = N * H * W
    tr = min(tr, M)
    xf = x.reshape(M, C)
    grid = (pl.cdiv(M, tr),)
    row_spec = pl.BlockSpec((tr, C), lambda i: (i, 0))
    stat_spec = pl.BlockSpec((2, C), lambda i: (0, 0))
    vec_spec = pl.BlockSpec((1, C), lambda i: (0, 0))
    g = gamma.reshape(1, C).astype(jnp.float32)
    b = beta.reshape(1, C).astype(jnp.float32)
    cp = pltpu.CompilerParams(dimension_semantics=("parallel",),
                              vmem_limit_bytes=32 * 1024 * 1024)
    if residual is None:
        out = pl.pallas_call(
            functools.partial(_bn_apply_kernel, count=float(M), relu=relu),
            grid=grid,
            in_specs=[row_spec, stat_spec, vec_spec, vec_spec],
            out_specs=row_spec,
            out_shape=jax.ShapeDtypeStruct((M, C), x.dtype),
            compiler_params=cp,
        )(xf, stats, g, b)
    else:
        out = pl.pallas_call(
            functools.partial(_bn_apply_add_kernel, count=float(M)),
            grid=grid,
            in_specs=[row_spec, stat_spec, vec_spec, vec_spec, row_spec],
            out_specs=row_spec,
            out_shape=jax.ShapeDtypeStruct((M, C), x.dtype),
            compiler_params=cp,
        )(xf, stats, g, b, residual.reshape(M, C))
    return out.reshape(N, H, W, C)


# ------------------ ConvTranspose2d(k=3,s=2,p=1,op=1) via sub-pixel -------------

def conv_transpose2d(x, phase_weights):
    """4 sub-pixel stride-1 convs, then interleave.  phase_weights: list of 4 (w4, bias)
    for phases [(0,0),(0,1),(1,0),(1,1)].  Returns (y (N,2H,2W,Cout), stats (2,Cout))."""
    N, H, W, C = x.shape
    xp = jnp.pad(x, ((0, 0), (0, 1), (0, 1), (0, 0)))  # zero pad bottom/right by 1
    outs = []
    stats = None
    for r in range(2):
        row_outs = []
        for s in range(2):
            w4, b = phase_weights[r * 2 + s]
            kh_p, kw_p = w4.shape[0], w4.shape[1]
            xin = xp[:, :H + kh_p - 1, :W + kw_p - 1, :]
            o, st = conv2d_fused(xin, w4, b, stride=1)
            row_outs.append(o)
            stats = st if stats is None else stats + st
        outs.append(row_outs)
    # y[:, 2i+r, 2j+s, :] = outs[r][s][:, i, j, :]
    t = jnp.stack([jnp.stack(row, axis=3) for row in outs], axis=2)  # (N, H, 2, W, 2, Cout)
    cout = t.shape[-1]
    y = t.reshape(N, 2 * H, 2 * W, cout)
    return y, stats


# --------------------------------- parameters -----------------------------------

def init_params(key, input_nc, output_nc, ngf, n_blocks):
    """PyTorch-layout weights: Conv2d (Cout,Cin,kh,kw), ConvTranspose2d (Cin,Cout,kh,kw)."""
    keys = iter(jax.random.split(key, 8 + 2 * n_blocks))

    def conv_w(cout, cin, k):
        return 0.02 * jax.random.normal(next(keys), (cout, cin, k, k), jnp.float32)

    def bn(c):
        return (jnp.ones((c,), jnp.float32), jnp.zeros((c,), jnp.float32))

    p = {}
    p["conv0_w"] = conv_w(ngf, input_nc, 7)
    p["bn0"] = bn(ngf)
    for i in range(2):  # downsampling
        mult = 2 ** i
        p[f"down{i}_w"] = conv_w(ngf * mult * 2, ngf * mult, 3)
        p[f"down{i}_bn"] = bn(ngf * mult * 2)
    dim = ngf * 4
    for i in range(n_blocks):  # resnet blocks
        p[f"blk{i}_w1"] = conv_w(dim, dim, 3)
        p[f"blk{i}_bn1"] = bn(dim)
        p[f"blk{i}_w2"] = conv_w(dim, dim, 3)
        p[f"blk{i}_bn2"] = bn(dim)
    for i in range(2):  # upsampling
        mult = 2 ** (2 - i)
        cin, cout = ngf * mult, ngf * mult // 2
        p[f"up{i}_w"] = 0.02 * jax.random.normal(next(keys), (cin, cout, 3, 3), jnp.float32)
        p[f"up{i}_bn"] = bn(cout)
    p["convout_w"] = conv_w(output_nc, ngf, 7)
    p["convout_b"] = jnp.zeros((output_nc,), jnp.float32)  # final conv keeps bias=True
    return p


def _prep_conv(w, bias=None):
    cout, cin, kh, kw = w.shape
    w4 = jnp.transpose(w, (2, 3, 1, 0)).astype(jnp.bfloat16)   # (kh, kw, cin, cout)
    b = bias if bias is not None else jnp.zeros((cout,), jnp.float32)
    return (w4, b.reshape(1, cout).astype(jnp.float32))


def _prep_conv_transpose(w_t):
    # Sub-pixel decomposition of ConvTranspose2d(k=3, s=2, p=1, output_padding=1):
    #   out[2m+r, 2n+s] = sum_{a,b,ci} xpadBR[m+a, n+b, ci] * w_t[ci, :, KH[a], KW[b]]
    # with KH = [1] if r == 0 else [2, 0] (same for KW along W).
    cin, cout, _, _ = w_t.shape
    phases = []
    for r in range(2):
        KH = [1] if r == 0 else [2, 0]
        for s in range(2):
            KW = [1] if s == 0 else [2, 0]
            wsel = w_t[:, :, KH, :][:, :, :, KW]                       # (cin, cout, kh_p, kw_p)
            w4 = jnp.transpose(wsel, (2, 3, 0, 1)).astype(jnp.bfloat16)  # (kh_p, kw_p, cin, cout)
            phases.append((w4, jnp.zeros((1, cout), jnp.float32)))
    return phases


def prepare_params(p, n_blocks):
    """One-time weight relayout into kernel-ready bf16 matrices."""
    prep = {"conv0": _prep_conv(p["conv0_w"]), "bn0": p["bn0"]}
    for i in range(2):
        prep[f"down{i}"] = _prep_conv(p[f"down{i}_w"])
        prep[f"down{i}_bn"] = p[f"down{i}_bn"]
    for i in range(n_blocks):
        prep[f"blk{i}_c1"] = _prep_conv(p[f"blk{i}_w1"])
        prep[f"blk{i}_bn1"] = p[f"blk{i}_bn1"]
        prep[f"blk{i}_c2"] = _prep_conv(p[f"blk{i}_w2"])
        prep[f"blk{i}_bn2"] = p[f"blk{i}_bn2"]
    for i in range(2):
        prep[f"up{i}"] = _prep_conv_transpose(p[f"up{i}_w"])
        prep[f"up{i}_bn"] = p[f"up{i}_bn"]
    prep["convout"] = _prep_conv(p["convout_w"], p["convout_b"])
    return prep


# ----------------------------------- forward ------------------------------------

def reflect_pad(x, p):
    return jnp.pad(x, ((0, 0), (p, p), (p, p), (0, 0)), mode="reflect")


def zero_pad(x, p):
    return jnp.pad(x, ((0, 0), (p, p), (p, p), (0, 0)))


def resnet_generator_forward(x_nchw, prep, n_blocks):
    x = jnp.transpose(x_nchw, (0, 2, 3, 1)).astype(jnp.bfloat16)   # NCHW -> NHWC (bf16 acts)

    # ReflectionPad2d(3) + Conv2d(input_nc, ngf, 7, bias=False) + BN + ReLU
    y, st = conv2d_fused(reflect_pad(x, 3), *prep["conv0"], stride=1)
    x = batchnorm_apply(y, st, *prep["bn0"], relu=True)

    # 2 x [Conv2d(3x3, stride=2, pad=1, bias=False) + BN + ReLU]
    for i in range(2):
        y, st = conv2d_fused(zero_pad(x, 1), *prep[f"down{i}"], stride=2)
        x = batchnorm_apply(y, st, *prep[f"down{i}_bn"], relu=True)

    # ResnetBlocks: reflect, conv, BN, ReLU, reflect, conv, BN (+skip fused into BN)
    for i in range(n_blocks):
        r = x
        y, st = conv2d_fused(reflect_pad(x, 1), *prep[f"blk{i}_c1"], stride=1)
        h = batchnorm_apply(y, st, *prep[f"blk{i}_bn1"], relu=True)
        y, st = conv2d_fused(reflect_pad(h, 1), *prep[f"blk{i}_c2"], stride=1)
        x = batchnorm_apply(y, st, *prep[f"blk{i}_bn2"], residual=r)

    # 2 x [ConvTranspose2d(3x3, s=2, p=1, op=1, bias=False) + BN + ReLU]
    for i in range(2):
        y, st = conv_transpose2d(x, prep[f"up{i}"])
        x = batchnorm_apply(y, st, *prep[f"up{i}_bn"], relu=True)

    # ReflectionPad2d(3) + Conv2d(ngf, output_nc, 7, bias=True) + Tanh (fused in epilogue)
    y, _ = conv2d_fused(reflect_pad(x, 3), *prep["convout"], stride=1,
                        act="tanh", out_dtype=jnp.float32)
    return jnp.transpose(y, (0, 3, 1, 2))   # NHWC -> NCHW


# ------------------------------------- main --------------------------------------

if __name__ == "__main__":
    input_nc, output_nc, ngf, n_blocks = 3, 3, 8, 2
    batch, spatial = 2, 16

    key = jax.random.PRNGKey(0)
    kx, kp = jax.random.split(key)
    x = jax.random.normal(kx, (batch, input_nc, spatial, spatial), jnp.float32)
    params = init_params(kp, input_nc, output_nc, ngf, n_blocks)
    prep = prepare_params(params, n_blocks)

    fwd = jax.jit(functools.partial(resnet_generator_forward, n_blocks=n_blocks))
    y = fwd(x, prep)
    y = jax.block_until_ready(y)
    assert y.shape == (batch, output_nc, spatial, spatial), y.shape
    assert bool(jnp.all(jnp.isfinite(y)))
    print("KERNEL_OK")
</pallas_src>

<mosaic_0001>
module attributes {stable_mosaic.version = 11 : i64} {
  func.func @_conv_row_kernel(%arg0: i32, %arg1: i32, %arg2: i32, %arg3: memref<1x1x22x3xbf16, #tpu.memory_space<vmem>>, %arg4: memref<1x21x8xbf16, #tpu.memory_space<vmem>>, %arg5: memref<1x8xf32, #tpu.memory_space<vmem>>, %arg6: memref<1x1x16x8xbf16, #tpu.memory_space<vmem>>, %arg7: memref<2x8xf32, #tpu.memory_space<vmem>>, %arg8: memref<16x8xf32, #tpu.memory_space<vmem>>) attributes {dimension_semantics = [#tpu.dimension_semantics<arbitrary>, #tpu.dimension_semantics<arbitrary>, #tpu.dimension_semantics<arbitrary>], iteration_bounds = array<i64: 2, 16, 7>, scalar_prefetch = 0 : i64, scratch_operands = 1 : i64, tpu.core_type = #tpu.core_type<tc>, window_params = [{transform_indices = @transform_0, window_bounds = array<i64: 1, 1, 22, 3>}, {transform_indices = @transform_1, window_bounds = array<i64: 1, 21, 8>}, {pipeline_mode = #tpu.pipeline_mode<synchronous>, transform_indices = @transform_2, window_bounds = array<i64: 1, 8>}, {transform_indices = @transform_3, window_bounds = array<i64: 1, 1, 16, 8>}, {pipeline_mode = #tpu.pipeline_mode<synchronous>, transform_indices = @transform_4, window_bounds = array<i64: 2, 8>}]} {
    %c0_i32 = arith.constant 0 : i32
    %0 = arith.cmpi eq, %arg0, %c0_i32 : i32
    %c0_i32_0 = arith.constant 0 : i32
    %1 = arith.cmpi eq, %arg1, %c0_i32_0 : i32
    %2 = arith.andi %0, %1 : i1
    %c0_i32_1 = arith.constant 0 : i32
    %3 = arith.cmpi eq, %arg2, %c0_i32_1 : i32
    %4 = arith.andi %2, %3 : i1
    %5 = arith.extui %4 : i1 to i32
    %c0_i32_2 = arith.constant 0 : i32
    %6 = arith.cmpi ne, %5, %c0_i32_2 : i32
    scf.if %6 {
      %cst_22 = arith.constant 0.000000e+00 : f32
      %47 = vector.broadcast %cst_22 : f32 to vector<2x8xf32>
      %c0_23 = arith.constant 0 : index
      %c0_24 = arith.constant 0 : index
      %48 = vector.load %arg7[%c0_23, %c0_24] : memref<2x8xf32, #tpu.memory_space<vmem>>, vector<2x8xf32>
      tpu.vector_store %arg7[%c0_23, %c0_24], %47 {strides = array<i32>} : memref<2x8xf32, #tpu.memory_space<vmem>>, vector<2x8xf32>,
    } else {
    }
    %c0_i32_3 = arith.constant 0 : i32
    %7 = arith.cmpi eq, %arg2, %c0_i32_3 : i32
    %8 = arith.extui %7 : i1 to i32
    %c0_i32_4 = arith.constant 0 : i32
    %9 = arith.cmpi ne, %8, %c0_i32_4 : i32
    scf.if %9 {
      %cst_22 = arith.constant 0.000000e+00 : f32
      %47 = vector.broadcast %cst_22 : f32 to vector<16x8xf32>
      %c0_23 = arith.constant 0 : index
      %c0_24 = arith.constant 0 : index
      %48 = vector.load %arg8[%c0_23, %c0_24] : memref<16x8xf32, #tpu.memory_space<vmem>>, vector<16x8xf32>
      tpu.vector_store %arg8[%c0_23, %c0_24], %47 {strides = array<i32>} : memref<16x8xf32, #tpu.memory_space<vmem>>, vector<16x8xf32>,
    } else {
    }
    %c0 = arith.constant 0 : index
    %c0_5 = arith.constant 0 : index
    %c0_6 = arith.constant 0 : index
    %c0_7 = arith.constant 0 : index
    %10 = vector.load %arg3[%c0, %c0_5, %c0_6, %c0_7] : memref<1x1x22x3xbf16, #tpu.memory_space<vmem>>, vector<1x1x22x3xbf16>
    %11 = vector.shape_cast %10 : vector<1x1x22x3xbf16> to vector<22x3xbf16>
    %c0_8 = arith.constant 0 : index
    %c0_9 = arith.constant 0 : index
    %c0_10 = arith.constant 0 : index
    %12 = vector.load %arg4[%c0_8, %c0_9, %c0_10] : memref<1x21x8xbf16, #tpu.memory_space<vmem>>, vector<1x21x8xbf16>
    %13 = vector.shape_cast %12 : vector<1x21x8xbf16> to vector<21x8xbf16>
    %c0_11 = arith.constant 0 : index
    %c0_12 = arith.constant 0 : index
    %14 = vector.load %arg8[%c0_11, %c0_12] : memref<16x8xf32, #tpu.memory_space<vmem>>, vector<16x8xf32>
    %15 = vector.extract_strided_slice %11 {offsets = [0, 0], sizes = [16, 3], strides = [1, 1]} : vector<22x3xbf16> to vector<16x3xbf16>
    %16 = vector.extract_strided_slice %13 {offsets = [0, 0], sizes = [3, 8], strides = [1, 1]} : vector<21x8xbf16> to vector<3x8xbf16>
    %cst = arith.constant dense<0.000000e+00> : vector<16x8xf32>
    %17 = tpu.matmul %15, %16, %cst {dimension_numbers = #tpu.dot_dimension_numbers<[1], [0], [0], [1], [0, 0, 1, 1], [], []>} : vector<16x3xbf16>, vector<3x8xbf16>, vector<16x8xf32> -> vector<16x8xf32>
    %18 = arith.addf %14, %17 : vector<16x8xf32>
    %19 = vector.extract_strided_slice %11 {offsets = [1, 0], sizes = [16, 3], strides = [1, 1]} : vector<22x3xbf16> to vector<16x3xbf16>
    %20 = vector.extract_strided_slice %13 {offsets = [3, 0], sizes = [3, 8], strides = [1, 1]} : vector<21x8xbf16> to vector<3x8xbf16>
    %cst_13 = arith.constant dense<0.000000e+00> : vector<16x8xf32>
    %21 = tpu.matmul %19, %20, %cst_13 {dimension_numbers = #tpu.dot_dimension_numbers<[1], [0], [0], [1], [0, 0, 1, 1], [], []>} : vector<16x3xbf16>, vector<3x8xbf16>, vector<16x8xf32> -> vector<16x8xf32>
    %22 = arith.addf %18, %21 : vector<16x8xf32>
    %23 = vector.extract_strided_slice %11 {offsets = [2, 0], sizes = [16, 3], strides = [1, 1]} : vector<22x3xbf16> to vector<16x3xbf16>
    %24 = vector.extract_strided_slice %13 {offsets = [6, 0], sizes = [3, 8], strides = [1, 1]} : vector<21x8xbf16> to vector<3x8xbf16>
    %cst_14 = arith.constant dense<0.000000e+00> : vector<16x8xf32>
    %25 = tpu.matmul %23, %24, %cst_14 {dimension_numbers = #tpu.dot_dimension_numbers<[1], [0], [0], [1], [0, 0, 1, 1], [], []>} : vector<16x3xbf16>, vector<3x8xbf16>, vector<16x8xf32> -> vector<16x8xf32>
    %26 = arith.addf %22, %25 : vector<16x8xf32>
    %27 = vector.extract_strided_slice %11 {offsets = [3, 0], sizes = [16, 3], strides = [1, 1]} : vector<22x3xbf16> to vector<16x3xbf16>
    %28 = vector.extract_strided_slice %13 {offsets = [9, 0], sizes = [3, 8], strides = [1, 1]} : vector<21x8xbf16> to vector<3x8xbf16>
    %cst_15 = arith.constant dense<0.000000e+00> : vector<16x8xf32>
    %29 = tpu.matmul %27, %28, %cst_15 {dimension_numbers = #tpu.dot_dimension_numbers<[1], [0], [0], [1], [0, 0, 1, 1], [], []>} : vector<16x3xbf16>, vector<3x8xbf16>, vector<16x8xf32> -> vector<16x8xf32>
    %30 = arith.addf %26, %29 : vector<16x8xf32>
    %31 = vector.extract_strided_slice %11 {offsets = [4, 0], sizes = [16, 3], strides = [1, 1]} : vector<22x3xbf16> to vector<16x3xbf16>
    %32 = vector.extract_strided_slice %13 {offsets = [12, 0], sizes = [3, 8], strides = [1, 1]} : vector<21x8xbf16> to vector<3x8xbf16>
    %cst_16 = arith.constant dense<0.000000e+00> : vector<16x8xf32>
    %33 = tpu.matmul %31, %32, %cst_16 {dimension_numbers = #tpu.dot_dimension_numbers<[1], [0], [0], [1], [0, 0, 1, 1], [], []>} : vector<16x3xbf16>, vector<3x8xbf16>, vector<16x8xf32> -> vector<16x8xf32>
    %34 = arith.addf %30, %33 : vector<16x8xf32>
    %35 = vector.extract_strided_slice %11 {offsets = [5, 0], sizes = [16, 3], strides = [1, 1]} : vector<22x3xbf16> to vector<16x3xbf16>
    %36 = vector.extract_strided_slice %13 {offsets = [15, 0], sizes = [3, 8], strides = [1, 1]} : vector<21x8xbf16> to vector<3x8xbf16>
    %cst_17 = arith.constant dense<0.000000e+00> : vector<16x8xf32>
    %37 = tpu.matmul %35, %36, %cst_17 {dimension_numbers = #tpu.dot_dimension_numbers<[1], [0], [0], [1], [0, 0, 1, 1], [], []>} : vector<16x3xbf16>, vector<3x8xbf16>, vector<16x8xf32> -> vector<16x8xf32>
    %38 = arith.addf %34, %37 : vector<16x8xf32>
    %39 = vector.extract_strided_slice %11 {offsets = [6, 0], sizes = [16, 3], strides = [1, 1]} : vector<22x3xbf16> to vector<16x3xbf16>
    %40 = vector.extract_strided_slice %13 {offsets = [18, 0], sizes = [3, 8], strides = [1, 1]} : vector<21x8xbf16> to vector<3x8xbf16>
    %cst_18 = arith.constant dense<0.000000e+00> : vector<16x8xf32>
    %41 = tpu.matmul %39, %40, %cst_18 {dimension_numbers = #tpu.dot_dimension_numbers<[1], [0], [0], [1], [0, 0, 1, 1], [], []>} : vector<16x3xbf16>, vector<3x8xbf16>, vector<16x8xf32> -> vector<16x8xf32>
    %42 = arith.addf %38, %41 : vector<16x8xf32>
    %c0_19 = arith.constant 0 : index
    %c0_20 = arith.constant 0 : index
    %43 = vector.load %arg8[%c0_19, %c0_20] : memref<16x8xf32, #tpu.memory_space<vmem>>, vector<16x8xf32>
    tpu.vector_store %arg8[%c0_19, %c0_20], %42 {strides = array<i32>} : memref<16x8xf32, #tpu.memory_space<vmem>>, vector<16x8xf32>,
    %c6_i32 = arith.constant 6 : i32
    %44 = arith.cmpi eq, %arg2, %c6_i32 : i32
    %45 = arith.extui %44 : i1 to i32
    %c0_i32_21 = arith.constant 0 : i32
    %46 = arith.cmpi ne, %45, %c0_i32_21 : i32
    scf.if %46 {
      %c0_22 = arith.constant 0 : index
      %c0_23 = arith.constant 0 : index
      %47 = vector.load %arg8[%c0_22, %c0_23] : memref<16x8xf32, #tpu.memory_space<vmem>>, vector<16x8xf32>
      %c0_24 = arith.constant 0 : index
      %c0_25 = arith.constant 0 : index
      %48 = vector.load %arg5[%c0_24, %c0_25] : memref<1x8xf32, #tpu.memory_space<vmem>>, vector<1x8xf32>
      %49 = vector.broadcast %48 : vector<1x8xf32> to vector<16x8xf32>
      %50 = arith.addf %47, %49 : vector<16x8xf32>
      %51 = arith.truncf %50 : vector<16x8xf32> to vector<16x8xbf16>
      %c0_26 = arith.constant 0 : index
      %c0_27 = arith.constant 0 : index
      %c0_28 = arith.constant 0 : index
      %c0_29 = arith.constant 0 : index
      %52 = vector.load %arg6[%c0_26, %c0_27, %c0_28, %c0_29] : memref<1x1x16x8xbf16, #tpu.memory_space<vmem>>, vector<1x1x16x8xbf16>
      %53 = vector.shape_cast %52 : vector<1x1x16x8xbf16> to vector<16x8xbf16>
      %54 = vector.shape_cast %51 : vector<16x8xbf16> to vector<1x1x16x8xbf16>
      tpu.vector_store %arg6[%c0_26, %c0_27, %c0_28, %c0_29], %54 {strides = array<i32>} : memref<1x1x16x8xbf16, #tpu.memory_space<vmem>>, vector<1x1x16x8xbf16>,
      %c0_30 = arith.constant 0 : index
      %c0_31 = arith.constant 0 : index
      %55 = vector.load %arg7[%c0_30, %c0_31] : memref<2x8xf32, #tpu.memory_space<vmem>>, vector<1x8xf32>
      %cst_32 = arith.constant dense<0.000000e+00> : vector<8xf32>
      %56 = vector.multi_reduction <add>, %50, %cst_32 [0] : vector<16x8xf32> to vector<8xf32>
      %57 = vector.shape_cast %56 : vector<8xf32> to vector<1x8xf32>
      %58 = arith.addf %55, %57 : vector<1x8xf32>
      %c0_33 = arith.constant 0 : index
      %c0_34 = arith.constant 0 : index
      %59 = vector.load %arg7[%c0_33, %c0_34] : memref<2x8xf32, #tpu.memory_space<vmem>>, vector<1x8xf32>
      tpu.vector_store %arg7[%c0_33, %c0_34], %58 {strides = array<i32>} : memref<2x8xf32, #tpu.memory_space<vmem>>, vector<1x8xf32>,
      %c1 = arith.constant 1 : index
      %c0_35 = arith.constant 0 : index
      %60 = vector.load %arg7[%c1, %c0_35] : memref<2x8xf32, #tpu.memory_space<vmem>>, vector<1x8xf32>
      %61 = arith.mulf %50, %50 : vector<16x8xf32>
      %cst_36 = arith.constant dense<0.000000e+00> : vector<8xf32>
      %62 = vector.multi_reduction <add>, %61, %cst_36 [0] : vector<16x8xf32> to vector<8xf32>
      %63 = vector.shape_cast %62 : vector<8xf32> to vector<1x8xf32>
      %64 = arith.addf %60, %63 : vector<1x8xf32>
      %c1_37 = arith.constant 1 : index
      %c0_38 = arith.constant 0 : index
      %65 = vector.load %arg7[%c1_37, %c0_38] : memref<2x8xf32, #tpu.memory_space<vmem>>, vector<1x8xf32>
      tpu.vector_store %arg7[%c1_37, %c0_38], %64 {strides = array<i32>} : memref<2x8xf32, #tpu.memory_space<vmem>>, vector<1x8xf32>,
    } else {
    }
    return
  }
  func.func @transform_0(%arg0: i32, %arg1: i32, %arg2: i32) -> (i32, i32, i32, i32) {
    %c1_i32 = arith.constant 1 : i32
    %0 = arith.muli %arg1, %c1_i32 : i32
    %1 = arith.addi %0, %arg2 : i32
    %c0_i32 = arith.constant 0 : i32
    %c0_i32_0 = arith.constant 0 : i32
    %c0_i32_1 = arith.constant 0 : i32
    return %arg0, %1, %c0_i32, %c0_i32_0 : i32, i32, i32, i32
  }
  func.func @transform_1(%arg0: i32, %arg1: i32, %arg2: i32) -> (i32, i32, i32) {
    %c0_i32 = arith.constant 0 : i32
    %c0_i32_0 = arith.constant 0 : i32
    %c0_i32_1 = arith.constant 0 : i32
    return %arg2, %c0_i32, %c0_i32_0 : i32, i32, i32
  }
  func.func @transform_2(%arg0: i32, %arg1: i32, %arg2: i32) -> (i32, i32) {
    %c0_i32 = arith.constant 0 : i32
    %c0_i32_0 = arith.constant 0 : i32
    %c0_i32_1 = arith.constant 0 : i32
    return %c0_i32, %c0_i32_0 : i32, i32
  }
  func.func @transform_3(%arg0: i32, %arg1: i32, %arg2: i32) -> (i32, i32, i32, i32) {
    %c0_i32 = arith.constant 0 : i32
    %c0_i32_0 = arith.constant 0 : i32
    %c0_i32_1 = arith.constant 0 : i32
    return %arg0, %arg1, %c0_i32, %c0_i32_0 : i32, i32, i32, i32
  }
  func.func @transform_4(%arg0: i32, %arg1: i32, %arg2: i32) -> (i32, i32) {
    %c0_i32 = arith.constant 0 : i32
    %c0_i32_0 = arith.constant 0 : i32
    %c0_i32_1 = arith.constant 0 : i32
    return %c0_i32, %c0_i32_0 : i32, i32
  }
}

module attributes {stable_mosaic.version = 11 : i64} {
  func.func @_bn_apply_kernel(%arg0: i32, %arg1: memref<512x8xbf16, #tpu.memory_space<vmem>>, %arg2: memref<2x8xf32, #tpu.memory_space<vmem>>, %arg3: memref<1x8xf32, #tpu.memory_space<vmem>>, %arg4: memref<1x8xf32, #tpu.memory_space<vmem>>, %arg5: memref<512x8xbf16, #tpu.memory_space<vmem>>) attributes {dimension_semantics = [#tpu.dimension_semantics<parallel>], iteration_bounds = array<i64: 1>, scalar_prefetch = 0 : i64, scratch_operands = 0 : i64, tpu.core_type = #tpu.core_type<tc>, window_params = [{transform_indices = @transform_0, window_bounds = array<i64: 512, 8>}, {pipeline_mode = #tpu.pipeline_mode<synchronous>, transform_indices = @transform_1, window_bounds = array<i64: 2, 8>}, {pipeline_mode = #tpu.pipeline_mode<synchronous>, transform_indices = @transform_2, window_bounds = array<i64: 1, 8>}, {pipeline_mode = #tpu.pipeline_mode<synchronous>, transform_indices = @transform_3, window_bounds = array<i64: 1, 8>}, {transform_indices = @transform_4, window_bounds = array<i64: 512, 8>}]} {
    %c0 = arith.constant 0 : index
    %c0_0 = arith.constant 0 : index
    %0 = vector.load %arg2[%c0, %c0_0] : memref<2x8xf32, #tpu.memory_space<vmem>>, vector<1x8xf32>
    %cst = arith.constant 0.001953125 : f32
    %1 = vector.broadcast %cst : f32 to vector<1x8xf32>
    %2 = arith.mulf %0, %1 : vector<1x8xf32>
    %c1 = arith.constant 1 : index
    %c0_1 = arith.constant 0 : index
    %3 = vector.load %arg2[%c1, %c0_1] : memref<2x8xf32, #tpu.memory_space<vmem>>, vector<1x8xf32>
    %cst_2 = arith.constant 0.001953125 : f32
    %4 = vector.broadcast %cst_2 : f32 to vector<1x8xf32>
    %5 = arith.mulf %3, %4 : vector<1x8xf32>
    %6 = arith.mulf %2, %2 : vector<1x8xf32>
    %7 = arith.subf %5, %6 : vector<1x8xf32>
    %cst_3 = arith.constant 0.000000e+00 : f32
    %8 = vector.broadcast %cst_3 : f32 to vector<1x8xf32>
    %9 = arith.maximumf %7, %8 : vector<1x8xf32>
    %c0_4 = arith.constant 0 : index
    %c0_5 = arith.constant 0 : index
    %10 = vector.load %arg3[%c0_4, %c0_5] : memref<1x8xf32, #tpu.memory_space<vmem>>, vector<1x8xf32>
    %cst_6 = arith.constant 9.99999974E-6 : f32
    %11 = vector.broadcast %cst_6 : f32 to vector<1x8xf32>
    %12 = arith.addf %9, %11 : vector<1x8xf32>
    %13 = math.rsqrt %12 : vector<1x8xf32>
    %14 = arith.mulf %10, %13 : vector<1x8xf32>
    %c0_7 = arith.constant 0 : index
    %c0_8 = arith.constant 0 : index
    %15 = vector.load %arg4[%c0_7, %c0_8] : memref<1x8xf32, #tpu.memory_space<vmem>>, vector<1x8xf32>
    %16 = arith.mulf %2, %14 : vector<1x8xf32>
    %17 = arith.subf %15, %16 : vector<1x8xf32>
    %c0_9 = arith.constant 0 : index
    %c0_10 = arith.constant 0 : index
    %18 = vector.load %arg1[%c0_9, %c0_10] : memref<512x8xbf16, #tpu.memory_space<vmem>>, vector<512x8xbf16>
    %19 = arith.extf %18 : vector<512x8xbf16> to vector<512x8xf32>
    %20 = vector.broadcast %14 : vector<1x8xf32> to vector<512x8xf32>
    %21 = arith.mulf %19, %20 : vector<512x8xf32>
    %22 = vector.broadcast %17 : vector<1x8xf32> to vector<512x8xf32>
    %23 = arith.addf %21, %22 : vector<512x8xf32>
    %cst_11 = arith.constant 0.000000e+00 : f32
    %24 = vector.broadcast %cst_11 : f32 to vector<512x8xf32>
    %25 = arith.maximumf %23, %24 : vector<512x8xf32>
    %26 = arith.truncf %25 : vector<512x8xf32> to vector<512x8xbf16>
    %c0_12 = arith.constant 0 : index
    %c0_13 = arith.constant 0 : index
    %27 = vector.load %arg5[%c0_12, %c0_13] : memref<512x8xbf16, #tpu.memory_space<vmem>>, vector<512x8xbf16>
    tpu.vector_store %arg5[%c0_12, %c0_13], %26 {strides = array<i32>} : memref<512x8xbf16, #tpu.memory_space<vmem>>, vector<512x8xbf16>,
    return
  }
  func.func @transform_0(%arg0: i32) -> (i32, i32) {
    %c0_i32 = arith.constant 0 : i32
    %c0_i32_0 = arith.constant 0 : i32
    return %arg0, %c0_i32 : i32, i32
  }
  func.func @transform_1(%arg0: i32) -> (i32, i32) {
    %c0_i32 = arith.constant 0 : i32
    %c0_i32_0 = arith.constant 0 : i32
    %c0_i32_1 = arith.constant 0 : i32
    return %c0_i32, %c0_i32_0 : i32, i32
  }
  func.func @transform_2(%arg0: i32) -> (i32, i32) {
    %c0_i32 = arith.constant 0 : i32
    %c0_i32_0 = arith.constant 0 : i32
    %c0_i32_1 = arith.constant 0 : i32
    return %c0_i32, %c0_i32_0 : i32, i32
  }
  func.func @transform_3(%arg0: i32) -> (i32, i32) {
    %c0_i32 = arith.constant 0 : i32
    %c0_i32_0 = arith.constant 0 : i32
    %c0_i32_1 = arith.constant 0 : i32
    return %c0_i32, %c0_i32_0 : i32, i32
  }
  func.func @transform_4(%arg0: i32) -> (i32, i32) {
    %c0_i32 = arith.constant 0 : i32
    %c0_i32_0 = arith.constant 0 : i32
    return %arg0, %c0_i32 : i32, i32
  }
}

module attributes {stable_mosaic.version = 11 : i64} {
  func.func @_bn_apply_kernel(%arg0: i32, %arg1: memref<128x16xbf16, #tpu.memory_space<vmem>>, %arg2: memref<2x16xf32, #tpu.memory_space<vmem>>, %arg3: memref<1x16xf32, #tpu.memory_space<vmem>>, %arg4: memref<1x16xf32, #tpu.memory_space<vmem>>, %arg5: memref<128x16xbf16, #tpu.memory_space<vmem>>) attributes {dimension_semantics = [#tpu.dimension_semantics<parallel>], iteration_bounds = array<i64: 1>, scalar_prefetch = 0 : i64, scratch_operands = 0 : i64, tpu.core_type = #tpu.core_type<tc>, window_params = [{transform_indices = @transform_0, window_bounds = array<i64: 128, 16>}, {pipeline_mode = #tpu.pipeline_mode<synchronous>, transform_indices = @transform_1, window_bounds = array<i64: 2, 16>}, {pipeline_mode = #tpu.pipeline_mode<synchronous>, transform_indices = @transform_2, window_bounds = array<i64: 1, 16>}, {pipeline_mode = #tpu.pipeline_mode<synchronous>, transform_indices = @transform_3, window_bounds = array<i64: 1, 16>}, {transform_indices = @transform_4, window_bounds = array<i64: 128, 16>}]} {
    %c0 = arith.constant 0 : index
    %c0_0 = arith.constant 0 : index
    %0 = vector.load %arg2[%c0, %c0_0] : memref<2x16xf32, #tpu.memory_space<vmem>>, vector<1x16xf32>
    %cst = arith.constant 7.812500e-03 : f32
    %1 = vector.broadcast %cst : f32 to vector<1x16xf32>
    %2 = arith.mulf %0, %1 : vector<1x16xf32>
    %c1 = arith.constant 1 : index
    %c0_1 = arith.constant 0 : index
    %3 = vector.load %arg2[%c1, %c0_1] : memref<2x16xf32, #tpu.memory_space<vmem>>, vector<1x16xf32>
    %cst_2 = arith.constant 7.812500e-03 : f32
    %4 = vector.broadcast %cst_2 : f32 to vector<1x16xf32>
    %5 = arith.mulf %3, %4 : vector<1x16xf32>
    %6 = arith.mulf %2, %2 : vector<1x16xf32>
    %7 = arith.subf %5, %6 : vector<1x16xf32>
    %cst_3 = arith.constant 0.000000e+00 : f32
    %8 = vector.broadcast %cst_3 : f32 to vector<1x16xf32>
    %9 = arith.maximumf %7, %8 : vector<1x16xf32>
    %c0_4 = arith.constant 0 : index
    %c0_5 = arith.constant 0 : index
    %10 = vector.load %arg3[%c0_4, %c0_5] : memref<1x16xf32, #tpu.memory_space<vmem>>, vector<1x16xf32>
    %cst_6 = arith.constant 9.99999974E-6 : f32
    %11 = vector.broadcast %cst_6 : f32 to vector<1x16xf32>
    %12 = arith.addf %9, %11 : vector<1x16xf32>
    %13 = math.rsqrt %12 : vector<1x16xf32>
    %14 = arith.mulf %10, %13 : vector<1x16xf32>
    %c0_7 = arith.constant 0 : index
    %c0_8 = arith.constant 0 : index
    %15 = vector.load %arg4[%c0_7, %c0_8] : memref<1x16xf32, #tpu.memory_space<vmem>>, vector<1x16xf32>
    %16 = arith.mulf %2, %14 : vector<1x16xf32>
    %17 = arith.subf %15, %16 : vector<1x16xf32>
    %c0_9 = arith.constant 0 : index
    %c0_10 = arith.constant 0 : index
    %18 = vector.load %arg1[%c0_9, %c0_10] : memref<128x16xbf16, #tpu.memory_space<vmem>>, vector<128x16xbf16>
    %19 = arith.extf %18 : vector<128x16xbf16> to vector<128x16xf32>
    %20 = vector.broadcast %14 : vector<1x16xf32> to vector<128x16xf32>
    %21 = arith.mulf %19, %20 : vector<128x16xf32>
    %22 = vector.broadcast %17 : vector<1x16xf32> to vector<128x16xf32>
    %23 = arith.addf %21, %22 : vector<128x16xf32>
    %cst_11 = arith.constant 0.000000e+00 : f32
    %24 = vector.broadcast %cst_11 : f32 to vector<128x16xf32>
    %25 = arith.maximumf %23, %24 : vector<128x16xf32>
    %26 = arith.truncf %25 : vector<128x16xf32> to vector<128x16xbf16>
    %c0_12 = arith.constant 0 : index
    %c0_13 = arith.constant 0 : index
    %27 = vector.load %arg5[%c0_12, %c0_13] : memref<128x16xbf16, #tpu.memory_space<vmem>>, vector<128x16xbf16>
    tpu.vector_store %arg5[%c0_12, %c0_13], %26 {strides = array<i32>} : memref<128x16xbf16, #tpu.memory_space<vmem>>, vector<128x16xbf16>,
    return
  }
  func.func @transform_0(%arg0: i32) -> (i32, i32) {
    %c0_i32 = arith.constant 0 : i32
    %c0_i32_0 = arith.constant 0 : i32
    return %arg0, %c0_i32 : i32, i32
  }
  func.func @transform_1(%arg0: i32) -> (i32, i32) {
    %c0_i32 = arith.constant 0 : i32
    %c0_i32_0 = arith.constant 0 : i32
    %c0_i32_1 = arith.constant 0 : i32
    return %c0_i32, %c0_i32_0 : i32, i32
  }
  func.func @transform_2(%arg0: i32) -> (i32, i32) {
    %c0_i32 = arith.constant 0 : i32
    %c0_i32_0 = arith.constant 0 : i32
    %c0_i32_1 = arith.constant 0 : i32
    return %c0_i32, %c0_i32_0 : i32, i32
  }
  func.func @transform_3(%arg0: i32) -> (i32, i32) {
    %c0_i32 = arith.constant 0 : i32
    %c0_i32_0 = arith.constant 0 : i32
    %c0_i32_1 = arith.constant 0 : i32
    return %c0_i32, %c0_i32_0 : i32, i32
  }
  func.func @transform_4(%arg0: i32) -> (i32, i32) {
    %c0_i32 = arith.constant 0 : i32
    %c0_i32_0 = arith.constant 0 : i32
    return %arg0, %c0_i32 : i32, i32
  }
}

module attributes {stable_mosaic.version = 11 : i64} {
  func.func @_conv_row_kernel(%arg0: i32, %arg1: i32, %arg2: i32, %arg3: memref<1x1x8x24xbf16, #tpu.memory_space<vmem>>, %arg4: memref<1x24x16xbf16, #tpu.memory_space<vmem>>, %arg5: memref<1x16xf32, #tpu.memory_space<vmem>>, %arg6: memref<1x1x8x16xbf16, #tpu.memory_space<vmem>>, %arg7: memref<2x16xf32, #tpu.memory_space<vmem>>, %arg8: memref<8x16xf32, #tpu.memory_space<vmem>>) attributes {dimension_semantics = [#tpu.dimension_semantics<arbitrary>, #tpu.dimension_semantics<arbitrary>, #tpu.dimension_semantics<arbitrary>], iteration_bounds = array<i64: 2, 8, 3>, scalar_prefetch = 0 : i64, scratch_operands = 1 : i64, tpu.core_type = #tpu.core_type<tc>, window_params = [{transform_indices = @transform_0, window_bounds = array<i64: 1, 1, 8, 24>}, {transform_indices = @transform_1, window_bounds = array<i64: 1, 24, 16>}, {pipeline_mode = #tpu.pipeline_mode<synchronous>, transform_indices = @transform_2, window_bounds = array<i64: 1, 16>}, {transform_indices = @transform_3, window_bounds = array<i64: 1, 1, 8, 16>}, {pipeline_mode = #tpu.pipeline_mode<synchronous>, transform_indices = @transform_4, window_bounds = array<i64: 2, 16>}]} {
    %c0_i32 = arith.constant 0 : i32
    %0 = arith.cmpi eq, %arg0, %c0_i32 : i32
    %c0_i32_0 = arith.constant 0 : i32
    %1 = arith.cmpi eq, %arg1, %c0_i32_0 : i32
    %2 = arith.andi %0, %1 : i1
    %c0_i32_1 = arith.constant 0 : i32
    %3 = arith.cmpi eq, %arg2, %c0_i32_1 : i32
    %4 = arith.andi %2, %3 : i1
    %5 = arith.extui %4 : i1 to i32
    %c0_i32_2 = arith.constant 0 : i32
    %6 = arith.cmpi ne, %5, %c0_i32_2 : i32
    scf.if %6 {
      %cst_16 = arith.constant 0.000000e+00 : f32
      %21 = vector.broadcast %cst_16 : f32 to vector<2x16xf32>
      %c0_17 = arith.constant 0 : index
      %c0_18 = arith.constant 0 : index
      %22 = vector.load %arg7[%c0_17, %c0_18] : memref<2x16xf32, #tpu.memory_space<vmem>>, vector<2x16xf32>
      tpu.vector_store %arg7[%c0_17, %c0_18], %21 {strides = array<i32>} : memref<2x16xf32, #tpu.memory_space<vmem>>, vector<2x16xf32>,
    } else {
    }
    %c0_i32_3 = arith.constant 0 : i32
    %7 = arith.cmpi eq, %arg2, %c0_i32_3 : i32
    %8 = arith.extui %7 : i1 to i32
    %c0_i32_4 = arith.constant 0 : i32
    %9 = arith.cmpi ne, %8, %c0_i32_4 : i32
    scf.if %9 {
      %cst_16 = arith.constant 0.000000e+00 : f32
      %21 = vector.broadcast %cst_16 : f32 to vector<8x16xf32>
      %c0_17 = arith.constant 0 : index
      %c0_18 = arith.constant 0 : index
      %22 = vector.load %arg8[%c0_17, %c0_18] : memref<8x16xf32, #tpu.memory_space<vmem>>, vector<8x16xf32>
      tpu.vector_store %arg8[%c0_17, %c0_18], %21 {strides = array<i32>} : memref<8x16xf32, #tpu.memory_space<vmem>>, vector<8x16xf32>,
    } else {
    }
    %c0 = arith.constant 0 : index
    %c0_5 = arith.constant 0 : index
    %c0_6 = arith.constant 0 : index
    %c0_7 = arith.constant 0 : index
    %10 = vector.load %arg3[%c0, %c0_5, %c0_6, %c0_7] : memref<1x1x8x24xbf16, #tpu.memory_space<vmem>>, vector<1x1x8x24xbf16>
    %11 = vector.shape_cast %10 : vector<1x1x8x24xbf16> to vector<8x24xbf16>
    %c0_8 = arith.constant 0 : index
    %c0_9 = arith.constant 0 : index
    %c0_10 = arith.constant 0 : index
    %12 = vector.load %arg4[%c0_8, %c0_9, %c0_10] : memref<1x24x16xbf16, #tpu.memory_space<vmem>>, vector<1x24x16xbf16>
    %13 = vector.shape_cast %12 : vector<1x24x16xbf16> to vector<24x16xbf16>
    %c0_11 = arith.constant 0 : index
    %c0_12 = arith.constant 0 : index
    %14 = vector.load %arg8[%c0_11, %c0_12] : memref<8x16xf32, #tpu.memory_space<vmem>>, vector<8x16xf32>
    %cst = arith.constant dense<0.000000e+00> : vector<8x16xf32>
    %15 = tpu.matmul %11, %13, %cst {dimension_numbers = #tpu.dot_dimension_numbers<[1], [0], [0], [1], [0, 0, 1, 1], [], []>} : vector<8x24xbf16>, vector<24x16xbf16>, vector<8x16xf32> -> vector<8x16xf32>
    %16 = arith.addf %14, %15 : vector<8x16xf32>
    %c0_13 = arith.constant 0 : index
    %c0_14 = arith.constant 0 : index
    %17 = vector.load %arg8[%c0_13, %c0_14] : memref<8x16xf32, #tpu.memory_space<vmem>>, vector<8x16xf32>
    tpu.vector_store %arg8[%c0_13, %c0_14], %16 {strides = array<i32>} : memref<8x16xf32, #tpu.memory_space<vmem>>, vector<8x16xf32>,
    %c2_i32 = arith.constant 2 : i32
    %18 = arith.cmpi eq, %arg2, %c2_i32 : i32
    %19 = arith.extui %18 : i1 to i32
    %c0_i32_15 = arith.constant 0 : i32
    %20 = arith.cmpi ne, %19, %c0_i32_15 : i32
    scf.if %20 {
      %c0_16 = arith.constant 0 : index
      %c0_17 = arith.constant 0 : index
      %21 = vector.load %arg8[%c0_16, %c0_17] : memref<8x16xf32, #tpu.memory_space<vmem>>, vector<8x16xf32>
      %c0_18 = arith.constant 0 : index
      %c0_19 = arith.constant 0 : index
      %22 = vector.load %arg5[%c0_18, %c0_19] : memref<1x16xf32, #tpu.memory_space<vmem>>, vector<1x16xf32>
      %23 = vector.broadcast %22 : vector<1x16xf32> to vector<8x16xf32>
      %24 = arith.addf %21, %23 : vector<8x16xf32>
      %25 = arith.truncf %24 : vector<8x16xf32> to vector<8x16xbf16>
      %c0_20 = arith.constant 0 : index
      %c0_21 = arith.constant 0 : index
      %c0_22 = arith.constant 0 : index
      %c0_23 = arith.constant 0 : index
      %26 = vector.load %arg6[%c0_20, %c0_21, %c0_22, %c0_23] : memref<1x1x8x16xbf16, #tpu.memory_space<vmem>>, vector<1x1x8x16xbf16>
      %27 = vector.shape_cast %26 : vector<1x1x8x16xbf16> to vector<8x16xbf16>
      %28 = vector.shape_cast %25 : vector<8x16xbf16> to vector<1x1x8x16xbf16>
      tpu.vector_store %arg6[%c0_20, %c0_21, %c0_22, %c0_23], %28 {strides = array<i32>} : memref<1x1x8x16xbf16, #tpu.memory_space<vmem>>, vector<1x1x8x16xbf16>,
      %c0_24 = arith.constant 0 : index
      %c0_25 = arith.constant 0 : index
      %29 = vector.load %arg7[%c0_24, %c0_25] : memref<2x16xf32, #tpu.memory_space<vmem>>, vector<1x16xf32>
      %cst_26 = arith.constant dense<0.000000e+00> : vector<16xf32>
      %30 = vector.multi_reduction <add>, %24, %cst_26 [0] : vector<8x16xf32> to vector<16xf32>
      %31 = vector.shape_cast %30 : vector<16xf32> to vector<1x16xf32>
      %32 = arith.addf %29, %31 : vector<1x16xf32>
      %c0_27 = arith.constant 0 : index
      %c0_28 = arith.constant 0 : index
      %33 = vector.load %arg7[%c0_27, %c0_28] : memref<2x16xf32, #tpu.memory_space<vmem>>, vector<1x16xf32>
      tpu.vector_store %arg7[%c0_27, %c0_28], %32 {strides = array<i32>} : memref<2x16xf32, #tpu.memory_space<vmem>>, vector<1x16xf32>,
      %c1 = arith.constant 1 : index
      %c0_29 = arith.constant 0 : index
      %34 = vector.load %arg7[%c1, %c0_29] : memref<2x16xf32, #tpu.memory_space<vmem>>, vector<1x16xf32>
      %35 = arith.mulf %24, %24 : vector<8x16xf32>
      %cst_30 = arith.constant dense<0.000000e+00> : vector<16xf32>
      %36 = vector.multi_reduction <add>, %35, %cst_30 [0] : vector<8x16xf32> to vector<16xf32>
      %37 = vector.shape_cast %36 : vector<16xf32> to vector<1x16xf32>
      %38 = arith.addf %34, %37 : vector<1x16xf32>
      %c1_31 = arith.constant 1 : index
      %c0_32 = arith.constant 0 : index
      %39 = vector.load %arg7[%c1_31, %c0_32] : memref<2x16xf32, #tpu.memory_space<vmem>>, vector<1x16xf32>
      tpu.vector_store %arg7[%c1_31, %c0_32], %38 {strides = array<i32>} : memref<2x16xf32, #tpu.memory_space<vmem>>, vector<1x16xf32>,
    } else {
    }
    return
  }
  func.func @transform_0(%arg0: i32, %arg1: i32, %arg2: i32) -> (i32, i32, i32, i32) {
    %c2_i32 = arith.constant 2 : i32
    %0 = arith.muli %arg1, %c2_i32 : i32
    %1 = arith.addi %0, %arg2 : i32
    %c0_i32 = arith.constant 0 : i32
    %c0_i32_0 = arith.constant 0 : i32
    %c0_i32_1 = arith.constant 0 : i32
    return %arg0, %1, %c0_i32, %c0_i32_0 : i32, i32, i32, i32
  }
  func.func @transform_1(%arg0: i32, %arg1: i32, %arg2: i32) -> (i32, i32, i32) {
    %c0_i32 = arith.constant 0 : i32
    %c0_i32_0 = arith.constant 0 : i32
    %c0_i32_1 = arith.constant 0 : i32
    return %arg2, %c0_i32, %c0_i32_0 : i32, i32, i32
  }
  func.func @transform_2(%arg0: i32, %arg1: i32, %arg2: i32) -> (i32, i32) {
    %c0_i32 = arith.constant 0 : i32
    %c0_i32_0 = arith.constant 0 : i32
    %c0_i32_1 = arith.constant 0 : i32
    return %c0_i32, %c0_i32_0 : i32, i32
  }
  func.func @transform_3(%arg0: i32, %arg1: i32, %arg2: i32) -> (i32, i32, i32, i32) {
    %c0_i32 = arith.constant 0 : i32
    %c0_i32_0 = arith.constant 0 : i32
    %c0_i32_1 = arith.constant 0 : i32
    return %arg0, %arg1, %c0_i32, %c0_i32_0 : i32, i32, i32, i32
  }
  func.func @transform_4(%arg0: i32, %arg1: i32, %arg2: i32) -> (i32, i32) {
    %c0_i32 = arith.constant 0 : i32
    %c0_i32_0 = arith.constant 0 : i32
    %c0_i32_1 = arith.constant 0 : i32
    return %c0_i32, %c0_i32_0 : i32, i32
  }
}

module attributes {stable_mosaic.version = 11 : i64} {
  func.func @_conv_row_kernel(%arg0: i32, %arg1: i32, %arg2: i32, %arg3: memref<1x1x4x48xbf16, #tpu.memory_space<vmem>>, %arg4: memref<1x48x32xbf16, #tpu.memory_space<vmem>>, %arg5: memref<1x32xf32, #tpu.memory_space<vmem>>, %arg6: memref<1x1x4x32xbf16, #tpu.memory_space<vmem>>, %arg7: memref<2x32xf32, #tpu.memory_space<vmem>>, %arg8: memref<4x32xf32, #tpu.memory_space<vmem>>) attributes {dimension_semantics = [#tpu.dimension_semantics<arbitrary>, #tpu.dimension_semantics<arbitrary>, #tpu.dimension_semantics<arbitrary>], iteration_bounds = array<i64: 2, 4, 3>, scalar_prefetch = 0 : i64, scratch_operands = 1 : i64, tpu.core_type = #tpu.core_type<tc>, window_params = [{transform_indices = @transform_0, window_bounds = array<i64: 1, 1, 4, 48>}, {transform_indices = @transform_1, window_bounds = array<i64: 1, 48, 32>}, {pipeline_mode = #tpu.pipeline_mode<synchronous>, transform_indices = @transform_2, window_bounds = array<i64: 1, 32>}, {transform_indices = @transform_3, window_bounds = array<i64: 1, 1, 4, 32>}, {pipeline_mode = #tpu.pipeline_mode<synchronous>, transform_indices = @transform_4, window_bounds = array<i64: 2, 32>}]} {
    %c0_i32 = arith.constant 0 : i32
    %0 = arith.cmpi eq, %arg0, %c0_i32 : i32
    %c0_i32_0 = arith.constant 0 : i32
    %1 = arith.cmpi eq, %arg1, %c0_i32_0 : i32
    %2 = arith.andi %0, %1 : i1
    %c0_i32_1 = arith.constant 0 : i32
    %3 = arith.cmpi eq, %arg2, %c0_i32_1 : i32
    %4 = arith.andi %2, %3 : i1
    %5 = arith.extui %4 : i1 to i32
    %c0_i32_2 = arith.constant 0 : i32
    %6 = arith.cmpi ne, %5, %c0_i32_2 : i32
    scf.if %6 {
      %cst_16 = arith.constant 0.000000e+00 : f32
      %21 = vector.broadcast %cst_16 : f32 to vector<2x32xf32>
      %c0_17 = arith.constant 0 : index
      %c0_18 = arith.constant 0 : index
      %22 = vector.load %arg7[%c0_17, %c0_18] : memref<2x32xf32, #tpu.memory_space<vmem>>, vector<2x32xf32>
      tpu.vector_store %arg7[%c0_17, %c0_18], %21 {strides = array<i32>} : memref<2x32xf32, #tpu.memory_space<vmem>>, vector<2x32xf32>,
    } else {
    }
    %c0_i32_3 = arith.constant 0 : i32
    %7 = arith.cmpi eq, %arg2, %c0_i32_3 : i32
    %8 = arith.extui %7 : i1 to i32
    %c0_i32_4 = arith.constant 0 : i32
    %9 = arith.cmpi ne, %8, %c0_i32_4 : i32
    scf.if %9 {
      %cst_16 = arith.constant 0.000000e+00 : f32
      %21 = vector.broadcast %cst_16 : f32 to vector<4x32xf32>
      %c0_17 = arith.constant 0 : index
      %c0_18 = arith.constant 0 : index
      %22 = vector.load %arg8[%c0_17, %c0_18] : memref<4x32xf32, #tpu.memory_space<vmem>>, vector<4x32xf32>
      tpu.vector_store %arg8[%c0_17, %c0_18], %21 {strides = array<i32>} : memref<4x32xf32, #tpu.memory_space<vmem>>, vector<4x32xf32>,
    } else {
    }
    %c0 = arith.constant 0 : index
    %c0_5 = arith.constant 0 : index
    %c0_6 = arith.constant 0 : index
    %c0_7 = arith.constant 0 : index
    %10 = vector.load %arg3[%c0, %c0_5, %c0_6, %c0_7] : memref<1x1x4x48xbf16, #tpu.memory_space<vmem>>, vector<1x1x4x48xbf16>
    %11 = vector.shape_cast %10 : vector<1x1x4x48xbf16> to vector<4x48xbf16>
    %c0_8 = arith.constant 0 : index
    %c0_9 = arith.constant 0 : index
    %c0_10 = arith.constant 0 : index
    %12 = vector.load %arg4[%c0_8, %c0_9, %c0_10] : memref<1x48x32xbf16, #tpu.memory_space<vmem>>, vector<1x48x32xbf16>
    %13 = vector.shape_cast %12 : vector<1x48x32xbf16> to vector<48x32xbf16>
    %c0_11 = arith.constant 0 : index
    %c0_12 = arith.constant 0 : index
    %14 = vector.load %arg8[%c0_11, %c0_12] : memref<4x32xf32, #tpu.memory_space<vmem>>, vector<4x32xf32>
    %cst = arith.constant dense<0.000000e+00> : vector<4x32xf32>
    %15 = tpu.matmul %11, %13, %cst {dimension_numbers = #tpu.dot_dimension_numbers<[1], [0], [0], [1], [0, 0, 1, 1], [], []>} : vector<4x48xbf16>, vector<48x32xbf16>, vector<4x32xf32> -> vector<4x32xf32>
    %16 = arith.addf %14, %15 : vector<4x32xf32>
    %c0_13 = arith.constant 0 : index
    %c0_14 = arith.constant 0 : index
    %17 = vector.load %arg8[%c0_13, %c0_14] : memref<4x32xf32, #tpu.memory_space<vmem>>, vector<4x32xf32>
    tpu.vector_store %arg8[%c0_13, %c0_14], %16 {strides = array<i32>} : memref<4x32xf32, #tpu.memory_space<vmem>>, vector<4x32xf32>,
    %c2_i32 = arith.constant 2 : i32
    %18 = arith.cmpi eq, %arg2, %c2_i32 : i32
    %19 = arith.extui %18 : i1 to i32
    %c0_i32_15 = arith.constant 0 : i32
    %20 = arith.cmpi ne, %19, %c0_i32_15 : i32
    scf.if %20 {
      %c0_16 = arith.constant 0 : index
      %c0_17 = arith.constant 0 : index
      %21 = vector.load %arg8[%c0_16, %c0_17] : memref<4x32xf32, #tpu.memory_space<vmem>>, vector<4x32xf32>
      %c0_18 = arith.constant 0 : index
      %c0_19 = arith.constant 0 : index
      %22 = vector.load %arg5[%c0_18, %c0_19] : memref<1x32xf32, #tpu.memory_space<vmem>>, vector<1x32xf32>
      %23 = vector.broadcast %22 : vector<1x32xf32> to vector<4x32xf32>
      %24 = arith.addf %21, %23 : vector<4x32xf32>
      %25 = arith.truncf %24 : vector<4x32xf32> to vector<4x32xbf16>
      %c0_20 = arith.constant 0 : index
      %c0_21 = arith.constant 0 : index
      %c0_22 = arith.constant 0 : index
      %c0_23 = arith.constant 0 : index
      %26 = vector.load %arg6[%c0_20, %c0_21, %c0_22, %c0_23] : memref<1x1x4x32xbf16, #tpu.memory_space<vmem>>, vector<1x1x4x32xbf16>
      %27 = vector.shape_cast %26 : vector<1x1x4x32xbf16> to vector<4x32xbf16>
      %28 = vector.shape_cast %25 : vector<4x32xbf16> to vector<1x1x4x32xbf16>
      tpu.vector_store %arg6[%c0_20, %c0_21, %c0_22, %c0_23], %28 {strides = array<i32>} : memref<1x1x4x32xbf16, #tpu.memory_space<vmem>>, vector<1x1x4x32xbf16>,
      %c0_24 = arith.constant 0 : index
      %c0_25 = arith.constant 0 : index
      %29 = vector.load %arg7[%c0_24, %c0_25] : memref<2x32xf32, #tpu.memory_space<vmem>>, vector<1x32xf32>
      %cst_26 = arith.constant dense<0.000000e+00> : vector<32xf32>
      %30 = vector.multi_reduction <add>, %24, %cst_26 [0] : vector<4x32xf32> to vector<32xf32>
      %31 = vector.shape_cast %30 : vector<32xf32> to vector<1x32xf32>
      %32 = arith.addf %29, %31 : vector<1x32xf32>
      %c0_27 = arith.constant 0 : index
      %c0_28 = arith.constant 0 : index
      %33 = vector.load %arg7[%c0_27, %c0_28] : memref<2x32xf32, #tpu.memory_space<vmem>>, vector<1x32xf32>
      tpu.vector_store %arg7[%c0_27, %c0_28], %32 {strides = array<i32>} : memref<2x32xf32, #tpu.memory_space<vmem>>, vector<1x32xf32>,
      %c1 = arith.constant 1 : index
      %c0_29 = arith.constant 0 : index
      %34 = vector.load %arg7[%c1, %c0_29] : memref<2x32xf32, #tpu.memory_space<vmem>>, vector<1x32xf32>
      %35 = arith.mulf %24, %24 : vector<4x32xf32>
      %cst_30 = arith.constant dense<0.000000e+00> : vector<32xf32>
      %36 = vector.multi_reduction <add>, %35, %cst_30 [0] : vector<4x32xf32> to vector<32xf32>
      %37 = vector.shape_cast %36 : vector<32xf32> to vector<1x32xf32>
      %38 = arith.addf %34, %37 : vector<1x32xf32>
      %c1_31 = arith.constant 1 : index
      %c0_32 = arith.constant 0 : index
      %39 = vector.load %arg7[%c1_31, %c0_32] : memref<2x32xf32, #tpu.memory_space<vmem>>, vector<1x32xf32>
      tpu.vector_store %arg7[%c1_31, %c0_32], %38 {strides = array<i32>} : memref<2x32xf32, #tpu.memory_space<vmem>>, vector<1x32xf32>,
    } else {
    }
    return
  }
  func.func @transform_0(%arg0: i32, %arg1: i32, %arg2: i32) -> (i32, i32, i32, i32) {
    %c2_i32 = arith.constant 2 : i32
    %0 = arith.muli %arg1, %c2_i32 : i32
    %1 = arith.addi %0, %arg2 : i32
    %c0_i32 = arith.constant 0 : i32
    %c0_i32_0 = arith.constant 0 : i32
    %c0_i32_1 = arith.constant 0 : i32
    return %arg0, %1, %c0_i32, %c0_i32_0 : i32, i32, i32, i32
  }
  func.func @transform_1(%arg0: i32, %arg1: i32, %arg2: i32) -> (i32, i32, i32) {
    %c0_i32 = arith.constant 0 : i32
    %c0_i32_0 = arith.constant 0 : i32
    %c0_i32_1 = arith.constant 0 : i32
    return %arg2, %c0_i32, %c0_i32_0 : i32, i32, i32
  }
  func.func @transform_2(%arg0: i32, %arg1: i32, %arg2: i32) -> (i32, i32) {
    %c0_i32 = arith.constant 0 : i32
    %c0_i32_0 = arith.constant 0 : i32
    %c0_i32_1 = arith.constant 0 : i32
    return %c0_i32, %c0_i32_0 : i32, i32
  }
  func.func @transform_3(%arg0: i32, %arg1: i32, %arg2: i32) -> (i32, i32, i32, i32) {
    %c0_i32 = arith.constant 0 : i32
    %c0_i32_0 = arith.constant 0 : i32
    %c0_i32_1 = arith.constant 0 : i32
    return %arg0, %arg1, %c0_i32, %c0_i32_0 : i32, i32, i32, i32
  }
  func.func @transform_4(%arg0: i32, %arg1: i32, %arg2: i32) -> (i32, i32) {
    %c0_i32 = arith.constant 0 : i32
    %c0_i32_0 = arith.constant 0 : i32
    %c0_i32_1 = arith.constant 0 : i32
    return %c0_i32, %c0_i32_0 : i32, i32
  }
}

module attributes {stable_mosaic.version = 11 : i64} {
  func.func @_bn_apply_kernel(%arg0: i32, %arg1: memref<32x32xbf16, #tpu.memory_space<vmem>>, %arg2: memref<2x32xf32, #tpu.memory_space<vmem>>, %arg3: memref<1x32xf32, #tpu.memory_space<vmem>>, %arg4: memref<1x32xf32, #tpu.memory_space<vmem>>, %arg5: memref<32x32xbf16, #tpu.memory_space<vmem>>) attributes {dimension_semantics = [#tpu.dimension_semantics<parallel>], iteration_bounds = array<i64: 1>, scalar_prefetch = 0 : i64, scratch_operands = 0 : i64, tpu.core_type = #tpu.core_type<tc>, window_params = [{transform_indices = @transform_0, window_bounds = array<i64: 32, 32>}, {pipeline_mode = #tpu.pipeline_mode<synchronous>, transform_indices = @transform_1, window_bounds = array<i64: 2, 32>}, {pipeline_mode = #tpu.pipeline_mode<synchronous>, transform_indices = @transform_2, window_bounds = array<i64: 1, 32>}, {pipeline_mode = #tpu.pipeline_mode<synchronous>, transform_indices = @transform_3, window_bounds = array<i64: 1, 32>}, {transform_indices = @transform_4, window_bounds = array<i64: 32, 32>}]} {
    %c0 = arith.constant 0 : index
    %c0_0 = arith.constant 0 : index
    %0 = vector.load %arg2[%c0, %c0_0] : memref<2x32xf32, #tpu.memory_space<vmem>>, vector<1x32xf32>
    %cst = arith.constant 3.125000e-02 : f32
    %1 = vector.broadcast %cst : f32 to vector<1x32xf32>
    %2 = arith.mulf %0, %1 : vector<1x32xf32>
    %c1 = arith.constant 1 : index
    %c0_1 = arith.constant 0 : index
    %3 = vector.load %arg2[%c1, %c0_1] : memref<2x32xf32, #tpu.memory_space<vmem>>, vector<1x32xf32>
    %cst_2 = arith.constant 3.125000e-02 : f32
    %4 = vector.broadcast %cst_2 : f32 to vector<1x32xf32>
    %5 = arith.mulf %3, %4 : vector<1x32xf32>
    %6 = arith.mulf %2, %2 : vector<1x32xf32>
    %7 = arith.subf %5, %6 : vector<1x32xf32>
    %cst_3 = arith.constant 0.000000e+00 : f32
    %8 = vector.broadcast %cst_3 : f32 to vector<1x32xf32>
    %9 = arith.maximumf %7, %8 : vector<1x32xf32>
    %c0_4 = arith.constant 0 : index
    %c0_5 = arith.constant 0 : index
    %10 = vector.load %arg3[%c0_4, %c0_5] : memref<1x32xf32, #tpu.memory_space<vmem>>, vector<1x32xf32>
    %cst_6 = arith.constant 9.99999974E-6 : f32
    %11 = vector.broadcast %cst_6 : f32 to vector<1x32xf32>
    %12 = arith.addf %9, %11 : vector<1x32xf32>
    %13 = math.rsqrt %12 : vector<1x32xf32>
    %14 = arith.mulf %10, %13 : vector<1x32xf32>
    %c0_7 = arith.constant 0 : index
    %c0_8 = arith.constant 0 : index
    %15 = vector.load %arg4[%c0_7, %c0_8] : memref<1x32xf32, #tpu.memory_space<vmem>>, vector<1x32xf32>
    %16 = arith.mulf %2, %14 : vector<1x32xf32>
    %17 = arith.subf %15, %16 : vector<1x32xf32>
    %c0_9 = arith.constant 0 : index
    %c0_10 = arith.constant 0 : index
    %18 = vector.load %arg1[%c0_9, %c0_10] : memref<32x32xbf16, #tpu.memory_space<vmem>>, vector<32x32xbf16>
    %19 = arith.extf %18 : vector<32x32xbf16> to vector<32x32xf32>
    %20 = vector.broadcast %14 : vector<1x32xf32> to vector<32x32xf32>
    %21 = arith.mulf %19, %20 : vector<32x32xf32>
    %22 = vector.broadcast %17 : vector<1x32xf32> to vector<32x32xf32>
    %23 = arith.addf %21, %22 : vector<32x32xf32>
    %cst_11 = arith.constant 0.000000e+00 : f32
    %24 = vector.broadcast %cst_11 : f32 to vector<32x32xf32>
    %25 = arith.maximumf %23, %24 : vector<32x32xf32>
    %26 = arith.truncf %25 : vector<32x32xf32> to vector<32x32xbf16>
    %c0_12 = arith.constant 0 : index
    %c0_13 = arith.constant 0 : index
    %27 = vector.load %arg5[%c0_12, %c0_13] : memref<32x32xbf16, #tpu.memory_space<vmem>>, vector<32x32xbf16>
    tpu.vector_store %arg5[%c0_12, %c0_13], %26 {strides = array<i32>} : memref<32x32xbf16, #tpu.memory_space<vmem>>, vector<32x32xbf16>,
    return
  }
  func.func @transform_0(%arg0: i32) -> (i32, i32) {
    %c0_i32 = arith.constant 0 : i32
    %c0_i32_0 = arith.constant 0 : i32
    return %arg0, %c0_i32 : i32, i32
  }
  func.func @transform_1(%arg0: i32) -> (i32, i32) {
    %c0_i32 = arith.constant 0 : i32
    %c0_i32_0 = arith.constant 0 : i32
    %c0_i32_1 = arith.constant 0 : i32
    return %c0_i32, %c0_i32_0 : i32, i32
  }
  func.func @transform_2(%arg0: i32) -> (i32, i32) {
    %c0_i32 = arith.constant 0 : i32
    %c0_i32_0 = arith.constant 0 : i32
    %c0_i32_1 = arith.constant 0 : i32
    return %c0_i32, %c0_i32_0 : i32, i32
  }
  func.func @transform_3(%arg0: i32) -> (i32, i32) {
    %c0_i32 = arith.constant 0 : i32
    %c0_i32_0 = arith.constant 0 : i32
    %c0_i32_1 = arith.constant 0 : i32
    return %c0_i32, %c0_i32_0 : i32, i32
  }
  func.func @transform_4(%arg0: i32) -> (i32, i32) {
    %c0_i32 = arith.constant 0 : i32
    %c0_i32_0 = arith.constant 0 : i32
    return %arg0, %c0_i32 : i32, i32
  }
}

module attributes {stable_mosaic.version = 11 : i64} {
  func.func @_conv_row_kernel(%arg0: i32, %arg1: i32, %arg2: i32, %arg3: memref<1x1x6x32xbf16, #tpu.memory_space<vmem>>, %arg4: memref<1x96x32xbf16, #tpu.memory_space<vmem>>, %arg5: memref<1x32xf32, #tpu.memory_space<vmem>>, %arg6: memref<1x1x4x32xbf16, #tpu.memory_space<vmem>>, %arg7: memref<2x32xf32, #tpu.memory_space<vmem>>, %arg8: memref<4x32xf32, #tpu.memory_space<vmem>>) attributes {dimension_semantics = [#tpu.dimension_semantics<arbitrary>, #tpu.dimension_semantics<arbitrary>, #tpu.dimension_semantics<arbitrary>], iteration_bounds = array<i64: 2, 4, 3>, scalar_prefetch = 0 : i64, scratch_operands = 1 : i64, tpu.core_type = #tpu.core_type<tc>, window_params = [{transform_indices = @transform_0, window_bounds = array<i64: 1, 1, 6, 32>}, {transform_indices = @transform_1, window_bounds = array<i64: 1, 96, 32>}, {pipeline_mode = #tpu.pipeline_mode<synchronous>, transform_indices = @transform_2, window_bounds = array<i64: 1, 32>}, {transform_indices = @transform_3, window_bounds = array<i64: 1, 1, 4, 32>}, {pipeline_mode = #tpu.pipeline_mode<synchronous>, transform_indices = @transform_4, window_bounds = array<i64: 2, 32>}]} {
    %c0_i32 = arith.constant 0 : i32
    %0 = arith.cmpi eq, %arg0, %c0_i32 : i32
    %c0_i32_0 = arith.constant 0 : i32
    %1 = arith.cmpi eq, %arg1, %c0_i32_0 : i32
    %2 = arith.andi %0, %1 : i1
    %c0_i32_1 = arith.constant 0 : i32
    %3 = arith.cmpi eq, %arg2, %c0_i32_1 : i32
    %4 = arith.andi %2, %3 : i1
    %5 = arith.extui %4 : i1 to i32
    %c0_i32_2 = arith.constant 0 : i32
    %6 = arith.cmpi ne, %5, %c0_i32_2 : i32
    scf.if %6 {
      %cst_18 = arith.constant 0.000000e+00 : f32
      %31 = vector.broadcast %cst_18 : f32 to vector<2x32xf32>
      %c0_19 = arith.constant 0 : index
      %c0_20 = arith.constant 0 : index
      %32 = vector.load %arg7[%c0_19, %c0_20] : memref<2x32xf32, #tpu.memory_space<vmem>>, vector<2x32xf32>
      tpu.vector_store %arg7[%c0_19, %c0_20], %31 {strides = array<i32>} : memref<2x32xf32, #tpu.memory_space<vmem>>, vector<2x32xf32>,
    } else {
    }
    %c0_i32_3 = arith.constant 0 : i32
    %7 = arith.cmpi eq, %arg2, %c0_i32_3 : i32
    %8 = arith.extui %7 : i1 to i32
    %c0_i32_4 = arith.constant 0 : i32
    %9 = arith.cmpi ne, %8, %c0_i32_4 : i32
    scf.if %9 {
      %cst_18 = arith.constant 0.000000e+00 : f32
      %31 = vector.broadcast %cst_18 : f32 to vector<4x32xf32>
      %c0_19 = arith.constant 0 : index
      %c0_20 = arith.constant 0 : index
      %32 = vector.load %arg8[%c0_19, %c0_20] : memref<4x32xf32, #tpu.memory_space<vmem>>, vector<4x32xf32>
      tpu.vector_store %arg8[%c0_19, %c0_20], %31 {strides = array<i32>} : memref<4x32xf32, #tpu.memory_space<vmem>>, vector<4x32xf32>,
    } else {
    }
    %c0 = arith.constant 0 : index
    %c0_5 = arith.constant 0 : index
    %c0_6 = arith.constant 0 : index
    %c0_7 = arith.constant 0 : index
    %10 = vector.load %arg3[%c0, %c0_5, %c0_6, %c0_7] : memref<1x1x6x32xbf16, #tpu.memory_space<vmem>>, vector<1x1x6x32xbf16>
    %11 = vector.shape_cast %10 : vector<1x1x6x32xbf16> to vector<6x32xbf16>
    %c0_8 = arith.constant 0 : index
    %c0_9 = arith.constant 0 : index
    %c0_10 = arith.constant 0 : index
    %12 = vector.load %arg4[%c0_8, %c0_9, %c0_10] : memref<1x96x32xbf16, #tpu.memory_space<vmem>>, vector<1x96x32xbf16>
    %13 = vector.shape_cast %12 : vector<1x96x32xbf16> to vector<96x32xbf16>
    %c0_11 = arith.constant 0 : index
    %c0_12 = arith.constant 0 : index
    %14 = vector.load %arg8[%c0_11, %c0_12] : memref<4x32xf32, #tpu.memory_space<vmem>>, vector<4x32xf32>
    %15 = vector.extract_strided_slice %11 {offsets = [0, 0], sizes = [4, 32], strides = [1, 1]} : vector<6x32xbf16> to vector<4x32xbf16>
    %16 = vector.extract_strided_slice %13 {offsets = [0, 0], sizes = [32, 32], strides = [1, 1]} : vector<96x32xbf16> to vector<32x32xbf16>
    %cst = arith.constant dense<0.000000e+00> : vector<4x32xf32>
    %17 = tpu.matmul %15, %16, %cst {dimension_numbers = #tpu.dot_dimension_numbers<[1], [0], [0], [1], [0, 0, 1, 1], [], []>} : vector<4x32xbf16>, vector<32x32xbf16>, vector<4x32xf32> -> vector<4x32xf32>
    %18 = arith.addf %14, %17 : vector<4x32xf32>
    %19 = vector.extract_strided_slice %11 {offsets = [1, 0], sizes = [4, 32], strides = [1, 1]} : vector<6x32xbf16> to vector<4x32xbf16>
    %20 = vector.extract_strided_slice %13 {offsets = [32, 0], sizes = [32, 32], strides = [1, 1]} : vector<96x32xbf16> to vector<32x32xbf16>
    %cst_13 = arith.constant dense<0.000000e+00> : vector<4x32xf32>
    %21 = tpu.matmul %19, %20, %cst_13 {dimension_numbers = #tpu.dot_dimension_numbers<[1], [0], [0], [1], [0, 0, 1, 1], [], []>} : vector<4x32xbf16>, vector<32x32xbf16>, vector<4x32xf32> -> vector<4x32xf32>
    %22 = arith.addf %18, %21 : vector<4x32xf32>
    %23 = vector.extract_strided_slice %11 {offsets = [2, 0], sizes = [4, 32], strides = [1, 1]} : vector<6x32xbf16> to vector<4x32xbf16>
    %24 = vector.extract_strided_slice %13 {offsets = [64, 0], sizes = [32, 32], strides = [1, 1]} : vector<96x32xbf16> to vector<32x32xbf16>
    %cst_14 = arith.constant dense<0.000000e+00> : vector<4x32xf32>
    %25 = tpu.matmul %23, %24, %cst_14 {dimension_numbers = #tpu.dot_dimension_numbers<[1], [0], [0], [1], [0, 0, 1, 1], [], []>} : vector<4x32xbf16>, vector<32x32xbf16>, vector<4x32xf32> -> vector<4x32xf32>
    %26 = arith.addf %22, %25 : vector<4x32xf32>
    %c0_15 = arith.constant 0 : index
    %c0_16 = arith.constant 0 : index
    %27 = vector.load %arg8[%c0_15, %c0_16] : memref<4x32xf32, #tpu.memory_space<vmem>>, vector<4x32xf32>
    tpu.vector_store %arg8[%c0_15, %c0_16], %26 {strides = array<i32>} : memref<4x32xf32, #tpu.memory_space<vmem>>, vector<4x32xf32>,
    %c2_i32 = arith.constant 2 : i32
    %28 = arith.cmpi eq, %arg2, %c2_i32 : i32
    %29 = arith.extui %28 : i1 to i32
    %c0_i32_17 = arith.constant 0 : i32
    %30 = arith.cmpi ne, %29, %c0_i32_17 : i32
    scf.if %30 {
      %c0_18 = arith.constant 0 : index
      %c0_19 = arith.constant 0 : index
      %31 = vector.load %arg8[%c0_18, %c0_19] : memref<4x32xf32, #tpu.memory_space<vmem>>, vector<4x32xf32>
      %c0_20 = arith.constant 0 : index
      %c0_21 = arith.constant 0 : index
      %32 = vector.load %arg5[%c0_20, %c0_21] : memref<1x32xf32, #tpu.memory_space<vmem>>, vector<1x32xf32>
      %33 = vector.broadcast %32 : vector<1x32xf32> to vector<4x32xf32>
      %34 = arith.addf %31, %33 : vector<4x32xf32>
      %35 = arith.truncf %34 : vector<4x32xf32> to vector<4x32xbf16>
      %c0_22 = arith.constant 0 : index
      %c0_23 = arith.constant 0 : index
      %c0_24 = arith.constant 0 : index
      %c0_25 = arith.constant 0 : index
      %36 = vector.load %arg6[%c0_22, %c0_23, %c0_24, %c0_25] : memref<1x1x4x32xbf16, #tpu.memory_space<vmem>>, vector<1x1x4x32xbf16>
      %37 = vector.shape_cast %36 : vector<1x1x4x32xbf16> to vector<4x32xbf16>
      %38 = vector.shape_cast %35 : vector<4x32xbf16> to vector<1x1x4x32xbf16>
      tpu.vector_store %arg6[%c0_22, %c0_23, %c0_24, %c0_25], %38 {strides = array<i32>} : memref<1x1x4x32xbf16, #tpu.memory_space<vmem>>, vector<1x1x4x32xbf16>,
      %c0_26 = arith.constant 0 : index
      %c0_27 = arith.constant 0 : index
      %39 = vector.load %arg7[%c0_26, %c0_27] : memref<2x32xf32, #tpu.memory_space<vmem>>, vector<1x32xf32>
      %cst_28 = arith.constant dense<0.000000e+00> : vector<32xf32>
      %40 = vector.multi_reduction <add>, %34, %cst_28 [0] : vector<4x32xf32> to vector<32xf32>
      %41 = vector.shape_cast %40 : vector<32xf32> to vector<1x32xf32>
      %42 = arith.addf %39, %41 : vector<1x32xf32>
      %c0_29 = arith.constant 0 : index
      %c0_30 = arith.constant 0 : index
      %43 = vector.load %arg7[%c0_29, %c0_30] : memref<2x32xf32, #tpu.memory_space<vmem>>, vector<1x32xf32>
      tpu.vector_store %arg7[%c0_29, %c0_30], %42 {strides = array<i32>} : memref<2x32xf32, #tpu.memory_space<vmem>>, vector<1x32xf32>,
      %c1 = arith.constant 1 : index
      %c0_31 = arith.constant 0 : index
      %44 = vector.load %arg7[%c1, %c0_31] : memref<2x32xf32, #tpu.memory_space<vmem>>, vector<1x32xf32>
      %45 = arith.mulf %34, %34 : vector<4x32xf32>
      %cst_32 = arith.constant dense<0.000000e+00> : vector<32xf32>
      %46 = vector.multi_reduction <add>, %45, %cst_32 [0] : vector<4x32xf32> to vector<32xf32>
      %47 = vector.shape_cast %46 : vector<32xf32> to vector<1x32xf32>
      %48 = arith.addf %44, %47 : vector<1x32xf32>
      %c1_33 = arith.constant 1 : index
      %c0_34 = arith.constant 0 : index
      %49 = vector.load %arg7[%c1_33, %c0_34] : memref<2x32xf32, #tpu.memory_space<vmem>>, vector<1x32xf32>
      tpu.vector_store %arg7[%c1_33, %c0_34], %48 {strides = array<i32>} : memref<2x32xf32, #tpu.memory_space<vmem>>, vector<1x32xf32>,
    } else {
    }
    return
  }
  func.func @transform_0(%arg0: i32, %arg1: i32, %arg2: i32) -> (i32, i32, i32, i32) {
    %c1_i32 = arith.constant 1 : i32
    %0 = arith.muli %arg1, %c1_i32 : i32
    %1 = arith.addi %0, %arg2 : i32
    %c0_i32 = arith.constant 0 : i32
    %c0_i32_0 = arith.constant 0 : i32
    %c0_i32_1 = arith.constant 0 : i32
    return %arg0, %1, %c0_i32, %c0_i32_0 : i32, i32, i32, i32
  }
  func.func @transform_1(%arg0: i32, %arg1: i32, %arg2: i32) -> (i32, i32, i32) {
    %c0_i32 = arith.constant 0 : i32
    %c0_i32_0 = arith.constant 0 : i32
    %c0_i32_1 = arith.constant 0 : i32
    return %arg2, %c0_i32, %c0_i32_0 : i32, i32, i32
  }
  func.func @transform_2(%arg0: i32, %arg1: i32, %arg2: i32) -> (i32, i32) {
    %c0_i32 = arith.constant 0 : i32
    %c0_i32_0 = arith.constant 0 : i32
    %c0_i32_1 = arith.constant 0 : i32
    return %c0_i32, %c0_i32_0 : i32, i32
  }
  func.func @transform_3(%arg0: i32, %arg1: i32, %arg2: i32) -> (i32, i32, i32, i32) {
    %c0_i32 = arith.constant 0 : i32
    %c0_i32_0 = arith.constant 0 : i32
    %c0_i32_1 = arith.constant 0 : i32
    return %arg0, %arg1, %c0_i32, %c0_i32_0 : i32, i32, i32, i32
  }
  func.func @transform_4(%arg0: i32, %arg1: i32, %arg2: i32) -> (i32, i32) {
    %c0_i32 = arith.constant 0 : i32
    %c0_i32_0 = arith.constant 0 : i32
    %c0_i32_1 = arith.constant 0 : i32
    return %c0_i32, %c0_i32_0 : i32, i32
  }
}

module attributes {stable_mosaic.version = 11 : i64} {
  func.func @_bn_apply_add_kernel(%arg0: i32, %arg1: memref<32x32xbf16, #tpu.memory_space<vmem>>, %arg2: memref<2x32xf32, #tpu.memory_space<vmem>>, %arg3: memref<1x32xf32, #tpu.memory_space<vmem>>, %arg4: memref<1x32xf32, #tpu.memory_space<vmem>>, %arg5: memref<32x32xbf16, #tpu.memory_space<vmem>>, %arg6: memref<32x32xbf16, #tpu.memory_space<vmem>>) attributes {dimension_semantics = [#tpu.dimension_semantics<parallel>], iteration_bounds = array<i64: 1>, scalar_prefetch = 0 : i64, scratch_operands = 0 : i64, tpu.core_type = #tpu.core_type<tc>, window_params = [{transform_indices = @transform_0, window_bounds = array<i64: 32, 32>}, {pipeline_mode = #tpu.pipeline_mode<synchronous>, transform_indices = @transform_1, window_bounds = array<i64: 2, 32>}, {pipeline_mode = #tpu.pipeline_mode<synchronous>, transform_indices = @transform_2, window_bounds = array<i64: 1, 32>}, {pipeline_mode = #tpu.pipeline_mode<synchronous>, transform_indices = @transform_3, window_bounds = array<i64: 1, 32>}, {transform_indices = @transform_4, window_bounds = array<i64: 32, 32>}, {transform_indices = @transform_5, window_bounds = array<i64: 32, 32>}]} {
    %c0 = arith.constant 0 : index
    %c0_0 = arith.constant 0 : index
    %0 = vector.load %arg2[%c0, %c0_0] : memref<2x32xf32, #tpu.memory_space<vmem>>, vector<1x32xf32>
    %cst = arith.constant 3.125000e-02 : f32
    %1 = vector.broadcast %cst : f32 to vector<1x32xf32>
    %2 = arith.mulf %0, %1 : vector<1x32xf32>
    %c1 = arith.constant 1 : index
    %c0_1 = arith.constant 0 : index
    %3 = vector.load %arg2[%c1, %c0_1] : memref<2x32xf32, #tpu.memory_space<vmem>>, vector<1x32xf32>
    %cst_2 = arith.constant 3.125000e-02 : f32
    %4 = vector.broadcast %cst_2 : f32 to vector<1x32xf32>
    %5 = arith.mulf %3, %4 : vector<1x32xf32>
    %6 = arith.mulf %2, %2 : vector<1x32xf32>
    %7 = arith.subf %5, %6 : vector<1x32xf32>
    %cst_3 = arith.constant 0.000000e+00 : f32
    %8 = vector.broadcast %cst_3 : f32 to vector<1x32xf32>
    %9 = arith.maximumf %7, %8 : vector<1x32xf32>
    %c0_4 = arith.constant 0 : index
    %c0_5 = arith.constant 0 : index
    %10 = vector.load %arg3[%c0_4, %c0_5] : memref<1x32xf32, #tpu.memory_space<vmem>>, vector<1x32xf32>
    %cst_6 = arith.constant 9.99999974E-6 : f32
    %11 = vector.broadcast %cst_6 : f32 to vector<1x32xf32>
    %12 = arith.addf %9, %11 : vector<1x32xf32>
    %13 = math.rsqrt %12 : vector<1x32xf32>
    %14 = arith.mulf %10, %13 : vector<1x32xf32>
    %c0_7 = arith.constant 0 : index
    %c0_8 = arith.constant 0 : index
    %15 = vector.load %arg4[%c0_7, %c0_8] : memref<1x32xf32, #tpu.memory_space<vmem>>, vector<1x32xf32>
    %16 = arith.mulf %2, %14 : vector<1x32xf32>
    %17 = arith.subf %15, %16 : vector<1x32xf32>
    %c0_9 = arith.constant 0 : index
    %c0_10 = arith.constant 0 : index
    %18 = vector.load %arg1[%c0_9, %c0_10] : memref<32x32xbf16, #tpu.memory_space<vmem>>, vector<32x32xbf16>
    %19 = arith.extf %18 : vector<32x32xbf16> to vector<32x32xf32>
    %20 = vector.broadcast %14 : vector<1x32xf32> to vector<32x32xf32>
    %21 = arith.mulf %19, %20 : vector<32x32xf32>
    %22 = vector.broadcast %17 : vector<1x32xf32> to vector<32x32xf32>
    %23 = arith.addf %21, %22 : vector<32x32xf32>
    %c0_11 = arith.constant 0 : index
    %c0_12 = arith.constant 0 : index
    %24 = vector.load %arg5[%c0_11, %c0_12] : memref<32x32xbf16, #tpu.memory_space<vmem>>, vector<32x32xbf16>
    %25 = arith.extf %24 : vector<32x32xbf16> to vector<32x32xf32>
    %26 = arith.addf %23, %25 : vector<32x32xf32>
    %27 = arith.truncf %26 : vector<32x32xf32> to vector<32x32xbf16>
    %c0_13 = arith.constant 0 : index
    %c0_14 = arith.constant 0 : index
    %28 = vector.load %arg6[%c0_13, %c0_14] : memref<32x32xbf16, #tpu.memory_space<vmem>>, vector<32x32xbf16>
    tpu.vector_store %arg6[%c0_13, %c0_14], %27 {strides = array<i32>} : memref<32x32xbf16, #tpu.memory_space<vmem>>, vector<32x32xbf16>,
    return
  }
  func.func @transform_0(%arg0: i32) -> (i32, i32) {
    %c0_i32 = arith.constant 0 : i32
    %c0_i32_0 = arith.constant 0 : i32
    return %arg0, %c0_i32 : i32, i32
  }
  func.func @transform_1(%arg0: i32) -> (i32, i32) {
    %c0_i32 = arith.constant 0 : i32
    %c0_i32_0 = arith.constant 0 : i32
    %c0_i32_1 = arith.constant 0 : i32
    return %c0_i32, %c0_i32_0 : i32, i32
  }
  func.func @transform_2(%arg0: i32) -> (i32, i32) {
    %c0_i32 = arith.constant 0 : i32
    %c0_i32_0 = arith.constant 0 : i32
    %c0_i32_1 = arith.constant 0 : i32
    return %c0_i32, %c0_i32_0 : i32, i32
  }
  func.func @transform_3(%arg0: i32) -> (i32, i32) {
    %c0_i32 = arith.constant 0 : i32
    %c0_i32_0 = arith.constant 0 : i32
    %c0_i32_1 = arith.constant 0 : i32
    return %c0_i32, %c0_i32_0 : i32, i32
  }
  func.func @transform_4(%arg0: i32) -> (i32, i32) {
    %c0_i32 = arith.constant 0 : i32
    %c0_i32_0 = arith.constant 0 : i32
    return %arg0, %c0_i32 : i32, i32
  }
  func.func @transform_5(%arg0: i32) -> (i32, i32) {
    %c0_i32 = arith.constant 0 : i32
    %c0_i32_0 = arith.constant 0 : i32
    return %arg0, %c0_i32 : i32, i32
  }
}

module attributes {stable_mosaic.version = 11 : i64} {
  func.func @_conv_row_kernel(%arg0: i32, %arg1: i32, %arg2: i32, %arg3: memref<1x1x5x32xbf16, #tpu.memory_space<vmem>>, %arg4: memref<1x64x16xbf16, #tpu.memory_space<vmem>>, %arg5: memref<1x16xf32, #tpu.memory_space<vmem>>, %arg6: memref<1x1x4x16xbf16, #tpu.memory_space<vmem>>, %arg7: memref<2x16xf32, #tpu.memory_space<vmem>>, %arg8: memref<4x16xf32, #tpu.memory_space<vmem>>) attributes {dimension_semantics = [#tpu.dimension_semantics<arbitrary>, #tpu.dimension_semantics<arbitrary>, #tpu.dimension_semantics<arbitrary>], iteration_bounds = array<i64: 2, 4, 2>, scalar_prefetch = 0 : i64, scratch_operands = 1 : i64, tpu.core_type = #tpu.core_type<tc>, window_params = [{transform_indices = @transform_0, window_bounds = array<i64: 1, 1, 5, 32>}, {transform_indices = @transform_1, window_bounds = array<i64: 1, 64, 16>}, {pipeline_mode = #tpu.pipeline_mode<synchronous>, transform_indices = @transform_2, window_bounds = array<i64: 1, 16>}, {transform_indices = @transform_3, window_bounds = array<i64: 1, 1, 4, 16>}, {pipeline_mode = #tpu.pipeline_mode<synchronous>, transform_indices = @transform_4, window_bounds = array<i64: 2, 16>}]} {
    %c0_i32 = arith.constant 0 : i32
    %0 = arith.cmpi eq, %arg0, %c0_i32 : i32
    %c0_i32_0 = arith.constant 0 : i32
    %1 = arith.cmpi eq, %arg1, %c0_i32_0 : i32
    %2 = arith.andi %0, %1 : i1
    %c0_i32_1 = arith.constant 0 : i32
    %3 = arith.cmpi eq, %arg2, %c0_i32_1 : i32
    %4 = arith.andi %2, %3 : i1
    %5 = arith.extui %4 : i1 to i32
    %c0_i32_2 = arith.constant 0 : i32
    %6 = arith.cmpi ne, %5, %c0_i32_2 : i32
    scf.if %6 {
      %cst_17 = arith.constant 0.000000e+00 : f32
      %27 = vector.broadcast %cst_17 : f32 to vector<2x16xf32>
      %c0_18 = arith.constant 0 : index
      %c0_19 = arith.constant 0 : index
      %28 = vector.load %arg7[%c0_18, %c0_19] : memref<2x16xf32, #tpu.memory_space<vmem>>, vector<2x16xf32>
      tpu.vector_store %arg7[%c0_18, %c0_19], %27 {strides = array<i32>} : memref<2x16xf32, #tpu.memory_space<vmem>>, vector<2x16xf32>,
    } else {
    }
    %c0_i32_3 = arith.constant 0 : i32
    %7 = arith.cmpi eq, %arg2, %c0_i32_3 : i32
    %8 = arith.extui %7 : i1 to i32
    %c0_i32_4 = arith.constant 0 : i32
    %9 = arith.cmpi ne, %8, %c0_i32_4 : i32
    scf.if %9 {
      %cst_17 = arith.constant 0.000000e+00 : f32
      %27 = vector.broadcast %cst_17 : f32 to vector<4x16xf32>
      %c0_18 = arith.constant 0 : index
      %c0_19 = arith.constant 0 : index
      %28 = vector.load %arg8[%c0_18, %c0_19] : memref<4x16xf32, #tpu.memory_space<vmem>>, vector<4x16xf32>
      tpu.vector_store %arg8[%c0_18, %c0_19], %27 {strides = array<i32>} : memref<4x16xf32, #tpu.memory_space<vmem>>, vector<4x16xf32>,
    } else {
    }
    %c0 = arith.constant 0 : index
    %c0_5 = arith.constant 0 : index
    %c0_6 = arith.constant 0 : index
    %c0_7 = arith.constant 0 : index
    %10 = vector.load %arg3[%c0, %c0_5, %c0_6, %c0_7] : memref<1x1x5x32xbf16, #tpu.memory_space<vmem>>, vector<1x1x5x32xbf16>
    %11 = vector.shape_cast %10 : vector<1x1x5x32xbf16> to vector<5x32xbf16>
    %c0_8 = arith.constant 0 : index
    %c0_9 = arith.constant 0 : index
    %c0_10 = arith.constant 0 : index
    %12 = vector.load %arg4[%c0_8, %c0_9, %c0_10] : memref<1x64x16xbf16, #tpu.memory_space<vmem>>, vector<1x64x16xbf16>
    %13 = vector.shape_cast %12 : vector<1x64x16xbf16> to vector<64x16xbf16>
    %c0_11 = arith.constant 0 : index
    %c0_12 = arith.constant 0 : index
    %14 = vector.load %arg8[%c0_11, %c0_12] : memref<4x16xf32, #tpu.memory_space<vmem>>, vector<4x16xf32>
    %15 = vector.extract_strided_slice %11 {offsets = [0, 0], sizes = [4, 32], strides = [1, 1]} : vector<5x32xbf16> to vector<4x32xbf16>
    %16 = vector.extract_strided_slice %13 {offsets = [0, 0], sizes = [32, 16], strides = [1, 1]} : vector<64x16xbf16> to vector<32x16xbf16>
    %cst = arith.constant dense<0.000000e+00> : vector<4x16xf32>
    %17 = tpu.matmul %15, %16, %cst {dimension_numbers = #tpu.dot_dimension_numbers<[1], [0], [0], [1], [0, 0, 1, 1], [], []>} : vector<4x32xbf16>, vector<32x16xbf16>, vector<4x16xf32> -> vector<4x16xf32>
    %18 = arith.addf %14, %17 : vector<4x16xf32>
    %19 = vector.extract_strided_slice %11 {offsets = [1, 0], sizes = [4, 32], strides = [1, 1]} : vector<5x32xbf16> to vector<4x32xbf16>
    %20 = vector.extract_strided_slice %13 {offsets = [32, 0], sizes = [32, 16], strides = [1, 1]} : vector<64x16xbf16> to vector<32x16xbf16>
    %cst_13 = arith.constant dense<0.000000e+00> : vector<4x16xf32>
    %21 = tpu.matmul %19, %20, %cst_13 {dimension_numbers = #tpu.dot_dimension_numbers<[1], [0], [0], [1], [0, 0, 1, 1], [], []>} : vector<4x32xbf16>, vector<32x16xbf16>, vector<4x16xf32> -> vector<4x16xf32>
    %22 = arith.addf %18, %21 : vector<4x16xf32>
    %c0_14 = arith.constant 0 : index
    %c0_15 = arith.constant 0 : index
    %23 = vector.load %arg8[%c0_14, %c0_15] : memref<4x16xf32, #tpu.memory_space<vmem>>, vector<4x16xf32>
    tpu.vector_store %arg8[%c0_14, %c0_15], %22 {strides = array<i32>} : memref<4x16xf32, #tpu.memory_space<vmem>>, vector<4x16xf32>,
    %c1_i32 = arith.constant 1 : i32
    %24 = arith.cmpi eq, %arg2, %c1_i32 : i32
    %25 = arith.extui %24 : i1 to i32
    %c0_i32_16 = arith.constant 0 : i32
    %26 = arith.cmpi ne, %25, %c0_i32_16 : i32
    scf.if %26 {
      %c0_17 = arith.constant 0 : index
      %c0_18 = arith.constant 0 : index
      %27 = vector.load %arg8[%c0_17, %c0_18] : memref<4x16xf32, #tpu.memory_space<vmem>>, vector<4x16xf32>
      %c0_19 = arith.constant 0 : index
      %c0_20 = arith.constant 0 : index
      %28 = vector.load %arg5[%c0_19, %c0_20] : memref<1x16xf32, #tpu.memory_space<vmem>>, vector<1x16xf32>
      %29 = vector.broadcast %28 : vector<1x16xf32> to vector<4x16xf32>
      %30 = arith.addf %27, %29 : vector<4x16xf32>
      %31 = arith.truncf %30 : vector<4x16xf32> to vector<4x16xbf16>
      %c0_21 = arith.constant 0 : index
      %c0_22 = arith.constant 0 : index
      %c0_23 = arith.constant 0 : index
      %c0_24 = arith.constant 0 : index
      %32 = vector.load %arg6[%c0_21, %c0_22, %c0_23, %c0_24] : memref<1x1x4x16xbf16, #tpu.memory_space<vmem>>, vector<1x1x4x16xbf16>
      %33 = vector.shape_cast %32 : vector<1x1x4x16xbf16> to vector<4x16xbf16>
      %34 = vector.shape_cast %31 : vector<4x16xbf16> to vector<1x1x4x16xbf16>
      tpu.vector_store %arg6[%c0_21, %c0_22, %c0_23, %c0_24], %34 {strides = array<i32>} : memref<1x1x4x16xbf16, #tpu.memory_space<vmem>>, vector<1x1x4x16xbf16>,
      %c0_25 = arith.constant 0 : index
      %c0_26 = arith.constant 0 : index
      %35 = vector.load %arg7[%c0_25, %c0_26] : memref<2x16xf32, #tpu.memory_space<vmem>>, vector<1x16xf32>
      %cst_27 = arith.constant dense<0.000000e+00> : vector<16xf32>
      %36 = vector.multi_reduction <add>, %30, %cst_27 [0] : vector<4x16xf32> to vector<16xf32>
      %37 = vector.shape_cast %36 : vector<16xf32> to vector<1x16xf32>
      %38 = arith.addf %35, %37 : vector<1x16xf32>
      %c0_28 = arith.constant 0 : index
      %c0_29 = arith.constant 0 : index
      %39 = vector.load %arg7[%c0_28, %c0_29] : memref<2x16xf32, #tpu.memory_space<vmem>>, vector<1x16xf32>
      tpu.vector_store %arg7[%c0_28, %c0_29], %38 {strides = array<i32>} : memref<2x16xf32, #tpu.memory_space<vmem>>, vector<1x16xf32>,
      %c1 = arith.constant 1 : index
      %c0_30 = arith.constant 0 : index
      %40 = vector.load %arg7[%c1, %c0_30] : memref<2x16xf32, #tpu.memory_space<vmem>>, vector<1x16xf32>
      %41 = arith.mulf %30, %30 : vector<4x16xf32>
      %cst_31 = arith.constant dense<0.000000e+00> : vector<16xf32>
      %42 = vector.multi_reduction <add>, %41, %cst_31 [0] : vector<4x16xf32> to vector<16xf32>
      %43 = vector.shape_cast %42 : vector<16xf32> to vector<1x16xf32>
      %44 = arith.addf %40, %43 : vector<1x16xf32>
      %c1_32 = arith.constant 1 : index
      %c0_33 = arith.constant 0 : index
      %45 = vector.load %arg7[%c1_32, %c0_33] : memref<2x16xf32, #tpu.memory_space<vmem>>, vector<1x16xf32>
      tpu.vector_store %arg7[%c1_32, %c0_33], %44 {strides = array<i32>} : memref<2x16xf32, #tpu.memory_space<vmem>>, vector<1x16xf32>,
    } else {
    }
    return
  }
  func.func @transform_0(%arg0: i32, %arg1: i32, %arg2: i32) -> (i32, i32, i32, i32) {
    %c1_i32 = arith.constant 1 : i32
    %0 = arith.muli %arg1, %c1_i32 : i32
    %1 = arith.addi %0, %arg2 : i32
    %c0_i32 = arith.constant 0 : i32
    %c0_i32_0 = arith.constant 0 : i32
    %c0_i32_1 = arith.constant 0 : i32
    return %arg0, %1, %c0_i32, %c0_i32_0 : i32, i32, i32, i32
  }
  func.func @transform_1(%arg0: i32, %arg1: i32, %arg2: i32) -> (i32, i32, i32) {
    %c0_i32 = arith.constant 0 : i32
    %c0_i32_0 = arith.constant 0 : i32
    %c0_i32_1 = arith.constant 0 : i32
    return %arg2, %c0_i32, %c0_i32_0 : i32, i32, i32
  }
  func.func @transform_2(%arg0: i32, %arg1: i32, %arg2: i32) -> (i32, i32) {
    %c0_i32 = arith.constant 0 : i32
    %c0_i32_0 = arith.constant 0 : i32
    %c0_i32_1 = arith.constant 0 : i32
    return %c0_i32, %c0_i32_0 : i32, i32
  }
  func.func @transform_3(%arg0: i32, %arg1: i32, %arg2: i32) -> (i32, i32, i32, i32) {
    %c0_i32 = arith.constant 0 : i32
    %c0_i32_0 = arith.constant 0 : i32
    %c0_i32_1 = arith.constant 0 : i32
    return %arg0, %arg1, %c0_i32, %c0_i32_0 : i32, i32, i32, i32
  }
  func.func @transform_4(%arg0: i32, %arg1: i32, %arg2: i32) -> (i32, i32) {
    %c0_i32 = arith.constant 0 : i32
    %c0_i32_0 = arith.constant 0 : i32
    %c0_i32_1 = arith.constant 0 : i32
    return %c0_i32, %c0_i32_0 : i32, i32
  }
}

module attributes {stable_mosaic.version = 11 : i64} {
  func.func @_conv_row_kernel(%arg0: i32, %arg1: i32, %arg2: i32, %arg3: memref<1x1x5x32xbf16, #tpu.memory_space<vmem>>, %arg4: memref<1x64x16xbf16, #tpu.memory_space<vmem>>, %arg5: memref<1x16xf32, #tpu.memory_space<vmem>>, %arg6: memref<1x1x4x16xbf16, #tpu.memory_space<vmem>>, %arg7: memref<2x16xf32, #tpu.memory_space<vmem>>, %arg8: memref<4x16xf32, #tpu.memory_space<vmem>>) attributes {dimension_semantics = [#tpu.dimension_semantics<arbitrary>, #tpu.dimension_semantics<arbitrary>, #tpu.dimension_semantics<arbitrary>], iteration_bounds = array<i64: 2, 4, 1>, scalar_prefetch = 0 : i64, scratch_operands = 1 : i64, tpu.core_type = #tpu.core_type<tc>, window_params = [{transform_indices = @transform_0, window_bounds = array<i64: 1, 1, 5, 32>}, {transform_indices = @transform_1, window_bounds = array<i64: 1, 64, 16>}, {pipeline_mode = #tpu.pipeline_mode<synchronous>, transform_indices = @transform_2, window_bounds = array<i64: 1, 16>}, {transform_indices = @transform_3, window_bounds = array<i64: 1, 1, 4, 16>}, {pipeline_mode = #tpu.pipeline_mode<synchronous>, transform_indices = @transform_4, window_bounds = array<i64: 2, 16>}]} {
    %c0_i32 = arith.constant 0 : i32
    %0 = arith.cmpi eq, %arg0, %c0_i32 : i32
    %c0_i32_0 = arith.constant 0 : i32
    %1 = arith.cmpi eq, %arg1, %c0_i32_0 : i32
    %2 = arith.andi %0, %1 : i1
    %c0_i32_1 = arith.constant 0 : i32
    %3 = arith.cmpi eq, %arg2, %c0_i32_1 : i32
    %4 = arith.andi %2, %3 : i1
    %5 = arith.extui %4 : i1 to i32
    %c0_i32_2 = arith.constant 0 : i32
    %6 = arith.cmpi ne, %5, %c0_i32_2 : i32
    scf.if %6 {
      %cst_18 = arith.constant 0.000000e+00 : f32
      %27 = vector.broadcast %cst_18 : f32 to vector<2x16xf32>
      %c0_19 = arith.constant 0 : index
      %c0_20 = arith.constant 0 : index
      %28 = vector.load %arg7[%c0_19, %c0_20] : memref<2x16xf32, #tpu.memory_space<vmem>>, vector<2x16xf32>
      tpu.vector_store %arg7[%c0_19, %c0_20], %27 {strides = array<i32>} : memref<2x16xf32, #tpu.memory_space<vmem>>, vector<2x16xf32>,
    } else {
    }
    %c0_i32_3 = arith.constant 0 : i32
    %7 = arith.cmpi eq, %arg2, %c0_i32_3 : i32
    %8 = arith.extui %7 : i1 to i32
    %c0_i32_4 = arith.constant 0 : i32
    %9 = arith.cmpi ne, %8, %c0_i32_4 : i32
    scf.if %9 {
      %cst_18 = arith.constant 0.000000e+00 : f32
      %27 = vector.broadcast %cst_18 : f32 to vector<4x16xf32>
      %c0_19 = arith.constant 0 : index
      %c0_20 = arith.constant 0 : index
      %28 = vector.load %arg8[%c0_19, %c0_20] : memref<4x16xf32, #tpu.memory_space<vmem>>, vector<4x16xf32>
      tpu.vector_store %arg8[%c0_19, %c0_20], %27 {strides = array<i32>} : memref<4x16xf32, #tpu.memory_space<vmem>>, vector<4x16xf32>,
    } else {
    }
    %c0 = arith.constant 0 : index
    %c0_5 = arith.constant 0 : index
    %c0_6 = arith.constant 0 : index
    %c0_7 = arith.constant 0 : index
    %10 = vector.load %arg3[%c0, %c0_5, %c0_6, %c0_7] : memref<1x1x5x32xbf16, #tpu.memory_space<vmem>>, vector<1x1x5x32xbf16>
    %11 = vector.shape_cast %10 : vector<1x1x5x32xbf16> to vector<5x32xbf16>
    %c0_8 = arith.constant 0 : index
    %c0_9 = arith.constant 0 : index
    %c0_10 = arith.constant 0 : index
    %12 = vector.load %arg4[%c0_8, %c0_9, %c0_10] : memref<1x64x16xbf16, #tpu.memory_space<vmem>>, vector<1x64x16xbf16>
    %13 = vector.shape_cast %12 : vector<1x64x16xbf16> to vector<64x16xbf16>
    %c0_11 = arith.constant 0 : index
    %c0_12 = arith.constant 0 : index
    %14 = vector.load %arg8[%c0_11, %c0_12] : memref<4x16xf32, #tpu.memory_space<vmem>>, vector<4x16xf32>
    %15 = vector.extract_strided_slice %11 {offsets = [0, 0], sizes = [4, 32], strides = [1, 1]} : vector<5x32xbf16> to vector<4x32xbf16>
    %16 = vector.extract_strided_slice %13 {offsets = [0, 0], sizes = [32, 16], strides = [1, 1]} : vector<64x16xbf16> to vector<32x16xbf16>
    %cst = arith.constant dense<0.000000e+00> : vector<4x16xf32>
    %17 = tpu.matmul %15, %16, %cst {dimension_numbers = #tpu.dot_dimension_numbers<[1], [0], [0], [1], [0, 0, 1, 1], [], []>} : vector<4x32xbf16>, vector<32x16xbf16>, vector<4x16xf32> -> vector<4x16xf32>
    %18 = arith.addf %14, %17 : vector<4x16xf32>
    %19 = vector.extract_strided_slice %11 {offsets = [1, 0], sizes = [4, 32], strides = [1, 1]} : vector<5x32xbf16> to vector<4x32xbf16>
    %20 = vector.extract_strided_slice %13 {offsets = [32, 0], sizes = [32, 16], strides = [1, 1]} : vector<64x16xbf16> to vector<32x16xbf16>
    %cst_13 = arith.constant dense<0.000000e+00> : vector<4x16xf32>
    %21 = tpu.matmul %19, %20, %cst_13 {dimension_numbers = #tpu.dot_dimension_numbers<[1], [0], [0], [1], [0, 0, 1, 1], [], []>} : vector<4x32xbf16>, vector<32x16xbf16>, vector<4x16xf32> -> vector<4x16xf32>
    %22 = arith.addf %18, %21 : vector<4x16xf32>
    %c0_14 = arith.constant 0 : index
    %c0_15 = arith.constant 0 : index
    %23 = vector.load %arg8[%c0_14, %c0_15] : memref<4x16xf32, #tpu.memory_space<vmem>>, vector<4x16xf32>
    tpu.vector_store %arg8[%c0_14, %c0_15], %22 {strides = array<i32>} : memref<4x16xf32, #tpu.memory_space<vmem>>, vector<4x16xf32>,
    %c0_i32_16 = arith.constant 0 : i32
    %24 = arith.cmpi eq, %arg2, %c0_i32_16 : i32
    %25 = arith.extui %24 : i1 to i32
    %c0_i32_17 = arith.constant 0 : i32
    %26 = arith.cmpi ne, %25, %c0_i32_17 : i32
    scf.if %26 {
      %c0_18 = arith.constant 0 : index
      %c0_19 = arith.constant 0 : index
      %27 = vector.load %arg8[%c0_18, %c0_19] : memref<4x16xf32, #tpu.memory_space<vmem>>, vector<4x16xf32>
      %c0_20 = arith.constant 0 : index
      %c0_21 = arith.constant 0 : index
      %28 = vector.load %arg5[%c0_20, %c0_21] : memref<1x16xf32, #tpu.memory_space<vmem>>, vector<1x16xf32>
      %29 = vector.broadcast %28 : vector<1x16xf32> to vector<4x16xf32>
      %30 = arith.addf %27, %29 : vector<4x16xf32>
      %31 = arith.truncf %30 : vector<4x16xf32> to vector<4x16xbf16>
      %c0_22 = arith.constant 0 : index
      %c0_23 = arith.constant 0 : index
      %c0_24 = arith.constant 0 : index
      %c0_25 = arith.constant 0 : index
      %32 = vector.load %arg6[%c0_22, %c0_23, %c0_24, %c0_25] : memref<1x1x4x16xbf16, #tpu.memory_space<vmem>>, vector<1x1x4x16xbf16>
      %33 = vector.shape_cast %32 : vector<1x1x4x16xbf16> to vector<4x16xbf16>
      %34 = vector.shape_cast %31 : vector<4x16xbf16> to vector<1x1x4x16xbf16>
      tpu.vector_store %arg6[%c0_22, %c0_23, %c0_24, %c0_25], %34 {strides = array<i32>} : memref<1x1x4x16xbf16, #tpu.memory_space<vmem>>, vector<1x1x4x16xbf16>,
      %c0_26 = arith.constant 0 : index
      %c0_27 = arith.constant 0 : index
      %35 = vector.load %arg7[%c0_26, %c0_27] : memref<2x16xf32, #tpu.memory_space<vmem>>, vector<1x16xf32>
      %cst_28 = arith.constant dense<0.000000e+00> : vector<16xf32>
      %36 = vector.multi_reduction <add>, %30, %cst_28 [0] : vector<4x16xf32> to vector<16xf32>
      %37 = vector.shape_cast %36 : vector<16xf32> to vector<1x16xf32>
      %38 = arith.addf %35, %37 : vector<1x16xf32>
      %c0_29 = arith.constant 0 : index
      %c0_30 = arith.constant 0 : index
      %39 = vector.load %arg7[%c0_29, %c0_30] : memref<2x16xf32, #tpu.memory_space<vmem>>, vector<1x16xf32>
      tpu.vector_store %arg7[%c0_29, %c0_30], %38 {strides = array<i32>} : memref<2x16xf32, #tpu.memory_space<vmem>>, vector<1x16xf32>,
      %c1 = arith.constant 1 : index
      %c0_31 = arith.constant 0 : index
      %40 = vector.load %arg7[%c1, %c0_31] : memref<2x16xf32, #tpu.memory_space<vmem>>, vector<1x16xf32>
      %41 = arith.mulf %30, %30 : vector<4x16xf32>
      %cst_32 = arith.constant dense<0.000000e+00> : vector<16xf32>
      %42 = vector.multi_reduction <add>, %41, %cst_32 [0] : vector<4x16xf32> to vector<16xf32>
      %43 = vector.shape_cast %42 : vector<16xf32> to vector<1x16xf32>
      %44 = arith.addf %40, %43 : vector<1x16xf32>
      %c1_33 = arith.constant 1 : index
      %c0_34 = arith.constant 0 : index
      %45 = vector.load %arg7[%c1_33, %c0_34] : memref<2x16xf32, #tpu.memory_space<vmem>>, vector<1x16xf32>
      tpu.vector_store %arg7[%c1_33, %c0_34], %44 {strides = array<i32>} : memref<2x16xf32, #tpu.memory_space<vmem>>, vector<1x16xf32>,
    } else {
    }
    return
  }
  func.func @transform_0(%arg0: i32, %arg1: i32, %arg2: i32) -> (i32, i32, i32, i32) {
    %c1_i32 = arith.constant 1 : i32
    %0 = arith.muli %arg1, %c1_i32 : i32
    %1 = arith.addi %0, %arg2 : i32
    %c0_i32 = arith.constant 0 : i32
    %c0_i32_0 = arith.constant 0 : i32
    %c0_i32_1 = arith.constant 0 : i32
    return %arg0, %1, %c0_i32, %c0_i32_0 : i32, i32, i32, i32
  }
  func.func @transform_1(%arg0: i32, %arg1: i32, %arg2: i32) -> (i32, i32, i32) {
    %c0_i32 = arith.constant 0 : i32
    %c0_i32_0 = arith.constant 0 : i32
    %c0_i32_1 = arith.constant 0 : i32
    return %arg2, %c0_i32, %c0_i32_0 : i32, i32, i32
  }
  func.func @transform_2(%arg0: i32, %arg1: i32, %arg2: i32) -> (i32, i32) {
    %c0_i32 = arith.constant 0 : i32
    %c0_i32_0 = arith.constant 0 : i32
    %c0_i32_1 = arith.constant 0 : i32
    return %c0_i32, %c0_i32_0 : i32, i32
  }
  func.func @transform_3(%arg0: i32, %arg1: i32, %arg2: i32) -> (i32, i32, i32, i32) {
    %c0_i32 = arith.constant 0 : i32
    %c0_i32_0 = arith.constant 0 : i32
    %c0_i32_1 = arith.constant 0 : i32
    return %arg0, %arg1, %c0_i32, %c0_i32_0 : i32, i32, i32, i32
  }
  func.func @transform_4(%arg0: i32, %arg1: i32, %arg2: i32) -> (i32, i32) {
    %c0_i32 = arith.constant 0 : i32
    %c0_i32_0 = arith.constant 0 : i32
    %c0_i32_1 = arith.constant 0 : i32
    return %c0_i32, %c0_i32_0 : i32, i32
  }
}

module attributes {stable_mosaic.version = 11 : i64} {
  func.func @_conv_row_kernel(%arg0: i32, %arg1: i32, %arg2: i32, %arg3: memref<1x1x4x32xbf16, #tpu.memory_space<vmem>>, %arg4: memref<1x32x16xbf16, #tpu.memory_space<vmem>>, %arg5: memref<1x16xf32, #tpu.memory_space<vmem>>, %arg6: memref<1x1x4x16xbf16, #tpu.memory_space<vmem>>, %arg7: memref<2x16xf32, #tpu.memory_space<vmem>>, %arg8: memref<4x16xf32, #tpu.memory_space<vmem>>) attributes {dimension_semantics = [#tpu.dimension_semantics<arbitrary>, #tpu.dimension_semantics<arbitrary>, #tpu.dimension_semantics<arbitrary>], iteration_bounds = array<i64: 2, 4, 2>, scalar_prefetch = 0 : i64, scratch_operands = 1 : i64, tpu.core_type = #tpu.core_type<tc>, window_params = [{transform_indices = @transform_0, window_bounds = array<i64: 1, 1, 4, 32>}, {transform_indices = @transform_1, window_bounds = array<i64: 1, 32, 16>}, {pipeline_mode = #tpu.pipeline_mode<synchronous>, transform_indices = @transform_2, window_bounds = array<i64: 1, 16>}, {transform_indices = @transform_3, window_bounds = array<i64: 1, 1, 4, 16>}, {pipeline_mode = #tpu.pipeline_mode<synchronous>, transform_indices = @transform_4, window_bounds = array<i64: 2, 16>}]} {
    %c0_i32 = arith.constant 0 : i32
    %0 = arith.cmpi eq, %arg0, %c0_i32 : i32
    %c0_i32_0 = arith.constant 0 : i32
    %1 = arith.cmpi eq, %arg1, %c0_i32_0 : i32
    %2 = arith.andi %0, %1 : i1
    %c0_i32_1 = arith.constant 0 : i32
    %3 = arith.cmpi eq, %arg2, %c0_i32_1 : i32
    %4 = arith.andi %2, %3 : i1
    %5 = arith.extui %4 : i1 to i32
    %c0_i32_2 = arith.constant 0 : i32
    %6 = arith.cmpi ne, %5, %c0_i32_2 : i32
    scf.if %6 {
      %cst_16 = arith.constant 0.000000e+00 : f32
      %21 = vector.broadcast %cst_16 : f32 to vector<2x16xf32>
      %c0_17 = arith.constant 0 : index
      %c0_18 = arith.constant 0 : index
      %22 = vector.load %arg7[%c0_17, %c0_18] : memref<2x16xf32, #tpu.memory_space<vmem>>, vector<2x16xf32>
      tpu.vector_store %arg7[%c0_17, %c0_18], %21 {strides = array<i32>} : memref<2x16xf32, #tpu.memory_space<vmem>>, vector<2x16xf32>,
    } else {
    }
    %c0_i32_3 = arith.constant 0 : i32
    %7 = arith.cmpi eq, %arg2, %c0_i32_3 : i32
    %8 = arith.extui %7 : i1 to i32
    %c0_i32_4 = arith.constant 0 : i32
    %9 = arith.cmpi ne, %8, %c0_i32_4 : i32
    scf.if %9 {
      %cst_16 = arith.constant 0.000000e+00 : f32
      %21 = vector.broadcast %cst_16 : f32 to vector<4x16xf32>
      %c0_17 = arith.constant 0 : index
      %c0_18 = arith.constant 0 : index
      %22 = vector.load %arg8[%c0_17, %c0_18] : memref<4x16xf32, #tpu.memory_space<vmem>>, vector<4x16xf32>
      tpu.vector_store %arg8[%c0_17, %c0_18], %21 {strides = array<i32>} : memref<4x16xf32, #tpu.memory_space<vmem>>, vector<4x16xf32>,
    } else {
    }
    %c0 = arith.constant 0 : index
    %c0_5 = arith.constant 0 : index
    %c0_6 = arith.constant 0 : index
    %c0_7 = arith.constant 0 : index
    %10 = vector.load %arg3[%c0, %c0_5, %c0_6, %c0_7] : memref<1x1x4x32xbf16, #tpu.memory_space<vmem>>, vector<1x1x4x32xbf16>
    %11 = vector.shape_cast %10 : vector<1x1x4x32xbf16> to vector<4x32xbf16>
    %c0_8 = arith.constant 0 : index
    %c0_9 = arith.constant 0 : index
    %c0_10 = arith.constant 0 : index
    %12 = vector.load %arg4[%c0_8, %c0_9, %c0_10] : memref<1x32x16xbf16, #tpu.memory_space<vmem>>, vector<1x32x16xbf16>
    %13 = vector.shape_cast %12 : vector<1x32x16xbf16> to vector<32x16xbf16>
    %c0_11 = arith.constant 0 : index
    %c0_12 = arith.constant 0 : index
    %14 = vector.load %arg8[%c0_11, %c0_12] : memref<4x16xf32, #tpu.memory_space<vmem>>, vector<4x16xf32>
    %cst = arith.constant dense<0.000000e+00> : vector<4x16xf32>
    %15 = tpu.matmul %11, %13, %cst {dimension_numbers = #tpu.dot_dimension_numbers<[1], [0], [0], [1], [0, 0, 1, 1], [], []>} : vector<4x32xbf16>, vector<32x16xbf16>, vector<4x16xf32> -> vector<4x16xf32>
    %16 = arith.addf %14, %15 : vector<4x16xf32>
    %c0_13 = arith.constant 0 : index
    %c0_14 = arith.constant 0 : index
    %17 = vector.load %arg8[%c0_13, %c0_14] : memref<4x16xf32, #tpu.memory_space<vmem>>, vector<4x16xf32>
    tpu.vector_store %arg8[%c0_13, %c0_14], %16 {strides = array<i32>} : memref<4x16xf32, #tpu.memory_space<vmem>>, vector<4x16xf32>,
    %c1_i32 = arith.constant 1 : i32
    %18 = arith.cmpi eq, %arg2, %c1_i32 : i32
    %19 = arith.extui %18 : i1 to i32
    %c0_i32_15 = arith.constant 0 : i32
    %20 = arith.cmpi ne, %19, %c0_i32_15 : i32
    scf.if %20 {
      %c0_16 = arith.constant 0 : index
      %c0_17 = arith.constant 0 : index
      %21 = vector.load %arg8[%c0_16, %c0_17] : memref<4x16xf32, #tpu.memory_space<vmem>>, vector<4x16xf32>
      %c0_18 = arith.constant 0 : index
      %c0_19 = arith.constant 0 : index
      %22 = vector.load %arg5[%c0_18, %c0_19] : memref<1x16xf32, #tpu.memory_space<vmem>>, vector<1x16xf32>
      %23 = vector.broadcast %22 : vector<1x16xf32> to vector<4x16xf32>
      %24 = arith.addf %21, %23 : vector<4x16xf32>
      %25 = arith.truncf %24 : vector<4x16xf32> to vector<4x16xbf16>
      %c0_20 = arith.constant 0 : index
      %c0_21 = arith.constant 0 : index
      %c0_22 = arith.constant 0 : index
      %c0_23 = arith.constant 0 : index
      %26 = vector.load %arg6[%c0_20, %c0_21, %c0_22, %c0_23] : memref<1x1x4x16xbf16, #tpu.memory_space<vmem>>, vector<1x1x4x16xbf16>
      %27 = vector.shape_cast %26 : vector<1x1x4x16xbf16> to vector<4x16xbf16>
      %28 = vector.shape_cast %25 : vector<4x16xbf16> to vector<1x1x4x16xbf16>
      tpu.vector_store %arg6[%c0_20, %c0_21, %c0_22, %c0_23], %28 {strides = array<i32>} : memref<1x1x4x16xbf16, #tpu.memory_space<vmem>>, vector<1x1x4x16xbf16>,
      %c0_24 = arith.constant 0 : index
      %c0_25 = arith.constant 0 : index
      %29 = vector.load %arg7[%c0_24, %c0_25] : memref<2x16xf32, #tpu.memory_space<vmem>>, vector<1x16xf32>
      %cst_26 = arith.constant dense<0.000000e+00> : vector<16xf32>
      %30 = vector.multi_reduction <add>, %24, %cst_26 [0] : vector<4x16xf32> to vector<16xf32>
      %31 = vector.shape_cast %30 : vector<16xf32> to vector<1x16xf32>
      %32 = arith.addf %29, %31 : vector<1x16xf32>
      %c0_27 = arith.constant 0 : index
      %c0_28 = arith.constant 0 : index
      %33 = vector.load %arg7[%c0_27, %c0_28] : memref<2x16xf32, #tpu.memory_space<vmem>>, vector<1x16xf32>
      tpu.vector_store %arg7[%c0_27, %c0_28], %32 {strides = array<i32>} : memref<2x16xf32, #tpu.memory_space<vmem>>, vector<1x16xf32>,
      %c1 = arith.constant 1 : index
      %c0_29 = arith.constant 0 : index
      %34 = vector.load %arg7[%c1, %c0_29] : memref<2x16xf32, #tpu.memory_space<vmem>>, vector<1x16xf32>
      %35 = arith.mulf %24, %24 : vector<4x16xf32>
      %cst_30 = arith.constant dense<0.000000e+00> : vector<16xf32>
      %36 = vector.multi_reduction <add>, %35, %cst_30 [0] : vector<4x16xf32> to vector<16xf32>
      %37 = vector.shape_cast %36 : vector<16xf32> to vector<1x16xf32>
      %38 = arith.addf %34, %37 : vector<1x16xf32>
      %c1_31 = arith.constant 1 : index
      %c0_32 = arith.constant 0 : index
      %39 = vector.load %arg7[%c1_31, %c0_32] : memref<2x16xf32, #tpu.memory_space<vmem>>, vector<1x16xf32>
      tpu.vector_store %arg7[%c1_31, %c0_32], %38 {strides = array<i32>} : memref<2x16xf32, #tpu.memory_space<vmem>>, vector<1x16xf32>,
    } else {
    }
    return
  }
  func.func @transform_0(%arg0: i32, %arg1: i32, %arg2: i32) -> (i32, i32, i32, i32) {
    %c1_i32 = arith.constant 1 : i32
    %0 = arith.muli %arg1, %c1_i32 : i32
    %1 = arith.addi %0, %arg2 : i32
    %c0_i32 = arith.constant 0 : i32
    %c0_i32_0 = arith.constant 0 : i32
    %c0_i32_1 = arith.constant 0 : i32
    return %arg0, %1, %c0_i32, %c0_i32_0 : i32, i32, i32, i32
  }
  func.func @transform_1(%arg0: i32, %arg1: i32, %arg2: i32) -> (i32, i32, i32) {
    %c0_i32 = arith.constant 0 : i32
    %c0_i32_0 = arith.constant 0 : i32
    %c0_i32_1 = arith.constant 0 : i32
    return %arg2, %c0_i32, %c0_i32_0 : i32, i32, i32
  }
  func.func @transform_2(%arg0: i32, %arg1: i32, %arg2: i32) -> (i32, i32) {
    %c0_i32 = arith.constant 0 : i32
    %c0_i32_0 = arith.constant 0 : i32
    %c0_i32_1 = arith.constant 0 : i32
    return %c0_i32, %c0_i32_0 : i32, i32
  }
  func.func @transform_3(%arg0: i32, %arg1: i32, %arg2: i32) -> (i32, i32, i32, i32) {
    %c0_i32 = arith.constant 0 : i32
    %c0_i32_0 = arith.constant 0 : i32
    %c0_i32_1 = arith.constant 0 : i32
    return %arg0, %arg1, %c0_i32, %c0_i32_0 : i32, i32, i32, i32
  }
  func.func @transform_4(%arg0: i32, %arg1: i32, %arg2: i32) -> (i32, i32) {
    %c0_i32 = arith.constant 0 : i32
    %c0_i32_0 = arith.constant 0 : i32
    %c0_i32_1 = arith.constant 0 : i32
    return %c0_i32, %c0_i32_0 : i32, i32
  }
}

module attributes {stable_mosaic.version = 11 : i64} {
  func.func @_conv_row_kernel(%arg0: i32, %arg1: i32, %arg2: i32, %arg3: memref<1x1x4x32xbf16, #tpu.memory_space<vmem>>, %arg4: memref<1x32x16xbf16, #tpu.memory_space<vmem>>, %arg5: memref<1x16xf32, #tpu.memory_space<vmem>>, %arg6: memref<1x1x4x16xbf16, #tpu.memory_space<vmem>>, %arg7: memref<2x16xf32, #tpu.memory_space<vmem>>, %arg8: memref<4x16xf32, #tpu.memory_space<vmem>>) attributes {dimension_semantics = [#tpu.dimension_semantics<arbitrary>, #tpu.dimension_semantics<arbitrary>, #tpu.dimension_semantics<arbitrary>], iteration_bounds = array<i64: 2, 4, 1>, scalar_prefetch = 0 : i64, scratch_operands = 1 : i64, tpu.core_type = #tpu.core_type<tc>, window_params = [{transform_indices = @transform_0, window_bounds = array<i64: 1, 1, 4, 32>}, {transform_indices = @transform_1, window_bounds = array<i64: 1, 32, 16>}, {pipeline_mode = #tpu.pipeline_mode<synchronous>, transform_indices = @transform_2, window_bounds = array<i64: 1, 16>}, {transform_indices = @transform_3, window_bounds = array<i64: 1, 1, 4, 16>}, {pipeline_mode = #tpu.pipeline_mode<synchronous>, transform_indices = @transform_4, window_bounds = array<i64: 2, 16>}]} {
    %c0_i32 = arith.constant 0 : i32
    %0 = arith.cmpi eq, %arg0, %c0_i32 : i32
    %c0_i32_0 = arith.constant 0 : i32
    %1 = arith.cmpi eq, %arg1, %c0_i32_0 : i32
    %2 = arith.andi %0, %1 : i1
    %c0_i32_1 = arith.constant 0 : i32
    %3 = arith.cmpi eq, %arg2, %c0_i32_1 : i32
    %4 = arith.andi %2, %3 : i1
    %5 = arith.extui %4 : i1 to i32
    %c0_i32_2 = arith.constant 0 : i32
    %6 = arith.cmpi ne, %5, %c0_i32_2 : i32
    scf.if %6 {
      %cst_17 = arith.constant 0.000000e+00 : f32
      %21 = vector.broadcast %cst_17 : f32 to vector<2x16xf32>
      %c0_18 = arith.constant 0 : index
      %c0_19 = arith.constant 0 : index
      %22 = vector.load %arg7[%c0_18, %c0_19] : memref<2x16xf32, #tpu.memory_space<vmem>>, vector<2x16xf32>
      tpu.vector_store %arg7[%c0_18, %c0_19], %21 {strides = array<i32>} : memref<2x16xf32, #tpu.memory_space<vmem>>, vector<2x16xf32>,
    } else {
    }
    %c0_i32_3 = arith.constant 0 : i32
    %7 = arith.cmpi eq, %arg2, %c0_i32_3 : i32
    %8 = arith.extui %7 : i1 to i32
    %c0_i32_4 = arith.constant 0 : i32
    %9 = arith.cmpi ne, %8, %c0_i32_4 : i32
    scf.if %9 {
      %cst_17 = arith.constant 0.000000e+00 : f32
      %21 = vector.broadcast %cst_17 : f32 to vector<4x16xf32>
      %c0_18 = arith.constant 0 : index
      %c0_19 = arith.constant 0 : index
      %22 = vector.load %arg8[%c0_18, %c0_19] : memref<4x16xf32, #tpu.memory_space<vmem>>, vector<4x16xf32>
      tpu.vector_store %arg8[%c0_18, %c0_19], %21 {strides = array<i32>} : memref<4x16xf32, #tpu.memory_space<vmem>>, vector<4x16xf32>,
    } else {
    }
    %c0 = arith.constant 0 : index
    %c0_5 = arith.constant 0 : index
    %c0_6 = arith.constant 0 : index
    %c0_7 = arith.constant 0 : index
    %10 = vector.load %arg3[%c0, %c0_5, %c0_6, %c0_7] : memref<1x1x4x32xbf16, #tpu.memory_space<vmem>>, vector<1x1x4x32xbf16>
    %11 = vector.shape_cast %10 : vector<1x1x4x32xbf16> to vector<4x32xbf16>
    %c0_8 = arith.constant 0 : index
    %c0_9 = arith.constant 0 : index
    %c0_10 = arith.constant 0 : index
    %12 = vector.load %arg4[%c0_8, %c0_9, %c0_10] : memref<1x32x16xbf16, #tpu.memory_space<vmem>>, vector<1x32x16xbf16>
    %13 = vector.shape_cast %12 : vector<1x32x16xbf16> to vector<32x16xbf16>
    %c0_11 = arith.constant 0 : index
    %c0_12 = arith.constant 0 : index
    %14 = vector.load %arg8[%c0_11, %c0_12] : memref<4x16xf32, #tpu.memory_space<vmem>>, vector<4x16xf32>
    %cst = arith.constant dense<0.000000e+00> : vector<4x16xf32>
    %15 = tpu.matmul %11, %13, %cst {dimension_numbers = #tpu.dot_dimension_numbers<[1], [0], [0], [1], [0, 0, 1, 1], [], []>} : vector<4x32xbf16>, vector<32x16xbf16>, vector<4x16xf32> -> vector<4x16xf32>
    %16 = arith.addf %14, %15 : vector<4x16xf32>
    %c0_13 = arith.constant 0 : index
    %c0_14 = arith.constant 0 : index
    %17 = vector.load %arg8[%c0_13, %c0_14] : memref<4x16xf32, #tpu.memory_space<vmem>>, vector<4x16xf32>
    tpu.vector_store %arg8[%c0_13, %c0_14], %16 {strides = array<i32>} : memref<4x16xf32, #tpu.memory_space<vmem>>, vector<4x16xf32>,
    %c0_i32_15 = arith.constant 0 : i32
    %18 = arith.cmpi eq, %arg2, %c0_i32_15 : i32
    %19 = arith.extui %18 : i1 to i32
    %c0_i32_16 = arith.constant 0 : i32
    %20 = arith.cmpi ne, %19, %c0_i32_16 : i32
    scf.if %20 {
      %c0_17 = arith.constant 0 : index
      %c0_18 = arith.constant 0 : index
      %21 = vector.load %arg8[%c0_17, %c0_18] : memref<4x16xf32, #tpu.memory_space<vmem>>, vector<4x16xf32>
      %c0_19 = arith.constant 0 : index
      %c0_20 = arith.constant 0 : index
      %22 = vector.load %arg5[%c0_19, %c0_20] : memref<1x16xf32, #tpu.memory_space<vmem>>, vector<1x16xf32>
      %23 = vector.broadcast %22 : vector<1x16xf32> to vector<4x16xf32>
      %24 = arith.addf %21, %23 : vector<4x16xf32>
      %25 = arith.truncf %24 : vector<4x16xf32> to vector<4x16xbf16>
      %c0_21 = arith.constant 0 : index
      %c0_22 = arith.constant 0 : index
      %c0_23 = arith.constant 0 : index
      %c0_24 = arith.constant 0 : index
      %26 = vector.load %arg6[%c0_21, %c0_22, %c0_23, %c0_24] : memref<1x1x4x16xbf16, #tpu.memory_space<vmem>>, vector<1x1x4x16xbf16>
      %27 = vector.shape_cast %26 : vector<1x1x4x16xbf16> to vector<4x16xbf16>
      %28 = vector.shape_cast %25 : vector<4x16xbf16> to vector<1x1x4x16xbf16>
      tpu.vector_store %arg6[%c0_21, %c0_22, %c0_23, %c0_24], %28 {strides = array<i32>} : memref<1x1x4x16xbf16, #tpu.memory_space<vmem>>, vector<1x1x4x16xbf16>,
      %c0_25 = arith.constant 0 : index
      %c0_26 = arith.constant 0 : index
      %29 = vector.load %arg7[%c0_25, %c0_26] : memref<2x16xf32, #tpu.memory_space<vmem>>, vector<1x16xf32>
      %cst_27 = arith.constant dense<0.000000e+00> : vector<16xf32>
      %30 = vector.multi_reduction <add>, %24, %cst_27 [0] : vector<4x16xf32> to vector<16xf32>
      %31 = vector.shape_cast %30 : vector<16xf32> to vector<1x16xf32>
      %32 = arith.addf %29, %31 : vector<1x16xf32>
      %c0_28 = arith.constant 0 : index
      %c0_29 = arith.constant 0 : index
      %33 = vector.load %arg7[%c0_28, %c0_29] : memref<2x16xf32, #tpu.memory_space<vmem>>, vector<1x16xf32>
      tpu.vector_store %arg7[%c0_28, %c0_29], %32 {strides = array<i32>} : memref<2x16xf32, #tpu.memory_space<vmem>>, vector<1x16xf32>,
      %c1 = arith.constant 1 : index
      %c0_30 = arith.constant 0 : index
      %34 = vector.load %arg7[%c1, %c0_30] : memref<2x16xf32, #tpu.memory_space<vmem>>, vector<1x16xf32>
      %35 = arith.mulf %24, %24 : vector<4x16xf32>
      %cst_31 = arith.constant dense<0.000000e+00> : vector<16xf32>
      %36 = vector.multi_reduction <add>, %35, %cst_31 [0] : vector<4x16xf32> to vector<16xf32>
      %37 = vector.shape_cast %36 : vector<16xf32> to vector<1x16xf32>
      %38 = arith.addf %34, %37 : vector<1x16xf32>
      %c1_32 = arith.constant 1 : index
      %c0_33 = arith.constant 0 : index
      %39 = vector.load %arg7[%c1_32, %c0_33] : memref<2x16xf32, #tpu.memory_space<vmem>>, vector<1x16xf32>
      tpu.vector_store %arg7[%c1_32, %c0_33], %38 {strides = array<i32>} : memref<2x16xf32, #tpu.memory_space<vmem>>, vector<1x16xf32>,
    } else {
    }
    return
  }
  func.func @transform_0(%arg0: i32, %arg1: i32, %arg2: i32) -> (i32, i32, i32, i32) {
    %c1_i32 = arith.constant 1 : i32
    %0 = arith.muli %arg1, %c1_i32 : i32
    %1 = arith.addi %0, %arg2 : i32
    %c0_i32 = arith.constant 0 : i32
    %c0_i32_0 = arith.constant 0 : i32
    %c0_i32_1 = arith.constant 0 : i32
    return %arg0, %1, %c0_i32, %c0_i32_0 : i32, i32, i32, i32
  }
  func.func @transform_1(%arg0: i32, %arg1: i32, %arg2: i32) -> (i32, i32, i32) {
    %c0_i32 = arith.constant 0 : i32
    %c0_i32_0 = arith.constant 0 : i32
    %c0_i32_1 = arith.constant 0 : i32
    return %arg2, %c0_i32, %c0_i32_0 : i32, i32, i32
  }
  func.func @transform_2(%arg0: i32, %arg1: i32, %arg2: i32) -> (i32, i32) {
    %c0_i32 = arith.constant 0 : i32
    %c0_i32_0 = arith.constant 0 : i32
    %c0_i32_1 = arith.constant 0 : i32
    return %c0_i32, %c0_i32_0 : i32, i32
  }
  func.func @transform_3(%arg0: i32, %arg1: i32, %arg2: i32) -> (i32, i32, i32, i32) {
    %c0_i32 = arith.constant 0 : i32
    %c0_i32_0 = arith.constant 0 : i32
    %c0_i32_1 = arith.constant 0 : i32
    return %arg0, %arg1, %c0_i32, %c0_i32_0 : i32, i32, i32, i32
  }
  func.func @transform_4(%arg0: i32, %arg1: i32, %arg2: i32) -> (i32, i32) {
    %c0_i32 = arith.constant 0 : i32
    %c0_i32_0 = arith.constant 0 : i32
    %c0_i32_1 = arith.constant 0 : i32
    return %c0_i32, %c0_i32_0 : i32, i32
  }
}

module attributes {stable_mosaic.version = 11 : i64} {
  func.func @_conv_row_kernel(%arg0: i32, %arg1: i32, %arg2: i32, %arg3: memref<1x1x9x16xbf16, #tpu.memory_space<vmem>>, %arg4: memref<1x32x8xbf16, #tpu.memory_space<vmem>>, %arg5: memref<1x8xf32, #tpu.memory_space<vmem>>, %arg6: memref<1x1x8x8xbf16, #tpu.memory_space<vmem>>, %arg7: memref<2x8xf32, #tpu.memory_space<vmem>>, %arg8: memref<8x8xf32, #tpu.memory_space<vmem>>) attributes {dimension_semantics = [#tpu.dimension_semantics<arbitrary>, #tpu.dimension_semantics<arbitrary>, #tpu.dimension_semantics<arbitrary>], iteration_bounds = array<i64: 2, 8, 2>, scalar_prefetch = 0 : i64, scratch_operands = 1 : i64, tpu.core_type = #tpu.core_type<tc>, window_params = [{transform_indices = @transform_0, window_bounds = array<i64: 1, 1, 9, 16>}, {transform_indices = @transform_1, window_bounds = array<i64: 1, 32, 8>}, {pipeline_mode = #tpu.pipeline_mode<synchronous>, transform_indices = @transform_2, window_bounds = array<i64: 1, 8>}, {transform_indices = @transform_3, window_bounds = array<i64: 1, 1, 8, 8>}, {pipeline_mode = #tpu.pipeline_mode<synchronous>, transform_indices = @transform_4, window_bounds = array<i64: 2, 8>}]} {
    %c0_i32 = arith.constant 0 : i32
    %0 = arith.cmpi eq, %arg0, %c0_i32 : i32
    %c0_i32_0 = arith.constant 0 : i32
    %1 = arith.cmpi eq, %arg1, %c0_i32_0 : i32
    %2 = arith.andi %0, %1 : i1
    %c0_i32_1 = arith.constant 0 : i32
    %3 = arith.cmpi eq, %arg2, %c0_i32_1 : i32
    %4 = arith.andi %2, %3 : i1
    %5 = arith.extui %4 : i1 to i32
    %c0_i32_2 = arith.constant 0 : i32
    %6 = arith.cmpi ne, %5, %c0_i32_2 : i32
    scf.if %6 {
      %cst_17 = arith.constant 0.000000e+00 : f32
      %27 = vector.broadcast %cst_17 : f32 to vector<2x8xf32>
      %c0_18 = arith.constant 0 : index
      %c0_19 = arith.constant 0 : index
      %28 = vector.load %arg7[%c0_18, %c0_19] : memref<2x8xf32, #tpu.memory_space<vmem>>, vector<2x8xf32>
      tpu.vector_store %arg7[%c0_18, %c0_19], %27 {strides = array<i32>} : memref<2x8xf32, #tpu.memory_space<vmem>>, vector<2x8xf32>,
    } else {
    }
    %c0_i32_3 = arith.constant 0 : i32
    %7 = arith.cmpi eq, %arg2, %c0_i32_3 : i32
    %8 = arith.extui %7 : i1 to i32
    %c0_i32_4 = arith.constant 0 : i32
    %9 = arith.cmpi ne, %8, %c0_i32_4 : i32
    scf.if %9 {
      %cst_17 = arith.constant 0.000000e+00 : f32
      %27 = vector.broadcast %cst_17 : f32 to vector<8x8xf32>
      %c0_18 = arith.constant 0 : index
      %c0_19 = arith.constant 0 : index
      %28 = vector.load %arg8[%c0_18, %c0_19] : memref<8x8xf32, #tpu.memory_space<vmem>>, vector<8x8xf32>
      tpu.vector_store %arg8[%c0_18, %c0_19], %27 {strides = array<i32>} : memref<8x8xf32, #tpu.memory_space<vmem>>, vector<8x8xf32>,
    } else {
    }
    %c0 = arith.constant 0 : index
    %c0_5 = arith.constant 0 : index
    %c0_6 = arith.constant 0 : index
    %c0_7 = arith.constant 0 : index
    %10 = vector.load %arg3[%c0, %c0_5, %c0_6, %c0_7] : memref<1x1x9x16xbf16, #tpu.memory_space<vmem>>, vector<1x1x9x16xbf16>
    %11 = vector.shape_cast %10 : vector<1x1x9x16xbf16> to vector<9x16xbf16>
    %c0_8 = arith.constant 0 : index
    %c0_9 = arith.constant 0 : index
    %c0_10 = arith.constant 0 : index
    %12 = vector.load %arg4[%c0_8, %c0_9, %c0_10] : memref<1x32x8xbf16, #tpu.memory_space<vmem>>, vector<1x32x8xbf16>
    %13 = vector.shape_cast %12 : vector<1x32x8xbf16> to vector<32x8xbf16>
    %c0_11 = arith.constant 0 : index
    %c0_12 = arith.constant 0 : index
    %14 = vector.load %arg8[%c0_11, %c0_12] : memref<8x8xf32, #tpu.memory_space<vmem>>, vector<8x8xf32>
    %15 = vector.extract_strided_slice %11 {offsets = [0, 0], sizes = [8, 16], strides = [1, 1]} : vector<9x16xbf16> to vector<8x16xbf16>
    %16 = vector.extract_strided_slice %13 {offsets = [0, 0], sizes = [16, 8], strides = [1, 1]} : vector<32x8xbf16> to vector<16x8xbf16>
    %cst = arith.constant dense<0.000000e+00> : vector<8x8xf32>
    %17 = tpu.matmul %15, %16, %cst {dimension_numbers = #tpu.dot_dimension_numbers<[1], [0], [0], [1], [0, 0, 1, 1], [], []>} : vector<8x16xbf16>, vector<16x8xbf16>, vector<8x8xf32> -> vector<8x8xf32>
    %18 = arith.addf %14, %17 : vector<8x8xf32>
    %19 = vector.extract_strided_slice %11 {offsets = [1, 0], sizes = [8, 16], strides = [1, 1]} : vector<9x16xbf16> to vector<8x16xbf16>
    %20 = vector.extract_strided_slice %13 {offsets = [16, 0], sizes = [16, 8], strides = [1, 1]} : vector<32x8xbf16> to vector<16x8xbf16>
    %cst_13 = arith.constant dense<0.000000e+00> : vector<8x8xf32>
    %21 = tpu.matmul %19, %20, %cst_13 {dimension_numbers = #tpu.dot_dimension_numbers<[1], [0], [0], [1], [0, 0, 1, 1], [], []>} : vector<8x16xbf16>, vector<16x8xbf16>, vector<8x8xf32> -> vector<8x8xf32>
    %22 = arith.addf %18, %21 : vector<8x8xf32>
    %c0_14 = arith.constant 0 : index
    %c0_15 = arith.constant 0 : index
    %23 = vector.load %arg8[%c0_14, %c0_15] : memref<8x8xf32, #tpu.memory_space<vmem>>, vector<8x8xf32>
    tpu.vector_store %arg8[%c0_14, %c0_15], %22 {strides = array<i32>} : memref<8x8xf32, #tpu.memory_space<vmem>>, vector<8x8xf32>,
    %c1_i32 = arith.constant 1 : i32
    %24 = arith.cmpi eq, %arg2, %c1_i32 : i32
    %25 = arith.extui %24 : i1 to i32
    %c0_i32_16 = arith.constant 0 : i32
    %26 = arith.cmpi ne, %25, %c0_i32_16 : i32
    scf.if %26 {
      %c0_17 = arith.constant 0 : index
      %c0_18 = arith.constant 0 : index
      %27 = vector.load %arg8[%c0_17, %c0_18] : memref<8x8xf32, #tpu.memory_space<vmem>>, vector<8x8xf32>
      %c0_19 = arith.constant 0 : index
      %c0_20 = arith.constant 0 : index
      %28 = vector.load %arg5[%c0_19, %c0_20] : memref<1x8xf32, #tpu.memory_space<vmem>>, vector<1x8xf32>
      %29 = vector.broadcast %28 : vector<1x8xf32> to vector<8x8xf32>
      %30 = arith.addf %27, %29 : vector<8x8xf32>
      %31 = arith.truncf %30 : vector<8x8xf32> to vector<8x8xbf16>
      %c0_21 = arith.constant 0 : index
      %c0_22 = arith.constant 0 : index
      %c0_23 = arith.constant 0 : index
      %c0_24 = arith.constant 0 : index
      %32 = vector.load %arg6[%c0_21, %c0_22, %c0_23, %c0_24] : memref<1x1x8x8xbf16, #tpu.memory_space<vmem>>, vector<1x1x8x8xbf16>
      %33 = vector.shape_cast %32 : vector<1x1x8x8xbf16> to vector<8x8xbf16>
      %34 = vector.shape_cast %31 : vector<8x8xbf16> to vector<1x1x8x8xbf16>
      tpu.vector_store %arg6[%c0_21, %c0_22, %c0_23, %c0_24], %34 {strides = array<i32>} : memref<1x1x8x8xbf16, #tpu.memory_space<vmem>>, vector<1x1x8x8xbf16>,
      %c0_25 = arith.constant 0 : index
      %c0_26 = arith.constant 0 : index
      %35 = vector.load %arg7[%c0_25, %c0_26] : memref<2x8xf32, #tpu.memory_space<vmem>>, vector<1x8xf32>
      %cst_27 = arith.constant dense<0.000000e+00> : vector<8xf32>
      %36 = vector.multi_reduction <add>, %30, %cst_27 [0] : vector<8x8xf32> to vector<8xf32>
      %37 = vector.shape_cast %36 : vector<8xf32> to vector<1x8xf32>
      %38 = arith.addf %35, %37 : vector<1x8xf32>
      %c0_28 = arith.constant 0 : index
      %c0_29 = arith.constant 0 : index
      %39 = vector.load %arg7[%c0_28, %c0_29] : memref<2x8xf32, #tpu.memory_space<vmem>>, vector<1x8xf32>
      tpu.vector_store %arg7[%c0_28, %c0_29], %38 {strides = array<i32>} : memref<2x8xf32, #tpu.memory_space<vmem>>, vector<1x8xf32>,
      %c1 = arith.constant 1 : index
      %c0_30 = arith.constant 0 : index
      %40 = vector.load %arg7[%c1, %c0_30] : memref<2x8xf32, #tpu.memory_space<vmem>>, vector<1x8xf32>
      %41 = arith.mulf %30, %30 : vector<8x8xf32>
      %cst_31 = arith.constant dense<0.000000e+00> : vector<8xf32>
      %42 = vector.multi_reduction <add>, %41, %cst_31 [0] : vector<8x8xf32> to vector<8xf32>
      %43 = vector.shape_cast %42 : vector<8xf32> to vector<1x8xf32>
      %44 = arith.addf %40, %43 : vector<1x8xf32>
      %c1_32 = arith.constant 1 : index
      %c0_33 = arith.constant 0 : index
      %45 = vector.load %arg7[%c1_32, %c0_33] : memref<2x8xf32, #tpu.memory_space<vmem>>, vector<1x8xf32>
      tpu.vector_store %arg7[%c1_32, %c0_33], %44 {strides = array<i32>} : memref<2x8xf32, #tpu.memory_space<vmem>>, vector<1x8xf32>,
    } else {
    }
    return
  }
  func.func @transform_0(%arg0: i32, %arg1: i32, %arg2: i32) -> (i32, i32, i32, i32) {
    %c1_i32 = arith.constant 1 : i32
    %0 = arith.muli %arg1, %c1_i32 : i32
    %1 = arith.addi %0, %arg2 : i32
    %c0_i32 = arith.constant 0 : i32
    %c0_i32_0 = arith.constant 0 : i32
    %c0_i32_1 = arith.constant 0 : i32
    return %arg0, %1, %c0_i32, %c0_i32_0 : i32, i32, i32, i32
  }
  func.func @transform_1(%arg0: i32, %arg1: i32, %arg2: i32) -> (i32, i32, i32) {
    %c0_i32 = arith.constant 0 : i32
    %c0_i32_0 = arith.constant 0 : i32
    %c0_i32_1 = arith.constant 0 : i32
    return %arg2, %c0_i32, %c0_i32_0 : i32, i32, i32
  }
  func.func @transform_2(%arg0: i32, %arg1: i32, %arg2: i32) -> (i32, i32) {
    %c0_i32 = arith.constant 0 : i32
    %c0_i32_0 = arith.constant 0 : i32
    %c0_i32_1 = arith.constant 0 : i32
    return %c0_i32, %c0_i32_0 : i32, i32
  }
  func.func @transform_3(%arg0: i32, %arg1: i32, %arg2: i32) -> (i32, i32, i32, i32) {
    %c0_i32 = arith.constant 0 : i32
    %c0_i32_0 = arith.constant 0 : i32
    %c0_i32_1 = arith.constant 0 : i32
    return %arg0, %arg1, %c0_i32, %c0_i32_0 : i32, i32, i32, i32
  }
  func.func @transform_4(%arg0: i32, %arg1: i32, %arg2: i32) -> (i32, i32) {
    %c0_i32 = arith.constant 0 : i32
    %c0_i32_0 = arith.constant 0 : i32
    %c0_i32_1 = arith.constant 0 : i32
    return %c0_i32, %c0_i32_0 : i32, i32
  }
}

module attributes {stable_mosaic.version = 11 : i64} {
  func.func @_conv_row_kernel(%arg0: i32, %arg1: i32, %arg2: i32, %arg3: memref<1x1x9x16xbf16, #tpu.memory_space<vmem>>, %arg4: memref<1x32x8xbf16, #tpu.memory_space<vmem>>, %arg5: memref<1x8xf32, #tpu.memory_space<vmem>>, %arg6: memref<1x1x8x8xbf16, #tpu.memory_space<vmem>>, %arg7: memref<2x8xf32, #tpu.memory_space<vmem>>, %arg8: memref<8x8xf32, #tpu.memory_space<vmem>>) attributes {dimension_semantics = [#tpu.dimension_semantics<arbitrary>, #tpu.dimension_semantics<arbitrary>, #tpu.dimension_semantics<arbitrary>], iteration_bounds = array<i64: 2, 8, 1>, scalar_prefetch = 0 : i64, scratch_operands = 1 : i64, tpu.core_type = #tpu.core_type<tc>, window_params = [{transform_indices = @transform_0, window_bounds = array<i64: 1, 1, 9, 16>}, {transform_indices = @transform_1, window_bounds = array<i64: 1, 32, 8>}, {pipeline_mode = #tpu.pipeline_mode<synchronous>, transform_indices = @transform_2, window_bounds = array<i64: 1, 8>}, {transform_indices = @transform_3, window_bounds = array<i64: 1, 1, 8, 8>}, {pipeline_mode = #tpu.pipeline_mode<synchronous>, transform_indices = @transform_4, window_bounds = array<i64: 2, 8>}]} {
    %c0_i32 = arith.constant 0 : i32
    %0 = arith.cmpi eq, %arg0, %c0_i32 : i32
    %c0_i32_0 = arith.constant 0 : i32
    %1 = arith.cmpi eq, %arg1, %c0_i32_0 : i32
    %2 = arith.andi %0, %1 : i1
    %c0_i32_1 = arith.constant 0 : i32
    %3 = arith.cmpi eq, %arg2, %c0_i32_1 : i32
    %4 = arith.andi %2, %3 : i1
    %5 = arith.extui %4 : i1 to i32
    %c0_i32_2 = arith.constant 0 : i32
    %6 = arith.cmpi ne, %5, %c0_i32_2 : i32
    scf.if %6 {
      %cst_18 = arith.constant 0.000000e+00 : f32
      %27 = vector.broadcast %cst_18 : f32 to vector<2x8xf32>
      %c0_19 = arith.constant 0 : index
      %c0_20 = arith.constant 0 : index
      %28 = vector.load %arg7[%c0_19, %c0_20] : memref<2x8xf32, #tpu.memory_space<vmem>>, vector<2x8xf32>
      tpu.vector_store %arg7[%c0_19, %c0_20], %27 {strides = array<i32>} : memref<2x8xf32, #tpu.memory_space<vmem>>, vector<2x8xf32>,
    } else {
    }
    %c0_i32_3 = arith.constant 0 : i32
    %7 = arith.cmpi eq, %arg2, %c0_i32_3 : i32
    %8 = arith.extui %7 : i1 to i32
    %c0_i32_4 = arith.constant 0 : i32
    %9 = arith.cmpi ne, %8, %c0_i32_4 : i32
    scf.if %9 {
      %cst_18 = arith.constant 0.000000e+00 : f32
      %27 = vector.broadcast %cst_18 : f32 to vector<8x8xf32>
      %c0_19 = arith.constant 0 : index
      %c0_20 = arith.constant 0 : index
      %28 = vector.load %arg8[%c0_19, %c0_20] : memref<8x8xf32, #tpu.memory_space<vmem>>, vector<8x8xf32>
      tpu.vector_store %arg8[%c0_19, %c0_20], %27 {strides = array<i32>} : memref<8x8xf32, #tpu.memory_space<vmem>>, vector<8x8xf32>,
    } else {
    }
    %c0 = arith.constant 0 : index
    %c0_5 = arith.constant 0 : index
    %c0_6 = arith.constant 0 : index
    %c0_7 = arith.constant 0 : index
    %10 = vector.load %arg3[%c0, %c0_5, %c0_6, %c0_7] : memref<1x1x9x16xbf16, #tpu.memory_space<vmem>>, vector<1x1x9x16xbf16>
    %11 = vector.shape_cast %10 : vector<1x1x9x16xbf16> to vector<9x16xbf16>
    %c0_8 = arith.constant 0 : index
    %c0_9 = arith.constant 0 : index
    %c0_10 = arith.constant 0 : index
    %12 = vector.load %arg4[%c0_8, %c0_9, %c0_10] : memref<1x32x8xbf16, #tpu.memory_space<vmem>>, vector<1x32x8xbf16>
    %13 = vector.shape_cast %12 : vector<1x32x8xbf16> to vector<32x8xbf16>
    %c0_11 = arith.constant 0 : index
    %c0_12 = arith.constant 0 : index
    %14 = vector.load %arg8[%c0_11, %c0_12] : memref<8x8xf32, #tpu.memory_space<vmem>>, vector<8x8xf32>
    %15 = vector.extract_strided_slice %11 {offsets = [0, 0], sizes = [8, 16], strides = [1, 1]} : vector<9x16xbf16> to vector<8x16xbf16>
    %16 = vector.extract_strided_slice %13 {offsets = [0, 0], sizes = [16, 8], strides = [1, 1]} : vector<32x8xbf16> to vector<16x8xbf16>
    %cst = arith.constant dense<0.000000e+00> : vector<8x8xf32>
    %17 = tpu.matmul %15, %16, %cst {dimension_numbers = #tpu.dot_dimension_numbers<[1], [0], [0], [1], [0, 0, 1, 1], [], []>} : vector<8x16xbf16>, vector<16x8xbf16>, vector<8x8xf32> -> vector<8x8xf32>
    %18 = arith.addf %14, %17 : vector<8x8xf32>
    %19 = vector.extract_strided_slice %11 {offsets = [1, 0], sizes = [8, 16], strides = [1, 1]} : vector<9x16xbf16> to vector<8x16xbf16>
    %20 = vector.extract_strided_slice %13 {offsets = [16, 0], sizes = [16, 8], strides = [1, 1]} : vector<32x8xbf16> to vector<16x8xbf16>
    %cst_13 = arith.constant dense<0.000000e+00> : vector<8x8xf32>
    %21 = tpu.matmul %19, %20, %cst_13 {dimension_numbers = #tpu.dot_dimension_numbers<[1], [0], [0], [1], [0, 0, 1, 1], [], []>} : vector<8x16xbf16>, vector<16x8xbf16>, vector<8x8xf32> -> vector<8x8xf32>
    %22 = arith.addf %18, %21 : vector<8x8xf32>
    %c0_14 = arith.constant 0 : index
    %c0_15 = arith.constant 0 : index
    %23 = vector.load %arg8[%c0_14, %c0_15] : memref<8x8xf32, #tpu.memory_space<vmem>>, vector<8x8xf32>
    tpu.vector_store %arg8[%c0_14, %c0_15], %22 {strides = array<i32>} : memref<8x8xf32, #tpu.memory_space<vmem>>, vector<8x8xf32>,
    %c0_i32_16 = arith.constant 0 : i32
    %24 = arith.cmpi eq, %arg2, %c0_i32_16 : i32
    %25 = arith.extui %24 : i1 to i32
    %c0_i32_17 = arith.constant 0 : i32
    %26 = arith.cmpi ne, %25, %c0_i32_17 : i32
    scf.if %26 {
      %c0_18 = arith.constant 0 : index
      %c0_19 = arith.constant 0 : index
      %27 = vector.load %arg8[%c0_18, %c0_19] : memref<8x8xf32, #tpu.memory_space<vmem>>, vector<8x8xf32>
      %c0_20 = arith.constant 0 : index
      %c0_21 = arith.constant 0 : index
      %28 = vector.load %arg5[%c0_20, %c0_21] : memref<1x8xf32, #tpu.memory_space<vmem>>, vector<1x8xf32>
      %29 = vector.broadcast %28 : vector<1x8xf32> to vector<8x8xf32>
      %30 = arith.addf %27, %29 : vector<8x8xf32>
      %31 = arith.truncf %30 : vector<8x8xf32> to vector<8x8xbf16>
      %c0_22 = arith.constant 0 : index
      %c0_23 = arith.constant 0 : index
      %c0_24 = arith.constant 0 : index
      %c0_25 = arith.constant 0 : index
      %32 = vector.load %arg6[%c0_22, %c0_23, %c0_24, %c0_25] : memref<1x1x8x8xbf16, #tpu.memory_space<vmem>>, vector<1x1x8x8xbf16>
      %33 = vector.shape_cast %32 : vector<1x1x8x8xbf16> to vector<8x8xbf16>
      %34 = vector.shape_cast %31 : vector<8x8xbf16> to vector<1x1x8x8xbf16>
      tpu.vector_store %arg6[%c0_22, %c0_23, %c0_24, %c0_25], %34 {strides = array<i32>} : memref<1x1x8x8xbf16, #tpu.memory_space<vmem>>, vector<1x1x8x8xbf16>,
      %c0_26 = arith.constant 0 : index
      %c0_27 = arith.constant 0 : index
      %35 = vector.load %arg7[%c0_26, %c0_27] : memref<2x8xf32, #tpu.memory_space<vmem>>, vector<1x8xf32>
      %cst_28 = arith.constant dense<0.000000e+00> : vector<8xf32>
      %36 = vector.multi_reduction <add>, %30, %cst_28 [0] : vector<8x8xf32> to vector<8xf32>
      %37 = vector.shape_cast %36 : vector<8xf32> to vector<1x8xf32>
      %38 = arith.addf %35, %37 : vector<1x8xf32>
      %c0_29 = arith.constant 0 : index
      %c0_30 = arith.constant 0 : index
      %39 = vector.load %arg7[%c0_29, %c0_30] : memref<2x8xf32, #tpu.memory_space<vmem>>, vector<1x8xf32>
      tpu.vector_store %arg7[%c0_29, %c0_30], %38 {strides = array<i32>} : memref<2x8xf32, #tpu.memory_space<vmem>>, vector<1x8xf32>,
      %c1 = arith.constant 1 : index
      %c0_31 = arith.constant 0 : index
      %40 = vector.load %arg7[%c1, %c0_31] : memref<2x8xf32, #tpu.memory_space<vmem>>, vector<1x8xf32>
      %41 = arith.mulf %30, %30 : vector<8x8xf32>
      %cst_32 = arith.constant dense<0.000000e+00> : vector<8xf32>
      %42 = vector.multi_reduction <add>, %41, %cst_32 [0] : vector<8x8xf32> to vector<8xf32>
      %43 = vector.shape_cast %42 : vector<8xf32> to vector<1x8xf32>
      %44 = arith.addf %40, %43 : vector<1x8xf32>
      %c1_33 = arith.constant 1 : index
      %c0_34 = arith.constant 0 : index
      %45 = vector.load %arg7[%c1_33, %c0_34] : memref<2x8xf32, #tpu.memory_space<vmem>>, vector<1x8xf32>
      tpu.vector_store %arg7[%c1_33, %c0_34], %44 {strides = array<i32>} : memref<2x8xf32, #tpu.memory_space<vmem>>, vector<1x8xf32>,
    } else {
    }
    return
  }
  func.func @transform_0(%arg0: i32, %arg1: i32, %arg2: i32) -> (i32, i32, i32, i32) {
    %c1_i32 = arith.constant 1 : i32
    %0 = arith.muli %arg1, %c1_i32 : i32
    %1 = arith.addi %0, %arg2 : i32
    %c0_i32 = arith.constant 0 : i32
    %c0_i32_0 = arith.constant 0 : i32
    %c0_i32_1 = arith.constant 0 : i32
    return %arg0, %1, %c0_i32, %c0_i32_0 : i32, i32, i32, i32
  }
  func.func @transform_1(%arg0: i32, %arg1: i32, %arg2: i32) -> (i32, i32, i32) {
    %c0_i32 = arith.constant 0 : i32
    %c0_i32_0 = arith.constant 0 : i32
    %c0_i32_1 = arith.constant 0 : i32
    return %arg2, %c0_i32, %c0_i32_0 : i32, i32, i32
  }
  func.func @transform_2(%arg0: i32, %arg1: i32, %arg2: i32) -> (i32, i32) {
    %c0_i32 = arith.constant 0 : i32
    %c0_i32_0 = arith.constant 0 : i32
    %c0_i32_1 = arith.constant 0 : i32
    return %c0_i32, %c0_i32_0 : i32, i32
  }
  func.func @transform_3(%arg0: i32, %arg1: i32, %arg2: i32) -> (i32, i32, i32, i32) {
    %c0_i32 = arith.constant 0 : i32
    %c0_i32_0 = arith.constant 0 : i32
    %c0_i32_1 = arith.constant 0 : i32
    return %arg0, %arg1, %c0_i32, %c0_i32_0 : i32, i32, i32, i32
  }
  func.func @transform_4(%arg0: i32, %arg1: i32, %arg2: i32) -> (i32, i32) {
    %c0_i32 = arith.constant 0 : i32
    %c0_i32_0 = arith.constant 0 : i32
    %c0_i32_1 = arith.constant 0 : i32
    return %c0_i32, %c0_i32_0 : i32, i32
  }
}

module attributes {stable_mosaic.version = 11 : i64} {
  func.func @_conv_row_kernel(%arg0: i32, %arg1: i32, %arg2: i32, %arg3: memref<1x1x8x16xbf16, #tpu.memory_space<vmem>>, %arg4: memref<1x16x8xbf16, #tpu.memory_space<vmem>>, %arg5: memref<1x8xf32, #tpu.memory_space<vmem>>, %arg6: memref<1x1x8x8xbf16, #tpu.memory_space<vmem>>, %arg7: memref<2x8xf32, #tpu.memory_space<vmem>>, %arg8: memref<8x8xf32, #tpu.memory_space<vmem>>) attributes {dimension_semantics = [#tpu.dimension_semantics<arbitrary>, #tpu.dimension_semantics<arbitrary>, #tpu.dimension_semantics<arbitrary>], iteration_bounds = array<i64: 2, 8, 2>, scalar_prefetch = 0 : i64, scratch_operands = 1 : i64, tpu.core_type = #tpu.core_type<tc>, window_params = [{transform_indices = @transform_0, window_bounds = array<i64: 1, 1, 8, 16>}, {transform_indices = @transform_1, window_bounds = array<i64: 1, 16, 8>}, {pipeline_mode = #tpu.pipeline_mode<synchronous>, transform_indices = @transform_2, window_bounds = array<i64: 1, 8>}, {transform_indices = @transform_3, window_bounds = array<i64: 1, 1, 8, 8>}, {pipeline_mode = #tpu.pipeline_mode<synchronous>, transform_indices = @transform_4, window_bounds = array<i64: 2, 8>}]} {
    %c0_i32 = arith.constant 0 : i32
    %0 = arith.cmpi eq, %arg0, %c0_i32 : i32
    %c0_i32_0 = arith.constant 0 : i32
    %1 = arith.cmpi eq, %arg1, %c0_i32_0 : i32
    %2 = arith.andi %0, %1 : i1
    %c0_i32_1 = arith.constant 0 : i32
    %3 = arith.cmpi eq, %arg2, %c0_i32_1 : i32
    %4 = arith.andi %2, %3 : i1
    %5 = arith.extui %4 : i1 to i32
    %c0_i32_2 = arith.constant 0 : i32
    %6 = arith.cmpi ne, %5, %c0_i32_2 : i32
    scf.if %6 {
      %cst_16 = arith.constant 0.000000e+00 : f32
      %21 = vector.broadcast %cst_16 : f32 to vector<2x8xf32>
      %c0_17 = arith.constant 0 : index
      %c0_18 = arith.constant 0 : index
      %22 = vector.load %arg7[%c0_17, %c0_18] : memref<2x8xf32, #tpu.memory_space<vmem>>, vector<2x8xf32>
      tpu.vector_store %arg7[%c0_17, %c0_18], %21 {strides = array<i32>} : memref<2x8xf32, #tpu.memory_space<vmem>>, vector<2x8xf32>,
    } else {
    }
    %c0_i32_3 = arith.constant 0 : i32
    %7 = arith.cmpi eq, %arg2, %c0_i32_3 : i32
    %8 = arith.extui %7 : i1 to i32
    %c0_i32_4 = arith.constant 0 : i32
    %9 = arith.cmpi ne, %8, %c0_i32_4 : i32
    scf.if %9 {
      %cst_16 = arith.constant 0.000000e+00 : f32
      %21 = vector.broadcast %cst_16 : f32 to vector<8x8xf32>
      %c0_17 = arith.constant 0 : index
      %c0_18 = arith.constant 0 : index
      %22 = vector.load %arg8[%c0_17, %c0_18] : memref<8x8xf32, #tpu.memory_space<vmem>>, vector<8x8xf32>
      tpu.vector_store %arg8[%c0_17, %c0_18], %21 {strides = array<i32>} : memref<8x8xf32, #tpu.memory_space<vmem>>, vector<8x8xf32>,
    } else {
    }
    %c0 = arith.constant 0 : index
    %c0_5 = arith.constant 0 : index
    %c0_6 = arith.constant 0 : index
    %c0_7 = arith.constant 0 : index
    %10 = vector.load %arg3[%c0, %c0_5, %c0_6, %c0_7] : memref<1x1x8x16xbf16, #tpu.memory_space<vmem>>, vector<1x1x8x16xbf16>
    %11 = vector.shape_cast %10 : vector<1x1x8x16xbf16> to vector<8x16xbf16>
    %c0_8 = arith.constant 0 : index
    %c0_9 = arith.constant 0 : index
    %c0_10 = arith.constant 0 : index
    %12 = vector.load %arg4[%c0_8, %c0_9, %c0_10] : memref<1x16x8xbf16, #tpu.memory_space<vmem>>, vector<1x16x8xbf16>
    %13 = vector.shape_cast %12 : vector<1x16x8xbf16> to vector<16x8xbf16>
    %c0_11 = arith.constant 0 : index
    %c0_12 = arith.constant 0 : index
    %14 = vector.load %arg8[%c0_11, %c0_12] : memref<8x8xf32, #tpu.memory_space<vmem>>, vector<8x8xf32>
    %cst = arith.constant dense<0.000000e+00> : vector<8x8xf32>
    %15 = tpu.matmul %11, %13, %cst {dimension_numbers = #tpu.dot_dimension_numbers<[1], [0], [0], [1], [0, 0, 1, 1], [], []>} : vector<8x16xbf16>, vector<16x8xbf16>, vector<8x8xf32> -> vector<8x8xf32>
    %16 = arith.addf %14, %15 : vector<8x8xf32>
    %c0_13 = arith.constant 0 : index
    %c0_14 = arith.constant 0 : index
    %17 = vector.load %arg8[%c0_13, %c0_14] : memref<8x8xf32, #tpu.memory_space<vmem>>, vector<8x8xf32>
    tpu.vector_store %arg8[%c0_13, %c0_14], %16 {strides = array<i32>} : memref<8x8xf32, #tpu.memory_space<vmem>>, vector<8x8xf32>,
    %c1_i32 = arith.constant 1 : i32
    %18 = arith.cmpi eq, %arg2, %c1_i32 : i32
    %19 = arith.extui %18 : i1 to i32
    %c0_i32_15 = arith.constant 0 : i32
    %20 = arith.cmpi ne, %19, %c0_i32_15 : i32
    scf.if %20 {
      %c0_16 = arith.constant 0 : index
      %c0_17 = arith.constant 0 : index
      %21 = vector.load %arg8[%c0_16, %c0_17] : memref<8x8xf32, #tpu.memory_space<vmem>>, vector<8x8xf32>
      %c0_18 = arith.constant 0 : index
      %c0_19 = arith.constant 0 : index
      %22 = vector.load %arg5[%c0_18, %c0_19] : memref<1x8xf32, #tpu.memory_space<vmem>>, vector<1x8xf32>
      %23 = vector.broadcast %22 : vector<1x8xf32> to vector<8x8xf32>
      %24 = arith.addf %21, %23 : vector<8x8xf32>
      %25 = arith.truncf %24 : vector<8x8xf32> to vector<8x8xbf16>
      %c0_20 = arith.constant 0 : index
      %c0_21 = arith.constant 0 : index
      %c0_22 = arith.constant 0 : index
      %c0_23 = arith.constant 0 : index
      %26 = vector.load %arg6[%c0_20, %c0_21, %c0_22, %c0_23] : memref<1x1x8x8xbf16, #tpu.memory_space<vmem>>, vector<1x1x8x8xbf16>
      %27 = vector.shape_cast %26 : vector<1x1x8x8xbf16> to vector<8x8xbf16>
      %28 = vector.shape_cast %25 : vector<8x8xbf16> to vector<1x1x8x8xbf16>
      tpu.vector_store %arg6[%c0_20, %c0_21, %c0_22, %c0_23], %28 {strides = array<i32>} : memref<1x1x8x8xbf16, #tpu.memory_space<vmem>>, vector<1x1x8x8xbf16>,
      %c0_24 = arith.constant 0 : index
      %c0_25 = arith.constant 0 : index
      %29 = vector.load %arg7[%c0_24, %c0_25] : memref<2x8xf32, #tpu.memory_space<vmem>>, vector<1x8xf32>
      %cst_26 = arith.constant dense<0.000000e+00> : vector<8xf32>
      %30 = vector.multi_reduction <add>, %24, %cst_26 [0] : vector<8x8xf32> to vector<8xf32>
      %31 = vector.shape_cast %30 : vector<8xf32> to vector<1x8xf32>
      %32 = arith.addf %29, %31 : vector<1x8xf32>
      %c0_27 = arith.constant 0 : index
      %c0_28 = arith.constant 0 : index
      %33 = vector.load %arg7[%c0_27, %c0_28] : memref<2x8xf32, #tpu.memory_space<vmem>>, vector<1x8xf32>
      tpu.vector_store %arg7[%c0_27, %c0_28], %32 {strides = array<i32>} : memref<2x8xf32, #tpu.memory_space<vmem>>, vector<1x8xf32>,
      %c1 = arith.constant 1 : index
      %c0_29 = arith.constant 0 : index
      %34 = vector.load %arg7[%c1, %c0_29] : memref<2x8xf32, #tpu.memory_space<vmem>>, vector<1x8xf32>
      %35 = arith.mulf %24, %24 : vector<8x8xf32>
      %cst_30 = arith.constant dense<0.000000e+00> : vector<8xf32>
      %36 = vector.multi_reduction <add>, %35, %cst_30 [0] : vector<8x8xf32> to vector<8xf32>
      %37 = vector.shape_cast %36 : vector<8xf32> to vector<1x8xf32>
      %38 = arith.addf %34, %37 : vector<1x8xf32>
      %c1_31 = arith.constant 1 : index
      %c0_32 = arith.constant 0 : index
      %39 = vector.load %arg7[%c1_31, %c0_32] : memref<2x8xf32, #tpu.memory_space<vmem>>, vector<1x8xf32>
      tpu.vector_store %arg7[%c1_31, %c0_32], %38 {strides = array<i32>} : memref<2x8xf32, #tpu.memory_space<vmem>>, vector<1x8xf32>,
    } else {
    }
    return
  }
  func.func @transform_0(%arg0: i32, %arg1: i32, %arg2: i32) -> (i32, i32, i32, i32) {
    %c1_i32 = arith.constant 1 : i32
    %0 = arith.muli %arg1, %c1_i32 : i32
    %1 = arith.addi %0, %arg2 : i32
    %c0_i32 = arith.constant 0 : i32
    %c0_i32_0 = arith.constant 0 : i32
    %c0_i32_1 = arith.constant 0 : i32
    return %arg0, %1, %c0_i32, %c0_i32_0 : i32, i32, i32, i32
  }
  func.func @transform_1(%arg0: i32, %arg1: i32, %arg2: i32) -> (i32, i32, i32) {
    %c0_i32 = arith.constant 0 : i32
    %c0_i32_0 = arith.constant 0 : i32
    %c0_i32_1 = arith.constant 0 : i32
    return %arg2, %c0_i32, %c0_i32_0 : i32, i32, i32
  }
  func.func @transform_2(%arg0: i32, %arg1: i32, %arg2: i32) -> (i32, i32) {
    %c0_i32 = arith.constant 0 : i32
    %c0_i32_0 = arith.constant 0 : i32
    %c0_i32_1 = arith.constant 0 : i32
    return %c0_i32, %c0_i32_0 : i32, i32
  }
  func.func @transform_3(%arg0: i32, %arg1: i32, %arg2: i32) -> (i32, i32, i32, i32) {
    %c0_i32 = arith.constant 0 : i32
    %c0_i32_0 = arith.constant 0 : i32
    %c0_i32_1 = arith.constant 0 : i32
    return %arg0, %arg1, %c0_i32, %c0_i32_0 : i32, i32, i32, i32
  }
  func.func @transform_4(%arg0: i32, %arg1: i32, %arg2: i32) -> (i32, i32) {
    %c0_i32 = arith.constant 0 : i32
    %c0_i32_0 = arith.constant 0 : i32
    %c0_i32_1 = arith.constant 0 : i32
    return %c0_i32, %c0_i32_0 : i32, i32
  }
}

module attributes {stable_mosaic.version = 11 : i64} {
  func.func @_conv_row_kernel(%arg0: i32, %arg1: i32, %arg2: i32, %arg3: memref<1x1x8x16xbf16, #tpu.memory_space<vmem>>, %arg4: memref<1x16x8xbf16, #tpu.memory_space<vmem>>, %arg5: memref<1x8xf32, #tpu.memory_space<vmem>>, %arg6: memref<1x1x8x8xbf16, #tpu.memory_space<vmem>>, %arg7: memref<2x8xf32, #tpu.memory_space<vmem>>, %arg8: memref<8x8xf32, #tpu.memory_space<vmem>>) attributes {dimension_semantics = [#tpu.dimension_semantics<arbitrary>, #tpu.dimension_semantics<arbitrary>, #tpu.dimension_semantics<arbitrary>], iteration_bounds = array<i64: 2, 8, 1>, scalar_prefetch = 0 : i64, scratch_operands = 1 : i64, tpu.core_type = #tpu.core_type<tc>, window_params = [{transform_indices = @transform_0, window_bounds = array<i64: 1, 1, 8, 16>}, {transform_indices = @transform_1, window_bounds = array<i64: 1, 16, 8>}, {pipeline_mode = #tpu.pipeline_mode<synchronous>, transform_indices = @transform_2, window_bounds = array<i64: 1, 8>}, {transform_indices = @transform_3, window_bounds = array<i64: 1, 1, 8, 8>}, {pipeline_mode = #tpu.pipeline_mode<synchronous>, transform_indices = @transform_4, window_bounds = array<i64: 2, 8>}]} {
    %c0_i32 = arith.constant 0 : i32
    %0 = arith.cmpi eq, %arg0, %c0_i32 : i32
    %c0_i32_0 = arith.constant 0 : i32
    %1 = arith.cmpi eq, %arg1, %c0_i32_0 : i32
    %2 = arith.andi %0, %1 : i1
    %c0_i32_1 = arith.constant 0 : i32
    %3 = arith.cmpi eq, %arg2, %c0_i32_1 : i32
    %4 = arith.andi %2, %3 : i1
    %5 = arith.extui %4 : i1 to i32
    %c0_i32_2 = arith.constant 0 : i32
    %6 = arith.cmpi ne, %5, %c0_i32_2 : i32
    scf.if %6 {
      %cst_17 = arith.constant 0.000000e+00 : f32
      %21 = vector.broadcast %cst_17 : f32 to vector<2x8xf32>
      %c0_18 = arith.constant 0 : index
      %c0_19 = arith.constant 0 : index
      %22 = vector.load %arg7[%c0_18, %c0_19] : memref<2x8xf32, #tpu.memory_space<vmem>>, vector<2x8xf32>
      tpu.vector_store %arg7[%c0_18, %c0_19], %21 {strides = array<i32>} : memref<2x8xf32, #tpu.memory_space<vmem>>, vector<2x8xf32>,
    } else {
    }
    %c0_i32_3 = arith.constant 0 : i32
    %7 = arith.cmpi eq, %arg2, %c0_i32_3 : i32
    %8 = arith.extui %7 : i1 to i32
    %c0_i32_4 = arith.constant 0 : i32
    %9 = arith.cmpi ne, %8, %c0_i32_4 : i32
    scf.if %9 {
      %cst_17 = arith.constant 0.000000e+00 : f32
      %21 = vector.broadcast %cst_17 : f32 to vector<8x8xf32>
      %c0_18 = arith.constant 0 : index
      %c0_19 = arith.constant 0 : index
      %22 = vector.load %arg8[%c0_18, %c0_19] : memref<8x8xf32, #tpu.memory_space<vmem>>, vector<8x8xf32>
      tpu.vector_store %arg8[%c0_18, %c0_19], %21 {strides = array<i32>} : memref<8x8xf32, #tpu.memory_space<vmem>>, vector<8x8xf32>,
    } else {
    }
    %c0 = arith.constant 0 : index
    %c0_5 = arith.constant 0 : index
    %c0_6 = arith.constant 0 : index
    %c0_7 = arith.constant 0 : index
    %10 = vector.load %arg3[%c0, %c0_5, %c0_6, %c0_7] : memref<1x1x8x16xbf16, #tpu.memory_space<vmem>>, vector<1x1x8x16xbf16>
    %11 = vector.shape_cast %10 : vector<1x1x8x16xbf16> to vector<8x16xbf16>
    %c0_8 = arith.constant 0 : index
    %c0_9 = arith.constant 0 : index
    %c0_10 = arith.constant 0 : index
    %12 = vector.load %arg4[%c0_8, %c0_9, %c0_10] : memref<1x16x8xbf16, #tpu.memory_space<vmem>>, vector<1x16x8xbf16>
    %13 = vector.shape_cast %12 : vector<1x16x8xbf16> to vector<16x8xbf16>
    %c0_11 = arith.constant 0 : index
    %c0_12 = arith.constant 0 : index
    %14 = vector.load %arg8[%c0_11, %c0_12] : memref<8x8xf32, #tpu.memory_space<vmem>>, vector<8x8xf32>
    %cst = arith.constant dense<0.000000e+00> : vector<8x8xf32>
    %15 = tpu.matmul %11, %13, %cst {dimension_numbers = #tpu.dot_dimension_numbers<[1], [0], [0], [1], [0, 0, 1, 1], [], []>} : vector<8x16xbf16>, vector<16x8xbf16>, vector<8x8xf32> -> vector<8x8xf32>
    %16 = arith.addf %14, %15 : vector<8x8xf32>
    %c0_13 = arith.constant 0 : index
    %c0_14 = arith.constant 0 : index
    %17 = vector.load %arg8[%c0_13, %c0_14] : memref<8x8xf32, #tpu.memory_space<vmem>>, vector<8x8xf32>
    tpu.vector_store %arg8[%c0_13, %c0_14], %16 {strides = array<i32>} : memref<8x8xf32, #tpu.memory_space<vmem>>, vector<8x8xf32>,
    %c0_i32_15 = arith.constant 0 : i32
    %18 = arith.cmpi eq, %arg2, %c0_i32_15 : i32
    %19 = arith.extui %18 : i1 to i32
    %c0_i32_16 = arith.constant 0 : i32
    %20 = arith.cmpi ne, %19, %c0_i32_16 : i32
    scf.if %20 {
      %c0_17 = arith.constant 0 : index
      %c0_18 = arith.constant 0 : index
      %21 = vector.load %arg8[%c0_17, %c0_18] : memref<8x8xf32, #tpu.memory_space<vmem>>, vector<8x8xf32>
      %c0_19 = arith.constant 0 : index
      %c0_20 = arith.constant 0 : index
      %22 = vector.load %arg5[%c0_19, %c0_20] : memref<1x8xf32, #tpu.memory_space<vmem>>, vector<1x8xf32>
      %23 = vector.broadcast %22 : vector<1x8xf32> to vector<8x8xf32>
      %24 = arith.addf %21, %23 : vector<8x8xf32>
      %25 = arith.truncf %24 : vector<8x8xf32> to vector<8x8xbf16>
      %c0_21 = arith.constant 0 : index
      %c0_22 = arith.constant 0 : index
      %c0_23 = arith.constant 0 : index
      %c0_24 = arith.constant 0 : index
      %26 = vector.load %arg6[%c0_21, %c0_22, %c0_23, %c0_24] : memref<1x1x8x8xbf16, #tpu.memory_space<vmem>>, vector<1x1x8x8xbf16>
      %27 = vector.shape_cast %26 : vector<1x1x8x8xbf16> to vector<8x8xbf16>
      %28 = vector.shape_cast %25 : vector<8x8xbf16> to vector<1x1x8x8xbf16>
      tpu.vector_store %arg6[%c0_21, %c0_22, %c0_23, %c0_24], %28 {strides = array<i32>} : memref<1x1x8x8xbf16, #tpu.memory_space<vmem>>, vector<1x1x8x8xbf16>,
      %c0_25 = arith.constant 0 : index
      %c0_26 = arith.constant 0 : index
      %29 = vector.load %arg7[%c0_25, %c0_26] : memref<2x8xf32, #tpu.memory_space<vmem>>, vector<1x8xf32>
      %cst_27 = arith.constant dense<0.000000e+00> : vector<8xf32>
      %30 = vector.multi_reduction <add>, %24, %cst_27 [0] : vector<8x8xf32> to vector<8xf32>
      %31 = vector.shape_cast %30 : vector<8xf32> to vector<1x8xf32>
      %32 = arith.addf %29, %31 : vector<1x8xf32>
      %c0_28 = arith.constant 0 : index
      %c0_29 = arith.constant 0 : index
      %33 = vector.load %arg7[%c0_28, %c0_29] : memref<2x8xf32, #tpu.memory_space<vmem>>, vector<1x8xf32>
      tpu.vector_store %arg7[%c0_28, %c0_29], %32 {strides = array<i32>} : memref<2x8xf32, #tpu.memory_space<vmem>>, vector<1x8xf32>,
      %c1 = arith.constant 1 : index
      %c0_30 = arith.constant 0 : index
      %34 = vector.load %arg7[%c1, %c0_30] : memref<2x8xf32, #tpu.memory_space<vmem>>, vector<1x8xf32>
      %35 = arith.mulf %24, %24 : vector<8x8xf32>
      %cst_31 = arith.constant dense<0.000000e+00> : vector<8xf32>
      %36 = vector.multi_reduction <add>, %35, %cst_31 [0] : vector<8x8xf32> to vector<8xf32>
      %37 = vector.shape_cast %36 : vector<8xf32> to vector<1x8xf32>
      %38 = arith.addf %34, %37 : vector<1x8xf32>
      %c1_32 = arith.constant 1 : index
      %c0_33 = arith.constant 0 : index
      %39 = vector.load %arg7[%c1_32, %c0_33] : memref<2x8xf32, #tpu.memory_space<vmem>>, vector<1x8xf32>
      tpu.vector_store %arg7[%c1_32, %c0_33], %38 {strides = array<i32>} : memref<2x8xf32, #tpu.memory_space<vmem>>, vector<1x8xf32>,
    } else {
    }
    return
  }
  func.func @transform_0(%arg0: i32, %arg1: i32, %arg2: i32) -> (i32, i32, i32, i32) {
    %c1_i32 = arith.constant 1 : i32
    %0 = arith.muli %arg1, %c1_i32 : i32
    %1 = arith.addi %0, %arg2 : i32
    %c0_i32 = arith.constant 0 : i32
    %c0_i32_0 = arith.constant 0 : i32
    %c0_i32_1 = arith.constant 0 : i32
    return %arg0, %1, %c0_i32, %c0_i32_0 : i32, i32, i32, i32
  }
  func.func @transform_1(%arg0: i32, %arg1: i32, %arg2: i32) -> (i32, i32, i32) {
    %c0_i32 = arith.constant 0 : i32
    %c0_i32_0 = arith.constant 0 : i32
    %c0_i32_1 = arith.constant 0 : i32
    return %arg2, %c0_i32, %c0_i32_0 : i32, i32, i32
  }
  func.func @transform_2(%arg0: i32, %arg1: i32, %arg2: i32) -> (i32, i32) {
    %c0_i32 = arith.constant 0 : i32
    %c0_i32_0 = arith.constant 0 : i32
    %c0_i32_1 = arith.constant 0 : i32
    return %c0_i32, %c0_i32_0 : i32, i32
  }
  func.func @transform_3(%arg0: i32, %arg1: i32, %arg2: i32) -> (i32, i32, i32, i32) {
    %c0_i32 = arith.constant 0 : i32
    %c0_i32_0 = arith.constant 0 : i32
    %c0_i32_1 = arith.constant 0 : i32
    return %arg0, %arg1, %c0_i32, %c0_i32_0 : i32, i32, i32, i32
  }
  func.func @transform_4(%arg0: i32, %arg1: i32, %arg2: i32) -> (i32, i32) {
    %c0_i32 = arith.constant 0 : i32
    %c0_i32_0 = arith.constant 0 : i32
    %c0_i32_1 = arith.constant 0 : i32
    return %c0_i32, %c0_i32_0 : i32, i32
  }
}

module attributes {stable_mosaic.version = 11 : i64} {
  func.func @_conv_row_kernel(%arg0: i32, %arg1: i32, %arg2: i32, %arg3: memref<1x1x22x8xbf16, #tpu.memory_space<vmem>>, %arg4: memref<1x56x3xbf16, #tpu.memory_space<vmem>>, %arg5: memref<1x3xf32, #tpu.memory_space<vmem>>, %arg6: memref<1x1x16x3xf32, #tpu.memory_space<vmem>>, %arg7: memref<2x3xf32, #tpu.memory_space<vmem>>, %arg8: memref<16x3xf32, #tpu.memory_space<vmem>>) attributes {dimension_semantics = [#tpu.dimension_semantics<arbitrary>, #tpu.dimension_semantics<arbitrary>, #tpu.dimension_semantics<arbitrary>], iteration_bounds = array<i64: 2, 16, 7>, scalar_prefetch = 0 : i64, scratch_operands = 1 : i64, tpu.core_type = #tpu.core_type<tc>, window_params = [{transform_indices = @transform_0, window_bounds = array<i64: 1, 1, 22, 8>}, {transform_indices = @transform_1, window_bounds = array<i64: 1, 56, 3>}, {pipeline_mode = #tpu.pipeline_mode<synchronous>, transform_indices = @transform_2, window_bounds = array<i64: 1, 3>}, {transform_indices = @transform_3, window_bounds = array<i64: 1, 1, 16, 3>}, {pipeline_mode = #tpu.pipeline_mode<synchronous>, transform_indices = @transform_4, window_bounds = array<i64: 2, 3>}]} {
    %c0_i32 = arith.constant 0 : i32
    %0 = arith.cmpi eq, %arg0, %c0_i32 : i32
    %c0_i32_0 = arith.constant 0 : i32
    %1 = arith.cmpi eq, %arg1, %c0_i32_0 : i32
    %2 = arith.andi %0, %1 : i1
    %c0_i32_1 = arith.constant 0 : i32
    %3 = arith.cmpi eq, %arg2, %c0_i32_1 : i32
    %4 = arith.andi %2, %3 : i1
    %5 = arith.extui %4 : i1 to i32
    %c0_i32_2 = arith.constant 0 : i32
    %6 = arith.cmpi ne, %5, %c0_i32_2 : i32
    scf.if %6 {
      %cst_22 = arith.constant 0.000000e+00 : f32
      %47 = vector.broadcast %cst_22 : f32 to vector<2x3xf32>
      %c0_23 = arith.constant 0 : index
      %c0_24 = arith.constant 0 : index
      %48 = vector.load %arg7[%c0_23, %c0_24] : memref<2x3xf32, #tpu.memory_space<vmem>>, vector<2x3xf32>
      tpu.vector_store %arg7[%c0_23, %c0_24], %47 {strides = array<i32>} : memref<2x3xf32, #tpu.memory_space<vmem>>, vector<2x3xf32>,
    } else {
    }
    %c0_i32_3 = arith.constant 0 : i32
    %7 = arith.cmpi eq, %arg2, %c0_i32_3 : i32
    %8 = arith.extui %7 : i1 to i32
    %c0_i32_4 = arith.constant 0 : i32
    %9 = arith.cmpi ne, %8, %c0_i32_4 : i32
    scf.if %9 {
      %cst_22 = arith.constant 0.000000e+00 : f32
      %47 = vector.broadcast %cst_22 : f32 to vector<16x3xf32>
      %c0_23 = arith.constant 0 : index
      %c0_24 = arith.constant 0 : index
      %48 = vector.load %arg8[%c0_23, %c0_24] : memref<16x3xf32, #tpu.memory_space<vmem>>, vector<16x3xf32>
      tpu.vector_store %arg8[%c0_23, %c0_24], %47 {strides = array<i32>} : memref<16x3xf32, #tpu.memory_space<vmem>>, vector<16x3xf32>,
    } else {
    }
    %c0 = arith.constant 0 : index
    %c0_5 = arith.constant 0 : index
    %c0_6 = arith.constant 0 : index
    %c0_7 = arith.constant 0 : index
    %10 = vector.load %arg3[%c0, %c0_5, %c0_6, %c0_7] : memref<1x1x22x8xbf16, #tpu.memory_space<vmem>>, vector<1x1x22x8xbf16>
    %11 = vector.shape_cast %10 : vector<1x1x22x8xbf16> to vector<22x8xbf16>
    %c0_8 = arith.constant 0 : index
    %c0_9 = arith.constant 0 : index
    %c0_10 = arith.constant 0 : index
    %12 = vector.load %arg4[%c0_8, %c0_9, %c0_10] : memref<1x56x3xbf16, #tpu.memory_space<vmem>>, vector<1x56x3xbf16>
    %13 = vector.shape_cast %12 : vector<1x56x3xbf16> to vector<56x3xbf16>
    %c0_11 = arith.constant 0 : index
    %c0_12 = arith.constant 0 : index
    %14 = vector.load %arg8[%c0_11, %c0_12] : memref<16x3xf32, #tpu.memory_space<vmem>>, vector<16x3xf32>
    %15 = vector.extract_strided_slice %11 {offsets = [0, 0], sizes = [16, 8], strides = [1, 1]} : vector<22x8xbf16> to vector<16x8xbf16>
    %16 = vector.extract_strided_slice %13 {offsets = [0, 0], sizes = [8, 3], strides = [1, 1]} : vector<56x3xbf16> to vector<8x3xbf16>
    %cst = arith.constant dense<0.000000e+00> : vector<16x3xf32>
    %17 = tpu.matmul %15, %16, %cst {dimension_numbers = #tpu.dot_dimension_numbers<[1], [0], [0], [1], [0, 0, 1, 1], [], []>} : vector<16x8xbf16>, vector<8x3xbf16>, vector<16x3xf32> -> vector<16x3xf32>
    %18 = arith.addf %14, %17 : vector<16x3xf32>
    %19 = vector.extract_strided_slice %11 {offsets = [1, 0], sizes = [16, 8], strides = [1, 1]} : vector<22x8xbf16> to vector<16x8xbf16>
    %20 = vector.extract_strided_slice %13 {offsets = [8, 0], sizes = [8, 3], strides = [1, 1]} : vector<56x3xbf16> to vector<8x3xbf16>
    %cst_13 = arith.constant dense<0.000000e+00> : vector<16x3xf32>
    %21 = tpu.matmul %19, %20, %cst_13 {dimension_numbers = #tpu.dot_dimension_numbers<[1], [0], [0], [1], [0, 0, 1, 1], [], []>} : vector<16x8xbf16>, vector<8x3xbf16>, vector<16x3xf32> -> vector<16x3xf32>
    %22 = arith.addf %18, %21 : vector<16x3xf32>
    %23 = vector.extract_strided_slice %11 {offsets = [2, 0], sizes = [16, 8], strides = [1, 1]} : vector<22x8xbf16> to vector<16x8xbf16>
    %24 = vector.extract_strided_slice %13 {offsets = [16, 0], sizes = [8, 3], strides = [1, 1]} : vector<56x3xbf16> to vector<8x3xbf16>
    %cst_14 = arith.constant dense<0.000000e+00> : vector<16x3xf32>
    %25 = tpu.matmul %23, %24, %cst_14 {dimension_numbers = #tpu.dot_dimension_numbers<[1], [0], [0], [1], [0, 0, 1, 1], [], []>} : vector<16x8xbf16>, vector<8x3xbf16>, vector<16x3xf32> -> vector<16x3xf32>
    %26 = arith.addf %22, %25 : vector<16x3xf32>
    %27 = vector.extract_strided_slice %11 {offsets = [3, 0], sizes = [16, 8], strides = [1, 1]} : vector<22x8xbf16> to vector<16x8xbf16>
    %28 = vector.extract_strided_slice %13 {offsets = [24, 0], sizes = [8, 3], strides = [1, 1]} : vector<56x3xbf16> to vector<8x3xbf16>
    %cst_15 = arith.constant dense<0.000000e+00> : vector<16x3xf32>
    %29 = tpu.matmul %27, %28, %cst_15 {dimension_numbers = #tpu.dot_dimension_numbers<[1], [0], [0], [1], [0, 0, 1, 1], [], []>} : vector<16x8xbf16>, vector<8x3xbf16>, vector<16x3xf32> -> vector<16x3xf32>
    %30 = arith.addf %26, %29 : vector<16x3xf32>
    %31 = vector.extract_strided_slice %11 {offsets = [4, 0], sizes = [16, 8], strides = [1, 1]} : vector<22x8xbf16> to vector<16x8xbf16>
    %32 = vector.extract_strided_slice %13 {offsets = [32, 0], sizes = [8, 3], strides = [1, 1]} : vector<56x3xbf16> to vector<8x3xbf16>
    %cst_16 = arith.constant dense<0.000000e+00> : vector<16x3xf32>
    %33 = tpu.matmul %31, %32, %cst_16 {dimension_numbers = #tpu.dot_dimension_numbers<[1], [0], [0], [1], [0, 0, 1, 1], [], []>} : vector<16x8xbf16>, vector<8x3xbf16>, vector<16x3xf32> -> vector<16x3xf32>
    %34 = arith.addf %30, %33 : vector<16x3xf32>
    %35 = vector.extract_strided_slice %11 {offsets = [5, 0], sizes = [16, 8], strides = [1, 1]} : vector<22x8xbf16> to vector<16x8xbf16>
    %36 = vector.extract_strided_slice %13 {offsets = [40, 0], sizes = [8, 3], strides = [1, 1]} : vector<56x3xbf16> to vector<8x3xbf16>
    %cst_17 = arith.constant dense<0.000000e+00> : vector<16x3xf32>
    %37 = tpu.matmul %35, %36, %cst_17 {dimension_numbers = #tpu.dot_dimension_numbers<[1], [0], [0], [1], [0, 0, 1, 1], [], []>} : vector<16x8xbf16>, vector<8x3xbf16>, vector<16x3xf32> -> vector<16x3xf32>
    %38 = arith.addf %34, %37 : vector<16x3xf32>
    %39 = vector.extract_strided_slice %11 {offsets = [6, 0], sizes = [16, 8], strides = [1, 1]} : vector<22x8xbf16> to vector<16x8xbf16>
    %40 = vector.extract_strided_slice %13 {offsets = [48, 0], sizes = [8, 3], strides = [1, 1]} : vector<56x3xbf16> to vector<8x3xbf16>
    %cst_18 = arith.constant dense<0.000000e+00> : vector<16x3xf32>
    %41 = tpu.matmul %39, %40, %cst_18 {dimension_numbers = #tpu.dot_dimension_numbers<[1], [0], [0], [1], [0, 0, 1, 1], [], []>} : vector<16x8xbf16>, vector<8x3xbf16>, vector<16x3xf32> -> vector<16x3xf32>
    %42 = arith.addf %38, %41 : vector<16x3xf32>
    %c0_19 = arith.constant 0 : index
    %c0_20 = arith.constant 0 : index
    %43 = vector.load %arg8[%c0_19, %c0_20] : memref<16x3xf32, #tpu.memory_space<vmem>>, vector<16x3xf32>
    tpu.vector_store %arg8[%c0_19, %c0_20], %42 {strides = array<i32>} : memref<16x3xf32, #tpu.memory_space<vmem>>, vector<16x3xf32>,
    %c6_i32 = arith.constant 6 : i32
    %44 = arith.cmpi eq, %arg2, %c6_i32 : i32
    %45 = arith.extui %44 : i1 to i32
    %c0_i32_21 = arith.constant 0 : i32
    %46 = arith.cmpi ne, %45, %c0_i32_21 : i32
    scf.if %46 {
      %c0_22 = arith.constant 0 : index
      %c0_23 = arith.constant 0 : index
      %47 = vector.load %arg8[%c0_22, %c0_23] : memref<16x3xf32, #tpu.memory_space<vmem>>, vector<16x3xf32>
      %c0_24 = arith.constant 0 : index
      %c0_25 = arith.constant 0 : index
      %48 = vector.load %arg5[%c0_24, %c0_25] : memref<1x3xf32, #tpu.memory_space<vmem>>, vector<1x3xf32>
      %49 = vector.broadcast %48 : vector<1x3xf32> to vector<16x3xf32>
      %50 = arith.addf %47, %49 : vector<16x3xf32>
      %51 = math.tanh %50 : vector<16x3xf32>
      %c0_26 = arith.constant 0 : index
      %c0_27 = arith.constant 0 : index
      %c0_28 = arith.constant 0 : index
      %c0_29 = arith.constant 0 : index
      %52 = vector.load %arg6[%c0_26, %c0_27, %c0_28, %c0_29] : memref<1x1x16x3xf32, #tpu.memory_space<vmem>>, vector<1x1x16x3xf32>
      %53 = vector.shape_cast %52 : vector<1x1x16x3xf32> to vector<16x3xf32>
      %54 = vector.shape_cast %51 : vector<16x3xf32> to vector<1x1x16x3xf32>
      tpu.vector_store %arg6[%c0_26, %c0_27, %c0_28, %c0_29], %54 {strides = array<i32>} : memref<1x1x16x3xf32, #tpu.memory_space<vmem>>, vector<1x1x16x3xf32>,
      %c0_30 = arith.constant 0 : index
      %c0_31 = arith.constant 0 : index
      %55 = vector.load %arg7[%c0_30, %c0_31] : memref<2x3xf32, #tpu.memory_space<vmem>>, vector<1x3xf32>
      %cst_32 = arith.constant dense<0.000000e+00> : vector<3xf32>
      %56 = vector.multi_reduction <add>, %51, %cst_32 [0] : vector<16x3xf32> to vector<3xf32>
      %57 = vector.shape_cast %56 : vector<3xf32> to vector<1x3xf32>
      %58 = arith.addf %55, %57 : vector<1x3xf32>
      %c0_33 = arith.constant 0 : index
      %c0_34 = arith.constant 0 : index
      %59 = vector.load %arg7[%c0_33, %c0_34] : memref<2x3xf32, #tpu.memory_space<vmem>>, vector<1x3xf32>
      tpu.vector_store %arg7[%c0_33, %c0_34], %58 {strides = array<i32>} : memref<2x3xf32, #tpu.memory_space<vmem>>, vector<1x3xf32>,
      %c1 = arith.constant 1 : index
      %c0_35 = arith.constant 0 : index
      %60 = vector.load %arg7[%c1, %c0_35] : memref<2x3xf32, #tpu.memory_space<vmem>>, vector<1x3xf32>
      %61 = arith.mulf %51, %51 : vector<16x3xf32>
      %cst_36 = arith.constant dense<0.000000e+00> : vector<3xf32>
      %62 = vector.multi_reduction <add>, %61, %cst_36 [0] : vector<16x3xf32> to vector<3xf32>
      %63 = vector.shape_cast %62 : vector<3xf32> to vector<1x3xf32>
      %64 = arith.addf %60, %63 : vector<1x3xf32>
      %c1_37 = arith.constant 1 : index
      %c0_38 = arith.constant 0 : index
      %65 = vector.load %arg7[%c1_37, %c0_38] : memref<2x3xf32, #tpu.memory_space<vmem>>, vector<1x3xf32>
      tpu.vector_store %arg7[%c1_37, %c0_38], %64 {strides = array<i32>} : memref<2x3xf32, #tpu.memory_space<vmem>>, vector<1x3xf32>,
    } else {
    }
    return
  }
  func.func @transform_0(%arg0: i32, %arg1: i32, %arg2: i32) -> (i32, i32, i32, i32) {
    %c1_i32 = arith.constant 1 : i32
    %0 = arith.muli %arg1, %c1_i32 : i32
    %1 = arith.addi %0, %arg2 : i32
    %c0_i32 = arith.constant 0 : i32
    %c0_i32_0 = arith.constant 0 : i32
    %c0_i32_1 = arith.constant 0 : i32
    return %arg0, %1, %c0_i32, %c0_i32_0 : i32, i32, i32, i32
  }
  func.func @transform_1(%arg0: i32, %arg1: i32, %arg2: i32) -> (i32, i32, i32) {
    %c0_i32 = arith.constant 0 : i32
    %c0_i32_0 = arith.constant 0 : i32
    %c0_i32_1 = arith.constant 0 : i32
    return %arg2, %c0_i32, %c0_i32_0 : i32, i32, i32
  }
  func.func @transform_2(%arg0: i32, %arg1: i32, %arg2: i32) -> (i32, i32) {
    %c0_i32 = arith.constant 0 : i32
    %c0_i32_0 = arith.constant 0 : i32
    %c0_i32_1 = arith.constant 0 : i32
    return %c0_i32, %c0_i32_0 : i32, i32
  }
  func.func @transform_3(%arg0: i32, %arg1: i32, %arg2: i32) -> (i32, i32, i32, i32) {
    %c0_i32 = arith.constant 0 : i32
    %c0_i32_0 = arith.constant 0 : i32
    %c0_i32_1 = arith.constant 0 : i32
    return %arg0, %arg1, %c0_i32, %c0_i32_0 : i32, i32, i32, i32
  }
  func.func @transform_4(%arg0: i32, %arg1: i32, %arg2: i32) -> (i32, i32) {
    %c0_i32 = arith.constant 0 : i32
    %c0_i32_0 = arith.constant 0 : i32
    %c0_i32_1 = arith.constant 0 : i32
    return %c0_i32, %c0_i32_0 : i32, i32
  }
}

</mosaic_0001>

<bundles_post_ra>
// kernel: resnet_generator_forward.25
= control target key start
LH: loop header
LB: loop body
LE: loop exit
PB: predicated region body
PF: predicated region fallthrough
CT: control target
= control target key end

     0   :  { %s877_s15 = smov 0   ;;  %s879_s16 = smov 0   ;;  %s1043_s0 = inlined_call_operand.vmem [shape: bf16[2,22,22,3], index: 0, kind: input, shape index: {}]   ;;  %s1044_s1 = inlined_call_operand.vmem [shape: bf16[7,21,8], index: 1, kind: input, shape index: {}]   ;;  %s1045_s2 = inlined_call_operand.vmem [shape: f32[1,8], index: 2, kind: input, shape index: {}]   ;;  %s1046_s3 = inlined_call_operand.vmem [shape: bf16[2,16,16,8], index: 3, kind: output, shape index: {0}]   ;;  %s1047_s4 = inlined_call_operand.vmem [shape: f32[2,8], index: 4, kind: output, shape index: {1}]  }
   0x1   :  { %s881_s17 = smov 0   ;;  %s883_s18 = smov 0  }
   0x2   :  { %s885_s19 = smov 0   ;;  %s887_s20 = smov 0  }
   0x3   :  { %s889_s21 = smov 0  }
   0x4 LB: > { %s27_s22 = sadd.s32 1, %s835_s18  ;;  %s30_s23 = sadd.s32 1, %s839_s19  ;;  %s847_s21 = sphi %s889_s21, %s15_s21   ;;  %s843_s20 = sphi %s887_s20, %s1053_s20   ;;  %s839_s19 = sphi %s885_s19, %s1052_s19   ;;  %s835_s18 = sphi %s883_s18, %s1051_s18   ;;  %s831_s17 = sphi %s881_s17, %s1050_s17   ;;  %s827_s16 = sphi %s879_s16, %s1049_s16   ;;  %s823_s15 = sphi %s877_s15, %s1048_s15  }
   0x5   : > { %p28_p0 = scmp.ge.s32.totalorder %s27_s22, 7  ;;  %p708_p1 = scmp.ge.s32.totalorder %s847_s21, 1 }
   0x6   : > { %p201_p2 = scmp.lt.s32.totalorder %s847_s21, 225  ;;  %s34_s24 = sadd.s32 1, %s843_s20 }
   0x7   : > { %s1055_s22 = smov (%p28_p0, %s27_s22), 0  ;;  %s1057_s23 = smov (!%p28_p0, %s30_s23), %s839_s19 }
   0x8   : > { %p202_p3 = pnand %p708_p1, %p201_p2  ;;  %p32_p4 = scmp.ge.s32.totalorder %s1057_s23, 16 }
   0x9   : > { %s241_s25 = sadd.s32 (!%p202_p3), %s823_s15, %s827_s16  ;;  %p242_p6 = scmp.lt.s32.totalorder (!%p202_p3), %s831_s17, 1 }
   0xa   : > { %s1059_s23 = smov (%p32_p4, %s1057_s23), 0  ;;  %s1061_s24 = smov (!%p32_p4, %s34_s24), %s843_s20 }
   0xb   : > { %p36_p5 = scmp.ge.s32.totalorder %s1061_s24, 2  ;;  %205 = sbr.rel (%p202_p3) target bundleno = 247 (0xf7), region = 32 }
   0xc   : > { %p244_p7 = scmp.lt.s32.totalorder (!%p202_p3), %s241_s25, 21  ;;  %p252_p8 = scmp.lt.s32.totalorder (!%p202_p3), %s823_s15, 6 }
   0xd   : > { %s1063_s24 = smov (%p36_p5, %s1061_s24), 0  ;;  %p259_p9 = scmp.lt.s32.totalorder (!%p202_p3), %s827_s16, 15 }
   0xe   : > { %p267_p10 = scmp.eq.s32.totalorder (!%p202_p3), %s831_s17, 0  ;;  %p268_p11 = scmp.eq.s32.totalorder (!%p202_p3), %s827_s16, 0 }
   0xf   : > { %p271_p13 = scmp.eq.s32.totalorder (!%p202_p3), %s823_s15, 0 }
  0x10   : > { %s243_s26 = scalar_select %p242_p6, %s831_s17, 1 }
  0x11   : > { %s1065_s25 = smov (!%p244_p7, %s241_s25), 21  ;;  %s1067_s16 = smov (!%p259_p9, %s827_s16), 15 }
  0x12   : > { %s731_s27 = smul.u32 66, %s243_s26  ;;  %s712_s13 = sshll.u32 %s243_s26, 5 }
  0x13   : > { %s730_s28 = smul.u32 3, %s1065_s25  ;;  %p269_p12 = pnand %p268_p11, %p267_p10 }
  0x14   : > { %s253_s29 = scalar_select %p252_p8, %s823_s15, 6 }
  0x15   : > { %s248_s30 = sadd.s32 %s731_s27, %s730_s28  ;;  %s711_s14 = sshll.u32 %s1067_s16, 1 }
  0x16   : > { %s709_s5 = sshll.u32 %s248_s30, 2  ;;  %s732_s6 = smul.u32 12, %s253_s29 }
  0x17   : > { %s936_s9 = scalar_lea.vmem %s1043_s0, %s709_s5  ;;  %s263_s25 = sadd.s32 %s712_s13, %s711_s14 }
  0x18   : > { %s942_s12 = scalar_lea.vmem %s1044_s1, %s732_s6  ;;  %p270_p0 = pneg %p269_p12 }
  0x19   : > { %s713_s17 = sshll.u32 %s263_s25, 2 }
  0x1a   : > { %s949_s29 = scalar_lea.vmem %s1046_s3, %s713_s17  ;;  %p272_p1 = pnand %p271_p13, %p270_p0 }
  0x1c   : > { %275 = sbr.rel (%p272_p1) target bundleno = 35 (0x23), region = 36 }
  0x21   : > { %vm276_vm0 = vcmask 58368   ;;  %v849_v0 = vmov 0.0  }
  0x22   : > { %277 = vst.msk [vmem:[%s1047_s4] sm:$0x3] %vm276_vm0, %v849_v0 }
  0x23 PF: > { %p714_p2 = scmp.ne.s32.totalorder %s823_s15, 0 }
  0x25   : > { %280 = sbr.rel (%p714_p2) target bundleno = 45 (0x2d), region = 40 }
  0x2a   : > { %vm281_vm1 = vcmask 64512   ;;  %v850_v1 = vmov 0.0  }
  0x2b   : > { %282 = vst.msk [vmem:[#allocation2] sm:$0xff] %vm281_vm1, %v850_v1 }
  0x2c   : > { %283 = vst.msk [vmem:[#allocation2 + $0x8] sm:$0xff] %vm281_vm1, %v850_v1 }
  0x2d PF: > { %v287_v2 = vld [vmem:[%s942_s12] sm:$0xf]  ;;  %vm301_vm2 = vcmask 1040384   ;;  %vm302_vm3 = vcmask 1041408   ;;  %v851_v4 = vmov 65535   ;;  %vm297_vm4 = vcmask 23552  }
  0x2e   : > { %v957_v3 = vld [vmem:[%s936_s9] sm:$0xff]  ;;  %v303_v5 = vsel %vm301_vm2, 4294967295, %v851_v4  ;;  %v340_v6 = vunpack.c.l.b16 %v287_v2  ;;  %v286_v8 = vld [vmem:[%s936_s9 + $0x8] sm:$0x7]  ;;  %vm372_vm5 = vcmask 1046528   ;;  %vm442_vm8 = vcmask 1045504  }
  0x2f   : > { %v288_v7 = vld [vmem:[%s942_s12 + $0x4] sm:$0xf]  ;;  %v961_v9 = vsel %vm302_vm3, %v303_v5, 0  ;;  %v325_v11 = vunpack.c.l.b16 %v286_v8  ;;  %v289_v12 = vld [vmem:[%s942_s12 + $0x8] sm:$0x7]  ;;  %v373_v18 = vrot.slane %v957_v3, 1 }
  0x30   : > { %v377_v10 = vunpack.c.l.b16 %v288_v7  ;;  %v306_v13 = vand.u32 %v961_v9, %v287_v2  ;;  %v341_v14 = vpack.c.b16 %v340_v6, %v340_v6  ;;  %v478_v15 = vunpack.c.l.b16 %v289_v12  ;;  %p726_p3 = scmp.ne.s32.totalorder %s823_s15, 6 }
  0x31   : > { %v965_v17 = vpack.c.b16 %v325_v11, %v325_v11  ;;  %v969_v23 = vshrl.u32 %v957_v3, 16  ;;  %vm327_vm6 = vsmask.f32 7424  ;;  %v330_v34 = vshll.u32 %v957_v3, 16 }
  0x32   : > { %v378_v16 = vpack.c.b16 %v377_v10, %v340_v6  ;;  %v412_v19 = vpack.c.b16 %v377_v10, %v377_v10  ;;  %315 = vmatpush.bf16.msra.mxu0 %v306_v13  ;;  %v514_v20 = vpack.c.b16 %v478_v15, %v478_v15  ;;  %v343_v21 = vshrl.u32 %v341_v14, 16  ;;  %v290_v13 = vld [vmem:[#allocation2] sm:$0xff] }
  0x33   : > { %v346_v22 = vshll.u32 %v341_v14, 16  ;;  %v374_v25 = vrot.slane %v965_v17, 1  ;;  %v335_v38 = vshll.u32 %v965_v17, 16  ;;  %v332_v41 = vrot.slane %v330_v34, 1 }
  0x34   : > { %v379_v24 = vrot.slane %v378_v16, 3  ;;  %v414_v26 = vshrl.u32 %v412_v19, 16  ;;  %v416_v27 = vshll.u32 %v412_v19, 16  ;;  %v515_v28 = vrot.slane %v514_v20, 1 }
  0x35   : > { %v345_v29 = vrot.slane %v343_v21, 1  ;;  %v348_v30 = vrot.slane %v346_v22, 2  ;;  %v446_v31 = vrot.slane %v412_v19, 2  ;;  %719 = vmatmul.msk.bf16.vlgmr.msra.gmra.mxu0 %vm297_vm4, %v957_v3  ;;  %v375_v39 = vsel %vm372_vm5, %v373_v18, %v374_v25 }
  0x36   : > { %v384_v32 = vand.u32 %v379_v24, %v961_v9  ;;  %v418_v33 = vrot.slane %v416_v27, 1  ;;  %v520_v35 = vand.u32 %v515_v28, %v961_v9  ;;  %v403_v42 = vrot.slane %v969_v23, 1 }
  0x37   : > { %v349_v36 = vor.u32 %v348_v30, %v345_v29  ;;  %v451_v37 = vand.u32 %v446_v31, %v961_v9  ;;  %v337_v44 = vrot.slane %v335_v38, 1  ;;  %v404_v45 = vrot.slane %v330_v34, 2 }
  0x38   : > { %393 = vmatpush.bf16.msra.mxu2 %v384_v32  ;;  %v419_v40 = vor.u32 %v418_v33, %v414_v26  ;;  %v406_v46 = vshrl.u32 %v965_v17, 16  ;;  %v333_v48 = vor.u32 %v332_v41, %v969_v23  ;;  %v409_v49 = vrot.slane %v335_v38, 2 }
  0x39   : > { %v354_v43 = vand.u32 %v349_v36, %v961_v9  ;;  %460 = vmatpush.bf16.msrb.mxu0 %v451_v37  ;;  %v479_v50 = vpack.c.b16 %v478_v15, %v377_v10  ;;  %v405_v51 = vor.u32 %v404_v45, %v403_v42  ;;  %vm402_vm7 = vsmask.f32 6400 }
  0x3a   : > { %v424_v47 = vand.u32 %v419_v40, %v961_v9  ;;  %v408_v52 = vrot.slane %v406_v46, 1  ;;  %v338_v53 = vsel %vm327_vm6, %v333_v48, %v337_v44  ;;  %v443_v59 = vrot.slane %v957_v3, 2 }
  0x3b   : > { %721 = vmatmul.msk.bf16.vlgmr.msra.gmra.mxu2 %vm297_vm4, %v375_v39  ;;  %363 = vmatpush.bf16.msra.mxu1 %v354_v43  ;;  %v481_v54 = vshrl.u32 %v479_v50, 16  ;;  %v484_v55 = vshll.u32 %v479_v50, 16  ;;  %v444_v60 = vrot.slane %v965_v17, 2  ;;  %v470_v1 = vrot.slane %v969_v23, 2 }
  0x3c   : > { %529 = vmatpush.bf16.msrb.mxu2 %v520_v35  ;;  %433 = vmatpush.bf16.msra.mxu3 %v424_v47  ;;  %v410_v56 = vor.u32 %v409_v49, %v408_v52  ;;  %v471_v2 = vrot.slane %v330_v34, 3  ;;  %v473_v4 = vrot.slane %v406_v46, 2  ;;  %v474_v5 = vrot.slane %v335_v38, 3 }
  0x3d   : > { %v483_v57 = vrot.slane %v481_v54, 3  ;;  %v486_v58 = vrot.slane %v484_v55, 4  ;;  %v445_v0 = vsel %vm442_vm8, %v443_v59, %v444_v60  ;;  %v511_v6 = vrot.slane %v957_v3, 3 }
  0x3e   : > { %720 = vmatmul.msk.bf16.vlgmr.msra.gmra.mxu1 %vm297_vm4, %v338_v53  ;;  %v411_v61 = vsel %vm402_vm7, %v405_v51, %v410_v56  ;;  %v512_v7 = vrot.slane %v965_v17, 3  ;;  %vm510_vm9 = vcmask 1044480   ;;  %v472_v8 = vor.u32 %v471_v2, %v470_v1  ;;  %v291_v17 = vld [vmem:[#allocation2 + $0x8] sm:$0xff] }
  0x3f   : > { %722 = vmatmul.msk.bf16.vlgmr.msra.gmra.mxu3 %vm297_vm4, %v411_v61  ;;  %v487_v62 = vor.u32 %v486_v58, %v483_v57  ;;  %v475_v10 = vor.u32 %v474_v5, %v473_v4  ;;  %vm469_vm10 = vsmask.f32 5376  ;;  %vm538_vm11 = vcmask 64512  }
  0x40   : > { %v513_v11 = vsel %vm510_vm9, %v511_v6, %v512_v7 }
  0x41   : > { %v492_v63 = vand.u32 %v487_v62, %v961_v9  ;;  %v476_v9 = vsel %vm469_vm10, %v472_v8, %v475_v10 }
  0x43   : > { %501 = vmatpush.bf16.msrb.mxu1 %v492_v63 }
  0x45   : > { %723 = vmatmul.msk.bf16.vlgmr.msrb.gmra.mxu0 %vm297_vm4, %v445_v0 }
  0x4b   : > { %725 = vmatmul.msk.bf16.vlgmr.msrb.gmra.mxu2 %vm297_vm4, %v513_v11 }
  0x4e   : > { %724 = vmatmul.msk.bf16.vlgmr.msrb.gmra.mxu1 %vm297_vm4, %v476_v9 }
  0xb2   : > { %v317_v12 = vpop.f32.mrf.mxu0 }
  0xb3   : > { %v322_v16 = vadd.f32 %v317_v12, %v290_v13 }
  0xba   : > { %v319_v14 = vpop.f32.mrf.mxu0 }
  0xbb   : > { %v365_v15 = vpop.f32.mrf.mxu1  ;;  %v323_v23 = vadd.f32 %v319_v14, %v291_v17 }
  0xbc   : > { %v370_v18 = vadd.f32 %v365_v15, %v322_v16 }
  0xbe   : > { %v395_v3 = vpop.f32.mrf.mxu2 }
  0xbf   : > { %v400_v21 = vadd.f32 %v395_v3, %v370_v18 }
  0xc2   : > { %v435_v19 = vpop.f32.mrf.mxu3  ;;  %v462_v22 = vpop.f32.mrf.mxu0 }
  0xc3   : > { %v367_v20 = vpop.f32.mrf.mxu1  ;;  %v440_v24 = vadd.f32 %v435_v19, %v400_v21 }
  0xc4   : > { %v371_v26 = vadd.f32 %v367_v20, %v323_v23 }
  0xc5   : > { %v467_v27 = vadd.f32 %v462_v22, %v440_v24 }
  0xc6   : > { %v397_v25 = vpop.f32.mrf.mxu2 }
  0xc7   : > { %v401_v30 = vadd.f32 %v397_v25, %v371_v26 }
  0xca   : > { %v437_v28 = vpop.f32.mrf.mxu3  ;;  %v464_v34 = vpop.f32.mrf.mxu0 }
  0xcb   : > { %v503_v29 = vpop.f32.mrf.mxu1  ;;  %v441_v32 = vadd.f32 %v437_v28, %v401_v30 }
  0xcc   : > { %v508_v31 = vadd.f32 %v503_v29, %v467_v27 }
  0xcd   : > { %v468_v36 = vadd.f32 %v464_v34, %v441_v32 }
  0xce   : > { %v531_v33 = vpop.f32.mrf.mxu2 }
  0xcf   : > { %v536_v35 = vadd.f32 %v531_v33, %v508_v31 }
  0xd1   : > { %539 = vst.msk [vmem:[#allocation2] sm:$0xff] %vm538_vm11, %v536_v35 }
  0xd3   : > { %v505_v37 = vpop.f32.mrf.mxu1 }
  0xd4   : > { %v509_v38 = vadd.f32 %v505_v37, %v468_v36 }
  0xd5   : > { %544 = sbr.rel (%p726_p3) target bundleno = 247 (0xf7), region = 44 }
  0xd6   : > { %v533_v39 = vpop.f32.mrf.mxu2 }
  0xd7   : > { %v537_v40 = vadd.f32 %v533_v39, %v509_v38 }
  0xd9   : > { %540 = vst.msk [vmem:[#allocation2 + $0x8] sm:$0xff] %vm538_vm11, %v537_v40 }
  0xda   : > { %v545_v41 = vld [vmem:[#allocation2] sm:$0xff]  ;;  %vm555_vm12 = vcmask 60416   ;;  %vm569_vm13 = vcmask 57344  }
  0xdb   : > { %v792_v42 = vld [vmem:[%s1045_s2] ss:$0 sm:$0xff]  ;;  %v571_v5 = vld [vmem:[%s1047_s4 + $0x1] sm:$0x1] }
  0xdc   : > { %v551_v44 = vadd.f32 %v792_v42, %v545_v41  ;;  %v558_v1 = vld [vmem:[%s1047_s4] sm:$0x1] }
  0xde   : > { %v553_v46 = vpack.c.bf16 %v551_v44, %v551_v44  ;;  %v559_v47 = vsel %vm538_vm11, %v551_v44, 0.0  ;;  %v572_v48 = vmul.f32 %v551_v44, %v551_v44 }
  0xe0   : > { %v546_v43 = vld [vmem:[#allocation2 + $0x8] sm:$0xff]  ;;  %556 = vst.msk [vmem:[%s949_s29] sm:$0xf] %vm555_vm12, %v553_v46  ;;  %v574_v52 = vsel %vm538_vm11, %v572_v48, 0.0 }
  0xe1   : > { %v552_v45 = vadd.f32 %v792_v42, %v546_v43 }
  0xe3   : > { %v554_v49 = vpack.c.bf16 %v552_v45, %v552_v45  ;;  %v560_v50 = vsel %vm538_vm11, %v552_v45, 0.0  ;;  %v573_v51 = vmul.f32 %v552_v45, %v552_v45 }
  0xe4   : > { %v561_v53 = vadd.f32 %v560_v50, %v559_v47 }
  0xe5   : > { %557 = vst.msk [vmem:[%s949_s29 + $0x4] sm:$0xf] %vm555_vm12, %v554_v49  ;;  %v575_v54 = vsel %vm538_vm11, %v573_v51, 0.0 }
  0xe6   : > { %v562_v55 = vrot.slane %v561_v53, 4  ;;  %v576_v56 = vadd.f32 %v575_v54, %v574_v52 }
  0xe8   : > { %v563_v57 = vadd.f32 %v562_v55, %v561_v53  ;;  %v577_v58 = vrot.slane %v576_v56, 4 }
  0xea   : > { %v564_v59 = vrot.slane %v563_v57, 2  ;;  %v578_v60 = vadd.f32 %v577_v58, %v576_v56 }
  0xec   : > { %v565_v61 = vadd.f32 %v564_v59, %v563_v57  ;;  %v579_v62 = vrot.slane %v578_v60, 2 }
  0xee   : > { %v566_v63 = vrot.slane %v565_v61, 1  ;;  %v580_v0 = vadd.f32 %v579_v62, %v578_v60 }
  0xf0   : > { %v567_v2 = vadd.f32 %v566_v63, %v565_v61  ;;  %v581_v4 = vrot.slane %v580_v0, 1 }
  0xf2   : > { %v568_v6 = vadd.f32 %v567_v2, %v558_v1  ;;  %v582_v7 = vadd.f32 %v581_v4, %v580_v0 }
  0xf4   : > { %570 = vst.msk [vmem:[%s1047_s4] sm:$0x1] %vm569_vm13, %v568_v6  ;;  %v583_v8 = vadd.f32 %v582_v7, %v571_v5 }
  0xf6   : > { %584 = vst.msk [vmem:[%s1047_s4 + $0x1] sm:$0x1] %vm569_vm13, %v583_v8 }
  0xf7 PF: > { %s15_s21 = sadd.s32 1, %s847_s21   ;;  %s1048_s15 = smov %s835_s18 }
  0xf8   : > { %p12_p4 = scmp.ge.s32.totalorder %s15_s21, 226   ;;  %s1049_s16 = smov %s839_s19 }
  0xf9   : > { %s1050_s17 = smov %s843_s20  ;;  %s1051_s18 = smov %s1055_s22 }
  0xfa   : > { %s1052_s19 = smov %s1059_s23  ;;  %s1053_s20 = smov %s1063_s24 }
  0xfb   :  { %14 = sbr.rel (!%p12_p4) target bundleno = 4 (0x4), region = 85 }

// kernel: resnet_generator_forward.26
= control target key start
LH: loop header
LB: loop body
LE: loop exit
PB: predicated region body
PF: predicated region fallthrough
CT: control target
= control target key end

     0   :  { %vm430_vm3 = vcmask 60416   ;;  %s1300_s1 = inlined_call_operand.vmem [shape: f32[2,8], index: 1, kind: input, shape index: {}]   ;;  %s1301_s0 = inlined_call_operand.vmem [shape: bf16[512,8], index: 0, kind: input, shape index: {}]   ;;  %s1302_s2 = inlined_call_operand.vmem [shape: f32[1,8], index: 2, kind: input, shape index: {}]   ;;  %s1303_s3 = inlined_call_operand.vmem [shape: f32[1,8], index: 3, kind: input, shape index: {}]   ;;  %s1304_s4 = inlined_call_operand.vmem [shape: bf16[512,8], index: 4, kind: output, shape index: {}]  }
   0x1   :  { %v17_v0 = vld [vmem:[%s1300_s1] sm:$0x1]  ;;  %v19_v1 = vld [vmem:[%s1300_s1 + $0x1] sm:$0x1]  ;;  %v703_v12 = vld [vmem:[%s1301_s0 + $0x8] sm:$0xff]  }
   0x2   :  { %v691_v2 = vmul.f32 0.001953125, %v17_v0  ;;  %v20_v3 = vmul.f32 0.001953125, %v19_v1  ;;  %v698_v11 = vld [vmem:[%s1301_s0] sm:$0xff]   ;;  %v708_v13 = vld [vmem:[%s1301_s0 + $0x10] sm:$0xff]   ;;  %v713_v15 = vld [vmem:[%s1301_s0 + $0x18] sm:$0xff]   ;;  %v505_v19 = vunpack.c.l.bf16 %v703_v12  ;;  %v506_v23 = vunpack.c.h.bf16 %v703_v12 }
   0x3   :  { %v718_v16 = vld [vmem:[%s1301_s0 + $0x20] sm:$0xff]   ;;  %v501_v17 = vunpack.c.l.bf16 %v698_v11  ;;  %v502_v18 = vunpack.c.h.bf16 %v698_v11  ;;  %v726_v20 = vld [vmem:[%s1301_s0 + $0x28] sm:$0xff]   ;;  %v731_v21 = vld [vmem:[%s1301_s0 + $0x30] sm:$0xff]   ;;  %v509_v24 = vunpack.c.l.bf16 %v708_v13  ;;  %v510_v25 = vunpack.c.h.bf16 %v708_v13 }
   0x4   :  { %v21_v4 = vmul.f32 %v691_v2, %v691_v2  ;;  %v739_v26 = vld [vmem:[%s1301_s0 + $0x38] sm:$0xff]   ;;  %v744_v27 = vld [vmem:[%s1301_s0 + $0x40] sm:$0xff]   ;;  %v513_v29 = vunpack.c.l.bf16 %v713_v15  ;;  %v514_v30 = vunpack.c.h.bf16 %v713_v15  ;;  %v517_v31 = vunpack.c.l.bf16 %v718_v16  ;;  %v759_v33 = vld [vmem:[%s1301_s0 + $0x48] sm:$0xff]  }
   0x5   :  { %v518_v32 = vunpack.c.h.bf16 %v718_v16  ;;  %v24_v34 = vld [vmem:[%s1302_s2] sm:$0x1]  ;;  %v521_v36 = vunpack.c.l.bf16 %v726_v20  ;;  %v522_v37 = vunpack.c.h.bf16 %v726_v20  ;;  %v525_v38 = vunpack.c.l.bf16 %v731_v21  ;;  %v770_v39 = vld [vmem:[%s1301_s0 + $0x50] sm:$0xff]   ;;  %v775_v40 = vld [vmem:[%s1301_s0 + $0x58] sm:$0xff]  }
   0x6   :  { %v22_v5 = vsub.f32 %v20_v3, %v21_v4  ;;  %v526_v41 = vunpack.c.h.bf16 %v731_v21  ;;  %v529_v42 = vunpack.c.l.bf16 %v739_v26  ;;  %v530_v43 = vunpack.c.h.bf16 %v739_v26  ;;  %v784_v45 = vld [vmem:[%s1301_s0 + $0x60] sm:$0xff]   ;;  %v789_v46 = vld [vmem:[%s1301_s0 + $0x68] sm:$0xff]   ;;  %v799_v51 = vld [vmem:[%s1301_s0 + $0x70] sm:$0xff]  }
   0x7   :  { %v533_v44 = vunpack.c.l.bf16 %v744_v27  ;;  %v534_v48 = vunpack.c.h.bf16 %v744_v27  ;;  %v537_v49 = vunpack.c.l.bf16 %v759_v33  ;;  %v538_v50 = vunpack.c.h.bf16 %v759_v33  ;;  %v807_v56 = vld [vmem:[%s1301_s0 + $0x78] sm:$0xff]   ;;  %v37_v57 = vld [vmem:[%s1303_s3] sm:$0x1] }
   0x8   :  { %v23_v6 = vmax.f32 %v22_v5, 0.0  ;;  %v541_v53 = vunpack.c.l.bf16 %v770_v39  ;;  %v542_v54 = vunpack.c.h.bf16 %v770_v39  ;;  %v545_v55 = vunpack.c.l.bf16 %v775_v40  ;;  %v824_v3 = vld [vmem:[%s1301_s0 + $0x80] sm:$0xff]  }
   0x9   :  { %v546_v58 = vunpack.c.h.bf16 %v775_v40  ;;  %v549_v59 = vunpack.c.l.bf16 %v784_v45  ;;  %v550_v60 = vunpack.c.h.bf16 %v784_v45  ;;  %v553_v61 = vunpack.c.l.bf16 %v789_v46 }
   0xa   :  { %v25_v7 = vadd.f32 1e-05, %v23_v6  ;;  %v554_v0 = vunpack.c.h.bf16 %v789_v46  ;;  %v557_v1 = vunpack.c.l.bf16 %v799_v51  ;;  %v558_v4 = vunpack.c.h.bf16 %v799_v51 }
   0xb   :  { %v561_v5 = vunpack.c.l.bf16 %v807_v56  ;;  %v562_v6 = vunpack.c.h.bf16 %v807_v56 }
   0xc   :  { %658 = vrsqrt.f32 %v25_v7  ;;  %vm32_vm0 = vweird.f32 %v25_v7 }
  0x12   :  { %v659_v8 = vpop.eup %658 }
  0x13   :  { %v27_v9 = vmul.f32 %v659_v8, %v25_v7  ;;  %vm33_vm1 = vweird.f32 %v659_v8 }
  0x14   :  { %vm748_vm2 = vmor %vm32_vm0, %vm33_vm1 }
  0x15   :  { %v28_v10 = vmul.f32 %v659_v8, %v27_v9 }
  0x17   :  { %v29_v14 = vmul.f32 0.5, %v28_v10 }
  0x19   :  { %v30_v22 = vsub.f32 1.5, %v29_v14 }
  0x1b   :  { %v31_v35 = vmul.f32 %v659_v8, %v30_v22 }
  0x1d   :  { %v35_v47 = vsel %vm748_vm2, %v659_v8, %v31_v35 }
  0x1e   :  { %v36_v52 = vmul.f32 %v35_v47, %v24_v34 }
  0x20   :  { %v38_v62 = vmul.f32 %v36_v52, %v691_v2  ;;  %v817_v63 = vperm.slane %v36_v52, 0  ;;  %v565_v2 = vunpack.c.l.bf16 %v824_v3 }
  0x22   :  { %v39_v7 = vsub.f32 %v37_v57, %v38_v62  ;;  %v171_v8 = vmul.f32 %v501_v17, %v817_v63  ;;  %v172_v9 = vmul.f32 %v502_v18, %v817_v63  ;;  %v173_v10 = vmul.f32 %v505_v19, %v817_v63 }
  0x23   :  { %v174_v11 = vmul.f32 %v506_v23, %v817_v63  ;;  %v175_v12 = vmul.f32 %v509_v24, %v817_v63  ;;  %v176_v13 = vmul.f32 %v510_v25, %v817_v63  ;;  %v177_v14 = vmul.f32 %v513_v29, %v817_v63 }
  0x24   :  { %v837_v15 = vperm.slane %v39_v7, 0  ;;  %v178_v16 = vmul.f32 %v514_v30, %v817_v63  ;;  %v179_v20 = vmul.f32 %v517_v31, %v817_v63  ;;  %v180_v17 = vmul.f32 %v518_v32, %v817_v63 }
  0x25   :  { %v181_v18 = vmul.f32 %v521_v36, %v817_v63  ;;  %v182_v19 = vmul.f32 %v522_v37, %v817_v63  ;;  %v183_v21 = vmul.f32 %v525_v38, %v817_v63  ;;  %v184_v22 = vmul.f32 %v526_v41, %v817_v63 }
  0x26   :  { %v238_v23 = vadd.f32 %v837_v15, %v171_v8  ;;  %v239_v24 = vadd.f32 %v837_v15, %v172_v9  ;;  %v240_v25 = vadd.f32 %v837_v15, %v173_v10  ;;  %v241_v28 = vadd.f32 %v837_v15, %v174_v11 }
  0x27   :  { %v242_v29 = vadd.f32 %v837_v15, %v175_v12  ;;  %v243_v30 = vadd.f32 %v837_v15, %v176_v13  ;;  %v244_v31 = vadd.f32 %v837_v15, %v177_v14  ;;  %v245_v32 = vadd.f32 %v837_v15, %v178_v16 }
  0x28   :  { %v302_v34 = vmax.f32 %v238_v23, 0.0  ;;  %v303_v35 = vmax.f32 %v239_v24, 0.0  ;;  %v304_v36 = vmax.f32 %v240_v25, 0.0  ;;  %v305_v37 = vmax.f32 %v241_v28, 0.0 }
  0x29   :  { %v306_v38 = vmax.f32 %v242_v29, 0.0  ;;  %v307_v41 = vmax.f32 %v243_v30, 0.0  ;;  %v308_v47 = vmax.f32 %v244_v31, 0.0  ;;  %v309_v52 = vmax.f32 %v245_v32, 0.0 }
  0x2a   :  { %v366_v57 = vpack.c.bf16 %v302_v34, %v302_v34  ;;  %v367_v62 = vpack.c.bf16 %v303_v35, %v303_v35  ;;  %v368_v7 = vpack.c.bf16 %v304_v36, %v304_v36  ;;  %v369_v8 = vpack.c.bf16 %v305_v37, %v305_v37 }
  0x2b   :  { %v370_v9 = vpack.c.bf16 %v306_v38, %v306_v38  ;;  %v371_v10 = vpack.c.bf16 %v307_v41, %v307_v41  ;;  %v372_v11 = vpack.c.bf16 %v308_v47, %v308_v47  ;;  %v373_v12 = vpack.c.bf16 %v309_v52, %v309_v52 }
  0x2c   :  { %431 = vst.msk [vmem:[%s1304_s4] sm:$0xf] %vm430_vm3, %v366_v57  ;;  %v246_v13 = vadd.f32 %v837_v15, %v179_v20  ;;  %v247_v14 = vadd.f32 %v837_v15, %v180_v17  ;;  %v248_v16 = vadd.f32 %v837_v15, %v181_v18  ;;  %v249_v23 = vadd.f32 %v837_v15, %v182_v19 }
  0x2d   :  { %432 = vst.msk [vmem:[%s1304_s4 + $0x4] sm:$0xf] %vm430_vm3, %v367_v62  ;;  %v250_v24 = vadd.f32 %v837_v15, %v183_v21  ;;  %v251_v25 = vadd.f32 %v837_v15, %v184_v22  ;;  %v185_v28 = vmul.f32 %v529_v42, %v817_v63  ;;  %v186_v20 = vmul.f32 %v530_v43, %v817_v63 }
  0x2e   :  { %433 = vst.msk [vmem:[%s1304_s4 + $0x8] sm:$0xf] %vm430_vm3, %v368_v7  ;;  %v310_v17 = vmax.f32 %v246_v13, 0.0  ;;  %v311_v18 = vmax.f32 %v247_v14, 0.0  ;;  %v312_v19 = vmax.f32 %v248_v16, 0.0  ;;  %v313_v29 = vmax.f32 %v249_v23, 0.0 }
  0x2f   :  { %434 = vst.msk [vmem:[%s1304_s4 + $0xc] sm:$0xf] %vm430_vm3, %v369_v8  ;;  %v314_v21 = vmax.f32 %v250_v24, 0.0  ;;  %v315_v42 = vmax.f32 %v251_v25, 0.0  ;;  %v252_v22 = vadd.f32 %v837_v15, %v185_v28  ;;  %v253_v26 = vadd.f32 %v837_v15, %v186_v20 }
  0x30   :  { %435 = vst.msk [vmem:[%s1304_s4 + $0x10] sm:$0xf] %vm430_vm3, %v370_v9  ;;  %v374_v43 = vpack.c.bf16 %v310_v17, %v310_v17  ;;  %v375_v30 = vpack.c.bf16 %v311_v18, %v311_v18  ;;  %v376_v31 = vpack.c.bf16 %v312_v19, %v312_v19  ;;  %v377_v32 = vpack.c.bf16 %v313_v29, %v313_v29 }
  0x31   :  { %436 = vst.msk [vmem:[%s1304_s4 + $0x14] sm:$0xf] %vm430_vm3, %v371_v10  ;;  %v378_v34 = vpack.c.bf16 %v314_v21, %v314_v21  ;;  %v379_v35 = vpack.c.bf16 %v315_v42, %v315_v42  ;;  %v316_v36 = vmax.f32 %v252_v22, 0.0  ;;  %v317_v37 = vmax.f32 %v253_v26, 0.0 }
  0x32   :  { %437 = vst.msk [vmem:[%s1304_s4 + $0x18] sm:$0xf] %vm430_vm3, %v372_v11  ;;  %v187_v38 = vmul.f32 %v533_v44, %v817_v63  ;;  %v188_v41 = vmul.f32 %v534_v48, %v817_v63  ;;  %v189_v47 = vmul.f32 %v537_v49, %v817_v63  ;;  %v190_v52 = vmul.f32 %v538_v50, %v817_v63 }
  0x33   :  { %438 = vst.msk [vmem:[%s1304_s4 + $0x1c] sm:$0xf] %vm430_vm3, %v373_v12  ;;  %v380_v57 = vpack.c.bf16 %v316_v36, %v316_v36  ;;  %v381_v62 = vpack.c.bf16 %v317_v37, %v317_v37  ;;  %v191_v27 = vmul.f32 %v541_v53, %v817_v63  ;;  %v192_v44 = vmul.f32 %v542_v54, %v817_v63 }
  0x34   :  { %439 = vst.msk [vmem:[%s1304_s4 + $0x20] sm:$0xf] %vm430_vm3, %v374_v43  ;;  %v254_v33 = vadd.f32 %v837_v15, %v187_v38  ;;  %v255_v48 = vadd.f32 %v837_v15, %v188_v41  ;;  %v256_v49 = vadd.f32 %v837_v15, %v189_v47  ;;  %v257_v50 = vadd.f32 %v837_v15, %v190_v52  ;;  %v644_v41 = vld [vmem:[%s1301_s0 + $0x90] sm:$0xff]  }
  0x35   :  { %440 = vst.msk [vmem:[%s1304_s4 + $0x24] sm:$0xf] %vm430_vm3, %v375_v30  ;;  %v258_v39 = vadd.f32 %v837_v15, %v191_v27  ;;  %v259_v53 = vadd.f32 %v837_v15, %v192_v44  ;;  %v193_v54 = vmul.f32 %v545_v55, %v817_v63  ;;  %v194_v7 = vmul.f32 %v546_v58, %v817_v63 }
  0x36   :  { %441 = vst.msk [vmem:[%s1304_s4 + $0x28] sm:$0xf] %vm430_vm3, %v376_v31  ;;  %v318_v8 = vmax.f32 %v254_v33, 0.0  ;;  %v319_v9 = vmax.f32 %v255_v48, 0.0  ;;  %v320_v10 = vmax.f32 %v256_v49, 0.0  ;;  %v321_v11 = vmax.f32 %v257_v50, 0.0 }
  0x37   :  { %442 = vst.msk [vmem:[%s1304_s4 + $0x2c] sm:$0xf] %vm430_vm3, %v377_v32  ;;  %v322_v12 = vmax.f32 %v258_v39, 0.0  ;;  %v323_v55 = vmax.f32 %v259_v53, 0.0  ;;  %v260_v13 = vadd.f32 %v837_v15, %v193_v54  ;;  %v261_v40 = vadd.f32 %v837_v15, %v194_v7  ;;  %v645_v49 = vld [vmem:[%s1301_s0 + $0x98] sm:$0xff]  }
  0x38   :  { %443 = vst.msk [vmem:[%s1304_s4 + $0x30] sm:$0xf] %vm430_vm3, %v378_v34  ;;  %v382_v58 = vpack.c.bf16 %v318_v8, %v318_v8  ;;  %v383_v14 = vpack.c.bf16 %v319_v9, %v319_v9  ;;  %v384_v16 = vpack.c.bf16 %v320_v10, %v320_v10  ;;  %v385_v23 = vpack.c.bf16 %v321_v11, %v321_v11 }
  0x39   :  { %444 = vst.msk [vmem:[%s1304_s4 + $0x34] sm:$0xf] %vm430_vm3, %v379_v35  ;;  %v386_v24 = vpack.c.bf16 %v322_v12, %v322_v12  ;;  %v387_v25 = vpack.c.bf16 %v323_v55, %v323_v55  ;;  %v324_v28 = vmax.f32 %v260_v13, 0.0  ;;  %v325_v20 = vmax.f32 %v261_v40, 0.0 }
  0x3a   :  { %445 = vst.msk [vmem:[%s1304_s4 + $0x38] sm:$0xf] %vm430_vm3, %v380_v57  ;;  %v195_v17 = vmul.f32 %v549_v59, %v817_v63  ;;  %v196_v18 = vmul.f32 %v550_v60, %v817_v63  ;;  %v197_v19 = vmul.f32 %v553_v61, %v817_v63  ;;  %v198_v29 = vmul.f32 %v554_v0, %v817_v63 }
  0x3b   :  { %446 = vst.msk [vmem:[%s1304_s4 + $0x3c] sm:$0xf] %vm430_vm3, %v381_v62  ;;  %v388_v21 = vpack.c.bf16 %v324_v28, %v324_v28  ;;  %v389_v42 = vpack.c.bf16 %v325_v20, %v325_v20  ;;  %v199_v45 = vmul.f32 %v557_v1, %v817_v63  ;;  %v200_v59 = vmul.f32 %v558_v4, %v817_v63 }
  0x3c   :  { %447 = vst.msk [vmem:[%s1304_s4 + $0x40] sm:$0xf] %vm430_vm3, %v382_v58  ;;  %v262_v46 = vadd.f32 %v837_v15, %v195_v17  ;;  %v263_v60 = vadd.f32 %v837_v15, %v196_v18  ;;  %v264_v61 = vadd.f32 %v837_v15, %v197_v19  ;;  %v265_v0 = vadd.f32 %v837_v15, %v198_v29 }
  0x3d   :  { %448 = vst.msk [vmem:[%s1304_s4 + $0x44] sm:$0xf] %vm430_vm3, %v383_v14  ;;  %v266_v51 = vadd.f32 %v837_v15, %v199_v45  ;;  %v267_v1 = vadd.f32 %v837_v15, %v200_v59  ;;  %v201_v4 = vmul.f32 %v561_v5, %v817_v63  ;;  %v202_v22 = vmul.f32 %v562_v6, %v817_v63  ;;  %v643_v6 = vld [vmem:[%s1301_s0 + $0x88] sm:$0xff]  }
  0x3e   :  { %449 = vst.msk [vmem:[%s1304_s4 + $0x48] sm:$0xf] %vm430_vm3, %v384_v16  ;;  %v326_v26 = vmax.f32 %v262_v46, 0.0  ;;  %v327_v43 = vmax.f32 %v263_v60, 0.0  ;;  %v328_v30 = vmax.f32 %v264_v61, 0.0  ;;  %v329_v31 = vmax.f32 %v265_v0, 0.0 }
  0x3f   :  { %450 = vst.msk [vmem:[%s1304_s4 + $0x4c] sm:$0xf] %vm430_vm3, %v385_v23  ;;  %v330_v32 = vmax.f32 %v266_v51, 0.0  ;;  %v331_v5 = vmax.f32 %v267_v1, 0.0  ;;  %v268_v34 = vadd.f32 %v837_v15, %v201_v4  ;;  %v269_v56 = vadd.f32 %v837_v15, %v202_v22  ;;  %v647_v45 = vld [vmem:[%s1301_s0 + $0xa8] sm:$0xff]   ;;  %v648_v0 = vld [vmem:[%s1301_s0 + $0xb0] sm:$0xff]  }
  0x40   :  { %451 = vst.msk [vmem:[%s1304_s4 + $0x50] sm:$0xf] %vm430_vm3, %v386_v24  ;;  %v390_v35 = vpack.c.bf16 %v326_v26, %v326_v26  ;;  %v391_v36 = vpack.c.bf16 %v327_v43, %v327_v43  ;;  %v392_v37 = vpack.c.bf16 %v328_v30, %v328_v30  ;;  %v393_v38 = vpack.c.bf16 %v329_v31, %v329_v31 }
  0x41   :  { %452 = vst.msk [vmem:[%s1304_s4 + $0x54] sm:$0xf] %vm430_vm3, %v387_v25  ;;  %v394_v47 = vpack.c.bf16 %v330_v32, %v330_v32  ;;  %v395_v52 = vpack.c.bf16 %v331_v5, %v331_v5  ;;  %v332_v57 = vmax.f32 %v268_v34, 0.0  ;;  %v333_v62 = vmax.f32 %v269_v56, 0.0  ;;  %v646_v25 = vld [vmem:[%s1301_s0 + $0xa0] sm:$0xff]   ;;  %v649_v32 = vld [vmem:[%s1301_s0 + $0xb8] sm:$0xff]  }
  0x42   :  { %453 = vst.msk [vmem:[%s1304_s4 + $0x58] sm:$0xf] %vm430_vm3, %v388_v21  ;;  %v203_v27 = vmul.f32 %v565_v2, %v817_v63  ;;  %v566_v44 = vunpack.c.h.bf16 %v824_v3  ;;  %v569_v33 = vunpack.c.l.bf16 %v643_v6  ;;  %v570_v48 = vunpack.c.h.bf16 %v643_v6 }
  0x43   :  { %454 = vst.msk [vmem:[%s1304_s4 + $0x5c] sm:$0xf] %vm430_vm3, %v389_v42  ;;  %v396_v50 = vpack.c.bf16 %v332_v57, %v332_v57  ;;  %v397_v39 = vpack.c.bf16 %v333_v62, %v333_v62  ;;  %v573_v53 = vunpack.c.l.bf16 %v644_v41  ;;  %v574_v54 = vunpack.c.h.bf16 %v644_v41 }
  0x44   :  { %455 = vst.msk [vmem:[%s1304_s4 + $0x60] sm:$0xf] %vm430_vm3, %v390_v35  ;;  %v270_v3 = vadd.f32 %v837_v15, %v203_v27  ;;  %v204_v2 = vmul.f32 %v566_v44, %v817_v63  ;;  %v205_v7 = vmul.f32 %v569_v33, %v817_v63  ;;  %v206_v8 = vmul.f32 %v570_v48, %v817_v63 }
  0x45   :  { %456 = vst.msk [vmem:[%s1304_s4 + $0x64] sm:$0xf] %vm430_vm3, %v391_v36  ;;  %v207_v9 = vmul.f32 %v573_v53, %v817_v63  ;;  %v208_v10 = vmul.f32 %v574_v54, %v817_v63  ;;  %v577_v11 = vunpack.c.l.bf16 %v645_v49  ;;  %v578_v12 = vunpack.c.h.bf16 %v645_v49  ;;  %v650_v53 = vld [vmem:[%s1301_s0 + $0xc0] sm:$0xff]  }
  0x46   :  { %457 = vst.msk [vmem:[%s1304_s4 + $0x68] sm:$0xf] %vm430_vm3, %v392_v37  ;;  %v334_v55 = vmax.f32 %v270_v3, 0.0  ;;  %v271_v13 = vadd.f32 %v837_v15, %v204_v2  ;;  %v272_v40 = vadd.f32 %v837_v15, %v205_v7  ;;  %v273_v58 = vadd.f32 %v837_v15, %v206_v8 }
  0x47   :  { %458 = vst.msk [vmem:[%s1304_s4 + $0x6c] sm:$0xf] %vm430_vm3, %v393_v38  ;;  %v274_v14 = vadd.f32 %v837_v15, %v207_v9  ;;  %v275_v16 = vadd.f32 %v837_v15, %v208_v10  ;;  %v209_v23 = vmul.f32 %v577_v11, %v817_v63  ;;  %v210_v24 = vmul.f32 %v578_v12, %v817_v63  ;;  %v651_v12 = vld [vmem:[%s1301_s0 + $0xc8] sm:$0xff]  }
  0x48   :  { %459 = vst.msk [vmem:[%s1304_s4 + $0x70] sm:$0xf] %vm430_vm3, %v394_v47  ;;  %v398_v28 = vpack.c.bf16 %v334_v55, %v334_v55  ;;  %v335_v20 = vmax.f32 %v271_v13, 0.0  ;;  %v336_v17 = vmax.f32 %v272_v40, 0.0  ;;  %v337_v18 = vmax.f32 %v273_v58, 0.0 }
  0x49   :  { %460 = vst.msk [vmem:[%s1304_s4 + $0x74] sm:$0xf] %vm430_vm3, %v395_v52  ;;  %v338_v19 = vmax.f32 %v274_v14, 0.0  ;;  %v339_v29 = vmax.f32 %v275_v16, 0.0  ;;  %v276_v21 = vadd.f32 %v837_v15, %v209_v23  ;;  %v277_v42 = vadd.f32 %v837_v15, %v210_v24  ;;  %v652_v14 = vld [vmem:[%s1301_s0 + $0xd0] sm:$0xff]  }
  0x4a   :  { %461 = vst.msk [vmem:[%s1304_s4 + $0x78] sm:$0xf] %vm430_vm3, %v396_v50  ;;  %v399_v59 = vpack.c.bf16 %v335_v20, %v335_v20  ;;  %v400_v46 = vpack.c.bf16 %v336_v17, %v336_v17  ;;  %v401_v60 = vpack.c.bf16 %v337_v18, %v337_v18  ;;  %v581_v61 = vunpack.c.l.bf16 %v646_v25 }
  0x4b   :  { %462 = vst.msk [vmem:[%s1304_s4 + $0x7c] sm:$0xf] %vm430_vm3, %v397_v39  ;;  %v402_v51 = vpack.c.bf16 %v338_v19, %v338_v19  ;;  %v403_v1 = vpack.c.bf16 %v339_v29, %v339_v29  ;;  %v340_v4 = vmax.f32 %v276_v21, 0.0  ;;  %v341_v22 = vmax.f32 %v277_v42, 0.0  ;;  %v653_v19 = vld [vmem:[%s1301_s0 + $0xd8] sm:$0xff]  }
  0x4c   :  { %463 = vst.msk [vmem:[%s1304_s4 + $0x80] sm:$0xf] %vm430_vm3, %v398_v28  ;;  %v211_v26 = vmul.f32 %v581_v61, %v817_v63  ;;  %v582_v43 = vunpack.c.h.bf16 %v646_v25  ;;  %v585_v30 = vunpack.c.l.bf16 %v647_v45  ;;  %v586_v31 = vunpack.c.h.bf16 %v647_v45 }
  0x4d   :  { %464 = vst.msk [vmem:[%s1304_s4 + $0x84] sm:$0xf] %vm430_vm3, %v399_v59  ;;  %v404_v5 = vpack.c.bf16 %v340_v4, %v340_v4  ;;  %v405_v34 = vpack.c.bf16 %v341_v22, %v341_v22  ;;  %v589_v56 = vunpack.c.l.bf16 %v648_v0  ;;  %v590_v6 = vunpack.c.h.bf16 %v648_v0 }
  0x4e   :  { %465 = vst.msk [vmem:[%s1304_s4 + $0x88] sm:$0xf] %vm430_vm3, %v400_v46  ;;  %v278_v35 = vadd.f32 %v837_v15, %v211_v26  ;;  %v212_v36 = vmul.f32 %v582_v43, %v817_v63  ;;  %v213_v37 = vmul.f32 %v585_v30, %v817_v63  ;;  %v214_v38 = vmul.f32 %v586_v31, %v817_v63 }
  0x4f   :  { %466 = vst.msk [vmem:[%s1304_s4 + $0x8c] sm:$0xf] %vm430_vm3, %v401_v60  ;;  %v215_v41 = vmul.f32 %v589_v56, %v817_v63  ;;  %v216_v47 = vmul.f32 %v590_v6, %v817_v63  ;;  %v593_v52 = vunpack.c.l.bf16 %v649_v32  ;;  %v594_v57 = vunpack.c.h.bf16 %v649_v32  ;;  %v654_v56 = vld [vmem:[%s1301_s0 + $0xe0] sm:$0xff]  }
  0x50   :  { %467 = vst.msk [vmem:[%s1304_s4 + $0x90] sm:$0xf] %vm430_vm3, %v402_v51  ;;  %v342_v62 = vmax.f32 %v278_v35, 0.0  ;;  %v279_v27 = vadd.f32 %v837_v15, %v212_v36  ;;  %v280_v44 = vadd.f32 %v837_v15, %v213_v37  ;;  %v281_v33 = vadd.f32 %v837_v15, %v214_v38 }
  0x51   :  { %468 = vst.msk [vmem:[%s1304_s4 + $0x94] sm:$0xf] %vm430_vm3, %v403_v1  ;;  %v282_v48 = vadd.f32 %v837_v15, %v215_v41  ;;  %v283_v49 = vadd.f32 %v837_v15, %v216_v47  ;;  %v217_v50 = vmul.f32 %v593_v52, %v817_v63  ;;  %v218_v39 = vmul.f32 %v594_v57, %v817_v63  ;;  %v655_v57 = vld [vmem:[%s1301_s0 + $0xe8] sm:$0xff]  }
  0x52   :  { %469 = vst.msk [vmem:[%s1304_s4 + $0x98] sm:$0xf] %vm430_vm3, %v404_v5  ;;  %v406_v54 = vpack.c.bf16 %v342_v62, %v342_v62  ;;  %v343_v3 = vmax.f32 %v279_v27, 0.0  ;;  %v344_v2 = vmax.f32 %v280_v44, 0.0  ;;  %v345_v7 = vmax.f32 %v281_v33, 0.0 }
  0x53   :  { %470 = vst.msk [vmem:[%s1304_s4 + $0x9c] sm:$0xf] %vm430_vm3, %v405_v34  ;;  %v346_v8 = vmax.f32 %v282_v48, 0.0  ;;  %v347_v9 = vmax.f32 %v283_v49, 0.0  ;;  %v284_v10 = vadd.f32 %v837_v15, %v217_v50  ;;  %v285_v11 = vadd.f32 %v837_v15, %v218_v39  ;;  %v656_v48 = vld [vmem:[%s1301_s0 + $0xf0] sm:$0xff]  }
  0x54   :  { %471 = vst.msk [vmem:[%s1304_s4 + $0xa0] sm:$0xf] %vm430_vm3, %v406_v54  ;;  %v407_v55 = vpack.c.bf16 %v343_v3, %v343_v3  ;;  %v408_v13 = vpack.c.bf16 %v344_v2, %v344_v2  ;;  %v409_v40 = vpack.c.bf16 %v345_v7, %v345_v7  ;;  %v597_v58 = vunpack.c.l.bf16 %v650_v53 }
  0x55   :  { %v410_v16 = vpack.c.bf16 %v346_v8, %v346_v8  ;;  %v411_v23 = vpack.c.bf16 %v347_v9, %v347_v9  ;;  %v348_v24 = vmax.f32 %v284_v10, 0.0  ;;  %v349_v25 = vmax.f32 %v285_v11, 0.0  ;;  %v657_v8 = vld [vmem:[%s1301_s0 + $0xf8] sm:$0xff]  }
  0x56   :  { %472 = vst.msk [vmem:[%s1304_s4 + $0xa4] sm:$0xf] %vm430_vm3, %v407_v55  ;;  %v219_v28 = vmul.f32 %v597_v58, %v817_v63  ;;  %v598_v20 = vunpack.c.h.bf16 %v650_v53  ;;  %v601_v17 = vunpack.c.l.bf16 %v651_v12  ;;  %v602_v18 = vunpack.c.h.bf16 %v651_v12 }
  0x57   :  { %473 = vst.msk [vmem:[%s1304_s4 + $0xa8] sm:$0xf] %vm430_vm3, %v408_v13  ;;  %v412_v29 = vpack.c.bf16 %v348_v24, %v348_v24  ;;  %v413_v21 = vpack.c.bf16 %v349_v25, %v349_v25  ;;  %v605_v42 = vunpack.c.l.bf16 %v652_v14  ;;  %v606_v45 = vunpack.c.h.bf16 %v652_v14 }
  0x58   :  { %474 = vst.msk [vmem:[%s1304_s4 + $0xac] sm:$0xf] %vm430_vm3, %v409_v40  ;;  %v286_v59 = vadd.f32 %v837_v15, %v219_v28  ;;  %v220_v46 = vmul.f32 %v598_v20, %v817_v63  ;;  %v221_v60 = vmul.f32 %v601_v17, %v817_v63  ;;  %v222_v61 = vmul.f32 %v602_v18, %v817_v63 }
  0x59   :  { %475 = vst.msk [vmem:[%s1304_s4 + $0xb0] sm:$0xf] %vm430_vm3, %v410_v16  ;;  %v223_v0 = vmul.f32 %v605_v42, %v817_v63  ;;  %v224_v51 = vmul.f32 %v606_v45, %v817_v63  ;;  %v609_v1 = vunpack.c.l.bf16 %v653_v19  ;;  %v610_v4 = vunpack.c.h.bf16 %v653_v19 }
  0x5a   :  { %476 = vst.msk [vmem:[%s1304_s4 + $0xb4] sm:$0xf] %vm430_vm3, %v411_v23  ;;  %v350_v22 = vmax.f32 %v286_v59, 0.0  ;;  %v287_v26 = vadd.f32 %v837_v15, %v220_v46  ;;  %v288_v43 = vadd.f32 %v837_v15, %v221_v60  ;;  %v289_v30 = vadd.f32 %v837_v15, %v222_v61 }
  0x5b   :  { %477 = vst.msk [vmem:[%s1304_s4 + $0xb8] sm:$0xf] %vm430_vm3, %v412_v29  ;;  %v290_v31 = vadd.f32 %v837_v15, %v223_v0  ;;  %v291_v32 = vadd.f32 %v837_v15, %v224_v51  ;;  %v225_v5 = vmul.f32 %v609_v1, %v817_v63  ;;  %v226_v34 = vmul.f32 %v610_v4, %v817_v63 }
  0x5c   :  { %478 = vst.msk [vmem:[%s1304_s4 + $0xbc] sm:$0xf] %vm430_vm3, %v413_v21  ;;  %v414_v6 = vpack.c.bf16 %v350_v22, %v350_v22  ;;  %v351_v35 = vmax.f32 %v287_v26, 0.0  ;;  %v352_v36 = vmax.f32 %v288_v43, 0.0  ;;  %v353_v37 = vmax.f32 %v289_v30, 0.0 }
  0x5d   :  { %v354_v38 = vmax.f32 %v290_v31, 0.0  ;;  %v355_v41 = vmax.f32 %v291_v32, 0.0  ;;  %v292_v47 = vadd.f32 %v837_v15, %v225_v5  ;;  %v293_v52 = vadd.f32 %v837_v15, %v226_v34 }
  0x5e   :  { %479 = vst.msk [vmem:[%s1304_s4 + $0xc0] sm:$0xf] %vm430_vm3, %v414_v6  ;;  %v415_v62 = vpack.c.bf16 %v351_v35, %v351_v35  ;;  %v416_v27 = vpack.c.bf16 %v352_v36, %v352_v36  ;;  %v417_v44 = vpack.c.bf16 %v353_v37, %v353_v37  ;;  %v613_v33 = vunpack.c.l.bf16 %v654_v56 }
  0x5f   :  { %v418_v49 = vpack.c.bf16 %v354_v38, %v354_v38  ;;  %v419_v50 = vpack.c.bf16 %v355_v41, %v355_v41  ;;  %v356_v39 = vmax.f32 %v292_v47, 0.0  ;;  %v357_v53 = vmax.f32 %v293_v52, 0.0 }
  0x60   :  { %480 = vst.msk [vmem:[%s1304_s4 + $0xc4] sm:$0xf] %vm430_vm3, %v415_v62  ;;  %v227_v54 = vmul.f32 %v613_v33, %v817_v63  ;;  %v614_v3 = vunpack.c.h.bf16 %v654_v56  ;;  %v617_v2 = vunpack.c.l.bf16 %v655_v57  ;;  %v618_v7 = vunpack.c.h.bf16 %v655_v57 }
  0x61   :  { %481 = vst.msk [vmem:[%s1304_s4 + $0xc8] sm:$0xf] %vm430_vm3, %v416_v27  ;;  %v420_v9 = vpack.c.bf16 %v356_v39, %v356_v39  ;;  %v421_v10 = vpack.c.bf16 %v357_v53, %v357_v53  ;;  %v621_v11 = vunpack.c.l.bf16 %v656_v48  ;;  %v622_v12 = vunpack.c.h.bf16 %v656_v48 }
  0x62   :  { %482 = vst.msk [vmem:[%s1304_s4 + $0xcc] sm:$0xf] %vm430_vm3, %v417_v44  ;;  %v294_v55 = vadd.f32 %v837_v15, %v227_v54  ;;  %v228_v13 = vmul.f32 %v614_v3, %v817_v63  ;;  %v229_v40 = vmul.f32 %v617_v2, %v817_v63  ;;  %v230_v58 = vmul.f32 %v618_v7, %v817_v63 }
  0x63   :  { %483 = vst.msk [vmem:[%s1304_s4 + $0xd0] sm:$0xf] %vm430_vm3, %v418_v49  ;;  %v231_v14 = vmul.f32 %v621_v11, %v817_v63  ;;  %v232_v16 = vmul.f32 %v622_v12, %v817_v63  ;;  %v625_v23 = vunpack.c.l.bf16 %v657_v8  ;;  %v626_v24 = vunpack.c.h.bf16 %v657_v8 }
  0x64   :  { %484 = vst.msk [vmem:[%s1304_s4 + $0xd4] sm:$0xf] %vm430_vm3, %v419_v50  ;;  %v358_v25 = vmax.f32 %v294_v55, 0.0  ;;  %v295_v28 = vadd.f32 %v837_v15, %v228_v13  ;;  %v296_v20 = vadd.f32 %v837_v15, %v229_v40  ;;  %v297_v17 = vadd.f32 %v837_v15, %v230_v58 }
  0x65   :  { %485 = vst.msk [vmem:[%s1304_s4 + $0xd8] sm:$0xf] %vm430_vm3, %v420_v9  ;;  %v298_v18 = vadd.f32 %v837_v15, %v231_v14  ;;  %v299_v19 = vadd.f32 %v837_v15, %v232_v16  ;;  %v233_v29 = vmul.f32 %v625_v23, %v817_v63  ;;  %v234_v21 = vmul.f32 %v626_v24, %v817_v63 }
  0x66   :  { %486 = vst.msk [vmem:[%s1304_s4 + $0xdc] sm:$0xf] %vm430_vm3, %v421_v10  ;;  %v422_v42 = vpack.c.bf16 %v358_v25, %v358_v25  ;;  %v359_v45 = vmax.f32 %v295_v28, 0.0  ;;  %v360_v59 = vmax.f32 %v296_v20, 0.0  ;;  %v361_v46 = vmax.f32 %v297_v17, 0.0 }
  0x67   :  { %v362_v60 = vmax.f32 %v298_v18, 0.0  ;;  %v363_v61 = vmax.f32 %v299_v19, 0.0  ;;  %v300_v0 = vadd.f32 %v837_v15, %v233_v29  ;;  %v301_v51 = vadd.f32 %v837_v15, %v234_v21 }
  0x68   :  { %487 = vst.msk [vmem:[%s1304_s4 + $0xe0] sm:$0xf] %vm430_vm3, %v422_v42  ;;  %v423_v63 = vpack.c.bf16 %v359_v45, %v359_v45  ;;  %v424_v1 = vpack.c.bf16 %v360_v59, %v360_v59  ;;  %v425_v4 = vpack.c.bf16 %v361_v46, %v361_v46 }
  0x69   :  { %v426_v22 = vpack.c.bf16 %v362_v60, %v362_v60  ;;  %v364_v26 = vmax.f32 %v300_v0, 0.0  ;;  %v365_v43 = vmax.f32 %v301_v51, 0.0  ;;  %v427_v30 = vpack.c.bf16 %v363_v61, %v363_v61 }
  0x6a   :  { %488 = vst.msk [vmem:[%s1304_s4 + $0xe4] sm:$0xf] %vm430_vm3, %v423_v63 }
  0x6b   :  { %489 = vst.msk [vmem:[%s1304_s4 + $0xe8] sm:$0xf] %vm430_vm3, %v424_v1  ;;  %v428_v15 = vpack.c.bf16 %v364_v26, %v364_v26  ;;  %v429_v31 = vpack.c.bf16 %v365_v43, %v365_v43 }
  0x6c   :  { %490 = vst.msk [vmem:[%s1304_s4 + $0xec] sm:$0xf] %vm430_vm3, %v425_v4 }
  0x6d   :  { %491 = vst.msk [vmem:[%s1304_s4 + $0xf0] sm:$0xf] %vm430_vm3, %v426_v22 }
  0x6e   :  { %492 = vst.msk [vmem:[%s1304_s4 + $0xf4] sm:$0xf] %vm430_vm3, %v427_v30 }
  0x6f   :  { %493 = vst.msk [vmem:[%s1304_s4 + $0xf8] sm:$0xf] %vm430_vm3, %v428_v15 }
  0x70   :  { %494 = vst.msk [vmem:[%s1304_s4 + $0xfc] sm:$0xf] %vm430_vm3, %v429_v31 }

// kernel: resnet_generator_forward.27
= control target key start
LH: loop header
LB: loop body
LE: loop exit
PB: predicated region body
PF: predicated region fallthrough
CT: control target
= control target key end

     0   :  { %s634_s15 = smov 0   ;;  %s636_s16 = smov 0   ;;  %s749_s0 = inlined_call_operand.vmem [shape: bf16[2,18,8,24], index: 0, kind: input, shape index: {}]   ;;  %s750_s1 = inlined_call_operand.vmem [shape: bf16[3,24,16], index: 1, kind: input, shape index: {}]   ;;  %s751_s2 = inlined_call_operand.vmem [shape: f32[1,16], index: 2, kind: input, shape index: {}]   ;;  %s752_s3 = inlined_call_operand.vmem [shape: bf16[2,8,8,16], index: 3, kind: output, shape index: {0}]   ;;  %s753_s4 = inlined_call_operand.vmem [shape: f32[2,16], index: 4, kind: output, shape index: {1}]  }
   0x1   :  { %s638_s17 = smov 0   ;;  %s640_s18 = smov 0  }
   0x2   :  { %s642_s19 = smov 0   ;;  %s644_s20 = smov 0  }
   0x3   :  { %s646_s21 = smov 0  }
   0x4 LB: > { %s27_s22 = sadd.s32 1, %s593_s18  ;;  %s30_s23 = sadd.s32 1, %s597_s19  ;;  %s605_s21 = sphi %s646_s21, %s15_s21   ;;  %s601_s20 = sphi %s644_s20, %s759_s20   ;;  %s597_s19 = sphi %s642_s19, %s758_s19   ;;  %s593_s18 = sphi %s640_s18, %s757_s18   ;;  %s589_s17 = sphi %s638_s17, %s756_s17   ;;  %s585_s16 = sphi %s636_s16, %s755_s16   ;;  %s581_s15 = sphi %s634_s15, %s754_s15  }
   0x5   : > { %p28_p0 = scmp.ge.s32.totalorder %s27_s22, 3  ;;  %p474_p1 = scmp.ge.s32.totalorder %s605_s21, 1 }
   0x6   : > { %p204_p2 = scmp.lt.s32.totalorder %s605_s21, 49  ;;  %s34_s24 = sadd.s32 1, %s601_s20 }
   0x7   : > { %s761_s22 = smov (%p28_p0, %s27_s22), 0  ;;  %s763_s23 = smov (!%p28_p0, %s30_s23), %s597_s19 }
   0x8   : > { %p205_p3 = pnand %p474_p1, %p204_p2  ;;  %p32_p4 = scmp.ge.s32.totalorder %s763_s23, 8 }
   0x9   : > { %s475_s25 = sshll.u32 (!%p205_p3), %s585_s16, 1  ;;  %p245_p6 = scmp.lt.s32.totalorder (!%p205_p3), %s589_s17, 1 }
   0xa   : > { %s765_s23 = smov (%p32_p4, %s763_s23), 0  ;;  %s767_s24 = smov (!%p32_p4, %s34_s24), %s601_s20 }
   0xb   : > { %p36_p5 = scmp.ge.s32.totalorder %s767_s24, 2  ;;  %208 = sbr.rel (%p205_p3) target bundleno = 213 (0xd5), region = 32 }
   0xc   : > { %s244_s26 = sadd.s32 (!%p205_p3), %s581_s15, %s475_s25  ;;  %p255_p7 = scmp.lt.s32.totalorder (!%p205_p3), %s581_s15, 2 }
   0xd   : > { %s769_s24 = smov (%p36_p5, %s767_s24), 0  ;;  %p247_p8 = scmp.lt.s32.totalorder (!%p205_p3), %s244_s26, 17 }
   0xe   : > { %p262_p9 = scmp.lt.s32.totalorder (!%p205_p3), %s585_s16, 7  ;;  %p269_p10 = scmp.eq.s32.totalorder (!%p205_p3), %s589_s17, 0 }
   0xf   : > { %p270_p11 = scmp.eq.s32.totalorder (!%p205_p3), %s585_s16, 0  ;;  %p273_p13 = scmp.eq.s32.totalorder (!%p205_p3), %s581_s15, 0 }
  0x10   : > { %s246_s27 = scalar_select %p245_p6, %s589_s17, 1 }
  0x11   : > { %s771_s26 = smov (!%p247_p8, %s244_s26), 17  ;;  %s773_s16 = smov (!%p262_p9, %s585_s16), 7 }
  0x12   : > { %s490_s28 = smul.u32 18, %s246_s27  ;;  %s478_s13 = sshll.u32 %s246_s27, 3 }
  0x13   : > { %s256_s29 = scalar_select %p255_p7, %s581_s15, 2 }
  0x14   : > { %s250_s30 = sadd.s32 %s490_s28, %s771_s26  ;;  %p271_p12 = pnand %p270_p11, %p269_p10 }
  0x15   : > { %s476_s5 = sshll.u32 %s250_s30, 2  ;;  %s491_s6 = smul.u32 12, %s256_s29 }
  0x16   : > { %s693_s9 = scalar_lea.vmem %s749_s0, %s476_s5  ;;  %s265_s14 = sadd.s32 %s478_s13, %s773_s16 }
  0x17   : > { %s259_s12 = scalar_lea.vmem %s750_s1, %s491_s6  ;;  %s479_s25 = sshll.u32 %s265_s14, 2 }
  0x18   : > { %p272_p0 = pneg %p271_p12  ;;  %s704_s28 = scalar_lea.vmem %s752_s3, %s479_s25 }
  0x1a   : > { %p274_p1 = pnand %p273_p13, %p272_p0 }
  0x1c   : > { %277 = sbr.rel (%p274_p1) target bundleno = 35 (0x23), region = 36 }
  0x21   : > { %vm278_vm0 = vcmask 123904   ;;  %v607_v0 = vmov 0.0  }
  0x22   : > { %279 = vst.msk [vmem:[%s753_s4] sm:$0x3] %vm278_vm0, %v607_v0 }
  0x23 PF: > { %p480_p2 = scmp.ne.s32.totalorder %s581_s15, 0 }
  0x25   : > { %282 = sbr.rel (%p480_p2) target bundleno = 44 (0x2c), region = 40 }
  0x2a   : > { %vm283_vm1 = vcmask 130048   ;;  %v608_v1 = vmov 0.0  }
  0x2b   : > { %284 = vst.msk [vmem:[#allocation2] sm:$0xff] %vm283_vm1, %v608_v1 }
  0x2c PF: > { %v288_v2 = vld [vmem:[%s259_s12 + $0x8] sm:$0xf]  ;;  %vm303_vm2 = vcmask 1043456   ;;  %v489_v6 = vld [vmem:[%s259_s12] sm:$0xff]  ;;  %vm299_vm3 = vcmask 195584   ;;  %vm321_vm4 = vcmask 130048  }
  0x2d   : > { %v295_v3 = vunpack.c.l.b16 %v288_v2  ;;  %v285_v7 = vld [vmem:[%s693_s9] sm:$0xf]  ;;  %p486_p3 = scmp.ne.s32.totalorder %s581_s15, 2 }
  0x2f   : > { %v297_v4 = vpack.c.b16 %v295_v3, %v295_v3 }
  0x31   : > { %v305_v5 = vsel %vm303_vm2, %v297_v4, 0 }
  0x32   : > { %313 = vmatpush.bf16.msra.mxu0 %v305_v5  ;;  %v289_v8 = vld [vmem:[#allocation2] sm:$0xff] }
  0x36   : > { %314 = vmatpush.bf16.msra.mxu0 %v489_v6 }
  0x39   : > { %485 = vmatmul.msk.bf16.vlgmr.msra.gmra.mxu0 %vm299_vm3, %v285_v7 }
  0xb6   : > { %v316_v9 = vpop.f32.mrf.mxu0 }
  0xb7   : > { %v320_v10 = vadd.f32 %v316_v9, %v289_v8 }
  0xb9   : > { %322 = vst.msk [vmem:[#allocation2] sm:$0xff] %vm321_vm4, %v320_v10 }
  0xba   : > { %326 = sbr.rel (%p486_p3) target bundleno = 213 (0xd5), region = 44 }
  0xbe   : > { %v318_v11 = vpop.f32.mrf.mxu0 }
  0xbf   : > { %v550_v13 = vld [vmem:[%s751_s2] ss:$0 sm:$0xff]  ;;  %vm334_vm5 = vcmask 125952   ;;  %vm345_vm6 = vcmask 122880   ;;  %v347_v31 = vld [vmem:[%s753_s4 + $0x1] sm:$0x1] }
  0xc0   : > { %v327_v12 = vld [vmem:[#allocation2] sm:$0xff] }
  0xc1   : > { %v332_v14 = vadd.f32 %v550_v13, %v327_v12  ;;  %v336_v28 = vld [vmem:[%s753_s4] sm:$0x1] }
  0xc3   : > { %v333_v15 = vpack.c.bf16 %v332_v14, %v332_v14  ;;  %v337_v16 = vsel %vm321_vm4, %v332_v14, 0.0  ;;  %v348_v17 = vmul.f32 %v332_v14, %v332_v14 }
  0xc4   : > { %v338_v18 = vrot.slane %v337_v16, 4 }
  0xc5   : > { %335 = vst.msk [vmem:[%s704_s28] sm:$0xf] %vm334_vm5, %v333_v15  ;;  %v349_v19 = vsel %vm321_vm4, %v348_v17, 0.0 }
  0xc6   : > { %v339_v20 = vadd.f32 %v338_v18, %v337_v16  ;;  %v350_v21 = vrot.slane %v349_v19, 4 }
  0xc8   : > { %v340_v22 = vrot.slane %v339_v20, 2  ;;  %v351_v23 = vadd.f32 %v350_v21, %v349_v19 }
  0xca   : > { %v341_v24 = vadd.f32 %v340_v22, %v339_v20  ;;  %v352_v25 = vrot.slane %v351_v23, 2 }
  0xcc   : > { %v342_v26 = vrot.slane %v341_v24, 1  ;;  %v353_v27 = vadd.f32 %v352_v25, %v351_v23 }
  0xce   : > { %v343_v29 = vadd.f32 %v342_v26, %v341_v24  ;;  %v354_v30 = vrot.slane %v353_v27, 1 }
  0xd0   : > { %v344_v32 = vadd.f32 %v343_v29, %v336_v28  ;;  %v355_v33 = vadd.f32 %v354_v30, %v353_v27 }
  0xd2   : > { %346 = vst.msk [vmem:[%s753_s4] sm:$0x1] %vm345_vm6, %v344_v32  ;;  %v356_v34 = vadd.f32 %v355_v33, %v347_v31 }
  0xd4   : > { %357 = vst.msk [vmem:[%s753_s4 + $0x1] sm:$0x1] %vm345_vm6, %v356_v34 }
  0xd5 PF: > { %s15_s21 = sadd.s32 1, %s605_s21   ;;  %s754_s15 = smov %s593_s18 }
  0xd6   : > { %p12_p4 = scmp.ge.s32.totalorder %s15_s21, 50   ;;  %s755_s16 = smov %s597_s19 }
  0xd7   : > { %s756_s17 = smov %s601_s20  ;;  %s757_s18 = smov %s761_s22 }
  0xd8   : > { %s758_s19 = smov %s765_s23  ;;  %s759_s20 = smov %s769_s24 }
  0xd9   :  { %14 = sbr.rel (!%p12_p4) target bundleno = 4 (0x4), region = 85 }

// kernel: resnet_generator_forward.28
= control target key start
LH: loop header
LB: loop body
LE: loop exit
PB: predicated region body
PF: predicated region fallthrough
CT: control target
= control target key end

     0   :  { %vm142_vm3 = vcmask 125952   ;;  %s329_s1 = inlined_call_operand.vmem [shape: f32[2,16], index: 1, kind: input, shape index: {}]   ;;  %s330_s0 = inlined_call_operand.vmem [shape: bf16[128,16], index: 0, kind: input, shape index: {}]   ;;  %s331_s2 = inlined_call_operand.vmem [shape: f32[1,16], index: 2, kind: input, shape index: {}]   ;;  %s332_s3 = inlined_call_operand.vmem [shape: f32[1,16], index: 3, kind: input, shape index: {}]   ;;  %s333_s4 = inlined_call_operand.vmem [shape: bf16[128,16], index: 4, kind: output, shape index: {}]  }
   0x1   :  { %v17_v0 = vld [vmem:[%s329_s1] sm:$0x1]  ;;  %v19_v1 = vld [vmem:[%s329_s1 + $0x1] sm:$0x1]  ;;  %v195_v16 = vld [vmem:[%s330_s0 + $0x8] sm:$0xff]  }
   0x2   :  { %v18_v2 = vmul.f32 0.0078125, %v17_v0  ;;  %v20_v3 = vmul.f32 0.0078125, %v19_v1  ;;  %v164_v13 = vld [vmem:[%s330_s0] sm:$0xff]   ;;  %v196_v17 = vld [vmem:[%s330_s0 + $0x10] sm:$0xff]   ;;  %v197_v18 = vld [vmem:[%s330_s0 + $0x18] sm:$0xff]   ;;  %v169_v24 = vunpack.c.l.bf16 %v195_v16  ;;  %v170_v25 = vunpack.c.h.bf16 %v195_v16 }
   0x3   :  { %v24_v14 = vld [vmem:[%s331_s2] sm:$0x1]  ;;  %v165_v20 = vunpack.c.l.bf16 %v164_v13  ;;  %v166_v23 = vunpack.c.h.bf16 %v164_v13  ;;  %v199_v26 = vld [vmem:[%s330_s0 + $0x28] sm:$0xff]   ;;  %v200_v27 = vld [vmem:[%s330_s0 + $0x30] sm:$0xff]   ;;  %v173_v29 = vunpack.c.l.bf16 %v196_v17  ;;  %v174_v30 = vunpack.c.h.bf16 %v196_v17 }
   0x4   :  { %v21_v4 = vmul.f32 %v18_v2, %v18_v2  ;;  %v198_v21 = vld [vmem:[%s330_s0 + $0x20] sm:$0xff]   ;;  %v177_v31 = vunpack.c.l.bf16 %v197_v18  ;;  %v178_v32 = vunpack.c.h.bf16 %v197_v18  ;;  %v185_v37 = vunpack.c.l.bf16 %v199_v26  ;;  %v201_v41 = vld [vmem:[%s330_s0 + $0x38] sm:$0xff]  }
   0x5   :  { %v37_v28 = vld [vmem:[%s332_s3] sm:$0x1]  ;;  %v181_v35 = vunpack.c.l.bf16 %v198_v21  ;;  %v182_v36 = vunpack.c.h.bf16 %v198_v21  ;;  %v186_v38 = vunpack.c.h.bf16 %v199_v26  ;;  %v189_v39 = vunpack.c.l.bf16 %v200_v27 }
   0x6   :  { %v22_v5 = vsub.f32 %v20_v3, %v21_v4  ;;  %v190_v40 = vunpack.c.h.bf16 %v200_v27  ;;  %v193_v52 = vunpack.c.l.bf16 %v201_v41  ;;  %v194_v53 = vunpack.c.h.bf16 %v201_v41 }
   0x8   :  { %v23_v6 = vmax.f32 %v22_v5, 0.0 }
   0xa   :  { %v25_v7 = vadd.f32 1e-05, %v23_v6 }
   0xc   :  { %202 = vrsqrt.f32 %v25_v7  ;;  %vm32_vm0 = vweird.f32 %v25_v7 }
  0x12   :  { %v203_v8 = vpop.eup %202 }
  0x13   :  { %v27_v9 = vmul.f32 %v203_v8, %v25_v7  ;;  %vm33_vm1 = vweird.f32 %v203_v8 }
  0x14   :  { %vm34_vm2 = vmor %vm32_vm0, %vm33_vm1 }
  0x15   :  { %v28_v10 = vmul.f32 %v203_v8, %v27_v9 }
  0x17   :  { %v29_v11 = vmul.f32 0.5, %v28_v10 }
  0x19   :  { %v30_v12 = vsub.f32 1.5, %v29_v11 }
  0x1b   :  { %v31_v15 = vmul.f32 %v203_v8, %v30_v12 }
  0x1d   :  { %v35_v19 = vsel %vm34_vm2, %v203_v8, %v31_v15 }
  0x1e   :  { %v36_v22 = vmul.f32 %v35_v19, %v24_v14 }
  0x20   :  { %v38_v33 = vmul.f32 %v36_v22, %v18_v2  ;;  %v73_v34 = vperm.slane %v36_v22, 0 }
  0x22   :  { %v39_v42 = vsub.f32 %v37_v28, %v38_v33  ;;  %v75_v43 = vmul.f32 %v165_v20, %v73_v34  ;;  %v76_v44 = vmul.f32 %v166_v23, %v73_v34  ;;  %v77_v45 = vmul.f32 %v169_v24, %v73_v34 }
  0x23   :  { %v78_v46 = vmul.f32 %v170_v25, %v73_v34  ;;  %v79_v47 = vmul.f32 %v173_v29, %v73_v34  ;;  %v80_v48 = vmul.f32 %v174_v30, %v73_v34  ;;  %v81_v49 = vmul.f32 %v177_v31, %v73_v34 }
  0x24   :  { %v92_v50 = vperm.slane %v39_v42, 0  ;;  %v82_v51 = vmul.f32 %v178_v32, %v73_v34  ;;  %v83_v54 = vmul.f32 %v181_v35, %v73_v34  ;;  %v84_v55 = vmul.f32 %v182_v36, %v73_v34 }
  0x25   :  { %v85_v56 = vmul.f32 %v185_v37, %v73_v34  ;;  %v86_v57 = vmul.f32 %v186_v38, %v73_v34  ;;  %v87_v8 = vmul.f32 %v189_v39, %v73_v34  ;;  %v88_v9 = vmul.f32 %v190_v40, %v73_v34 }
  0x26   :  { %v94_v58 = vadd.f32 %v92_v50, %v75_v43  ;;  %v95_v59 = vadd.f32 %v92_v50, %v76_v44  ;;  %v96_v60 = vadd.f32 %v92_v50, %v77_v45  ;;  %v97_v61 = vadd.f32 %v92_v50, %v78_v46 }
  0x27   :  { %v98_v62 = vadd.f32 %v92_v50, %v79_v47  ;;  %v99_v63 = vadd.f32 %v92_v50, %v80_v48  ;;  %v100_v0 = vadd.f32 %v92_v50, %v81_v49  ;;  %v101_v1 = vadd.f32 %v92_v50, %v82_v51 }
  0x28   :  { %v110_v2 = vmax.f32 %v94_v58, 0.0  ;;  %v111_v3 = vmax.f32 %v95_v59, 0.0  ;;  %v112_v4 = vmax.f32 %v96_v60, 0.0  ;;  %v113_v5 = vmax.f32 %v97_v61, 0.0 }
  0x29   :  { %v114_v6 = vmax.f32 %v98_v62, 0.0  ;;  %v115_v7 = vmax.f32 %v99_v63, 0.0  ;;  %v116_v13 = vmax.f32 %v100_v0, 0.0  ;;  %v117_v17 = vmax.f32 %v101_v1, 0.0 }
  0x2a   :  { %v126_v10 = vpack.c.bf16 %v110_v2, %v110_v2  ;;  %v127_v11 = vpack.c.bf16 %v111_v3, %v111_v3  ;;  %v128_v12 = vpack.c.bf16 %v112_v4, %v112_v4  ;;  %v129_v14 = vpack.c.bf16 %v113_v5, %v113_v5 }
  0x2b   :  { %v130_v15 = vpack.c.bf16 %v114_v6, %v114_v6  ;;  %v131_v16 = vpack.c.bf16 %v115_v7, %v115_v7  ;;  %v102_v18 = vadd.f32 %v92_v50, %v83_v54  ;;  %v103_v19 = vadd.f32 %v92_v50, %v84_v55 }
  0x2c   :  { %143 = vst.msk [vmem:[%s333_s4] sm:$0xf] %vm142_vm3, %v126_v10  ;;  %v104_v20 = vadd.f32 %v92_v50, %v85_v56  ;;  %v105_v21 = vadd.f32 %v92_v50, %v86_v57  ;;  %v106_v22 = vadd.f32 %v92_v50, %v87_v8  ;;  %v107_v23 = vadd.f32 %v92_v50, %v88_v9 }
  0x2d   :  { %144 = vst.msk [vmem:[%s333_s4 + $0x4] sm:$0xf] %vm142_vm3, %v127_v11  ;;  %v89_v24 = vmul.f32 %v193_v52, %v73_v34  ;;  %v90_v25 = vmul.f32 %v194_v53, %v73_v34  ;;  %v132_v26 = vpack.c.bf16 %v116_v13, %v116_v13  ;;  %v118_v27 = vmax.f32 %v102_v18, 0.0 }
  0x2e   :  { %145 = vst.msk [vmem:[%s333_s4 + $0x8] sm:$0xf] %vm142_vm3, %v128_v12  ;;  %v119_v28 = vmax.f32 %v103_v19, 0.0  ;;  %v120_v29 = vmax.f32 %v104_v20, 0.0  ;;  %v133_v30 = vpack.c.bf16 %v117_v17, %v117_v17  ;;  %v121_v31 = vmax.f32 %v105_v21, 0.0 }
  0x2f   :  { %146 = vst.msk [vmem:[%s333_s4 + $0xc] sm:$0xf] %vm142_vm3, %v129_v14  ;;  %v108_v32 = vadd.f32 %v92_v50, %v89_v24  ;;  %v109_v33 = vadd.f32 %v92_v50, %v90_v25  ;;  %v134_v34 = vpack.c.bf16 %v118_v27, %v118_v27  ;;  %v122_v35 = vmax.f32 %v106_v22, 0.0 }
  0x30   :  { %147 = vst.msk [vmem:[%s333_s4 + $0x10] sm:$0xf] %vm142_vm3, %v130_v15  ;;  %v135_v36 = vpack.c.bf16 %v119_v28, %v119_v28  ;;  %v123_v37 = vmax.f32 %v107_v23, 0.0  ;;  %v136_v38 = vpack.c.bf16 %v120_v29, %v120_v29  ;;  %v137_v40 = vpack.c.bf16 %v121_v31, %v121_v31 }
  0x31   :  { %148 = vst.msk [vmem:[%s333_s4 + $0x14] sm:$0xf] %vm142_vm3, %v131_v16  ;;  %v124_v39 = vmax.f32 %v108_v32, 0.0  ;;  %v125_v41 = vmax.f32 %v109_v33, 0.0  ;;  %v138_v42 = vpack.c.bf16 %v122_v35, %v122_v35 }
  0x32   :  { %149 = vst.msk [vmem:[%s333_s4 + $0x18] sm:$0xf] %vm142_vm3, %v132_v26  ;;  %v139_v43 = vpack.c.bf16 %v123_v37, %v123_v37 }
  0x33   :  { %150 = vst.msk [vmem:[%s333_s4 + $0x1c] sm:$0xf] %vm142_vm3, %v133_v30  ;;  %v140_v44 = vpack.c.bf16 %v124_v39, %v124_v39  ;;  %v141_v45 = vpack.c.bf16 %v125_v41, %v125_v41 }
  0x34   :  { %151 = vst.msk [vmem:[%s333_s4 + $0x20] sm:$0xf] %vm142_vm3, %v134_v34 }
  0x35   :  { %152 = vst.msk [vmem:[%s333_s4 + $0x24] sm:$0xf] %vm142_vm3, %v135_v36 }
  0x36   :  { %153 = vst.msk [vmem:[%s333_s4 + $0x28] sm:$0xf] %vm142_vm3, %v136_v38 }
  0x37   :  { %154 = vst.msk [vmem:[%s333_s4 + $0x2c] sm:$0xf] %vm142_vm3, %v137_v40 }
  0x38   :  { %155 = vst.msk [vmem:[%s333_s4 + $0x30] sm:$0xf] %vm142_vm3, %v138_v42 }
  0x39   :  { %156 = vst.msk [vmem:[%s333_s4 + $0x34] sm:$0xf] %vm142_vm3, %v139_v43 }
  0x3a   :  { %157 = vst.msk [vmem:[%s333_s4 + $0x38] sm:$0xf] %vm142_vm3, %v140_v44 }
  0x3b   :  { %158 = vst.msk [vmem:[%s333_s4 + $0x3c] sm:$0xf] %vm142_vm3, %v141_v45 }

// kernel: resnet_generator_forward.30
= control target key start
LH: loop header
LB: loop body
LE: loop exit
PB: predicated region body
PF: predicated region fallthrough
CT: control target
= control target key end

     0   :  { %vm70_vm3 = vcmask 257024   ;;  %s145_s1 = inlined_call_operand.vmem [shape: f32[2,32], index: 1, kind: input, shape index: {}]   ;;  %s146_s0 = inlined_call_operand.vmem [shape: bf16[32,32], index: 0, kind: input, shape index: {}]   ;;  %s147_s2 = inlined_call_operand.vmem [shape: f32[1,32], index: 2, kind: input, shape index: {}]   ;;  %s148_s3 = inlined_call_operand.vmem [shape: f32[1,32], index: 3, kind: input, shape index: {}]   ;;  %s149_s4 = inlined_call_operand.vmem [shape: bf16[32,32], index: 4, kind: output, shape index: {}]  }
   0x1   :  { %v17_v0 = vld [vmem:[%s145_s1] sm:$0x1]  ;;  %v19_v1 = vld [vmem:[%s145_s1 + $0x1] sm:$0x1]  ;;  %v87_v16 = vld [vmem:[%s146_s0 + $0x8] sm:$0xff]  }
   0x2   :  { %v18_v2 = vmul.f32 0.03125, %v17_v0  ;;  %v20_v3 = vmul.f32 0.03125, %v19_v1  ;;  %v24_v13 = vld [vmem:[%s147_s2] sm:$0x1]  ;;  %v85_v21 = vunpack.c.l.bf16 %v87_v16  ;;  %v86_v23 = vunpack.c.h.bf16 %v87_v16 }
   0x3   :  { %v80_v15 = vld [vmem:[%s146_s0] sm:$0xff]  }
   0x4   :  { %v21_v4 = vmul.f32 %v18_v2, %v18_v2  ;;  %v81_v19 = vunpack.c.l.bf16 %v80_v15  ;;  %v82_v20 = vunpack.c.h.bf16 %v80_v15  ;;  %v37_v22 = vld [vmem:[%s148_s3] sm:$0x1] }
   0x6   :  { %v22_v5 = vsub.f32 %v20_v3, %v21_v4 }
   0x8   :  { %v23_v6 = vmax.f32 %v22_v5, 0.0 }
   0xa   :  { %v25_v7 = vadd.f32 1e-05, %v23_v6 }
   0xc   :  { %88 = vrsqrt.f32 %v25_v7  ;;  %vm32_vm0 = vweird.f32 %v25_v7 }
  0x12   :  { %v89_v8 = vpop.eup %88 }
  0x13   :  { %v27_v9 = vmul.f32 %v89_v8, %v25_v7  ;;  %vm33_vm1 = vweird.f32 %v89_v8 }
  0x14   :  { %vm34_vm2 = vmor %vm32_vm0, %vm33_vm1 }
  0x15   :  { %v28_v10 = vmul.f32 %v89_v8, %v27_v9 }
  0x17   :  { %v29_v11 = vmul.f32 0.5, %v28_v10 }
  0x19   :  { %v30_v12 = vsub.f32 1.5, %v29_v11 }
  0x1b   :  { %v31_v14 = vmul.f32 %v89_v8, %v30_v12 }
  0x1d   :  { %v35_v17 = vsel %vm34_vm2, %v89_v8, %v31_v14 }
  0x1e   :  { %v36_v18 = vmul.f32 %v35_v17, %v24_v13 }
  0x20   :  { %v38_v24 = vmul.f32 %v36_v18, %v18_v2  ;;  %v49_v25 = vperm.slane %v36_v18, 0 }
  0x22   :  { %v39_v26 = vsub.f32 %v37_v22, %v38_v24  ;;  %v51_v27 = vmul.f32 %v81_v19, %v49_v25  ;;  %v52_v28 = vmul.f32 %v82_v20, %v49_v25  ;;  %v53_v29 = vmul.f32 %v85_v21, %v49_v25 }
  0x23   :  { %v54_v30 = vmul.f32 %v86_v23, %v49_v25 }
  0x24   :  { %v56_v31 = vperm.slane %v39_v26, 0 }
  0x26   :  { %v58_v32 = vadd.f32 %v56_v31, %v51_v27  ;;  %v59_v33 = vadd.f32 %v56_v31, %v52_v28  ;;  %v60_v34 = vadd.f32 %v56_v31, %v53_v29  ;;  %v61_v35 = vadd.f32 %v56_v31, %v54_v30 }
  0x28   :  { %v62_v36 = vmax.f32 %v58_v32, 0.0  ;;  %v63_v37 = vmax.f32 %v59_v33, 0.0  ;;  %v64_v38 = vmax.f32 %v60_v34, 0.0  ;;  %v65_v39 = vmax.f32 %v61_v35, 0.0 }
  0x2a   :  { %v66_v40 = vpack.c.bf16 %v62_v36, %v62_v36  ;;  %v67_v41 = vpack.c.bf16 %v63_v37, %v63_v37  ;;  %v68_v42 = vpack.c.bf16 %v64_v38, %v64_v38  ;;  %v69_v43 = vpack.c.bf16 %v65_v39, %v65_v39 }
  0x2c   :  { %71 = vst.msk [vmem:[%s149_s4] sm:$0xf] %vm70_vm3, %v66_v40 }
  0x2d   :  { %72 = vst.msk [vmem:[%s149_s4 + $0x4] sm:$0xf] %vm70_vm3, %v67_v41 }
  0x2e   :  { %73 = vst.msk [vmem:[%s149_s4 + $0x8] sm:$0xf] %vm70_vm3, %v68_v42 }
  0x2f   :  { %74 = vst.msk [vmem:[%s149_s4 + $0xc] sm:$0xf] %vm70_vm3, %v69_v43 }

// kernel: resnet_generator_forward.29
= control target key start
LH: loop header
LB: loop body
LE: loop exit
PB: predicated region body
PF: predicated region fallthrough
CT: control target
= control target key end

     0   :  { %s652_s15 = smov 0   ;;  %s654_s16 = smov 0   ;;  %s764_s0 = inlined_call_operand.vmem [shape: bf16[2,10,4,48], index: 0, kind: input, shape index: {}]   ;;  %s765_s1 = inlined_call_operand.vmem [shape: bf16[3,48,32], index: 1, kind: input, shape index: {}]   ;;  %s766_s2 = inlined_call_operand.vmem [shape: f32[1,32], index: 2, kind: input, shape index: {}]   ;;  %s767_s3 = inlined_call_operand.vmem [shape: bf16[2,4,4,32], index: 3, kind: output, shape index: {0}]   ;;  %s768_s4 = inlined_call_operand.vmem [shape: f32[2,32], index: 4, kind: output, shape index: {1}]  }
   0x1   :  { %s656_s17 = smov 0   ;;  %s658_s18 = smov 0  }
   0x2   :  { %s660_s19 = smov 0   ;;  %s662_s20 = smov 0  }
   0x3   :  { %s664_s21 = smov 0  }
   0x4 LB: > { %s27_s22 = sadd.s32 1, %s611_s18  ;;  %s30_s23 = sadd.s32 1, %s615_s19  ;;  %s623_s21 = sphi %s664_s21, %s15_s21   ;;  %s619_s20 = sphi %s662_s20, %s774_s20   ;;  %s615_s19 = sphi %s660_s19, %s773_s19   ;;  %s611_s18 = sphi %s658_s18, %s772_s18   ;;  %s607_s17 = sphi %s656_s17, %s771_s17   ;;  %s603_s16 = sphi %s654_s16, %s770_s16   ;;  %s599_s15 = sphi %s652_s15, %s769_s15  }
   0x5   : > { %p28_p0 = scmp.ge.s32.totalorder %s27_s22, 3  ;;  %p482_p1 = scmp.ge.s32.totalorder %s623_s21, 1 }
   0x6   : > { %p204_p2 = scmp.lt.s32.totalorder %s623_s21, 25  ;;  %s34_s24 = sadd.s32 1, %s619_s20 }
   0x7   : > { %s776_s22 = smov (%p28_p0, %s27_s22), 0  ;;  %s778_s23 = smov (!%p28_p0, %s30_s23), %s615_s19 }
   0x8   : > { %p205_p3 = pnand %p482_p1, %p204_p2  ;;  %p32_p4 = scmp.ge.s32.totalorder %s778_s23, 4 }
   0x9   : > { %s483_s25 = sshll.u32 (!%p205_p3), %s603_s16, 1  ;;  %p245_p6 = scmp.lt.s32.totalorder (!%p205_p3), %s607_s17, 1 }
   0xa   : > { %s780_s23 = smov (%p32_p4, %s778_s23), 0  ;;  %s782_s24 = smov (!%p32_p4, %s34_s24), %s619_s20 }
   0xb   : > { %p36_p5 = scmp.ge.s32.totalorder %s782_s24, 2  ;;  %208 = sbr.rel (%p205_p3) target bundleno = 212 (0xd4), region = 32 }
   0xc   : > { %s244_s26 = sadd.s32 (!%p205_p3), %s599_s15, %s483_s25  ;;  %p255_p7 = scmp.lt.s32.totalorder (!%p205_p3), %s599_s15, 2 }
   0xd   : > { %s784_s24 = smov (%p36_p5, %s782_s24), 0  ;;  %p247_p8 = scmp.lt.s32.totalorder (!%p205_p3), %s244_s26, 9 }
   0xe   : > { %p262_p9 = scmp.lt.s32.totalorder (!%p205_p3), %s603_s16, 3  ;;  %p269_p10 = scmp.eq.s32.totalorder (!%p205_p3), %s607_s17, 0 }
   0xf   : > { %p270_p11 = scmp.eq.s32.totalorder (!%p205_p3), %s603_s16, 0  ;;  %p273_p13 = scmp.eq.s32.totalorder (!%p205_p3), %s599_s15, 0 }
  0x10   : > { %s246_s27 = scalar_select %p245_p6, %s607_s17, 1 }
  0x11   : > { %s786_s26 = smov (!%p247_p8, %s244_s26), 9  ;;  %s788_s16 = smov (!%p262_p9, %s603_s16), 3 }
  0x12   : > { %s508_s28 = smul.u32 10, %s246_s27  ;;  %s486_s13 = sshll.u32 %s246_s27, 2 }
  0x13   : > { %s256_s29 = scalar_select %p255_p7, %s599_s15, 2 }
  0x14   : > { %s250_s30 = sadd.s32 %s508_s28, %s786_s26  ;;  %p271_p12 = pnand %p270_p11, %p269_p10 }
  0x15   : > { %s484_s5 = sshll.u32 %s250_s30, 1  ;;  %s509_s6 = smul.u32 24, %s256_s29 }
  0x16   : > { %s252_s9 = scalar_lea.vmem %s764_s0, %s484_s5  ;;  %s265_s14 = sadd.s32 %s486_s13, %s788_s16 }
  0x17   : > { %s259_s12 = scalar_lea.vmem %s765_s1, %s509_s6  ;;  %s487_s25 = sshll.u32 %s265_s14, 1 }
  0x18   : > { %p272_p0 = pneg %p271_p12  ;;  %s720_s28 = scalar_lea.vmem %s767_s3, %s487_s25 }
  0x1a   : > { %p274_p1 = pnand %p273_p13, %p272_p0 }
  0x1c   : > { %277 = sbr.rel (%p274_p1) target bundleno = 35 (0x23), region = 36 }
  0x21   : > { %vm278_vm0 = vcmask 254976   ;;  %v625_v0 = vmov 0.0  }
  0x22   : > { %279 = vst.msk [vmem:[%s768_s4] sm:$0x3] %vm278_vm0, %v625_v0 }
  0x23 PF: > { %p488_p2 = scmp.ne.s32.totalorder %s599_s15, 0 }
  0x25   : > { %282 = sbr.rel (%p488_p2) target bundleno = 44 (0x2c), region = 40 }
  0x2a   : > { %vm283_vm1 = vcmask 257024   ;;  %v626_v1 = vmov 0.0  }
  0x2b   : > { %284 = vst.msk [vmem:[#allocation2] sm:$0xf] %vm283_vm1, %v626_v1 }
  0x2c PF: > { %v507_v2 = vld [vmem:[%s259_s12 + $0x10] sm:$0xff]  ;;  %v506_v3 = vld [vmem:[%s259_s12 + $0x8] sm:$0xff]  ;;  %v505_v4 = vld [vmem:[%s259_s12] sm:$0xff]  ;;  %vm311_vm2 = vcmask 392192   ;;  %vm329_vm3 = vcmask 257024   ;;  %p502_p3 = scmp.ne.s32.totalorder %s599_s15, 2 }
  0x2d   : > { %320 = vmatpush.bf16.msra.mxu0 %v507_v2  ;;  %v285_v5 = vld [vmem:[%s252_s9] sm:$0x3] }
  0x31   : > { %321 = vmatpush.bf16.msra.mxu0 %v506_v3 }
  0x32   : > { %v292_v6 = vld [vmem:[#allocation2] sm:$0xf] }
  0x35   : > { %322 = vmatpush.bf16.msra.mxu0 %v505_v4 }
  0x38   : > { %501 = vmatmul.msk.bf16.vlgmr.msra.gmra.mxu0 %vm311_vm2, %v285_v5 }
  0xb5   : > { %v324_v7 = vpop.f32.mrf.mxu0 }
  0xb6   : > { %v328_v8 = vadd.f32 %v324_v7, %v292_v6 }
  0xb8   : > { %330 = vst.msk [vmem:[#allocation2] sm:$0xf] %vm329_vm3, %v328_v8 }
  0xb9   : > { %334 = sbr.rel (%p502_p3) target bundleno = 212 (0xd4), region = 44 }
  0xbd   : > { %v326_v9 = vpop.f32.mrf.mxu0 }
  0xbe   : > { %v568_v11 = vld [vmem:[%s766_s2] ss:$0 sm:$0xff]  ;;  %vm342_vm4 = vcmask 254976   ;;  %vm353_vm5 = vcmask 253952   ;;  %v355_v29 = vld [vmem:[%s768_s4 + $0x1] sm:$0x1] }
  0xbf   : > { %v335_v10 = vld [vmem:[#allocation2] sm:$0xf] }
  0xc0   : > { %v340_v12 = vadd.f32 %v568_v11, %v335_v10  ;;  %v344_v26 = vld [vmem:[%s768_s4] sm:$0x1] }
  0xc2   : > { %v341_v13 = vpack.c.bf16 %v340_v12, %v340_v12  ;;  %v345_v14 = vsel %vm329_vm3, %v340_v12, 0.0  ;;  %v356_v15 = vmul.f32 %v340_v12, %v340_v12 }
  0xc3   : > { %v346_v16 = vrot.slane %v345_v14, 4 }
  0xc4   : > { %343 = vst.msk [vmem:[%s720_s28] sm:$0x3] %vm342_vm4, %v341_v13  ;;  %v357_v17 = vsel %vm329_vm3, %v356_v15, 0.0 }
  0xc5   : > { %v347_v18 = vadd.f32 %v346_v16, %v345_v14  ;;  %v358_v19 = vrot.slane %v357_v17, 4 }
  0xc7   : > { %v348_v20 = vrot.slane %v347_v18, 2  ;;  %v359_v21 = vadd.f32 %v358_v19, %v357_v17 }
  0xc9   : > { %v349_v22 = vadd.f32 %v348_v20, %v347_v18  ;;  %v360_v23 = vrot.slane %v359_v21, 2 }
  0xcb   : > { %v350_v24 = vrot.slane %v349_v22, 1  ;;  %v361_v25 = vadd.f32 %v360_v23, %v359_v21 }
  0xcd   : > { %v351_v27 = vadd.f32 %v350_v24, %v349_v22  ;;  %v362_v28 = vrot.slane %v361_v25, 1 }
  0xcf   : > { %v352_v30 = vadd.f32 %v351_v27, %v344_v26  ;;  %v363_v31 = vadd.f32 %v362_v28, %v361_v25 }
  0xd1   : > { %354 = vst.msk [vmem:[%s768_s4] sm:$0x1] %vm353_vm5, %v352_v30  ;;  %v364_v32 = vadd.f32 %v363_v31, %v355_v29 }
  0xd3   : > { %365 = vst.msk [vmem:[%s768_s4 + $0x1] sm:$0x1] %vm353_vm5, %v364_v32 }
  0xd4 PF: > { %s15_s21 = sadd.s32 1, %s623_s21   ;;  %s769_s15 = smov %s611_s18 }
  0xd5   : > { %p12_p4 = scmp.ge.s32.totalorder %s15_s21, 26   ;;  %s770_s16 = smov %s615_s19 }
  0xd6   : > { %s771_s17 = smov %s619_s20  ;;  %s772_s18 = smov %s776_s22 }
  0xd7   : > { %s773_s19 = smov %s780_s23  ;;  %s774_s20 = smov %s784_s24 }
  0xd8   :  { %14 = sbr.rel (!%p12_p4) target bundleno = 4 (0x4), region = 85 }

// kernel: resnet_generator_forward.31
= control target key start
LH: loop header
LB: loop body
LE: loop exit
PB: predicated region body
PF: predicated region fallthrough
CT: control target
= control target key end

     0   :  { %s728_s15 = smov 0   ;;  %s730_s16 = smov 0   ;;  %s846_s0 = inlined_call_operand.vmem [shape: bf16[2,6,6,32], index: 0, kind: input, shape index: {}]   ;;  %s847_s1 = inlined_call_operand.vmem [shape: bf16[3,96,32], index: 1, kind: input, shape index: {}]   ;;  %s848_s2 = inlined_call_operand.vmem [shape: f32[1,32], index: 2, kind: input, shape index: {}]   ;;  %s849_s3 = inlined_call_operand.vmem [shape: bf16[2,4,4,32], index: 3, kind: output, shape index: {0}]   ;;  %s850_s4 = inlined_call_operand.vmem [shape: f32[2,32], index: 4, kind: output, shape index: {1}]  }
   0x1   :  { %s732_s17 = smov 0   ;;  %s734_s18 = smov 0  }
   0x2   :  { %s736_s19 = smov 0   ;;  %s738_s20 = smov 0  }
   0x3   :  { %s740_s21 = smov 0  }
   0x4 LB: > { %s27_s22 = sadd.s32 1, %s687_s18  ;;  %s30_s23 = sadd.s32 1, %s691_s19  ;;  %s699_s21 = sphi %s740_s21, %s15_s21   ;;  %s695_s20 = sphi %s738_s20, %s856_s20   ;;  %s691_s19 = sphi %s736_s19, %s855_s19   ;;  %s687_s18 = sphi %s734_s18, %s854_s18   ;;  %s683_s17 = sphi %s732_s17, %s853_s17   ;;  %s679_s16 = sphi %s730_s16, %s852_s16   ;;  %s675_s15 = sphi %s728_s15, %s851_s15  }
   0x5   : > { %p28_p0 = scmp.ge.s32.totalorder %s27_s22, 3  ;;  %p542_p1 = scmp.ge.s32.totalorder %s699_s21, 1 }
   0x6   : > { %p200_p2 = scmp.lt.s32.totalorder %s699_s21, 25  ;;  %s34_s24 = sadd.s32 1, %s695_s20 }
   0x7   : > { %s858_s22 = smov (%p28_p0, %s27_s22), 0  ;;  %s860_s23 = smov (!%p28_p0, %s30_s23), %s691_s19 }
   0x8   : > { %p201_p3 = pnand %p542_p1, %p200_p2  ;;  %p32_p4 = scmp.ge.s32.totalorder %s860_s23, 4 }
   0x9   : > { %s238_s25 = sadd.s32 (!%p201_p3), %s675_s15, %s679_s16  ;;  %p239_p6 = scmp.lt.s32.totalorder (!%p201_p3), %s683_s17, 1 }
   0xa   : > { %s862_s23 = smov (%p32_p4, %s860_s23), 0  ;;  %s864_s24 = smov (!%p32_p4, %s34_s24), %s695_s20 }
   0xb   : > { %p36_p5 = scmp.ge.s32.totalorder %s864_s24, 2  ;;  %204 = sbr.rel (%p201_p3) target bundleno = 215 (0xd7), region = 32 }
   0xc   : > { %p241_p7 = scmp.lt.s32.totalorder (!%p201_p3), %s238_s25, 5  ;;  %p248_p8 = scmp.lt.s32.totalorder (!%p201_p3), %s675_s15, 2 }
   0xd   : > { %s866_s24 = smov (%p36_p5, %s864_s24), 0  ;;  %p255_p9 = scmp.lt.s32.totalorder (!%p201_p3), %s679_s16, 3 }
   0xe   : > { %p262_p10 = scmp.eq.s32.totalorder (!%p201_p3), %s683_s17, 0  ;;  %p263_p11 = scmp.eq.s32.totalorder (!%p201_p3), %s679_s16, 0 }
   0xf   : > { %p266_p13 = scmp.eq.s32.totalorder (!%p201_p3), %s675_s15, 0 }
  0x10   : > { %s240_s26 = scalar_select %p239_p6, %s683_s17, 1 }
  0x11   : > { %s868_s25 = smov (!%p241_p7, %s238_s25), 5  ;;  %s870_s16 = smov (!%p255_p9, %s679_s16), 3 }
  0x12   : > { %s584_s27 = smul.u32 6, %s240_s26  ;;  %s545_s30 = sshll.u32 %s240_s26, 2 }
  0x13   : > { %s249_s28 = scalar_select %p248_p8, %s675_s15, 2 }
  0x14   : > { %s244_s29 = sadd.s32 %s584_s27, %s868_s25  ;;  %p264_p12 = pnand %p263_p11, %p262_p10 }
  0x15   : > { %s543_s5 = sshll.u32 %s244_s29, 2  ;;  %s585_s6 = smul.u32 48, %s249_s28 }
  0x16   : > { %s786_s9 = scalar_lea.vmem %s846_s0, %s543_s5  ;;  %s258_s13 = sadd.s32 %s545_s30, %s870_s16 }
  0x17   : > { %s252_s12 = scalar_lea.vmem %s847_s1, %s585_s6  ;;  %s546_s14 = sshll.u32 %s258_s13, 1 }
  0x18   : > { %p265_p0 = pneg %p264_p12  ;;  %s798_s27 = scalar_lea.vmem %s849_s3, %s546_s14 }
  0x1a   : > { %p267_p1 = pnand %p266_p13, %p265_p0 }
  0x1c   : > { %270 = sbr.rel (%p267_p1) target bundleno = 35 (0x23), region = 36 }
  0x21   : > { %vm271_vm0 = vcmask 254976   ;;  %v701_v0 = vmov 0.0  }
  0x22   : > { %272 = vst.msk [vmem:[%s850_s4] sm:$0x3] %vm271_vm0, %v701_v0 }
  0x23 PF: > { %p547_p2 = scmp.ne.s32.totalorder %s675_s15, 0 }
  0x25   : > { %275 = sbr.rel (%p547_p2) target bundleno = 44 (0x2c), region = 40 }
  0x2a   : > { %vm276_vm1 = vcmask 257024   ;;  %v702_v1 = vmov 0.0  }
  0x2b   : > { %277 = vst.msk [vmem:[#allocation2] sm:$0xf] %vm276_vm1, %v702_v1 }
  0x2c PF: > { %v579_v2 = vld [vmem:[%s252_s12 + $0x8] sm:$0xff]  ;;  %v581_v4 = vld [vmem:[%s252_s12 + $0x18] sm:$0xff]  ;;  %v578_v5 = vld [vmem:[%s252_s12] sm:$0xff]  ;;  %vm304_vm2 = vcmask 261120   ;;  %vm391_vm3 = vcmask 257024   ;;  %p575_p3 = scmp.ne.s32.totalorder %s675_s15, 2 }
  0x2d   : > { %v583_v3 = vld [vmem:[%s252_s12 + $0x28] sm:$0xff]  ;;  %314 = vmatpush.bf16.msra.mxu0 %v579_v2  ;;  %v582_v6 = vld [vmem:[%s252_s12 + $0x20] sm:$0xff]  ;;  %353 = vmatpush.bf16.msra.mxu1 %v581_v4  ;;  %v580_v8 = vld [vmem:[%s252_s12 + $0x10] sm:$0xff] }
  0x2e   : > { %383 = vmatpush.bf16.msra.mxu2 %v583_v3  ;;  %v278_v7 = vld [vmem:[%s786_s9] sm:$0x7] }
  0x2f   : > { %v323_v9 = vunpack.c.l.b16 %v278_v7 }
  0x31   : > { %v324_v10 = vpack.c.b16 %v323_v9, %v323_v9  ;;  %315 = vmatpush.bf16.msra.mxu0 %v578_v5  ;;  %354 = vmatpush.bf16.msra.mxu1 %v580_v8 }
  0x32   : > { %384 = vmatpush.bf16.msra.mxu2 %v582_v6  ;;  %v291_v16 = vld [vmem:[#allocation2] sm:$0xf] }
  0x33   : > { %v361_v11 = vrot.slane %v324_v10, 1  ;;  %v326_v12 = vshrl.u32 %v324_v10, 16  ;;  %v328_v13 = vshll.u32 %v324_v10, 16 }
  0x34   : > { %556 = vmatmul.msk.bf16.vlgmr.msra.gmra.mxu0 %vm304_vm2, %v278_v7 }
  0x35   : > { %574 = vmatmul.msk.bf16.vlgmr.msra.gmra.mxu2 %vm304_vm2, %v361_v11  ;;  %v330_v14 = vrot.slane %v328_v13, 1 }
  0x37   : > { %v331_v15 = vor.u32 %v330_v14, %v326_v12 }
  0x39   : > { %565 = vmatmul.msk.bf16.vlgmr.msra.gmra.mxu1 %vm304_vm2, %v331_v15 }
  0xb1   : > { %v317_v17 = vpop.f32.mrf.mxu0 }
  0xb2   : > { %v321_v18 = vadd.f32 %v317_v17, %v291_v16 }
  0xb6   : > { %v356_v19 = vpop.f32.mrf.mxu1 }
  0xb7   : > { %v360_v20 = vadd.f32 %v356_v19, %v321_v18 }
  0xb8   : > { %v386_v21 = vpop.f32.mrf.mxu2 }
  0xb9   : > { %v390_v22 = vadd.f32 %v386_v21, %v360_v20  ;;  %v319_v23 = vpop.f32.mrf.mxu0 }
  0xbb   : > { %392 = vst.msk [vmem:[#allocation2] sm:$0xf] %vm391_vm3, %v390_v22 }
  0xbc   : > { %396 = sbr.rel (%p575_p3) target bundleno = 215 (0xd7), region = 44 }
  0xbe   : > { %v358_v24 = vpop.f32.mrf.mxu1 }
  0xc0   : > { %v388_v25 = vpop.f32.mrf.mxu2 }
  0xc1   : > { %v644_v27 = vld [vmem:[%s848_s2] ss:$0 sm:$0xff]  ;;  %vm404_vm4 = vcmask 254976   ;;  %vm415_vm5 = vcmask 253952   ;;  %v417_v45 = vld [vmem:[%s850_s4 + $0x1] sm:$0x1] }
  0xc2   : > { %v397_v26 = vld [vmem:[#allocation2] sm:$0xf] }
  0xc3   : > { %v402_v28 = vadd.f32 %v644_v27, %v397_v26  ;;  %v406_v42 = vld [vmem:[%s850_s4] sm:$0x1] }
  0xc5   : > { %v403_v29 = vpack.c.bf16 %v402_v28, %v402_v28  ;;  %v407_v30 = vsel %vm391_vm3, %v402_v28, 0.0  ;;  %v418_v31 = vmul.f32 %v402_v28, %v402_v28 }
  0xc6   : > { %v408_v32 = vrot.slane %v407_v30, 4 }
  0xc7   : > { %405 = vst.msk [vmem:[%s798_s27] sm:$0x3] %vm404_vm4, %v403_v29  ;;  %v419_v33 = vsel %vm391_vm3, %v418_v31, 0.0 }
  0xc8   : > { %v409_v34 = vadd.f32 %v408_v32, %v407_v30  ;;  %v420_v35 = vrot.slane %v419_v33, 4 }
  0xca   : > { %v410_v36 = vrot.slane %v409_v34, 2  ;;  %v421_v37 = vadd.f32 %v420_v35, %v419_v33 }
  0xcc   : > { %v411_v38 = vadd.f32 %v410_v36, %v409_v34  ;;  %v422_v39 = vrot.slane %v421_v37, 2 }
  0xce   : > { %v412_v40 = vrot.slane %v411_v38, 1  ;;  %v423_v41 = vadd.f32 %v422_v39, %v421_v37 }
  0xd0   : > { %v413_v43 = vadd.f32 %v412_v40, %v411_v38  ;;  %v424_v44 = vrot.slane %v423_v41, 1 }
  0xd2   : > { %v414_v46 = vadd.f32 %v413_v43, %v406_v42  ;;  %v425_v47 = vadd.f32 %v424_v44, %v423_v41 }
  0xd4   : > { %416 = vst.msk [vmem:[%s850_s4] sm:$0x1] %vm415_vm5, %v414_v46  ;;  %v426_v48 = vadd.f32 %v425_v47, %v417_v45 }
  0xd6   : > { %427 = vst.msk [vmem:[%s850_s4 + $0x1] sm:$0x1] %vm415_vm5, %v426_v48 }
  0xd7 PF: > { %s15_s21 = sadd.s32 1, %s699_s21   ;;  %s851_s15 = smov %s687_s18 }
  0xd8   : > { %p12_p4 = scmp.ge.s32.totalorder %s15_s21, 26   ;;  %s852_s16 = smov %s691_s19 }
  0xd9   : > { %s853_s17 = smov %s695_s20  ;;  %s854_s18 = smov %s858_s22 }
  0xda   : > { %s855_s19 = smov %s862_s23  ;;  %s856_s20 = smov %s866_s24 }
  0xdb   :  { %14 = sbr.rel (!%p12_p4) target bundleno = 4 (0x4), region = 85 }

// kernel: resnet_generator_forward.34
= control target key start
LH: loop header
LB: loop body
LE: loop exit
PB: predicated region body
PF: predicated region fallthrough
CT: control target
= control target key end

     0   :  { %vm81_vm3 = vcmask 257024   ;;  %s176_s1 = inlined_call_operand.vmem [shape: f32[2,32], index: 1, kind: input, shape index: {}]   ;;  %s177_s0 = inlined_call_operand.vmem [shape: bf16[32,32], index: 0, kind: input, shape index: {}]   ;;  %s178_s2 = inlined_call_operand.vmem [shape: f32[1,32], index: 2, kind: input, shape index: {}]   ;;  %s179_s3 = inlined_call_operand.vmem [shape: f32[1,32], index: 3, kind: input, shape index: {}]   ;;  %s180_s4 = inlined_call_operand.vmem [shape: bf16[32,32], index: 4, kind: input, shape index: {}]   ;;  %s181_s5 = inlined_call_operand.vmem [shape: bf16[32,32], index: 5, kind: output, shape index: {}]  }
   0x1   :  { %v20_v0 = vld [vmem:[%s176_s1] sm:$0x1]  ;;  %v22_v1 = vld [vmem:[%s176_s1 + $0x1] sm:$0x1]  ;;  %v106_v16 = vld [vmem:[%s177_s0 + $0x8] sm:$0xff]  }
   0x2   :  { %v21_v2 = vmul.f32 0.03125, %v20_v0  ;;  %v23_v3 = vmul.f32 0.03125, %v22_v1  ;;  %v27_v13 = vld [vmem:[%s178_s2] sm:$0x1]  ;;  %v96_v21 = vunpack.c.l.bf16 %v106_v16  ;;  %v97_v23 = vunpack.c.h.bf16 %v106_v16  ;;  %v107_v27 = vld [vmem:[%s180_s4 + $0x8] sm:$0xff]  }
   0x3   :  { %v91_v15 = vld [vmem:[%s177_s0] sm:$0xff]   ;;  %v104_v36 = vunpack.c.l.bf16 %v107_v27  ;;  %v105_v37 = vunpack.c.h.bf16 %v107_v27 }
   0x4   :  { %v24_v4 = vmul.f32 %v21_v2, %v21_v2  ;;  %v92_v19 = vunpack.c.l.bf16 %v91_v15  ;;  %v93_v20 = vunpack.c.h.bf16 %v91_v15  ;;  %v40_v22 = vld [vmem:[%s179_s3] sm:$0x1] }
   0x5   :  { %v99_v26 = vld [vmem:[%s180_s4] sm:$0xff]  }
   0x6   :  { %v25_v5 = vsub.f32 %v23_v3, %v24_v4  ;;  %v100_v32 = vunpack.c.l.bf16 %v99_v26  ;;  %v101_v35 = vunpack.c.h.bf16 %v99_v26 }
   0x8   :  { %v26_v6 = vmax.f32 %v25_v5, 0.0 }
   0xa   :  { %v28_v7 = vadd.f32 1e-05, %v26_v6 }
   0xc   :  { %108 = vrsqrt.f32 %v28_v7  ;;  %vm35_vm0 = vweird.f32 %v28_v7 }
  0x12   :  { %v109_v8 = vpop.eup %108 }
  0x13   :  { %v30_v9 = vmul.f32 %v109_v8, %v28_v7  ;;  %vm36_vm1 = vweird.f32 %v109_v8 }
  0x14   :  { %vm37_vm2 = vmor %vm35_vm0, %vm36_vm1 }
  0x15   :  { %v31_v10 = vmul.f32 %v109_v8, %v30_v9 }
  0x17   :  { %v32_v11 = vmul.f32 0.5, %v31_v10 }
  0x19   :  { %v33_v12 = vsub.f32 1.5, %v32_v11 }
  0x1b   :  { %v34_v14 = vmul.f32 %v109_v8, %v33_v12 }
  0x1d   :  { %v38_v17 = vsel %vm37_vm2, %v109_v8, %v34_v14 }
  0x1e   :  { %v39_v18 = vmul.f32 %v38_v17, %v27_v13 }
  0x20   :  { %v41_v24 = vmul.f32 %v39_v18, %v21_v2  ;;  %v52_v25 = vperm.slane %v39_v18, 0 }
  0x22   :  { %v42_v28 = vsub.f32 %v40_v22, %v41_v24  ;;  %v54_v29 = vmul.f32 %v92_v19, %v52_v25  ;;  %v55_v30 = vmul.f32 %v93_v20, %v52_v25  ;;  %v56_v31 = vmul.f32 %v96_v21, %v52_v25 }
  0x23   :  { %v57_v33 = vmul.f32 %v97_v23, %v52_v25 }
  0x24   :  { %v59_v34 = vperm.slane %v42_v28, 0 }
  0x26   :  { %v61_v38 = vadd.f32 %v59_v34, %v54_v29  ;;  %v62_v39 = vadd.f32 %v59_v34, %v55_v30  ;;  %v63_v40 = vadd.f32 %v59_v34, %v56_v31  ;;  %v64_v41 = vadd.f32 %v59_v34, %v57_v33 }
  0x28   :  { %v73_v42 = vadd.f32 %v100_v32, %v61_v38  ;;  %v74_v43 = vadd.f32 %v101_v35, %v62_v39  ;;  %v75_v44 = vadd.f32 %v104_v36, %v63_v40  ;;  %v76_v45 = vadd.f32 %v105_v37, %v64_v41 }
  0x2a   :  { %v77_v46 = vpack.c.bf16 %v73_v42, %v73_v42  ;;  %v78_v47 = vpack.c.bf16 %v74_v43, %v74_v43  ;;  %v79_v48 = vpack.c.bf16 %v75_v44, %v75_v44  ;;  %v80_v49 = vpack.c.bf16 %v76_v45, %v76_v45 }
  0x2c   :  { %82 = vst.msk [vmem:[%s181_s5] sm:$0xf] %vm81_vm3, %v77_v46 }
  0x2d   :  { %83 = vst.msk [vmem:[%s181_s5 + $0x4] sm:$0xf] %vm81_vm3, %v78_v47 }
  0x2e   :  { %84 = vst.msk [vmem:[%s181_s5 + $0x8] sm:$0xf] %vm81_vm3, %v79_v48 }
  0x2f   :  { %85 = vst.msk [vmem:[%s181_s5 + $0xc] sm:$0xf] %vm81_vm3, %v80_v49 }

// kernel: resnet_generator_forward.42
= control target key start
LH: loop header
LB: loop body
LE: loop exit
PB: predicated region body
PF: predicated region fallthrough
CT: control target
= control target key end

     0   :  { %s684_s15 = smov 0   ;;  %s686_s16 = smov 0   ;;  %s799_s0 = inlined_call_operand.vmem [shape: bf16[2,5,5,32], index: 0, kind: input, shape index: {}]   ;;  %s800_s1 = inlined_call_operand.vmem [shape: bf16[2,64,16], index: 1, kind: input, shape index: {}]   ;;  %s801_s2 = inlined_call_operand.vmem [shape: f32[1,16], index: 2, kind: input, shape index: {}]   ;;  %s802_s3 = inlined_call_operand.vmem [shape: bf16[2,4,4,16], index: 3, kind: output, shape index: {0}]   ;;  %s803_s4 = inlined_call_operand.vmem [shape: f32[2,16], index: 4, kind: output, shape index: {1}]  }
   0x1   :  { %s688_s17 = smov 0   ;;  %s690_s18 = smov 0  }
   0x2   :  { %s692_s19 = smov 0   ;;  %s694_s20 = smov 0  }
   0x3   :  { %s696_s21 = smov 0  }
   0x4 LB: > { %s27_s22 = sadd.s32 1, %s643_s18  ;;  %s30_s23 = sadd.s32 1, %s647_s19  ;;  %s655_s21 = sphi %s696_s21, %s15_s21   ;;  %s651_s20 = sphi %s694_s20, %s813_s20   ;;  %s647_s19 = sphi %s692_s19, %s812_s19   ;;  %s643_s18 = sphi %s690_s18, %s811_s18   ;;  %s639_s17 = sphi %s688_s17, %s810_s17   ;;  %s635_s16 = sphi %s686_s16, %s809_s16   ;;  %s631_s15 = sphi %s684_s15, %s808_s15  }
   0x5   : > { %p28_p0 = scmp.ge.s32.totalorder %s27_s22, 2  ;;  %p508_p1 = scmp.ge.s32.totalorder %s655_s21, 1 }
   0x6   : > { %p200_p2 = scmp.lt.s32.totalorder %s655_s21, 17  ;;  %s34_s24 = sadd.s32 1, %s651_s20 }
   0x7   : > { %s815_s22 = smov (%p28_p0, %s27_s22), 0  ;;  %s817_s23 = smov (!%p28_p0, %s30_s23), %s647_s19 }
   0x8   : > { %p201_p3 = pnand %p508_p1, %p200_p2  ;;  %p32_p4 = scmp.ge.s32.totalorder %s817_s23, 4 }
   0x9   : > { %s238_s25 = sadd.s32 (!%p201_p3), %s631_s15, %s635_s16  ;;  %p239_p6 = scmp.lt.s32.totalorder (!%p201_p3), %s639_s17, 1 }
   0xa   : > { %s819_s23 = smov (%p32_p4, %s817_s23), 0  ;;  %s821_s24 = smov (!%p32_p4, %s34_s24), %s651_s20 }
   0xb   : > { %804 = sst [smem:[#allocation3_spill]] %s819_s23  ;;  %p36_p5 = scmp.ge.s32.totalorder %s821_s24, 2 }
   0xc   : > { %204 = sbr.rel (%p201_p3) target bundleno = 210 (0xd2), region = 32  ;;  %p241_p7 = scmp.lt.s32.totalorder (!%p201_p3), %s238_s25, 4 }
   0xd   : > { %s823_s24 = smov (%p36_p5, %s821_s24), 0  ;;  %p248_p8 = scmp.lt.s32.totalorder (!%p201_p3), %s631_s15, 1 }
   0xe   : > { %805 = sst [smem:[#allocation4_spill]] %s823_s24  ;;  %p255_p9 = scmp.lt.s32.totalorder (!%p201_p3), %s635_s16, 3 }
   0xf   : > { %p262_p10 = scmp.eq.s32.totalorder (!%p201_p3), %s639_s17, 0  ;;  %p263_p11 = scmp.eq.s32.totalorder (!%p201_p3), %s635_s16, 0 }
  0x10   : > { %p266_p12 = scmp.eq.s32.totalorder (!%p201_p3), %s631_s15, 0 }
  0x11   : > { %s240_s26 = scalar_select %p239_p6, %s639_s17, 1 }
  0x12   : > { %s825_s25 = smov (!%p241_p7, %s238_s25), 4  ;;  %p264_p13 = pnand %p263_p11, %p262_p10 }
  0x13   : > { %s541_s27 = smul.u32 5, %s240_s26  ;;  %s512_s30 = sshll.u32 %s240_s26, 2 }
  0x14   : > { %s249_s28 = scalar_select %p248_p8, %s631_s15, 1 }
  0x15   : > { %s244_s29 = sadd.s32 %s541_s27, %s825_s25  ;;  %p265_p0 = pneg %p264_p13 }
  0x16   : > { %s509_s5 = sshll.u32 %s244_s29, 2  ;;  %s536_s6 = sshll.u32 %s249_s28, 5 }
  0x17   : > { %s246_s9 = scalar_lea.vmem %s799_s0, %s509_s5  ;;  %s252_s12 = scalar_lea.vmem %s800_s1, %s536_s6 }
  0x18   : > { %s256_s13 = scalar_select %p255_p9, %s635_s16, 3 }
  0x19   : > { %p267_p1 = pnand %p266_p12, %p265_p0 }
  0x1a   : > { %s258_s14 = sadd.s32 %s512_s30, %s256_s13 }
  0x1b   : > { %s513_s24 = sshll.u32 %s258_s14, 1  ;;  %270 = sbr.rel (%p267_p1) target bundleno = 34 (0x22), region = 36 }
  0x1c   : > { %s752_s26 = scalar_lea.vmem %s802_s3, %s513_s24 }
  0x20   : > { %vm271_vm0 = vcmask 123904   ;;  %v657_v0 = vmov 0.0  }
  0x21   : > { %272 = vst.msk [vmem:[%s803_s4] sm:$0x3] %vm271_vm0, %v657_v0 }
  0x22 PF: > { %p514_p2 = scmp.ne.s32.totalorder %s631_s15, 0 }
  0x24   : > { %275 = sbr.rel (%p514_p2) target bundleno = 43 (0x2b), region = 40 }
  0x29   : > { %vm276_vm1 = vcmask 125952   ;;  %v658_v1 = vmov 0.0  }
  0x2a   : > { %277 = vst.msk [vmem:[#allocation2] sm:$0xf] %vm276_vm1, %v658_v1 }
  0x2b PF: > { %v538_v2 = vld [vmem:[%s252_s12 + $0x8] sm:$0xff]  ;;  %v540_v3 = vld [vmem:[%s252_s12 + $0x18] sm:$0xff]  ;;  %v278_v4 = vld [vmem:[%s246_s9] sm:$0x7]  ;;  %vm300_vm2 = vcmask 261120   ;;  %vm357_vm3 = vcmask 125952  }
  0x2c   : > { %310 = vmatpush.bf16.msra.mxu0 %v538_v2  ;;  %349 = vmatpush.bf16.msra.mxu1 %v540_v3  ;;  %v537_v5 = vld [vmem:[%s252_s12] sm:$0xff]  ;;  %v539_v6 = vld [vmem:[%s252_s12 + $0x10] sm:$0xff]  ;;  %v319_v7 = vunpack.c.l.b16 %v278_v4  ;;  %p533_p3 = scmp.ne.s32.totalorder %s631_s15, 1 }
  0x2e   : > { %v320_v8 = vpack.c.b16 %v319_v7, %v319_v7 }
  0x30   : > { %311 = vmatpush.bf16.msra.mxu0 %v537_v5  ;;  %350 = vmatpush.bf16.msra.mxu1 %v539_v6  ;;  %v322_v9 = vshrl.u32 %v320_v8, 16  ;;  %v324_v10 = vshll.u32 %v320_v8, 16 }
  0x31   : > { %v287_v13 = vld [vmem:[#allocation2] sm:$0xf] }
  0x32   : > { %v326_v11 = vrot.slane %v324_v10, 1 }
  0x33   : > { %523 = vmatmul.msk.bf16.vlgmr.msra.gmra.mxu0 %vm300_vm2, %v278_v4 }
  0x34   : > { %v327_v12 = vor.u32 %v326_v11, %v322_v9 }
  0x36   : > { %532 = vmatmul.msk.bf16.vlgmr.msra.gmra.mxu1 %vm300_vm2, %v327_v12 }
  0xb0   : > { %v313_v14 = vpop.f32.mrf.mxu0 }
  0xb1   : > { %v317_v15 = vadd.f32 %v313_v14, %v287_v13 }
  0xb3   : > { %v352_v16 = vpop.f32.mrf.mxu1 }
  0xb4   : > { %v356_v17 = vadd.f32 %v352_v16, %v317_v15 }
  0xb6   : > { %358 = vst.msk [vmem:[#allocation2] sm:$0xf] %vm357_vm3, %v356_v17 }
  0xb7   : > { %362 = sbr.rel (%p533_p3) target bundleno = 210 (0xd2), region = 44 }
  0xb8   : > { %v315_v18 = vpop.f32.mrf.mxu0 }
  0xbb   : > { %v354_v19 = vpop.f32.mrf.mxu1 }
  0xbc   : > { %v600_v21 = vld [vmem:[%s801_s2] ss:$0 sm:$0xff]  ;;  %vm370_vm4 = vcmask 123904   ;;  %vm381_vm5 = vcmask 122880   ;;  %v383_v39 = vld [vmem:[%s803_s4 + $0x1] sm:$0x1] }
  0xbd   : > { %v363_v20 = vld [vmem:[#allocation2] sm:$0xf] }
  0xbe   : > { %v368_v22 = vadd.f32 %v600_v21, %v363_v20  ;;  %v372_v36 = vld [vmem:[%s803_s4] sm:$0x1] }
  0xc0   : > { %v369_v23 = vpack.c.bf16 %v368_v22, %v368_v22  ;;  %v373_v24 = vsel %vm357_vm3, %v368_v22, 0.0  ;;  %v384_v25 = vmul.f32 %v368_v22, %v368_v22 }
  0xc1   : > { %v374_v26 = vrot.slane %v373_v24, 4 }
  0xc2   : > { %371 = vst.msk [vmem:[%s752_s26] sm:$0x3] %vm370_vm4, %v369_v23  ;;  %v385_v27 = vsel %vm357_vm3, %v384_v25, 0.0 }
  0xc3   : > { %v375_v28 = vadd.f32 %v374_v26, %v373_v24  ;;  %v386_v29 = vrot.slane %v385_v27, 4 }
  0xc5   : > { %v376_v30 = vrot.slane %v375_v28, 2  ;;  %v387_v31 = vadd.f32 %v386_v29, %v385_v27 }
  0xc7   : > { %v377_v32 = vadd.f32 %v376_v30, %v375_v28  ;;  %v388_v33 = vrot.slane %v387_v31, 2 }
  0xc9   : > { %v378_v34 = vrot.slane %v377_v32, 1  ;;  %v389_v35 = vadd.f32 %v388_v33, %v387_v31 }
  0xcb   : > { %v379_v37 = vadd.f32 %v378_v34, %v377_v32  ;;  %v390_v38 = vrot.slane %v389_v35, 1 }
  0xcd   : > { %v380_v40 = vadd.f32 %v379_v37, %v372_v36  ;;  %v391_v41 = vadd.f32 %v390_v38, %v389_v35 }
  0xcf   : > { %382 = vst.msk [vmem:[%s803_s4] sm:$0x1] %vm381_vm5, %v380_v40  ;;  %v392_v42 = vadd.f32 %v391_v41, %v383_v39 }
  0xd1   : > { %393 = vst.msk [vmem:[%s803_s4 + $0x1] sm:$0x1] %vm381_vm5, %v392_v42 }
  0xd2 PF: > { %s15_s21 = sadd.s32 1, %s655_s21   ;;  %s806_s8 = sld [smem:[#allocation3_spill]] }
  0xd3   : > { %p12_p4 = scmp.ge.s32.totalorder %s15_s21, 18   ;;  %s807_s9 = sld [smem:[#allocation4_spill]] }
  0xd4   : > { %s808_s15 = smov %s643_s18  ;;  %s809_s16 = smov %s647_s19 }
  0xd5   : > { %s810_s17 = smov %s651_s20  ;;  %s811_s18 = smov %s815_s22 }
  0xd6   :  { %14 = sbr.rel (!%p12_p4) target bundleno = 4 (0x4), region = 85 }
  0xd8   : > { %s812_s19 = smov %s806_s8 }
  0xd9   : > { %s813_s20 = smov %s807_s9 }

// kernel: resnet_generator_forward.40
= control target key start
LH: loop header
LB: loop body
LE: loop exit
PB: predicated region body
PF: predicated region fallthrough
CT: control target
= control target key end

     0   :  { %s649_s15 = smov 0   ;;  %s651_s16 = smov 0   ;;  %s737_s0 = inlined_call_operand.vmem [shape: bf16[2,4,5,32], index: 0, kind: input, shape index: {}]   ;;  %s738_s1 = inlined_call_operand.vmem [shape: bf16[1,64,16], index: 1, kind: input, shape index: {}]   ;;  %s739_s2 = inlined_call_operand.vmem [shape: f32[1,16], index: 2, kind: input, shape index: {}]   ;;  %s740_s3 = inlined_call_operand.vmem [shape: bf16[2,4,4,16], index: 3, kind: output, shape index: {0}]   ;;  %s741_s4 = inlined_call_operand.vmem [shape: f32[2,16], index: 4, kind: output, shape index: {1}]  }
   0x1   :  { %s653_s17 = smov 0   ;;  %s655_s18 = smov 0  }
   0x2   :  { %s657_s19 = smov 0  }
   0x3 LB: > { %s30_s20 = sadd.s32 1, %s612_s17  ;;  %s34_s21 = sadd.s32 1, %s616_s18  ;;  %s620_s19 = sphi %s657_s19, %s15_s19   ;;  %s616_s18 = sphi %s655_s18, %s745_s18   ;;  %s612_s17 = sphi %s653_s17, %s744_s17   ;;  %s608_s16 = sphi %s651_s16, %s743_s16   ;;  %s604_s15 = sphi %s649_s15, %s742_s15  }
   0x4   : > { %p32_p0 = scmp.ge.s32.totalorder %s30_s20, 4  ;;  %p509_p1 = scmp.ge.s32.totalorder %s620_s19, 1 }
   0x5   : > { %p200_p2 = scmp.lt.s32.totalorder %s620_s19, 9 }
   0x6   : > { %s747_s20 = smov (%p32_p0, %s30_s20), 0  ;;  %s749_s21 = smov (!%p32_p0, %s34_s21), %s616_s18 }
   0x7   : > { %p201_p3 = pnand %p509_p1, %p200_p2  ;;  %p36_p4 = scmp.ge.s32.totalorder %s749_s21, 2 }
   0x8   : > { %p239_p5 = scmp.lt.s32.totalorder (!%p201_p3), %s608_s16, 1  ;;  %p241_p6 = scmp.lt.s32.totalorder (!%p201_p3), %s604_s15, 3 }
   0x9   : > { %s751_s21 = smov (%p36_p4, %s749_s21), 0  ;;  %204 = sbr.rel (%p201_p3) target bundleno = 189 (0xbd), region = 32 }
   0xa   : > { %p262_p7 = scmp.eq.s32.totalorder (!%p201_p3), %s608_s16, 0  ;;  %p263_p8 = scmp.eq.s32.totalorder (!%p201_p3), %s604_s15, 0 }
   0xc   : > { %p264_p9 = pnand (!%p201_p3), %p263_p8, %p262_p7 }
   0xe   : > { %s753_s16 = smov (!%p239_p5, %s608_s16), 1  ;;  %s755_s15 = smov (!%p241_p6, %s604_s15), 3 }
   0xf   : > { %s510_s22 = sshll.u32 %s753_s16, 2  ;;  %270 = sbr.rel (%p264_p9) target bundleno = 22 (0x16), region = 36 }
  0x10   : > { %s244_s23 = sadd.s32 %s510_s22, %s755_s15 }
  0x11   : > { %s511_s24 = sshll.u32 %s244_s23, 2  ;;  %s513_s25 = sshll.u32 %s244_s23, 1 }
  0x12   : > { %s246_s28 = scalar_lea.vmem %s737_s0, %s511_s24  ;;  %s685_s5 = scalar_lea.vmem %s740_s3, %s513_s25 }
  0x14   : > { %vm271_vm0 = vcmask 123904   ;;  %v622_v0 = vmov 0.0  }
  0x15   : > { %272 = vst.msk [vmem:[%s741_s4] sm:$0x3] %vm271_vm0, %v622_v0 }
  0x16 PF: > { %v536_v1 = vld [vmem:[%s738_s1 + $0x8] sm:$0xff]  ;;  %v538_v2 = vld [vmem:[%s738_s1 + $0x18] sm:$0xff]  ;;  %vm276_vm1 = vcmask 125952   ;;  %v278_v3 = vld [vmem:[%s246_s28] sm:$0x7]  ;;  %v623_v4 = vmov 0.0  }
  0x17   : > { %277 = vst.msk [vmem:[#allocation2] sm:$0xf] %vm276_vm1, %v623_v4  ;;  %310 = vmatpush.bf16.msra.mxu0 %v536_v1  ;;  %349 = vmatpush.bf16.msra.mxu1 %v538_v2  ;;  %v535_v5 = vld [vmem:[%s738_s1] sm:$0xff]  ;;  %v537_v6 = vld [vmem:[%s738_s1 + $0x10] sm:$0xff]  ;;  %v319_v7 = vunpack.c.l.b16 %v278_v3  ;;  %vm300_vm2 = vcmask 261120   ;;  %vm369_vm3 = vcmask 123904  }
  0x18   : > { %v581_v19 = vld [vmem:[%s739_s2] ss:$0 sm:$0xff]  ;;  %vm380_vm4 = vcmask 122880  }
  0x19   : > { %v320_v8 = vpack.c.b16 %v319_v7, %v319_v7 }
  0x1b   : > { %311 = vmatpush.bf16.msra.mxu0 %v535_v5  ;;  %350 = vmatpush.bf16.msra.mxu1 %v537_v6  ;;  %v322_v9 = vshrl.u32 %v320_v8, 16  ;;  %v324_v10 = vshll.u32 %v320_v8, 16 }
  0x1c   : > { %v371_v36 = vld [vmem:[%s741_s4] sm:$0x1]  ;;  %v382_v39 = vld [vmem:[%s741_s4 + $0x1] sm:$0x1] }
  0x1d   : > { %v326_v11 = vrot.slane %v324_v10, 1 }
  0x1e   : > { %523 = vmatmul.msk.bf16.vlgmr.msra.gmra.mxu0 %vm300_vm2, %v278_v3  ;;  %v287_v13 = vld [vmem:[#allocation2] sm:$0xf] }
  0x1f   : > { %v327_v12 = vor.u32 %v326_v11, %v322_v9 }
  0x21   : > { %532 = vmatmul.msk.bf16.vlgmr.msra.gmra.mxu1 %vm300_vm2, %v327_v12 }
  0x9b   : > { %v313_v14 = vpop.f32.mrf.mxu0 }
  0x9c   : > { %v317_v15 = vadd.f32 %v313_v14, %v287_v13 }
  0x9e   : > { %v352_v16 = vpop.f32.mrf.mxu1 }
  0x9f   : > { %v356_v17 = vadd.f32 %v352_v16, %v317_v15 }
  0xa1   : > { %358 = vst.msk [vmem:[#allocation2] sm:$0xf] %vm276_vm1, %v356_v17 }
  0xa3   : > { %v315_v18 = vpop.f32.mrf.mxu0 }
  0xa6   : > { %v354_v20 = vpop.f32.mrf.mxu1 }
  0xa8   : > { %v362_v21 = vld [vmem:[#allocation2] sm:$0xf] }
  0xa9   : > { %v367_v22 = vadd.f32 %v581_v19, %v362_v21 }
  0xab   : > { %v368_v23 = vpack.c.bf16 %v367_v22, %v367_v22  ;;  %v372_v24 = vsel %vm276_vm1, %v367_v22, 0.0  ;;  %v383_v25 = vmul.f32 %v367_v22, %v367_v22 }
  0xac   : > { %v373_v26 = vrot.slane %v372_v24, 4 }
  0xad   : > { %370 = vst.msk [vmem:[%s685_s5] sm:$0x3] %vm369_vm3, %v368_v23  ;;  %v384_v27 = vsel %vm276_vm1, %v383_v25, 0.0 }
  0xae   : > { %v374_v28 = vadd.f32 %v373_v26, %v372_v24  ;;  %v385_v29 = vrot.slane %v384_v27, 4 }
  0xb0   : > { %v375_v30 = vrot.slane %v374_v28, 2  ;;  %v386_v31 = vadd.f32 %v385_v29, %v384_v27 }
  0xb2   : > { %v376_v32 = vadd.f32 %v375_v30, %v374_v28  ;;  %v387_v33 = vrot.slane %v386_v31, 2 }
  0xb4   : > { %v377_v34 = vrot.slane %v376_v32, 1  ;;  %v388_v35 = vadd.f32 %v387_v33, %v386_v31 }
  0xb6   : > { %v378_v37 = vadd.f32 %v377_v34, %v376_v32  ;;  %v389_v38 = vrot.slane %v388_v35, 1 }
  0xb8   : > { %v379_v40 = vadd.f32 %v378_v37, %v371_v36  ;;  %v390_v41 = vadd.f32 %v389_v38, %v388_v35 }
  0xba   : > { %381 = vst.msk [vmem:[%s741_s4] sm:$0x1] %vm380_vm4, %v379_v40  ;;  %v391_v42 = vadd.f32 %v390_v41, %v382_v39 }
  0xbc   : > { %392 = vst.msk [vmem:[%s741_s4 + $0x1] sm:$0x1] %vm380_vm4, %v391_v42 }
  0xbd PF: > { %s15_s19 = sadd.s32 1, %s620_s19   ;;  %s742_s15 = smov %s612_s17 }
  0xbe   : > { %p12_p10 = scmp.ge.s32.totalorder %s15_s19, 10   ;;  %s743_s16 = smov %s616_s18 }
  0xbf   : > { %s744_s17 = smov %s747_s20  ;;  %s745_s18 = smov %s751_s21 }
  0xc0   :  { %14 = sbr.rel (!%p12_p10) target bundleno = 3 (0x3), region = 85 }

// kernel: resnet_generator_forward.41
= control target key start
LH: loop header
LB: loop body
LE: loop exit
PB: predicated region body
PF: predicated region fallthrough
CT: control target
= control target key end

     0   :  { %s630_s15 = smov 0   ;;  %s632_s16 = smov 0   ;;  %s742_s0 = inlined_call_operand.vmem [shape: bf16[2,5,4,32], index: 0, kind: input, shape index: {}]   ;;  %s743_s1 = inlined_call_operand.vmem [shape: bf16[2,32,16], index: 1, kind: input, shape index: {}]   ;;  %s744_s2 = inlined_call_operand.vmem [shape: f32[1,16], index: 2, kind: input, shape index: {}]   ;;  %s745_s3 = inlined_call_operand.vmem [shape: bf16[2,4,4,16], index: 3, kind: output, shape index: {0}]   ;;  %s746_s4 = inlined_call_operand.vmem [shape: f32[2,16], index: 4, kind: output, shape index: {1}]  }
   0x1   :  { %s634_s17 = smov 0   ;;  %s636_s18 = smov 0  }
   0x2   :  { %s638_s19 = smov 0   ;;  %s640_s20 = smov 0  }
   0x3   :  { %s642_s21 = smov 0  }
   0x4 LB: > { %s27_s22 = sadd.s32 1, %s589_s18  ;;  %s30_s23 = sadd.s32 1, %s593_s19  ;;  %s601_s21 = sphi %s642_s21, %s15_s21   ;;  %s597_s20 = sphi %s640_s20, %s756_s20   ;;  %s593_s19 = sphi %s638_s19, %s755_s19   ;;  %s589_s18 = sphi %s636_s18, %s754_s18   ;;  %s585_s17 = sphi %s634_s17, %s753_s17   ;;  %s581_s16 = sphi %s632_s16, %s752_s16   ;;  %s577_s15 = sphi %s630_s15, %s751_s15  }
   0x5   : > { %p28_p0 = scmp.ge.s32.totalorder %s27_s22, 2  ;;  %p465_p1 = scmp.ge.s32.totalorder %s601_s21, 1 }
   0x6   : > { %p200_p2 = scmp.lt.s32.totalorder %s601_s21, 17  ;;  %s34_s24 = sadd.s32 1, %s597_s20 }
   0x7   : > { %s758_s22 = smov (%p28_p0, %s27_s22), 0  ;;  %s760_s23 = smov (!%p28_p0, %s30_s23), %s593_s19 }
   0x8   : > { %p201_p3 = pnand %p465_p1, %p200_p2  ;;  %p32_p4 = scmp.ge.s32.totalorder %s760_s23, 4 }
   0x9   : > { %s238_s25 = sadd.s32 (!%p201_p3), %s577_s15, %s581_s16  ;;  %p239_p6 = scmp.lt.s32.totalorder (!%p201_p3), %s585_s17, 1 }
   0xa   : > { %s762_s23 = smov (%p32_p4, %s760_s23), 0  ;;  %s764_s24 = smov (!%p32_p4, %s34_s24), %s597_s20 }
   0xb   : > { %747 = sst [smem:[#allocation3_spill]] %s762_s23  ;;  %p36_p5 = scmp.ge.s32.totalorder %s764_s24, 2 }
   0xc   : > { %204 = sbr.rel (%p201_p3) target bundleno = 207 (0xcf), region = 32  ;;  %p241_p7 = scmp.lt.s32.totalorder (!%p201_p3), %s238_s25, 4 }
   0xd   : > { %s766_s24 = smov (%p36_p5, %s764_s24), 0  ;;  %p248_p8 = scmp.lt.s32.totalorder (!%p201_p3), %s577_s15, 1 }
   0xe   : > { %748 = sst [smem:[#allocation4_spill]] %s766_s24  ;;  %p255_p9 = scmp.lt.s32.totalorder (!%p201_p3), %s581_s16, 3 }
   0xf   : > { %p262_p10 = scmp.eq.s32.totalorder (!%p201_p3), %s585_s17, 0  ;;  %p263_p11 = scmp.eq.s32.totalorder (!%p201_p3), %s581_s16, 0 }
  0x10   : > { %p266_p12 = scmp.eq.s32.totalorder (!%p201_p3), %s577_s15, 0 }
  0x11   : > { %s240_s26 = scalar_select %p239_p6, %s585_s17, 1 }
  0x12   : > { %s768_s25 = smov (!%p241_p7, %s238_s25), 4  ;;  %p264_p13 = pnand %p263_p11, %p262_p10 }
  0x13   : > { %s487_s27 = smul.u32 5, %s240_s26  ;;  %s469_s30 = sshll.u32 %s240_s26, 2 }
  0x14   : > { %s249_s28 = scalar_select %p248_p8, %s577_s15, 1 }
  0x15   : > { %s244_s29 = sadd.s32 %s487_s27, %s768_s25  ;;  %p265_p0 = pneg %p264_p13 }
  0x16   : > { %s466_s5 = sshll.u32 %s244_s29, 1  ;;  %s484_s6 = sshll.u32 %s249_s28, 4 }
  0x17   : > { %s246_s9 = scalar_lea.vmem %s742_s0, %s466_s5  ;;  %s252_s12 = scalar_lea.vmem %s743_s1, %s484_s6 }
  0x18   : > { %s256_s13 = scalar_select %p255_p9, %s581_s16, 3 }
  0x19   : > { %p267_p1 = pnand %p266_p12, %p265_p0 }
  0x1a   : > { %s258_s14 = sadd.s32 %s469_s30, %s256_s13 }
  0x1b   : > { %s470_s24 = sshll.u32 %s258_s14, 1  ;;  %270 = sbr.rel (%p267_p1) target bundleno = 34 (0x22), region = 36 }
  0x1c   : > { %s698_s26 = scalar_lea.vmem %s745_s3, %s470_s24 }
  0x20   : > { %vm271_vm0 = vcmask 123904   ;;  %v603_v0 = vmov 0.0  }
  0x21   : > { %272 = vst.msk [vmem:[%s746_s4] sm:$0x3] %vm271_vm0, %v603_v0 }
  0x22 PF: > { %p471_p2 = scmp.ne.s32.totalorder %s577_s15, 0 }
  0x24   : > { %275 = sbr.rel (%p471_p2) target bundleno = 43 (0x2b), region = 40 }
  0x29   : > { %vm276_vm1 = vcmask 125952   ;;  %v604_v1 = vmov 0.0  }
  0x2a   : > { %277 = vst.msk [vmem:[#allocation2] sm:$0xf] %vm276_vm1, %v604_v1 }
  0x2b PF: > { %v486_v2 = vld [vmem:[%s252_s12 + $0x8] sm:$0xff]  ;;  %v485_v3 = vld [vmem:[%s252_s12] sm:$0xff]  ;;  %vm296_vm2 = vcmask 261120   ;;  %vm314_vm3 = vcmask 125952   ;;  %p481_p3 = scmp.ne.s32.totalorder %s577_s15, 1 }
  0x2c   : > { %306 = vmatpush.bf16.msra.mxu0 %v486_v2  ;;  %v278_v4 = vld [vmem:[%s246_s9] sm:$0x3] }
  0x30   : > { %307 = vmatpush.bf16.msra.mxu0 %v485_v3 }
  0x31   : > { %v283_v5 = vld [vmem:[#allocation2] sm:$0xf] }
  0x33   : > { %480 = vmatmul.msk.bf16.vlgmr.msra.gmra.mxu0 %vm296_vm2, %v278_v4 }
  0xb0   : > { %v309_v6 = vpop.f32.mrf.mxu0 }
  0xb1   : > { %v313_v7 = vadd.f32 %v309_v6, %v283_v5 }
  0xb3   : > { %315 = vst.msk [vmem:[#allocation2] sm:$0xf] %vm314_vm3, %v313_v7 }
  0xb4   : > { %319 = sbr.rel (%p481_p3) target bundleno = 207 (0xcf), region = 44 }
  0xb8   : > { %v311_v8 = vpop.f32.mrf.mxu0 }
  0xb9   : > { %v546_v10 = vld [vmem:[%s744_s2] ss:$0 sm:$0xff]  ;;  %vm327_vm4 = vcmask 123904   ;;  %vm338_vm5 = vcmask 122880   ;;  %v340_v28 = vld [vmem:[%s746_s4 + $0x1] sm:$0x1] }
  0xba   : > { %v320_v9 = vld [vmem:[#allocation2] sm:$0xf] }
  0xbb   : > { %v325_v11 = vadd.f32 %v546_v10, %v320_v9  ;;  %v329_v25 = vld [vmem:[%s746_s4] sm:$0x1] }
  0xbd   : > { %v326_v12 = vpack.c.bf16 %v325_v11, %v325_v11  ;;  %v330_v13 = vsel %vm314_vm3, %v325_v11, 0.0  ;;  %v341_v14 = vmul.f32 %v325_v11, %v325_v11 }
  0xbe   : > { %v331_v15 = vrot.slane %v330_v13, 4 }
  0xbf   : > { %328 = vst.msk [vmem:[%s698_s26] sm:$0x3] %vm327_vm4, %v326_v12  ;;  %v342_v16 = vsel %vm314_vm3, %v341_v14, 0.0 }
  0xc0   : > { %v332_v17 = vadd.f32 %v331_v15, %v330_v13  ;;  %v343_v18 = vrot.slane %v342_v16, 4 }
  0xc2   : > { %v333_v19 = vrot.slane %v332_v17, 2  ;;  %v344_v20 = vadd.f32 %v343_v18, %v342_v16 }
  0xc4   : > { %v334_v21 = vadd.f32 %v333_v19, %v332_v17  ;;  %v345_v22 = vrot.slane %v344_v20, 2 }
  0xc6   : > { %v335_v23 = vrot.slane %v334_v21, 1  ;;  %v346_v24 = vadd.f32 %v345_v22, %v344_v20 }
  0xc8   : > { %v336_v26 = vadd.f32 %v335_v23, %v334_v21  ;;  %v347_v27 = vrot.slane %v346_v24, 1 }
  0xca   : > { %v337_v29 = vadd.f32 %v336_v26, %v329_v25  ;;  %v348_v30 = vadd.f32 %v347_v27, %v346_v24 }
  0xcc   : > { %339 = vst.msk [vmem:[%s746_s4] sm:$0x1] %vm338_vm5, %v337_v29  ;;  %v349_v31 = vadd.f32 %v348_v30, %v340_v28 }
  0xce   : > { %350 = vst.msk [vmem:[%s746_s4 + $0x1] sm:$0x1] %vm338_vm5, %v349_v31 }
  0xcf PF: > { %s15_s21 = sadd.s32 1, %s601_s21   ;;  %s749_s8 = sld [smem:[#allocation3_spill]] }
  0xd0   : > { %p12_p4 = scmp.ge.s32.totalorder %s15_s21, 18   ;;  %s750_s9 = sld [smem:[#allocation4_spill]] }
  0xd1   : > { %s751_s15 = smov %s589_s18  ;;  %s752_s16 = smov %s593_s19 }
  0xd2   : > { %s753_s17 = smov %s597_s20  ;;  %s754_s18 = smov %s758_s22 }
  0xd3   :  { %14 = sbr.rel (!%p12_p4) target bundleno = 4 (0x4), region = 85 }
  0xd5   : > { %s755_s19 = smov %s749_s8 }
  0xd6   : > { %s756_s20 = smov %s750_s9 }

// kernel: resnet_generator_forward.39
= control target key start
LH: loop header
LB: loop body
LE: loop exit
PB: predicated region body
PF: predicated region fallthrough
CT: control target
= control target key end

     0   :  { %s595_s15 = smov 0   ;;  %s597_s16 = smov 0   ;;  %s674_s0 = inlined_call_operand.vmem [shape: bf16[2,4,4,32], index: 0, kind: input, shape index: {}]   ;;  %s675_s1 = inlined_call_operand.vmem [shape: bf16[1,32,16], index: 1, kind: input, shape index: {}]   ;;  %s676_s2 = inlined_call_operand.vmem [shape: f32[1,16], index: 2, kind: input, shape index: {}]   ;;  %s677_s3 = inlined_call_operand.vmem [shape: bf16[2,4,4,16], index: 3, kind: output, shape index: {0}]   ;;  %s678_s4 = inlined_call_operand.vmem [shape: f32[2,16], index: 4, kind: output, shape index: {1}]  }
   0x1   :  { %s599_s17 = smov 0   ;;  %s601_s18 = smov 0  }
   0x2   :  { %s603_s19 = smov 0  }
   0x3 LB: > { %s30_s20 = sadd.s32 1, %s558_s17  ;;  %s34_s21 = sadd.s32 1, %s562_s18  ;;  %s566_s19 = sphi %s603_s19, %s15_s19   ;;  %s562_s18 = sphi %s601_s18, %s682_s18   ;;  %s558_s17 = sphi %s599_s17, %s681_s17   ;;  %s554_s16 = sphi %s597_s16, %s680_s16   ;;  %s550_s15 = sphi %s595_s15, %s679_s15  }
   0x4   : > { %p32_p0 = scmp.ge.s32.totalorder %s30_s20, 4  ;;  %p466_p1 = scmp.ge.s32.totalorder %s566_s19, 1 }
   0x5   : > { %p200_p2 = scmp.lt.s32.totalorder %s566_s19, 9 }
   0x6   : > { %s684_s20 = smov (%p32_p0, %s30_s20), 0  ;;  %s686_s21 = smov (!%p32_p0, %s34_s21), %s562_s18 }
   0x7   : > { %p201_p3 = pnand %p466_p1, %p200_p2  ;;  %p36_p4 = scmp.ge.s32.totalorder %s686_s21, 2 }
   0x8   : > { %p239_p5 = scmp.lt.s32.totalorder (!%p201_p3), %s554_s16, 1  ;;  %p241_p6 = scmp.lt.s32.totalorder (!%p201_p3), %s550_s15, 3 }
   0x9   : > { %s688_s21 = smov (%p36_p4, %s686_s21), 0  ;;  %204 = sbr.rel (%p201_p3) target bundleno = 186 (0xba), region = 32 }
   0xa   : > { %p262_p7 = scmp.eq.s32.totalorder (!%p201_p3), %s554_s16, 0  ;;  %p263_p8 = scmp.eq.s32.totalorder (!%p201_p3), %s550_s15, 0 }
   0xc   : > { %p264_p9 = pnand (!%p201_p3), %p263_p8, %p262_p7 }
   0xe   : > { %s690_s16 = smov (!%p239_p5, %s554_s16), 1  ;;  %s692_s15 = smov (!%p241_p6, %s550_s15), 3 }
   0xf   : > { %s467_s22 = sshll.u32 %s690_s16, 2  ;;  %270 = sbr.rel (%p264_p9) target bundleno = 22 (0x16), region = 36 }
  0x10   : > { %s244_s23 = sadd.s32 %s467_s22, %s692_s15 }
  0x11   : > { %s468_s24 = sshll.u32 %s244_s23, 1 }
  0x12   : > { %s246_s27 = scalar_lea.vmem %s674_s0, %s468_s24  ;;  %s260_s30 = scalar_lea.vmem %s677_s3, %s468_s24 }
  0x14   : > { %vm271_vm0 = vcmask 123904   ;;  %v568_v0 = vmov 0.0  }
  0x15   : > { %272 = vst.msk [vmem:[%s678_s4] sm:$0x3] %vm271_vm0, %v568_v0 }
  0x16 PF: > { %v484_v1 = vld [vmem:[%s675_s1 + $0x8] sm:$0xff]  ;;  %vm276_vm1 = vcmask 125952   ;;  %v483_v2 = vld [vmem:[%s675_s1] sm:$0xff]  ;;  %v569_v3 = vmov 0.0   ;;  %vm296_vm2 = vcmask 261120   ;;  %vm326_vm3 = vcmask 123904  }
  0x17   : > { %306 = vmatpush.bf16.msra.mxu0 %v484_v1  ;;  %277 = vst.msk [vmem:[#allocation2] sm:$0xf] %vm276_vm1, %v569_v3  ;;  %v278_v4 = vld [vmem:[%s246_s27] sm:$0x3]  ;;  %vm337_vm4 = vcmask 122880  }
  0x18   : > { %v527_v8 = vld [vmem:[%s676_s2] ss:$0 sm:$0xff] }
  0x1b   : > { %307 = vmatpush.bf16.msra.mxu0 %v483_v2 }
  0x1c   : > { %v328_v25 = vld [vmem:[%s678_s4] sm:$0x1]  ;;  %v339_v28 = vld [vmem:[%s678_s4 + $0x1] sm:$0x1] }
  0x1e   : > { %480 = vmatmul.msk.bf16.vlgmr.msra.gmra.mxu0 %vm296_vm2, %v278_v4  ;;  %v283_v5 = vld [vmem:[#allocation2] sm:$0xf] }
  0x9b   : > { %v309_v6 = vpop.f32.mrf.mxu0 }
  0x9c   : > { %v313_v7 = vadd.f32 %v309_v6, %v283_v5 }
  0x9e   : > { %315 = vst.msk [vmem:[#allocation2] sm:$0xf] %vm276_vm1, %v313_v7 }
  0xa3   : > { %v311_v9 = vpop.f32.mrf.mxu0 }
  0xa5   : > { %v319_v10 = vld [vmem:[#allocation2] sm:$0xf] }
  0xa6   : > { %v324_v11 = vadd.f32 %v527_v8, %v319_v10 }
  0xa8   : > { %v325_v12 = vpack.c.bf16 %v324_v11, %v324_v11  ;;  %v329_v13 = vsel %vm276_vm1, %v324_v11, 0.0  ;;  %v340_v14 = vmul.f32 %v324_v11, %v324_v11 }
  0xa9   : > { %v330_v15 = vrot.slane %v329_v13, 4 }
  0xaa   : > { %327 = vst.msk [vmem:[%s260_s30] sm:$0x3] %vm326_vm3, %v325_v12  ;;  %v341_v16 = vsel %vm276_vm1, %v340_v14, 0.0 }
  0xab   : > { %v331_v17 = vadd.f32 %v330_v15, %v329_v13  ;;  %v342_v18 = vrot.slane %v341_v16, 4 }
  0xad   : > { %v332_v19 = vrot.slane %v331_v17, 2  ;;  %v343_v20 = vadd.f32 %v342_v18, %v341_v16 }
  0xaf   : > { %v333_v21 = vadd.f32 %v332_v19, %v331_v17  ;;  %v344_v22 = vrot.slane %v343_v20, 2 }
  0xb1   : > { %v334_v23 = vrot.slane %v333_v21, 1  ;;  %v345_v24 = vadd.f32 %v344_v22, %v343_v20 }
  0xb3   : > { %v335_v26 = vadd.f32 %v334_v23, %v333_v21  ;;  %v346_v27 = vrot.slane %v345_v24, 1 }
  0xb5   : > { %v336_v29 = vadd.f32 %v335_v26, %v328_v25  ;;  %v347_v30 = vadd.f32 %v346_v27, %v345_v24 }
  0xb7   : > { %338 = vst.msk [vmem:[%s678_s4] sm:$0x1] %vm337_vm4, %v336_v29  ;;  %v348_v31 = vadd.f32 %v347_v30, %v339_v28 }
  0xb9   : > { %349 = vst.msk [vmem:[%s678_s4 + $0x1] sm:$0x1] %vm337_vm4, %v348_v31 }
  0xba PF: > { %s15_s19 = sadd.s32 1, %s566_s19   ;;  %s679_s15 = smov %s558_s17 }
  0xbb   : > { %p12_p10 = scmp.ge.s32.totalorder %s15_s19, 10   ;;  %s680_s16 = smov %s562_s18 }
  0xbc   : > { %s681_s17 = smov %s684_s20  ;;  %s682_s18 = smov %s688_s21 }
  0xbd   :  { %14 = sbr.rel (!%p12_p10) target bundleno = 3 (0x3), region = 85 }

// kernel: resnet_generator_forward.47
= control target key start
LH: loop header
LB: loop body
LE: loop exit
PB: predicated region body
PF: predicated region fallthrough
CT: control target
= control target key end

     0   :  { %s673_s15 = smov 0   ;;  %s675_s16 = smov 0   ;;  %s788_s0 = inlined_call_operand.vmem [shape: bf16[2,9,9,16], index: 0, kind: input, shape index: {}]   ;;  %s789_s1 = inlined_call_operand.vmem [shape: bf16[2,32,8], index: 1, kind: input, shape index: {}]   ;;  %s790_s2 = inlined_call_operand.vmem [shape: f32[1,8], index: 2, kind: input, shape index: {}]   ;;  %s791_s3 = inlined_call_operand.vmem [shape: bf16[2,8,8,8], index: 3, kind: output, shape index: {0}]   ;;  %s792_s4 = inlined_call_operand.vmem [shape: f32[2,8], index: 4, kind: output, shape index: {1}]  }
   0x1   :  { %s677_s17 = smov 0   ;;  %s679_s18 = smov 0  }
   0x2   :  { %s681_s19 = smov 0   ;;  %s683_s20 = smov 0  }
   0x3   :  { %s685_s21 = smov 0  }
   0x4 LB: > { %s27_s22 = sadd.s32 1, %s632_s18  ;;  %s30_s23 = sadd.s32 1, %s636_s19  ;;  %s644_s21 = sphi %s685_s21, %s15_s21   ;;  %s640_s20 = sphi %s683_s20, %s798_s20   ;;  %s636_s19 = sphi %s681_s19, %s797_s19   ;;  %s632_s18 = sphi %s679_s18, %s796_s18   ;;  %s628_s17 = sphi %s677_s17, %s795_s17   ;;  %s624_s16 = sphi %s675_s16, %s794_s16   ;;  %s620_s15 = sphi %s673_s15, %s793_s15  }
   0x5   : > { %p28_p0 = scmp.ge.s32.totalorder %s27_s22, 2  ;;  %p501_p1 = scmp.ge.s32.totalorder %s644_s21, 1 }
   0x6   : > { %p201_p2 = scmp.lt.s32.totalorder %s644_s21, 33  ;;  %s34_s24 = sadd.s32 1, %s640_s20 }
   0x7   : > { %s800_s22 = smov (%p28_p0, %s27_s22), 0  ;;  %s802_s23 = smov (!%p28_p0, %s30_s23), %s636_s19 }
   0x8   : > { %p202_p3 = pnand %p501_p1, %p201_p2  ;;  %p32_p4 = scmp.ge.s32.totalorder %s802_s23, 8 }
   0x9   : > { %s240_s25 = sadd.s32 (!%p202_p3), %s620_s15, %s624_s16  ;;  %p241_p6 = scmp.lt.s32.totalorder (!%p202_p3), %s628_s17, 1 }
   0xa   : > { %s804_s23 = smov (%p32_p4, %s802_s23), 0  ;;  %s806_s24 = smov (!%p32_p4, %s34_s24), %s640_s20 }
   0xb   : > { %p36_p5 = scmp.ge.s32.totalorder %s806_s24, 2  ;;  %205 = sbr.rel (%p202_p3) target bundleno = 208 (0xd0), region = 32 }
   0xc   : > { %p243_p7 = scmp.lt.s32.totalorder (!%p202_p3), %s240_s25, 8  ;;  %p251_p8 = scmp.lt.s32.totalorder (!%p202_p3), %s620_s15, 1 }
   0xd   : > { %s808_s24 = smov (%p36_p5, %s806_s24), 0  ;;  %p258_p9 = scmp.lt.s32.totalorder (!%p202_p3), %s624_s16, 7 }
   0xe   : > { %p265_p10 = scmp.eq.s32.totalorder (!%p202_p3), %s628_s17, 0  ;;  %p266_p11 = scmp.eq.s32.totalorder (!%p202_p3), %s624_s16, 0 }
   0xf   : > { %p269_p12 = scmp.eq.s32.totalorder (!%p202_p3), %s620_s15, 0 }
  0x10   : > { %s242_s26 = scalar_select %p241_p6, %s628_s17, 1 }
  0x11   : > { %s810_s25 = smov (!%p243_p7, %s240_s25), 8  ;;  %s812_s16 = smov (!%p258_p9, %s624_s16), 7 }
  0x12   : > { %s530_s27 = smul.u32 18, %s242_s26  ;;  %s502_s28 = sshll.u32 %s810_s25, 1 }
  0x13   : > { %s506_s29 = sshll.u32 %s242_s26, 3  ;;  %p267_p13 = pnand %p266_p11, %p265_p10 }
  0x14   : > { %s247_s30 = sadd.s32 %s530_s27, %s502_s28  ;;  %s261_s14 = sadd.s32 %s506_s29, %s812_s16 }
  0x15   : > { %s503_s5 = sshll.u32 %s247_s30, 2  ;;  %s507_s25 = sshll.u32 %s261_s14, 2 }
  0x16   : > { %s249_s8 = scalar_lea.vmem %s788_s0, %s503_s5  ;;  %p268_p0 = pneg %p267_p13 }
  0x17   : > { %s252_s9 = scalar_select %p251_p8, %s620_s15, 1 }
  0x18   : > { %s741_s27 = scalar_lea.vmem %s791_s3, %s507_s25  ;;  %p270_p1 = pnand %p269_p12, %p268_p0 }
  0x19   : > { %s526_s10 = sshll.u32 %s252_s9, 4 }
  0x1a   : > { %s255_s13 = scalar_lea.vmem %s789_s1, %s526_s10  ;;  %273 = sbr.rel (%p270_p1) target bundleno = 33 (0x21), region = 36 }
  0x1f   : > { %vm274_vm0 = vcmask 58368   ;;  %v646_v0 = vmov 0.0  }
  0x20   : > { %275 = vst.msk [vmem:[%s792_s4] sm:$0x3] %vm274_vm0, %v646_v0 }
  0x21 PF: > { %p508_p2 = scmp.ne.s32.totalorder %s620_s15, 0 }
  0x23   : > { %278 = sbr.rel (%p508_p2) target bundleno = 42 (0x2a), region = 40 }
  0x28   : > { %vm279_vm1 = vcmask 64512   ;;  %v647_v1 = vmov 0.0  }
  0x29   : > { %280 = vst.msk [vmem:[#allocation2] sm:$0xff] %vm279_vm1, %v647_v1 }
  0x2a PF: > { %v528_v2 = vld [vmem:[%s255_s13] sm:$0xff]  ;;  %v529_v3 = vld [vmem:[%s255_s13 + $0x8] sm:$0xff]  ;;  %vm294_vm2 = vcmask 130048   ;;  %vm347_vm3 = vcmask 64512   ;;  %p523_p3 = scmp.ne.s32.totalorder %s620_s15, 1 }
  0x2b   : > { %v516_v4 = vld [vmem:[%s249_s8] sm:$0xf]  ;;  %v527_v5 = vld [vmem:[%s249_s8] sm:$0x10]  ;;  %305 = vmatpush.bf16.msra.mxu0 %v528_v2  ;;  %340 = vmatpush.bf16.msra.mxu1 %v529_v3 }
  0x2c   : > { %v281_v6 = vld [vmem:[%s249_s8] sm:$0xf]  ;;  %v517_v7 = vor.u32 %v527_v5, %v516_v4 }
  0x2e   : > { %v318_v8 = vshrl.u32 %v517_v7, 16  ;;  %v320_v9 = vshll.u32 %v517_v7, 16  ;;  %513 = vmatmul.msk.bf16.vlgmr.msra.gmra.mxu0 %vm294_vm2, %v281_v6 }
  0x30   : > { %v322_v10 = vrot.slane %v320_v9, 1  ;;  %v287_v12 = vld [vmem:[#allocation2] sm:$0xff] }
  0x32   : > { %v323_v11 = vor.u32 %v322_v10, %v318_v8 }
  0x34   : > { %522 = vmatmul.msk.bf16.vlgmr.msra.gmra.mxu1 %vm294_vm2, %v323_v11 }
  0xab   : > { %v307_v13 = vpop.f32.mrf.mxu0 }
  0xac   : > { %v311_v14 = vadd.f32 %v307_v13, %v287_v12 }
  0xb1   : > { %v342_v15 = vpop.f32.mrf.mxu1 }
  0xb2   : > { %v346_v16 = vadd.f32 %v342_v15, %v311_v14 }
  0xb3   : > { %v309_v17 = vpop.f32.mrf.mxu0 }
  0xb4   : > { %348 = vst.msk [vmem:[#allocation2] sm:$0xff] %vm347_vm3, %v346_v16 }
  0xb5   : > { %352 = sbr.rel (%p523_p3) target bundleno = 208 (0xd0), region = 44 }
  0xb9   : > { %v344_v18 = vpop.f32.mrf.mxu1 }
  0xba   : > { %v589_v20 = vld [vmem:[%s790_s2] ss:$0 sm:$0xff]  ;;  %vm360_vm4 = vcmask 60416   ;;  %vm371_vm5 = vcmask 57344   ;;  %v373_v38 = vld [vmem:[%s792_s4 + $0x1] sm:$0x1] }
  0xbb   : > { %v353_v19 = vld [vmem:[#allocation2] sm:$0xff] }
  0xbc   : > { %v358_v21 = vadd.f32 %v589_v20, %v353_v19  ;;  %v362_v35 = vld [vmem:[%s792_s4] sm:$0x1] }
  0xbe   : > { %v359_v22 = vpack.c.bf16 %v358_v21, %v358_v21  ;;  %v363_v23 = vsel %vm347_vm3, %v358_v21, 0.0  ;;  %v374_v24 = vmul.f32 %v358_v21, %v358_v21 }
  0xbf   : > { %v364_v25 = vrot.slane %v363_v23, 4 }
  0xc0   : > { %361 = vst.msk [vmem:[%s741_s27] sm:$0xf] %vm360_vm4, %v359_v22  ;;  %v375_v26 = vsel %vm347_vm3, %v374_v24, 0.0 }
  0xc1   : > { %v365_v27 = vadd.f32 %v364_v25, %v363_v23  ;;  %v376_v28 = vrot.slane %v375_v26, 4 }
  0xc3   : > { %v366_v29 = vrot.slane %v365_v27, 2  ;;  %v377_v30 = vadd.f32 %v376_v28, %v375_v26 }
  0xc5   : > { %v367_v31 = vadd.f32 %v366_v29, %v365_v27  ;;  %v378_v32 = vrot.slane %v377_v30, 2 }
  0xc7   : > { %v368_v33 = vrot.slane %v367_v31, 1  ;;  %v379_v34 = vadd.f32 %v378_v32, %v377_v30 }
  0xc9   : > { %v369_v36 = vadd.f32 %v368_v33, %v367_v31  ;;  %v380_v37 = vrot.slane %v379_v34, 1 }
  0xcb   : > { %v370_v39 = vadd.f32 %v369_v36, %v362_v35  ;;  %v381_v40 = vadd.f32 %v380_v37, %v379_v34 }
  0xcd   : > { %372 = vst.msk [vmem:[%s792_s4] sm:$0x1] %vm371_vm5, %v370_v39  ;;  %v382_v41 = vadd.f32 %v381_v40, %v373_v38 }
  0xcf   : > { %383 = vst.msk [vmem:[%s792_s4 + $0x1] sm:$0x1] %vm371_vm5, %v382_v41 }
  0xd0 PF: > { %s15_s21 = sadd.s32 1, %s644_s21   ;;  %s793_s15 = smov %s632_s18 }
  0xd1   : > { %p12_p4 = scmp.ge.s32.totalorder %s15_s21, 34   ;;  %s794_s16 = smov %s636_s19 }
  0xd2   : > { %s795_s17 = smov %s640_s20  ;;  %s796_s18 = smov %s800_s22 }
  0xd3   : > { %s797_s19 = smov %s804_s23  ;;  %s798_s20 = smov %s808_s24 }
  0xd4   :  { %14 = sbr.rel (!%p12_p4) target bundleno = 4 (0x4), region = 85 }

// kernel: resnet_generator_forward.45
= control target key start
LH: loop header
LB: loop body
LE: loop exit
PB: predicated region body
PF: predicated region fallthrough
CT: control target
= control target key end

     0   :  { %s638_s15 = smov 0   ;;  %s640_s16 = smov 0   ;;  %s732_s0 = inlined_call_operand.vmem [shape: bf16[2,8,9,16], index: 0, kind: input, shape index: {}]   ;;  %s733_s1 = inlined_call_operand.vmem [shape: bf16[1,32,8], index: 1, kind: input, shape index: {}]   ;;  %s734_s2 = inlined_call_operand.vmem [shape: f32[1,8], index: 2, kind: input, shape index: {}]   ;;  %s735_s3 = inlined_call_operand.vmem [shape: bf16[2,8,8,8], index: 3, kind: output, shape index: {0}]   ;;  %s736_s4 = inlined_call_operand.vmem [shape: f32[2,8], index: 4, kind: output, shape index: {1}]  }
   0x1   :  { %s642_s17 = smov 0   ;;  %s644_s18 = smov 0  }
   0x2   :  { %s646_s19 = smov 0  }
   0x3 LB: > { %s30_s20 = sadd.s32 1, %s601_s17  ;;  %s34_s21 = sadd.s32 1, %s605_s18  ;;  %s609_s19 = sphi %s646_s19, %s15_s19   ;;  %s605_s18 = sphi %s644_s18, %s740_s18   ;;  %s601_s17 = sphi %s642_s17, %s739_s17   ;;  %s597_s16 = sphi %s640_s16, %s738_s16   ;;  %s593_s15 = sphi %s638_s15, %s737_s15  }
   0x4   : > { %p32_p0 = scmp.ge.s32.totalorder %s30_s20, 8  ;;  %p502_p1 = scmp.ge.s32.totalorder %s609_s19, 1 }
   0x5   : > { %p201_p2 = scmp.lt.s32.totalorder %s609_s19, 17 }
   0x6   : > { %s742_s20 = smov (%p32_p0, %s30_s20), 0  ;;  %s744_s21 = smov (!%p32_p0, %s34_s21), %s605_s18 }
   0x7   : > { %p202_p3 = pnand %p502_p1, %p201_p2  ;;  %p36_p4 = scmp.ge.s32.totalorder %s744_s21, 2 }
   0x8   : > { %p241_p5 = scmp.lt.s32.totalorder (!%p202_p3), %s597_s16, 1  ;;  %p243_p6 = scmp.lt.s32.totalorder (!%p202_p3), %s593_s15, 7 }
   0x9   : > { %s746_s21 = smov (%p36_p4, %s744_s21), 0  ;;  %205 = sbr.rel (%p202_p3) target bundleno = 193 (0xc1), region = 32 }
   0xa   : > { %p265_p7 = scmp.eq.s32.totalorder (!%p202_p3), %s597_s16, 0  ;;  %p266_p8 = scmp.eq.s32.totalorder (!%p202_p3), %s593_s15, 0 }
   0xc   : > { %p267_p9 = pnand (!%p202_p3), %p266_p8, %p265_p7 }
   0xe   : > { %s242_s22 = scalar_select %p241_p5, %s597_s16, 1 }
   0xf   : > { %s748_s15 = smov (!%p243_p6, %s593_s15), 7 }
  0x10   : > { %s504_s23 = sshll.u32 %s242_s22, 4  ;;  %s506_s24 = sshll.u32 %s242_s22, 3 }
  0x11   : > { %s503_s25 = sshll.u32 %s748_s15, 1  ;;  %s261_s26 = sadd.s32 %s506_s24, %s748_s15 }
  0x12   : > { %s247_s27 = sadd.s32 %s504_s23, %s503_s25  ;;  %s507_s28 = sshll.u32 %s261_s26, 2 }
  0x13   : > { %s505_s29 = sshll.u32 %s247_s27, 2  ;;  %s681_s6 = scalar_lea.vmem %s735_s3, %s507_s28 }
  0x14   : > { %s249_s9 = scalar_lea.vmem %s732_s0, %s505_s29  ;;  %273 = sbr.rel (%p267_p9) target bundleno = 27 (0x1b), region = 36 }
  0x19   : > { %vm274_vm0 = vcmask 58368   ;;  %v611_v0 = vmov 0.0  }
  0x1a   : > { %275 = vst.msk [vmem:[%s736_s4] sm:$0x3] %vm274_vm0, %v611_v0 }
  0x1b PF: > { %v526_v1 = vld [vmem:[%s733_s1] sm:$0xff]  ;;  %v527_v2 = vld [vmem:[%s733_s1 + $0x8] sm:$0xff]  ;;  %vm279_vm1 = vcmask 64512   ;;  %vm294_vm2 = vcmask 130048   ;;  %v612_v7 = vmov 0.0   ;;  %vm359_vm3 = vcmask 60416  }
  0x1c   : > { %v516_v3 = vld [vmem:[%s249_s9] sm:$0xf]  ;;  %v525_v4 = vld [vmem:[%s249_s9] sm:$0x10]  ;;  %305 = vmatpush.bf16.msra.mxu0 %v526_v1  ;;  %340 = vmatpush.bf16.msra.mxu1 %v527_v2  ;;  %280 = vst.msk [vmem:[#allocation2] sm:$0xff] %vm279_vm1, %v612_v7  ;;  %vm370_vm4 = vcmask 57344  }
  0x1d   : > { %v281_v5 = vld [vmem:[%s249_s9] sm:$0xf]  ;;  %v517_v6 = vor.u32 %v525_v4, %v516_v3 }
  0x1e   : > { %v570_v18 = vld [vmem:[%s734_s2] ss:$0 sm:$0xff] }
  0x1f   : > { %v318_v8 = vshrl.u32 %v517_v6, 16  ;;  %v320_v9 = vshll.u32 %v517_v6, 16  ;;  %513 = vmatmul.msk.bf16.vlgmr.msra.gmra.mxu0 %vm294_vm2, %v281_v5 }
  0x21   : > { %v322_v10 = vrot.slane %v320_v9, 1  ;;  %v361_v35 = vld [vmem:[%s736_s4] sm:$0x1]  ;;  %v372_v38 = vld [vmem:[%s736_s4 + $0x1] sm:$0x1] }
  0x23   : > { %v323_v11 = vor.u32 %v322_v10, %v318_v8  ;;  %v287_v12 = vld [vmem:[#allocation2] sm:$0xff] }
  0x25   : > { %522 = vmatmul.msk.bf16.vlgmr.msra.gmra.mxu1 %vm294_vm2, %v323_v11 }
  0x9c   : > { %v307_v13 = vpop.f32.mrf.mxu0 }
  0x9d   : > { %v311_v14 = vadd.f32 %v307_v13, %v287_v12 }
  0xa2   : > { %v342_v15 = vpop.f32.mrf.mxu1 }
  0xa3   : > { %v346_v16 = vadd.f32 %v342_v15, %v311_v14 }
  0xa4   : > { %v309_v17 = vpop.f32.mrf.mxu0 }
  0xa5   : > { %348 = vst.msk [vmem:[#allocation2] sm:$0xff] %vm279_vm1, %v346_v16 }
  0xaa   : > { %v344_v19 = vpop.f32.mrf.mxu1 }
  0xac   : > { %v352_v20 = vld [vmem:[#allocation2] sm:$0xff] }
  0xad   : > { %v357_v21 = vadd.f32 %v570_v18, %v352_v20 }
  0xaf   : > { %v358_v22 = vpack.c.bf16 %v357_v21, %v357_v21  ;;  %v362_v23 = vsel %vm279_vm1, %v357_v21, 0.0  ;;  %v373_v24 = vmul.f32 %v357_v21, %v357_v21 }
  0xb0   : > { %v363_v25 = vrot.slane %v362_v23, 4 }
  0xb1   : > { %360 = vst.msk [vmem:[%s681_s6] sm:$0xf] %vm359_vm3, %v358_v22  ;;  %v374_v26 = vsel %vm279_vm1, %v373_v24, 0.0 }
  0xb2   : > { %v364_v27 = vadd.f32 %v363_v25, %v362_v23  ;;  %v375_v28 = vrot.slane %v374_v26, 4 }
  0xb4   : > { %v365_v29 = vrot.slane %v364_v27, 2  ;;  %v376_v30 = vadd.f32 %v375_v28, %v374_v26 }
  0xb6   : > { %v366_v31 = vadd.f32 %v365_v29, %v364_v27  ;;  %v377_v32 = vrot.slane %v376_v30, 2 }
  0xb8   : > { %v367_v33 = vrot.slane %v366_v31, 1  ;;  %v378_v34 = vadd.f32 %v377_v32, %v376_v30 }
  0xba   : > { %v368_v36 = vadd.f32 %v367_v33, %v366_v31  ;;  %v379_v37 = vrot.slane %v378_v34, 1 }
  0xbc   : > { %v369_v39 = vadd.f32 %v368_v36, %v361_v35  ;;  %v380_v40 = vadd.f32 %v379_v37, %v378_v34 }
  0xbe   : > { %371 = vst.msk [vmem:[%s736_s4] sm:$0x1] %vm370_vm4, %v369_v39  ;;  %v381_v41 = vadd.f32 %v380_v40, %v372_v38 }
  0xc0   : > { %382 = vst.msk [vmem:[%s736_s4 + $0x1] sm:$0x1] %vm370_vm4, %v381_v41 }
  0xc1 PF: > { %s15_s19 = sadd.s32 1, %s609_s19   ;;  %s737_s15 = smov %s601_s17 }
  0xc2   : > { %p12_p10 = scmp.ge.s32.totalorder %s15_s19, 18   ;;  %s738_s16 = smov %s605_s18 }
  0xc3   : > { %s739_s17 = smov %s742_s20  ;;  %s740_s18 = smov %s746_s21 }
  0xc4   :  { %14 = sbr.rel (!%p12_p10) target bundleno = 3 (0x3), region = 85 }

// kernel: resnet_generator_forward.44
= control target key start
LH: loop header
LB: loop body
LE: loop exit
PB: predicated region body
PF: predicated region fallthrough
CT: control target
= control target key end

     0   :  { %s582_s15 = smov 0   ;;  %s584_s16 = smov 0   ;;  %s658_s0 = inlined_call_operand.vmem [shape: bf16[2,8,8,16], index: 0, kind: input, shape index: {}]   ;;  %s659_s1 = inlined_call_operand.vmem [shape: bf16[1,16,8], index: 1, kind: input, shape index: {}]   ;;  %s660_s2 = inlined_call_operand.vmem [shape: f32[1,8], index: 2, kind: input, shape index: {}]   ;;  %s661_s3 = inlined_call_operand.vmem [shape: bf16[2,8,8,8], index: 3, kind: output, shape index: {0}]   ;;  %s662_s4 = inlined_call_operand.vmem [shape: f32[2,8], index: 4, kind: output, shape index: {1}]  }
   0x1   :  { %s586_s17 = smov 0   ;;  %s588_s18 = smov 0  }
   0x2   :  { %s590_s19 = smov 0  }
   0x3 LB: > { %s30_s20 = sadd.s32 1, %s545_s17  ;;  %s34_s21 = sadd.s32 1, %s549_s18  ;;  %s553_s19 = sphi %s590_s19, %s15_s19   ;;  %s549_s18 = sphi %s588_s18, %s666_s18   ;;  %s545_s17 = sphi %s586_s17, %s665_s17   ;;  %s541_s16 = sphi %s584_s16, %s664_s16   ;;  %s537_s15 = sphi %s582_s15, %s663_s15  }
   0x4   : > { %p32_p0 = scmp.ge.s32.totalorder %s30_s20, 8  ;;  %p458_p1 = scmp.ge.s32.totalorder %s553_s19, 1 }
   0x5   : > { %p200_p2 = scmp.lt.s32.totalorder %s553_s19, 17 }
   0x6   : > { %s668_s20 = smov (%p32_p0, %s30_s20), 0  ;;  %s670_s21 = smov (!%p32_p0, %s34_s21), %s549_s18 }
   0x7   : > { %p201_p3 = pnand %p458_p1, %p200_p2  ;;  %p36_p4 = scmp.ge.s32.totalorder %s670_s21, 2 }
   0x8   : > { %p239_p5 = scmp.lt.s32.totalorder (!%p201_p3), %s541_s16, 1  ;;  %p241_p6 = scmp.lt.s32.totalorder (!%p201_p3), %s537_s15, 7 }
   0x9   : > { %s672_s21 = smov (%p36_p4, %s670_s21), 0  ;;  %204 = sbr.rel (%p201_p3) target bundleno = 182 (0xb6), region = 32 }
   0xa   : > { %p262_p7 = scmp.eq.s32.totalorder (!%p201_p3), %s541_s16, 0  ;;  %p263_p8 = scmp.eq.s32.totalorder (!%p201_p3), %s537_s15, 0 }
   0xc   : > { %p264_p9 = pnand (!%p201_p3), %p263_p8, %p262_p7 }
   0xe   : > { %s674_s16 = smov (!%p239_p5, %s541_s16), 1  ;;  %s676_s15 = smov (!%p241_p6, %s537_s15), 7 }
   0xf   : > { %s459_s22 = sshll.u32 %s674_s16, 3  ;;  %270 = sbr.rel (%p264_p9) target bundleno = 22 (0x16), region = 36 }
  0x10   : > { %s244_s23 = sadd.s32 %s459_s22, %s676_s15 }
  0x11   : > { %s460_s24 = sshll.u32 %s244_s23, 2 }
  0x12   : > { %s246_s27 = scalar_lea.vmem %s658_s0, %s460_s24  ;;  %s260_s30 = scalar_lea.vmem %s661_s3, %s460_s24 }
  0x14   : > { %vm271_vm0 = vcmask 58368   ;;  %v555_v0 = vmov 0.0  }
  0x15   : > { %272 = vst.msk [vmem:[%s662_s4] sm:$0x3] %vm271_vm0, %v555_v0 }
  0x16 PF: > { %v471_v1 = vld [vmem:[%s659_s1] sm:$0xff]  ;;  %vm276_vm1 = vcmask 64512   ;;  %v556_v2 = vmov 0.0   ;;  %vm288_vm2 = vcmask 130048   ;;  %vm318_vm3 = vcmask 60416  }
  0x17   : > { %277 = vst.msk [vmem:[#allocation2] sm:$0xff] %vm276_vm1, %v556_v2  ;;  %299 = vmatpush.bf16.msra.mxu0 %v471_v1  ;;  %v278_v3 = vld [vmem:[%s246_s27] sm:$0xf]  ;;  %vm329_vm4 = vcmask 57344  }
  0x18   : > { %v514_v7 = vld [vmem:[%s660_s2] ss:$0 sm:$0xff] }
  0x1a   : > { %468 = vmatmul.msk.bf16.vlgmr.msra.gmra.mxu0 %vm288_vm2, %v278_v3 }
  0x1c   : > { %v320_v24 = vld [vmem:[%s662_s4] sm:$0x1]  ;;  %v331_v27 = vld [vmem:[%s662_s4 + $0x1] sm:$0x1] }
  0x1e   : > { %v281_v4 = vld [vmem:[#allocation2] sm:$0xff] }
  0x97   : > { %v301_v5 = vpop.f32.mrf.mxu0 }
  0x98   : > { %v305_v6 = vadd.f32 %v301_v5, %v281_v4 }
  0x9a   : > { %307 = vst.msk [vmem:[#allocation2] sm:$0xff] %vm276_vm1, %v305_v6 }
  0x9f   : > { %v303_v8 = vpop.f32.mrf.mxu0 }
  0xa1   : > { %v311_v9 = vld [vmem:[#allocation2] sm:$0xff] }
  0xa2   : > { %v316_v10 = vadd.f32 %v514_v7, %v311_v9 }
  0xa4   : > { %v317_v11 = vpack.c.bf16 %v316_v10, %v316_v10  ;;  %v321_v12 = vsel %vm276_vm1, %v316_v10, 0.0  ;;  %v332_v13 = vmul.f32 %v316_v10, %v316_v10 }
  0xa5   : > { %v322_v14 = vrot.slane %v321_v12, 4 }
  0xa6   : > { %319 = vst.msk [vmem:[%s260_s30] sm:$0xf] %vm318_vm3, %v317_v11  ;;  %v333_v15 = vsel %vm276_vm1, %v332_v13, 0.0 }
  0xa7   : > { %v323_v16 = vadd.f32 %v322_v14, %v321_v12  ;;  %v334_v17 = vrot.slane %v333_v15, 4 }
  0xa9   : > { %v324_v18 = vrot.slane %v323_v16, 2  ;;  %v335_v19 = vadd.f32 %v334_v17, %v333_v15 }
  0xab   : > { %v325_v20 = vadd.f32 %v324_v18, %v323_v16  ;;  %v336_v21 = vrot.slane %v335_v19, 2 }
  0xad   : > { %v326_v22 = vrot.slane %v325_v20, 1  ;;  %v337_v23 = vadd.f32 %v336_v21, %v335_v19 }
  0xaf   : > { %v327_v25 = vadd.f32 %v326_v22, %v325_v20  ;;  %v338_v26 = vrot.slane %v337_v23, 1 }
  0xb1   : > { %v328_v28 = vadd.f32 %v327_v25, %v320_v24  ;;  %v339_v29 = vadd.f32 %v338_v26, %v337_v23 }
  0xb3   : > { %330 = vst.msk [vmem:[%s662_s4] sm:$0x1] %vm329_vm4, %v328_v28  ;;  %v340_v30 = vadd.f32 %v339_v29, %v331_v27 }
  0xb5   : > { %341 = vst.msk [vmem:[%s662_s4 + $0x1] sm:$0x1] %vm329_vm4, %v340_v30 }
  0xb6 PF: > { %s15_s19 = sadd.s32 1, %s553_s19   ;;  %s663_s15 = smov %s545_s17 }
  0xb7   : > { %p12_p10 = scmp.ge.s32.totalorder %s15_s19, 18   ;;  %s664_s16 = smov %s549_s18 }
  0xb8   : > { %s665_s17 = smov %s668_s20  ;;  %s666_s18 = smov %s672_s21 }
  0xb9   :  { %14 = sbr.rel (!%p12_p10) target bundleno = 3 (0x3), region = 85 }

// kernel: resnet_generator_forward.46
= control target key start
LH: loop header
LB: loop body
LE: loop exit
PB: predicated region body
PF: predicated region fallthrough
CT: control target
= control target key end

     0   :  { %s617_s15 = smov 0   ;;  %s619_s16 = smov 0   ;;  %s729_s0 = inlined_call_operand.vmem [shape: bf16[2,9,8,16], index: 0, kind: input, shape index: {}]   ;;  %s730_s1 = inlined_call_operand.vmem [shape: bf16[2,16,8], index: 1, kind: input, shape index: {}]   ;;  %s731_s2 = inlined_call_operand.vmem [shape: f32[1,8], index: 2, kind: input, shape index: {}]   ;;  %s732_s3 = inlined_call_operand.vmem [shape: bf16[2,8,8,8], index: 3, kind: output, shape index: {0}]   ;;  %s733_s4 = inlined_call_operand.vmem [shape: f32[2,8], index: 4, kind: output, shape index: {1}]  }
   0x1   :  { %s621_s17 = smov 0   ;;  %s623_s18 = smov 0  }
   0x2   :  { %s625_s19 = smov 0   ;;  %s627_s20 = smov 0  }
   0x3   :  { %s629_s21 = smov 0  }
   0x4 LB: > { %s27_s22 = sadd.s32 1, %s576_s18  ;;  %s30_s23 = sadd.s32 1, %s580_s19  ;;  %s588_s21 = sphi %s629_s21, %s15_s21   ;;  %s584_s20 = sphi %s627_s20, %s743_s20   ;;  %s580_s19 = sphi %s625_s19, %s742_s19   ;;  %s576_s18 = sphi %s623_s18, %s741_s18   ;;  %s572_s17 = sphi %s621_s17, %s740_s17   ;;  %s568_s16 = sphi %s619_s16, %s739_s16   ;;  %s564_s15 = sphi %s617_s15, %s738_s15  }
   0x5   : > { %p28_p0 = scmp.ge.s32.totalorder %s27_s22, 2  ;;  %p457_p1 = scmp.ge.s32.totalorder %s588_s21, 1 }
   0x6   : > { %p200_p2 = scmp.lt.s32.totalorder %s588_s21, 33  ;;  %s34_s24 = sadd.s32 1, %s584_s20 }
   0x7   : > { %s745_s22 = smov (%p28_p0, %s27_s22), 0  ;;  %s747_s23 = smov (!%p28_p0, %s30_s23), %s580_s19 }
   0x8   : > { %p201_p3 = pnand %p457_p1, %p200_p2  ;;  %p32_p4 = scmp.ge.s32.totalorder %s747_s23, 8 }
   0x9   : > { %s238_s25 = sadd.s32 (!%p201_p3), %s564_s15, %s568_s16  ;;  %p239_p6 = scmp.lt.s32.totalorder (!%p201_p3), %s572_s17, 1 }
   0xa   : > { %s749_s23 = smov (%p32_p4, %s747_s23), 0  ;;  %s751_s24 = smov (!%p32_p4, %s34_s24), %s584_s20 }
   0xb   : > { %734 = sst [smem:[#allocation3_spill]] %s749_s23  ;;  %p36_p5 = scmp.ge.s32.totalorder %s751_s24, 2 }
   0xc   : > { %204 = sbr.rel (%p201_p3) target bundleno = 203 (0xcb), region = 32  ;;  %p241_p7 = scmp.lt.s32.totalorder (!%p201_p3), %s238_s25, 8 }
   0xd   : > { %s753_s24 = smov (%p36_p5, %s751_s24), 0  ;;  %p248_p8 = scmp.lt.s32.totalorder (!%p201_p3), %s564_s15, 1 }
   0xe   : > { %735 = sst [smem:[#allocation4_spill]] %s753_s24  ;;  %p255_p9 = scmp.lt.s32.totalorder (!%p201_p3), %s568_s16, 7 }
   0xf   : > { %p262_p10 = scmp.eq.s32.totalorder (!%p201_p3), %s572_s17, 0  ;;  %p263_p11 = scmp.eq.s32.totalorder (!%p201_p3), %s568_s16, 0 }
  0x10   : > { %p266_p12 = scmp.eq.s32.totalorder (!%p201_p3), %s564_s15, 0 }
  0x11   : > { %s240_s26 = scalar_select %p239_p6, %s572_s17, 1 }
  0x12   : > { %s755_s25 = smov (!%p241_p7, %s238_s25), 8  ;;  %p264_p13 = pnand %p263_p11, %p262_p10 }
  0x13   : > { %s474_s27 = smul.u32 9, %s240_s26  ;;  %s461_s30 = sshll.u32 %s240_s26, 3 }
  0x14   : > { %s249_s28 = scalar_select %p248_p8, %s564_s15, 1 }
  0x15   : > { %s244_s29 = sadd.s32 %s474_s27, %s755_s25  ;;  %p265_p0 = pneg %p264_p13 }
  0x16   : > { %s458_s5 = sshll.u32 %s244_s29, 2  ;;  %s472_s6 = sshll.u32 %s249_s28, 3 }
  0x17   : > { %s246_s9 = scalar_lea.vmem %s729_s0, %s458_s5  ;;  %s252_s12 = scalar_lea.vmem %s730_s1, %s472_s6 }
  0x18   : > { %s256_s13 = scalar_select %p255_p9, %s568_s16, 7 }
  0x19   : > { %p267_p1 = pnand %p266_p12, %p265_p0 }
  0x1a   : > { %s258_s14 = sadd.s32 %s461_s30, %s256_s13 }
  0x1b   : > { %s462_s24 = sshll.u32 %s258_s14, 2  ;;  %270 = sbr.rel (%p267_p1) target bundleno = 34 (0x22), region = 36 }
  0x1c   : > { %s685_s26 = scalar_lea.vmem %s732_s3, %s462_s24 }
  0x20   : > { %vm271_vm0 = vcmask 58368   ;;  %v590_v0 = vmov 0.0  }
  0x21   : > { %272 = vst.msk [vmem:[%s733_s4] sm:$0x3] %vm271_vm0, %v590_v0 }
  0x22 PF: > { %p463_p2 = scmp.ne.s32.totalorder %s564_s15, 0 }
  0x24   : > { %275 = sbr.rel (%p463_p2) target bundleno = 43 (0x2b), region = 40 }
  0x29   : > { %vm276_vm1 = vcmask 64512   ;;  %v591_v1 = vmov 0.0  }
  0x2a   : > { %277 = vst.msk [vmem:[#allocation2] sm:$0xff] %vm276_vm1, %v591_v1 }
  0x2b PF: > { %v473_v2 = vld [vmem:[%s252_s12] sm:$0xff]  ;;  %vm288_vm2 = vcmask 130048   ;;  %vm306_vm3 = vcmask 64512   ;;  %p469_p3 = scmp.ne.s32.totalorder %s564_s15, 1 }
  0x2c   : > { %299 = vmatpush.bf16.msra.mxu0 %v473_v2  ;;  %v278_v3 = vld [vmem:[%s246_s9] sm:$0xf] }
  0x2f   : > { %468 = vmatmul.msk.bf16.vlgmr.msra.gmra.mxu0 %vm288_vm2, %v278_v3 }
  0x31   : > { %v281_v4 = vld [vmem:[#allocation2] sm:$0xff] }
  0xac   : > { %v301_v5 = vpop.f32.mrf.mxu0 }
  0xad   : > { %v305_v6 = vadd.f32 %v301_v5, %v281_v4 }
  0xaf   : > { %307 = vst.msk [vmem:[#allocation2] sm:$0xff] %vm306_vm3, %v305_v6 }
  0xb0   : > { %311 = sbr.rel (%p469_p3) target bundleno = 203 (0xcb), region = 44 }
  0xb4   : > { %v303_v7 = vpop.f32.mrf.mxu0 }
  0xb5   : > { %v533_v9 = vld [vmem:[%s731_s2] ss:$0 sm:$0xff]  ;;  %vm319_vm4 = vcmask 60416   ;;  %vm330_vm5 = vcmask 57344   ;;  %v332_v27 = vld [vmem:[%s733_s4 + $0x1] sm:$0x1] }
  0xb6   : > { %v312_v8 = vld [vmem:[#allocation2] sm:$0xff] }
  0xb7   : > { %v317_v10 = vadd.f32 %v533_v9, %v312_v8  ;;  %v321_v24 = vld [vmem:[%s733_s4] sm:$0x1] }
  0xb9   : > { %v318_v11 = vpack.c.bf16 %v317_v10, %v317_v10  ;;  %v322_v12 = vsel %vm306_vm3, %v317_v10, 0.0  ;;  %v333_v13 = vmul.f32 %v317_v10, %v317_v10 }
  0xba   : > { %v323_v14 = vrot.slane %v322_v12, 4 }
  0xbb   : > { %320 = vst.msk [vmem:[%s685_s26] sm:$0xf] %vm319_vm4, %v318_v11  ;;  %v334_v15 = vsel %vm306_vm3, %v333_v13, 0.0 }
  0xbc   : > { %v324_v16 = vadd.f32 %v323_v14, %v322_v12  ;;  %v335_v17 = vrot.slane %v334_v15, 4 }
  0xbe   : > { %v325_v18 = vrot.slane %v324_v16, 2  ;;  %v336_v19 = vadd.f32 %v335_v17, %v334_v15 }
  0xc0   : > { %v326_v20 = vadd.f32 %v325_v18, %v324_v16  ;;  %v337_v21 = vrot.slane %v336_v19, 2 }
  0xc2   : > { %v327_v22 = vrot.slane %v326_v20, 1  ;;  %v338_v23 = vadd.f32 %v337_v21, %v336_v19 }
  0xc4   : > { %v328_v25 = vadd.f32 %v327_v22, %v326_v20  ;;  %v339_v26 = vrot.slane %v338_v23, 1 }
  0xc6   : > { %v329_v28 = vadd.f32 %v328_v25, %v321_v24  ;;  %v340_v29 = vadd.f32 %v339_v26, %v338_v23 }
  0xc8   : > { %331 = vst.msk [vmem:[%s733_s4] sm:$0x1] %vm330_vm5, %v329_v28  ;;  %v341_v30 = vadd.f32 %v340_v29, %v332_v27 }
  0xca   : > { %342 = vst.msk [vmem:[%s733_s4 + $0x1] sm:$0x1] %vm330_vm5, %v341_v30 }
  0xcb PF: > { %s15_s21 = sadd.s32 1, %s588_s21   ;;  %s736_s8 = sld [smem:[#allocation3_spill]] }
  0xcc   : > { %p12_p4 = scmp.ge.s32.totalorder %s15_s21, 34   ;;  %s737_s9 = sld [smem:[#allocation4_spill]] }
  0xcd   : > { %s738_s15 = smov %s576_s18  ;;  %s739_s16 = smov %s580_s19 }
  0xce   : > { %s740_s17 = smov %s584_s20  ;;  %s741_s18 = smov %s745_s22 }
  0xcf   :  { %14 = sbr.rel (!%p12_p4) target bundleno = 4 (0x4), region = 85 }
  0xd1   : > { %s742_s19 = smov %s736_s8 }
  0xd2   : > { %s743_s20 = smov %s737_s9 }

// kernel: resnet_generator_forward.49
= control target key start
LH: loop header
LB: loop body
LE: loop exit
PB: predicated region body
PF: predicated region fallthrough
CT: control target
= control target key end

     0   :  { %10 = vsyncpa [#allocation4], 0  ;;  %s906_s15 = smov 0   ;;  %s908_s16 = smov 0   ;;  %s1053_s0 = inlined_call_operand.vmem [shape: bf16[2,22,22,8], index: 0, kind: input, shape index: {}]   ;;  %s1054_s1 = inlined_call_operand.vmem [shape: bf16[7,56,3], index: 1, kind: input, shape index: {}]   ;;  %s1055_s2 = inlined_call_operand.vmem [shape: f32[1,3], index: 2, kind: input, shape index: {}]   ;;  %s1056_s3 = inlined_call_operand.vmem [shape: f32[2,16,16,3], index: 3, kind: output, shape index: {0}]   ;;  %s1057_s4 = inlined_call_operand.hbm [shape: f32[2,3], index: 4, kind: output, shape index: {1}]  }
   0x1   :  { %s910_s17 = smov 0   ;;  %s912_s18 = smov 0  }
   0x2   :  { %s914_s19 = smov 0   ;;  %s916_s20 = smov 0  }
   0x3   :  { %s918_s21 = smov 0  }
   0x4 LB: > { %s689_s22 = sadd.s32 4294967295, %s876_s21   ;;  %s28_s23 = sadd.s32 1, %s864_s18  ;;  %s876_s21 = sphi %s918_s21, %s16_s21   ;;  %s872_s20 = sphi %s916_s20, %s1063_s20   ;;  %s868_s19 = sphi %s914_s19, %s1062_s19   ;;  %s864_s18 = sphi %s912_s18, %s1061_s18   ;;  %s860_s17 = sphi %s910_s17, %s1060_s17   ;;  %s856_s16 = sphi %s908_s16, %s1059_s16   ;;  %s852_s15 = sphi %s906_s15, %s1058_s15  }
   0x5   : > { %p29_p0 = scmp.ge.s32.totalorder %s28_s23, 7  ;;  %s31_s24 = sadd.s32 1, %s868_s19 }
   0x6   : > { %p693_p1 = scmp.ge.s32.totalorder %s876_s21, 1  ;;  %p202_p2 = scmp.lt.s32.totalorder %s876_s21, 225 }
   0x7   : > { %s1065_s23 = smov (%p29_p0, %s28_s23), 0  ;;  %s1067_s24 = smov (!%p29_p0, %s31_s24), %s868_s19 }
   0x8   : > { %p33_p3 = scmp.ge.s32.totalorder %s1067_s24, 16  ;;  %s35_s25 = sadd.s32 1, %s872_s20 }
   0x9   : > { %p203_p4 = pnand %p693_p1, %p202_p2 }
   0xa   : > { %s1069_s24 = smov (%p33_p3, %s1067_s24), 0  ;;  %s1071_s25 = smov (!%p33_p3, %s35_s25), %s872_s20 }
   0xb   : > { %p37_p5 = scmp.ge.s32.totalorder %s1071_s25, 2  ;;  %206 = sbr.rel (%p203_p4) target bundleno = 256 (0x100), region = 32 }
   0xc   : > { %s242_s26 = sadd.s32 (!%p203_p4), %s852_s15, %s856_s16  ;;  %p243_p6 = scmp.lt.s32.totalorder (!%p203_p4), %s860_s17, 1 }
   0xd   : > { %s1073_s25 = smov (%p37_p5, %s1071_s25), 0  ;;  %p245_p7 = scmp.lt.s32.totalorder (!%p203_p4), %s242_s26, 21 }
   0xe   : > { %p253_p8 = scmp.lt.s32.totalorder (!%p203_p4), %s852_s15, 6  ;;  %p260_p9 = scmp.lt.s32.totalorder (!%p203_p4), %s856_s16, 15 }
   0xf   : > { %p268_p10 = scmp.eq.s32.totalorder (!%p203_p4), %s860_s17, 0  ;;  %p269_p11 = scmp.eq.s32.totalorder (!%p203_p4), %s856_s16, 0 }
  0x10   : > { %s244_s27 = scalar_select %p243_p6, %s860_s17, 1 }
  0x11   : > { %s1075_s26 = smov (!%p245_p7, %s242_s26), 21  ;;  %s1077_s16 = smov (!%p260_p9, %s856_s16), 15 }
  0x12   : > { %s718_s28 = smul.u32 66, %s244_s27  ;;  %s697_s14 = sshll.u32 %s244_s27, 5 }
  0x13   : > { %s717_s29 = smul.u32 3, %s1075_s26  ;;  %p270_p12 = pnand %p269_p11, %p268_p10 }
  0x14   : > { %s254_s30 = scalar_select %p253_p8, %s852_s15, 6 }
  0x15   : > { %s249_s5 = sadd.s32 %s718_s28, %s717_s29  ;;  %p272_p13 = scmp.eq.s32.totalorder %s852_s15, 0 }
  0x16   : > { %s694_s6 = sshll.u32 %s249_s5, 2  ;;  %s719_s7 = smul.u32 28, %s254_s30 }
  0x17   : > { %s966_s10 = scalar_lea.vmem %s1053_s0, %s694_s6  ;;  %s696_s26 = sshll.u32 %s1077_s16, 1 }
  0x18   : > { %s972_s13 = scalar_lea.vmem %s1054_s1, %s719_s7  ;;  %s264_s28 = sadd.s32 %s697_s14, %s696_s26 }
  0x19   : > { %p271_p0 = pneg %p270_p12  ;;  %s698_s17 = sshll.u32 %s264_s28, 3 }
  0x1a   : > { %s979_s5 = scalar_lea.vmem %s1056_s3, %s698_s17 }
  0x1b   : > { %p273_p1 = pnand %p272_p13, %p271_p0 }
  0x1d   : > { %276 = sbr.rel (%p273_p1) target bundleno = 36 (0x24), region = 36 }
  0x22   : > { %vm277_vm0 = vcmask 17408   ;;  %v878_v0 = vmov 0.0  }
  0x23   : > { %278 = vst.msk [vmem:[#allocation3] sm:$0x3] %vm277_vm0, %v878_v0 }
  0x24 PF: > { %p699_p2 = scmp.ne.s32.totalorder %s852_s15, 0 }
  0x26   : > { %281 = sbr.rel (%p699_p2) target bundleno = 46 (0x2e), region = 40 }
  0x2b   : > { %vm282_vm1 = vcmask 23552   ;;  %v879_v1 = vmov 0.0  }
  0x2c   : > { %283 = vst.msk [vmem:[#allocation2] sm:$0xff] %vm282_vm1, %v879_v1 }
  0x2d   : > { %284 = vst.msk [vmem:[#allocation2 + $0x8] sm:$0xff] %vm282_vm1, %v879_v1 }
  0x2e PF: > { %v288_v2 = vld [vmem:[%s972_s13] sm:$0xf]  ;;  %vm306_vm2 = vcmask 1043456   ;;  %v290_v5 = vld [vmem:[%s972_s13 + $0x8] sm:$0xf]  ;;  %vm302_vm3 = vcmask 64512  }
  0x2f   : > { %v984_v3 = vld [vmem:[%s966_s10] sm:$0xff]  ;;  %v308_v4 = vsel %vm306_vm2, %v288_v2, 0  ;;  %v371_v7 = vsel %vm306_vm2, %v290_v5, 0  ;;  %v287_v9 = vld [vmem:[%s966_s10 + $0x8] sm:$0x7]  ;;  %vm363_vm4 = vcmask 1046528  }
  0x30   : > { %v289_v6 = vld [vmem:[%s972_s13 + $0x4] sm:$0xf]  ;;  %317 = vmatpush.bf16.msra.mxu0 %v308_v4  ;;  %v330_v10 = vshrl.u32 %v984_v3, 16  ;;  %380 = vmatpush.bf16.msra.mxu2 %v371_v7  ;;  %v327_v11 = vunpack.c.l.b16 %v287_v9  ;;  %v294_v12 = vld [vmem:[%s972_s13 + $0x18] sm:$0xf]  ;;  %v332_v16 = vshll.u32 %v984_v3, 16 }
  0x31   : > { %v345_v8 = vsel %vm306_vm2, %v289_v6, 0  ;;  %v291_v13 = vld [vmem:[%s972_s13 + $0xc] sm:$0xf]  ;;  %v485_v14 = vsel %vm306_vm2, %v294_v12, 0  ;;  %v292_v17 = vld [vmem:[%s972_s13 + $0x10] sm:$0xf] }
  0x32   : > { %354 = vmatpush.bf16.msra.mxu1 %v345_v8  ;;  %v403_v15 = vsel %vm306_vm2, %v291_v13, 0  ;;  %v390_v18 = vrot.slane %v330_v10, 1  ;;  %v328_v19 = vpack.c.b16 %v327_v11, %v327_v11  ;;  %v364_v20 = vrot.slane %v984_v3, 1  ;;  %v293_v22 = vld [vmem:[%s972_s13 + $0x14] sm:$0xf]  ;;  %p711_p3 = scmp.ne.s32.totalorder %s852_s15, 6 }
  0x33   : > { %704 = vmatmul.msk.bf16.vlgmr.msra.gmra.mxu0 %vm302_vm3, %v984_v3  ;;  %v429_v21 = vsel %vm306_vm2, %v292_v17, 0  ;;  %412 = vmatpush.bf16.msra.mxu3 %v403_v15  ;;  %v334_v23 = vrot.slane %v332_v16, 1  ;;  %v391_v24 = vrot.slane %v332_v16, 2  ;;  %v459_v25 = vsel %vm306_vm2, %v293_v22, 0  ;;  %v295_v52 = vld [vmem:[#allocation2] sm:$0xff] }
  0x34   : > { %494 = vmatpush.bf16.msrb.mxu2 %v485_v14  ;;  %438 = vmatpush.bf16.msrb.mxu0 %v429_v21  ;;  %v365_v26 = vrot.slane %v328_v19, 1  ;;  %v337_v27 = vshll.u32 %v328_v19, 16  ;;  %v393_v28 = vshrl.u32 %v328_v19, 16  ;;  %vm329_vm5 = vsmask.f32 7424  ;;  %v296_v61 = vld [vmem:[#allocation2 + $0x8] sm:$0xff] }
  0x35   : > { %v335_v29 = vor.u32 %v334_v23, %v330_v10  ;;  %v392_v30 = vor.u32 %v391_v24, %v390_v18  ;;  %vm389_vm6 = vsmask.f32 6400  ;;  %v422_v38 = vrot.slane %v984_v3, 2 }
  0x36   : > { %468 = vmatpush.bf16.msrb.mxu1 %v459_v25  ;;  %v366_v31 = vsel %vm363_vm4, %v364_v20, %v365_v26  ;;  %v339_v32 = vrot.slane %v337_v27, 1  ;;  %v395_v33 = vrot.slane %v393_v28, 1  ;;  %v396_v34 = vrot.slane %v337_v27, 2 }
  0x37   : > { %706 = vmatmul.msk.bf16.vlgmr.msra.gmra.mxu2 %vm302_vm3, %v366_v31  ;;  %v423_v39 = vrot.slane %v328_v19, 2  ;;  %vm421_vm7 = vcmask 1045504   ;;  %v448_v40 = vrot.slane %v330_v10, 2  ;;  %v449_v41 = vrot.slane %v332_v16, 3 }
  0x38   : > { %v340_v35 = vsel %vm329_vm5, %v335_v29, %v339_v32  ;;  %v397_v36 = vor.u32 %v396_v34, %v395_v33  ;;  %v451_v42 = vrot.slane %v393_v28, 2  ;;  %v452_v43 = vrot.slane %v337_v27, 3 }
  0x39   : > { %705 = vmatmul.msk.bf16.vlgmr.msra.gmra.mxu1 %vm302_vm3, %v340_v35  ;;  %v424_v44 = vsel %vm421_vm7, %v422_v38, %v423_v39  ;;  %v478_v45 = vrot.slane %v984_v3, 3  ;;  %v479_v46 = vrot.slane %v328_v19, 3  ;;  %vm477_vm8 = vcmask 1044480  }
  0x3a   : > { %v398_v37 = vsel %vm389_vm6, %v392_v30, %v397_v36  ;;  %v450_v47 = vor.u32 %v449_v41, %v448_v40  ;;  %v453_v48 = vor.u32 %v452_v43, %v451_v42  ;;  %vm447_vm9 = vsmask.f32 5376 }
  0x3b   : > { %707 = vmatmul.msk.bf16.vlgmr.msra.gmra.mxu3 %vm302_vm3, %v398_v37  ;;  %v480_v49 = vsel %vm477_vm8, %v478_v45, %v479_v46  ;;  %vm503_vm10 = vcmask 23552  }
  0x3c   : > { %v454_v50 = vsel %vm447_vm9, %v450_v47, %v453_v48 }
  0x43   : > { %708 = vmatmul.msk.bf16.vlgmr.msrb.gmra.mxu0 %vm302_vm3, %v424_v44 }
  0x47   : > { %710 = vmatmul.msk.bf16.vlgmr.msrb.gmra.mxu2 %vm302_vm3, %v480_v49 }
  0x49   : > { %709 = vmatmul.msk.bf16.vlgmr.msrb.gmra.mxu1 %vm302_vm3, %v454_v50 }
  0xb0   : > { %v319_v51 = vpop.f32.mrf.mxu0 }
  0xb1   : > { %v324_v55 = vadd.f32 %v319_v51, %v295_v52 }
  0xb6   : > { %v356_v53 = vpop.f32.mrf.mxu1 }
  0xb7   : > { %v361_v57 = vadd.f32 %v356_v53, %v324_v55 }
  0xb8   : > { %v321_v54 = vpop.f32.mrf.mxu0 }
  0xb9   : > { %v325_v1 = vadd.f32 %v321_v54, %v296_v61 }
  0xba   : > { %v382_v56 = vpop.f32.mrf.mxu2 }
  0xbb   : > { %v387_v60 = vadd.f32 %v382_v56, %v361_v57 }
  0xbe   : > { %v358_v58 = vpop.f32.mrf.mxu1  ;;  %v414_v59 = vpop.f32.mrf.mxu3 }
  0xbf   : > { %v419_v0 = vadd.f32 %v414_v59, %v387_v60  ;;  %v362_v3 = vadd.f32 %v358_v58, %v325_v1 }
  0xc0   : > { %v440_v62 = vpop.f32.mrf.mxu0 }
  0xc1   : > { %v445_v4 = vadd.f32 %v440_v62, %v419_v0 }
  0xc2   : > { %v384_v63 = vpop.f32.mrf.mxu2 }
  0xc3   : > { %v388_v6 = vadd.f32 %v384_v63, %v362_v3 }
  0xc6   : > { %v470_v2 = vpop.f32.mrf.mxu1  ;;  %v416_v5 = vpop.f32.mrf.mxu3 }
  0xc7   : > { %v475_v7 = vadd.f32 %v470_v2, %v445_v4  ;;  %v420_v9 = vadd.f32 %v416_v5, %v388_v6 }
  0xc8   : > { %v442_v11 = vpop.f32.mrf.mxu0 }
  0xc9   : > { %v446_v13 = vadd.f32 %v442_v11, %v420_v9 }
  0xca   : > { %v496_v8 = vpop.f32.mrf.mxu2 }
  0xcb   : > { %v501_v10 = vadd.f32 %v496_v8, %v475_v7 }
  0xcd   : > { %504 = vst.msk [vmem:[#allocation2] sm:$0xff] %vm503_vm10, %v501_v10 }
  0xce   : > { %v472_v12 = vpop.f32.mrf.mxu1 }
  0xcf   : > { %v476_v14 = vadd.f32 %v472_v12, %v446_v13 }
  0xd1   : > { %509 = sbr.rel (%p711_p3) target bundleno = 250 (0xfa), region = 44 }
  0xd2   : > { %v498_v15 = vpop.f32.mrf.mxu2 }
  0xd3   : > { %v502_v16 = vadd.f32 %v498_v15, %v476_v14 }
  0xd5   : > { %505 = vst.msk [vmem:[#allocation2 + $0x8] sm:$0xff] %vm503_vm10, %v502_v16 }
  0xd6   : > { %v510_v17 = vld [vmem:[#allocation2] sm:$0xff]  ;;  %v522_v41 = vld [vmem:[#allocation3] sm:$0x1]  ;;  %vm533_vm11 = vcmask 16384   ;;  %v535_v44 = vld [vmem:[#allocation3 + $0x1] sm:$0x1] }
  0xd7   : > { %v785_v18 = vld [vmem:[%s1055_s2] ss:$0 sm:$0xff] }
  0xd8   : > { %v516_v20 = vadd.f32 %v785_v18, %v510_v17 }
  0xda   : > { %786 = vtanh.f32 %v516_v20 }
  0xdc   : > { %v511_v19 = vld [vmem:[#allocation2 + $0x8] sm:$0xff] }
  0xdd   : > { %v517_v21 = vadd.f32 %v785_v18, %v511_v19 }
  0xdf   : > { %788 = vtanh.f32 %v517_v21 }
  0xe0   : > { %v787_v22 = vpop.eup %786 }
  0xe1   : > { %520 = vst.msk [vmem:[%s979_s5] sm:$0xff] %vm503_vm10, %v787_v22  ;;  %v523_v24 = vsel %vm503_vm10, %v787_v22, 0.0  ;;  %v536_v25 = vmul.f32 %v787_v22, %v787_v22 }
  0xe3   : > { %v538_v29 = vsel %vm503_vm10, %v536_v25, 0.0 }
  0xe5   : > { %v789_v23 = vpop.eup %788 }
  0xe6   : > { %521 = vst.msk [vmem:[%s979_s5 + $0x8] sm:$0xff] %vm503_vm10, %v789_v23  ;;  %v524_v26 = vsel %vm503_vm10, %v789_v23, 0.0  ;;  %v537_v27 = vmul.f32 %v789_v23, %v789_v23 }
  0xe7   : > { %v525_v28 = vadd.f32 %v524_v26, %v523_v24 }
  0xe8   : > { %v539_v30 = vsel %vm503_vm10, %v537_v27, 0.0 }
  0xe9   : > { %v526_v31 = vrot.slane %v525_v28, 4  ;;  %v540_v32 = vadd.f32 %v539_v30, %v538_v29 }
  0xeb   : > { %v527_v33 = vadd.f32 %v526_v31, %v525_v28  ;;  %v541_v34 = vrot.slane %v540_v32, 4 }
  0xed   : > { %v528_v35 = vrot.slane %v527_v33, 2  ;;  %v542_v36 = vadd.f32 %v541_v34, %v540_v32 }
  0xef   : > { %v529_v37 = vadd.f32 %v528_v35, %v527_v33  ;;  %v543_v38 = vrot.slane %v542_v36, 2 }
  0xf1   : > { %v530_v39 = vrot.slane %v529_v37, 1  ;;  %v544_v40 = vadd.f32 %v543_v38, %v542_v36 }
  0xf3   : > { %v531_v42 = vadd.f32 %v530_v39, %v529_v37  ;;  %v545_v43 = vrot.slane %v544_v40, 1 }
  0xf5   : > { %v532_v45 = vadd.f32 %v531_v42, %v522_v41  ;;  %v546_v46 = vadd.f32 %v545_v43, %v544_v40 }
  0xf7   : > { %534 = vst.msk [vmem:[#allocation3] sm:$0x1] %vm533_vm11, %v532_v45  ;;  %v547_v47 = vadd.f32 %v546_v46, %v535_v44 }
  0xf9   : > { %548 = vst.msk [vmem:[#allocation3 + $0x1] sm:$0x1] %vm533_vm11, %v547_v47 }
  0xfa PF: > { %p724_p4 = scmp.eq.s32.totalorder %s689_s22, 223  ;;  %s569_s7 = sshll.u32 %s1057_s4, 4  ;;  %s570_s7 = int_to_ptr.hbm [resolvable:$true] %s569_s7 }
  0xfb   : > { %s880_s8 = smov [#allocation3]  }
  0xfc   : > { %s567_s9 = sshll.u32 %s880_s8, 4  ;;  %s568_s9 = int_to_ptr.vmem [resolvable:$true] %s567_s9 }
  0xfd   : > { %721 = dma.vmem_to_hbm [thread:$0]  (%p724_p4), %s568_s9, 32, %s570_s7, [#allocation4]  }
  0xfe   : > { %847 = dma.done.wait (%p724_p4), [#allocation4], 32  }
  0xff   : > { %849 = vsyncadd (%p724_p4), [#allocation4], 4294967264 }
 0x100 PF: > { %s16_s21 = sadd.s32 1, %s876_s21   ;;  %s1058_s15 = smov %s864_s18 }
 0x101   : > { %p13_p5 = scmp.ge.s32.totalorder %s16_s21, 226   ;;  %s1059_s16 = smov %s868_s19 }
 0x102   : > { %s1060_s17 = smov %s872_s20  ;;  %s1061_s18 = smov %s1065_s23 }
 0x103   : > { %s1062_s19 = smov %s1069_s24  ;;  %s1063_s20 = smov %s1073_s25 }
 0x104   :  { %15 = sbr.rel (!%p13_p5) target bundleno = 4 (0x4), region = 86 }
 0x109   :  { %595 = vsyncpa [#allocation4], 1 }
 0x10a   :  { %597 = vsyncpa [#allocation4 + $0x1], 1 }

</bundles_post_ra>
